<compile_context>
chip_gen: v7x
topology: tpu7x:2x2x1
jax: 0.10.0
libtpu: 0.0.40
codegen_flags: <defaults>
</compile_context>

<pallas_src>
import numpy as np
import jax
import jax.numpy as jnp
from jax.experimental import pallas as pl
from jax.experimental.pallas import tpu as pltpu


# ----------------------------- tree helpers (host-side glue) -----------------------------
def features(x):
    return x[0]


def left_child(x):
    if len(x) != 3:
        return None
    return x[1]


def right_child(x):
    if len(x) != 3:
        return None
    return x[2]


def prepare_tree(tree, in_channels, n1):
    """Preorder flatten of one tree.

    Returns:
      flat: (n1, C) float32, row 0 is the zero pad slot, padded rows are zero.
      idx:  (n1, 3) int32 triples (self, left, right); row 0 and padded rows are (0,0,0),
            matching the zero-padding convention of the pytorch tree_conv library.
    """
    feats, triples = [], []

    def walk(node):
        my_idx = len(feats) + 1          # index 0 is reserved for the zero pad slot
        feats.append(np.asarray(features(node), dtype=np.float32))
        pos = len(triples)
        triples.append(None)
        l, r = left_child(node), right_child(node)
        li = walk(l) if l is not None else 0
        ri = walk(r) if r is not None else 0
        triples[pos] = (my_idx, li, ri)
        return my_idx

    walk(tree)
    n = len(feats)
    flat = np.zeros((n1, in_channels), np.float32)
    flat[1:n + 1] = np.stack(feats, axis=0)
    idx = np.zeros((n1, 3), np.int32)
    idx[1:n + 1] = np.asarray(triples, dtype=np.int32)
    return flat, idx


# ----------------------------------- Pallas kernel ---------------------------------------
def tcnn_kernel(flat_ref, idx_ref,
                w1_ref, b1_ref, w2_ref, b2_ref, w3_ref, b3_ref,
                wl1_ref, bl1_ref, wl2_ref, bl2_ref, out_ref):
    TB, N1, C_in = flat_ref.shape
    P = TB * N1                                   # all TB trees stacked on the row axis

    data = flat_ref[...].reshape(P, C_in)         # (P, C_in) channels-last
    idx = idx_ref[...]                            # (TB, N1, 3) int32

    # --- block-diagonal gather matrices (built once, reused by all 3 conv layers).
    #     Row b*N1+n of tap t selects row b*N1 + idx[b, n, t]; idx==0 selects the tree's
    #     zero pad slot (which stays zero through every layer), so missing children and
    #     padded nodes behave exactly like the PyTorch library.
    base = jax.lax.broadcasted_iota(jnp.int32, (TB, N1, 1), 0) * N1
    tgt = (base + idx).reshape(P, 3)              # flat source-row per tap
    colp = jax.lax.broadcasted_iota(jnp.int32, (P, P), 1)
    g_self = (colp == tgt[:, 0:1]).astype(jnp.float32)
    g_left = (colp == tgt[:, 1:2]).astype(jnp.float32)
    g_right = (colp == tgt[:, 2:3]).astype(jnp.float32)

    # node-0 (prepended zero slot) mask, hoisted and reused by every layer
    node_id = jax.lax.broadcasted_iota(jnp.int32, (TB, N1, 1), 1)
    row_mask = (node_id != 0).astype(jnp.float32).reshape(P, 1)

    def leaky(x):
        return jnp.where(x > 0, x, 0.01 * x)

    def tree_conv(d, wcat_ref, b_ref):
        c_out = b_ref.shape[-1]
        # channel mixing first: one lane-dense matmul covering all 3 taps & all TB trees
        y = jnp.dot(d, wcat_ref[...], preferred_element_type=jnp.float32)   # (P, 3*c_out)
        h = (jnp.dot(g_self, y[:, 0:c_out], preferred_element_type=jnp.float32)
             + jnp.dot(g_left, y[:, c_out:2 * c_out], preferred_element_type=jnp.float32)
             + jnp.dot(g_right, y[:, 2 * c_out:3 * c_out], preferred_element_type=jnp.float32)
             + b_ref[...])
        return h * row_mask                        # re-create the zero pad row (node 0)

    def tree_layer_norm(h):
        c_out = h.shape[-1]
        n_elem = N1 * c_out
        h3 = h.reshape(TB, N1, c_out)
        # fused single pass: sum and sum-of-squares, per tree over (nodes x channels)
        s1 = jnp.sum(jnp.sum(h3, axis=2, keepdims=True), axis=1, keepdims=True)
        s2 = jnp.sum(jnp.sum(h3 * h3, axis=2, keepdims=True), axis=1, keepdims=True)
        mean = s1 / n_elem
        var = jnp.maximum((s2 - s1 * mean) / (n_elem - 1), 0.0)   # unbiased (torch.std)
        inv = 1.0 / (jnp.sqrt(var) + 1e-5)
        return ((h3 - mean) * inv).reshape(P, c_out)

    d1 = leaky(tree_layer_norm(tree_conv(data, w1_ref, b1_ref)))   # (P, 256)
    d2 = leaky(tree_layer_norm(tree_conv(d1, w2_ref, b2_ref)))     # (P, 128)
    d3 = tree_layer_norm(tree_conv(d2, w3_ref, b3_ref))            # (P, 64)

    # dynamic pooling: per-tree max over the node axis -> (TB, 64)
    pooled = jnp.max(d3.reshape(TB, N1, d3.shape[-1]), axis=1, keepdims=True)
    pooled = pooled.reshape(TB, d3.shape[-1])

    # batched MLP head over the TB trees of this block
    latent = leaky(jnp.dot(pooled, wl1_ref[...], preferred_element_type=jnp.float32)
                   + bl1_ref[...])                                  # (TB, 32)
    scores = jnp.dot(latent, wl2_ref[...], preferred_element_type=jnp.float32) + bl2_ref[...]

    # lane-dense store: move the TB scores from the sublane axis onto the lane axis via a
    # masked reduce (avoids relying on small-shape transpose/reshape lowering).
    r = jax.lax.broadcasted_iota(jnp.int32, (TB, TB), 0)
    c = jax.lax.broadcasted_iota(jnp.int32, (TB, TB), 1)
    eye = (r == c).astype(jnp.float32)
    out_ref[0] = jnp.sum(eye * scores, axis=0, keepdims=True)       # (1, TB)


def tcnn_forward(flat, idx, params, tb=16):
    """flat: (B_pad, N1, C_in) f32, idx: (B_pad, N1, 3) int32, B_pad % tb == 0."""
    B_pad, N1, C_in = flat.shape
    assert B_pad % tb == 0
    nb = B_pad // tb
    (w1, b1, w2, b2, w3, b3, wl1, bl1, wl2, bl2) = params

    # fuse the three conv taps into one lane-dense (C_in, 3*C_out) weight per layer
    fuse = lambda w: jnp.concatenate([w[0], w[1], w[2]], axis=1)
    w1c, w2c, w3c = fuse(w1), fuse(w2), fuse(w3)

    def rep(a):  # weights resident across all grid steps
        nd = a.ndim
        return pl.BlockSpec(a.shape, lambda g, _nd=nd: (0,) * _nd)

    out = pl.pallas_call(
        tcnn_kernel,
        out_shape=jax.ShapeDtypeStruct((nb, 1, tb), jnp.float32),
        grid=(nb,),
        in_specs=[
            pl.BlockSpec((tb, N1, C_in), lambda g: (g, 0, 0)),
            pl.BlockSpec((tb, N1, 3), lambda g: (g, 0, 0)),
            rep(w1c), rep(b1), rep(w2c), rep(b2), rep(w3c), rep(b3),
            rep(wl1), rep(bl1), rep(wl2), rep(bl2),
        ],
        out_specs=pl.BlockSpec((1, 1, tb), lambda g: (g, 0, 0)),
        compiler_params=pltpu.CompilerParams(
            dimension_semantics=("parallel",),
            vmem_limit_bytes=64 * 1024 * 1024),
    )(flat, idx, w1c, b1, w2c, b2, w3c, b3, wl1, bl1, wl2, bl2)
    return out.reshape(B_pad, 1)


# ------------------------------- pure-JAX reference --------------------------------------
def tcnn_reference(flat, idx, params):
    (w1, b1, w2, b2, w3, b3, wl1, bl1, wl2, bl2) = params
    N1 = flat.shape[1]
    row_mask = (jnp.arange(N1) != 0).astype(jnp.float32)[None, :, None]

    def gather(d, ind):   # d (B,N1,C), ind (B,N1)
        return jnp.take_along_axis(d, ind[:, :, None], axis=1)

    def conv(d, w, b):
        h = (gather(d, idx[:, :, 0]) @ w[0]
             + gather(d, idx[:, :, 1]) @ w[1]
             + gather(d, idx[:, :, 2]) @ w[2] + b[0])
        return h * row_mask

    def ln(d):
        n = d.shape[1] * d.shape[2]
        mean = jnp.mean(d, axis=(1, 2), keepdims=True)
        var = jnp.sum((d - mean) ** 2, axis=(1, 2), keepdims=True) / (n - 1)
        return (d - mean) / (jnp.sqrt(var) + 1e-5)

    leaky = lambda x: jnp.where(x > 0, x, 0.01 * x)
    d1 = leaky(ln(conv(flat, w1, b1)))
    d2 = leaky(ln(conv(d1, w2, b2)))
    d3 = ln(conv(d2, w3, b3))
    pooled = jnp.max(d3, axis=1)
    latent = leaky(pooled @ wl1 + bl1[0])
    return latent @ wl2 + bl2[0]


# ---------------------------------------- main --------------------------------------------
if __name__ == "__main__":
    IN_CHANNELS = 8
    B = 20                      # real trees (varied shapes)
    TB = 16                     # trees per grid step -> two grid steps after padding
    MAX_NODES = 7
    N1 = MAX_NODES + 1

    key = jax.random.PRNGKey(0)
    keys = jax.random.split(key, 12)
    feat_pool = np.asarray(
        jax.random.normal(keys[0], (B, MAX_NODES, IN_CHANNELS), jnp.float32))

    def build_tree(f, kind):
        leaf = lambda i: (f[i],)
        if kind == 0:    # complete binary tree, 7 nodes
            return (f[0], (f[1], leaf(2), leaf(3)), (f[4], leaf(5), leaf(6)))
        if kind == 1:    # 3 nodes
            return (f[0], leaf(1), leaf(2))
        if kind == 2:    # single leaf
            return (f[0],)
        return (f[0], (f[1], leaf(2), leaf(3)), leaf(4))   # 5 nodes

    trees = [build_tree(feat_pool[b], b % 4) for b in range(B)]

    prepared = [prepare_tree(t, IN_CHANNELS, N1) for t in trees]
    flat = np.stack([p[0] for p in prepared])     # (B, N1, C_in)
    idx = np.stack([p[1] for p in prepared])      # (B, N1, 3)

    # pad the batch to a multiple of the tree-batch tile (padded trees are all-zero)
    B_pad = ((B + TB - 1) // TB) * TB
    flat_p = np.zeros((B_pad, N1, IN_CHANNELS), np.float32); flat_p[:B] = flat
    idx_p = np.zeros((B_pad, N1, 3), np.int32);              idx_p[:B] = idx
    flat_p = jnp.asarray(flat_p)
    idx_p = jnp.asarray(idx_p)

    # Deterministic parameter init (conv weights stored as (3, C_in, C_out) = taps stacked).
    def winit(k, shape, scale=0.1):
        return (jax.random.normal(k, shape, jnp.float32) * scale).astype(jnp.float32)

    w1 = winit(keys[1], (3, IN_CHANNELS, 256)); b1 = winit(keys[2], (1, 256))
    w2 = winit(keys[3], (3, 256, 128));         b2 = winit(keys[4], (1, 128))
    w3 = winit(keys[5], (3, 128, 64));          b3 = winit(keys[6], (1, 64))
    wl1 = winit(keys[7], (64, 32));             bl1 = winit(keys[8], (1, 32))
    wl2 = winit(keys[9], (32, 1));              bl2 = winit(keys[10], (1, 1))
    params = (w1, b1, w2, b2, w3, b3, wl1, bl1, wl2, bl2)

    score_pad = jax.block_until_ready(tcnn_forward(flat_p, idx_p, params, tb=TB))
    score = np.asarray(score_pad)[:B]

    ref = np.asarray(jax.block_until_ready(
        tcnn_reference(jnp.asarray(flat), jnp.asarray(idx), params)))

    np.testing.assert_allclose(score, ref, rtol=2e-3, atol=2e-3)
    print("KERNEL_OK")
</pallas_src>

<mosaic_0001>
module attributes {stable_mosaic.version = 11 : i64} {
  func.func @tcnn_kernel(%arg0: i32, %arg1: memref<16x8x8xf32, #tpu.memory_space<vmem>>, %arg2: memref<16x8x3xi32, #tpu.memory_space<vmem>>, %arg3: memref<8x768xf32, #tpu.memory_space<vmem>>, %arg4: memref<1x256xf32, #tpu.memory_space<vmem>>, %arg5: memref<256x384xf32, #tpu.memory_space<vmem>>, %arg6: memref<1x128xf32, #tpu.memory_space<vmem>>, %arg7: memref<128x192xf32, #tpu.memory_space<vmem>>, %arg8: memref<1x64xf32, #tpu.memory_space<vmem>>, %arg9: memref<64x32xf32, #tpu.memory_space<vmem>>, %arg10: memref<1x32xf32, #tpu.memory_space<vmem>>, %arg11: memref<32x1xf32, #tpu.memory_space<vmem>>, %arg12: memref<1x1xf32, #tpu.memory_space<vmem>>, %arg13: memref<1x1x16xf32, #tpu.memory_space<vmem>>) attributes {dimension_semantics = [#tpu.dimension_semantics<parallel>], iteration_bounds = array<i64: 2>, scalar_prefetch = 0 : i64, scratch_operands = 0 : i64, tpu.core_type = #tpu.core_type<tc>, window_params = [{transform_indices = @transform_0, window_bounds = array<i64: 16, 8, 8>}, {transform_indices = @transform_1, window_bounds = array<i64: 16, 8, 3>}, {pipeline_mode = #tpu.pipeline_mode<synchronous>, transform_indices = @transform_2, window_bounds = array<i64: 8, 768>}, {pipeline_mode = #tpu.pipeline_mode<synchronous>, transform_indices = @transform_3, window_bounds = array<i64: 1, 256>}, {pipeline_mode = #tpu.pipeline_mode<synchronous>, transform_indices = @transform_4, window_bounds = array<i64: 256, 384>}, {pipeline_mode = #tpu.pipeline_mode<synchronous>, transform_indices = @transform_5, window_bounds = array<i64: 1, 128>}, {pipeline_mode = #tpu.pipeline_mode<synchronous>, transform_indices = @transform_6, window_bounds = array<i64: 128, 192>}, {pipeline_mode = #tpu.pipeline_mode<synchronous>, transform_indices = @transform_7, window_bounds = array<i64: 1, 64>}, {pipeline_mode = #tpu.pipeline_mode<synchronous>, transform_indices = @transform_8, window_bounds = array<i64: 64, 32>}, {pipeline_mode = #tpu.pipeline_mode<synchronous>, transform_indices = @transform_9, window_bounds = array<i64: 1, 32>}, {pipeline_mode = #tpu.pipeline_mode<synchronous>, transform_indices = @transform_10, window_bounds = array<i64: 32, 1>}, {pipeline_mode = #tpu.pipeline_mode<synchronous>, transform_indices = @transform_11, window_bounds = array<i64: 1, 1>}, {transform_indices = @transform_12, window_bounds = array<i64: 1, 1, 16>}]} {
    %c0 = arith.constant 0 : index
    %c0_0 = arith.constant 0 : index
    %c0_1 = arith.constant 0 : index
    %0 = vector.load %arg1[%c0, %c0_0, %c0_1] : memref<16x8x8xf32, #tpu.memory_space<vmem>>, vector<16x8x8xf32>
    %1 = vector.shape_cast %0 : vector<16x8x8xf32> to vector<128x8xf32>
    %c0_2 = arith.constant 0 : index
    %c0_3 = arith.constant 0 : index
    %c0_4 = arith.constant 0 : index
    %2 = vector.load %arg2[%c0_2, %c0_3, %c0_4] : memref<16x8x3xi32, #tpu.memory_space<vmem>>, vector<16x8x3xi32>
    %3 = tpu.iota {dimensions = array<i32: 0>} : vector<16x8x1xi32>
    %c8_i32 = arith.constant 8 : i32
    %4 = vector.broadcast %c8_i32 : i32 to vector<16x8x1xi32>
    %5 = arith.muli %3, %4 : vector<16x8x1xi32>
    %6 = vector.broadcast %5 : vector<16x8x1xi32> to vector<16x8x3xi32>
    %7 = arith.addi %6, %2 : vector<16x8x3xi32>
    %8 = vector.shape_cast %7 : vector<16x8x3xi32> to vector<128x3xi32>
    %9 = tpu.iota {dimensions = array<i32: 1>} : vector<128x128xi32>
    %10 = vector.extract_strided_slice %8 {offsets = [0, 0], sizes = [128, 1], strides = [1, 1]} : vector<128x3xi32> to vector<128x1xi32>
    %11 = vector.broadcast %10 : vector<128x1xi32> to vector<128x128xi32>
    %12 = arith.cmpi eq, %9, %11 : vector<128x128xi32>
    %13 = arith.extui %12 : vector<128x128xi1> to vector<128x128xi32>
    %14 = arith.sitofp %13 : vector<128x128xi32> to vector<128x128xf32>
    %15 = vector.extract_strided_slice %8 {offsets = [0, 1], sizes = [128, 1], strides = [1, 1]} : vector<128x3xi32> to vector<128x1xi32>
    %16 = vector.broadcast %15 : vector<128x1xi32> to vector<128x128xi32>
    %17 = arith.cmpi eq, %9, %16 : vector<128x128xi32>
    %18 = arith.extui %17 : vector<128x128xi1> to vector<128x128xi32>
    %19 = arith.sitofp %18 : vector<128x128xi32> to vector<128x128xf32>
    %20 = vector.extract_strided_slice %8 {offsets = [0, 2], sizes = [128, 1], strides = [1, 1]} : vector<128x3xi32> to vector<128x1xi32>
    %21 = vector.broadcast %20 : vector<128x1xi32> to vector<128x128xi32>
    %22 = arith.cmpi eq, %9, %21 : vector<128x128xi32>
    %23 = arith.extui %22 : vector<128x128xi1> to vector<128x128xi32>
    %24 = arith.sitofp %23 : vector<128x128xi32> to vector<128x128xf32>
    %25 = tpu.iota {dimensions = array<i32: 1>} : vector<16x8x1xi32>
    %c0_i32 = arith.constant 0 : i32
    %26 = vector.broadcast %c0_i32 : i32 to vector<16x8x1xi32>
    %27 = arith.cmpi ne, %25, %26 : vector<16x8x1xi32>
    %28 = arith.extui %27 : vector<16x8x1xi1> to vector<16x8x1xi32>
    %29 = arith.sitofp %28 : vector<16x8x1xi32> to vector<16x8x1xf32>
    %30 = vector.shape_cast %29 : vector<16x8x1xf32> to vector<128x1xf32>
    %c0_5 = arith.constant 0 : index
    %c0_6 = arith.constant 0 : index
    %31 = vector.load %arg3[%c0_5, %c0_6] : memref<8x768xf32, #tpu.memory_space<vmem>>, vector<8x768xf32>
    %cst = arith.constant dense<0.000000e+00> : vector<128x768xf32>
    %32 = tpu.matmul %1, %31, %cst {dimension_numbers = #tpu.dot_dimension_numbers<[1], [0], [0], [1], [0, 0, 1, 1], [], []>} : vector<128x8xf32>, vector<8x768xf32>, vector<128x768xf32> -> vector<128x768xf32>
    %33 = vector.extract_strided_slice %32 {offsets = [0, 0], sizes = [128, 256], strides = [1, 1]} : vector<128x768xf32> to vector<128x256xf32>
    %cst_7 = arith.constant dense<0.000000e+00> : vector<128x256xf32>
    %34 = tpu.matmul %14, %33, %cst_7 {dimension_numbers = #tpu.dot_dimension_numbers<[1], [0], [0], [1], [0, 0, 1, 1], [], []>} : vector<128x128xf32>, vector<128x256xf32>, vector<128x256xf32> -> vector<128x256xf32>
    %35 = vector.extract_strided_slice %32 {offsets = [0, 256], sizes = [128, 256], strides = [1, 1]} : vector<128x768xf32> to vector<128x256xf32>
    %cst_8 = arith.constant dense<0.000000e+00> : vector<128x256xf32>
    %36 = tpu.matmul %19, %35, %cst_8 {dimension_numbers = #tpu.dot_dimension_numbers<[1], [0], [0], [1], [0, 0, 1, 1], [], []>} : vector<128x128xf32>, vector<128x256xf32>, vector<128x256xf32> -> vector<128x256xf32>
    %37 = arith.addf %34, %36 : vector<128x256xf32>
    %38 = vector.extract_strided_slice %32 {offsets = [0, 512], sizes = [128, 256], strides = [1, 1]} : vector<128x768xf32> to vector<128x256xf32>
    %cst_9 = arith.constant dense<0.000000e+00> : vector<128x256xf32>
    %39 = tpu.matmul %24, %38, %cst_9 {dimension_numbers = #tpu.dot_dimension_numbers<[1], [0], [0], [1], [0, 0, 1, 1], [], []>} : vector<128x128xf32>, vector<128x256xf32>, vector<128x256xf32> -> vector<128x256xf32>
    %40 = arith.addf %37, %39 : vector<128x256xf32>
    %c0_10 = arith.constant 0 : index
    %c0_11 = arith.constant 0 : index
    %41 = vector.load %arg4[%c0_10, %c0_11] : memref<1x256xf32, #tpu.memory_space<vmem>>, vector<1x256xf32>
    %42 = vector.broadcast %41 : vector<1x256xf32> to vector<128x256xf32>
    %43 = arith.addf %40, %42 : vector<128x256xf32>
    %44 = vector.broadcast %30 : vector<128x1xf32> to vector<128x256xf32>
    %45 = arith.mulf %43, %44 : vector<128x256xf32>
    %46 = vector.shape_cast %45 : vector<128x256xf32> to vector<16x8x256xf32>
    %cst_12 = arith.constant dense<0.000000e+00> : vector<16x8xf32>
    %47 = vector.multi_reduction <add>, %46, %cst_12 [2] : vector<16x8x256xf32> to vector<16x8xf32>
    %48 = vector.shape_cast %47 : vector<16x8xf32> to vector<16x8x1xf32>
    %cst_13 = arith.constant dense<0.000000e+00> : vector<16x1xf32>
    %49 = vector.multi_reduction <add>, %48, %cst_13 [1] : vector<16x8x1xf32> to vector<16x1xf32>
    %50 = vector.shape_cast %49 : vector<16x1xf32> to vector<16x1x1xf32>
    %51 = arith.mulf %46, %46 : vector<16x8x256xf32>
    %cst_14 = arith.constant dense<0.000000e+00> : vector<16x8xf32>
    %52 = vector.multi_reduction <add>, %51, %cst_14 [2] : vector<16x8x256xf32> to vector<16x8xf32>
    %53 = vector.shape_cast %52 : vector<16x8xf32> to vector<16x8x1xf32>
    %cst_15 = arith.constant dense<0.000000e+00> : vector<16x1xf32>
    %54 = vector.multi_reduction <add>, %53, %cst_15 [1] : vector<16x8x1xf32> to vector<16x1xf32>
    %55 = vector.shape_cast %54 : vector<16x1xf32> to vector<16x1x1xf32>
    %cst_16 = arith.constant 2.048000e+03 : f32
    %56 = vector.broadcast %cst_16 : f32 to vector<16x1x1xf32>
    %57 = arith.divf %50, %56 : vector<16x1x1xf32>
    %58 = arith.mulf %50, %57 : vector<16x1x1xf32>
    %59 = arith.subf %55, %58 : vector<16x1x1xf32>
    %cst_17 = arith.constant 2.047000e+03 : f32
    %60 = vector.broadcast %cst_17 : f32 to vector<16x1x1xf32>
    %61 = arith.divf %59, %60 : vector<16x1x1xf32>
    %cst_18 = arith.constant 0.000000e+00 : f32
    %62 = vector.broadcast %cst_18 : f32 to vector<16x1x1xf32>
    %63 = arith.maximumf %61, %62 : vector<16x1x1xf32>
    %64 = math.sqrt %63 : vector<16x1x1xf32>
    %cst_19 = arith.constant 9.99999974E-6 : f32
    %65 = vector.broadcast %cst_19 : f32 to vector<16x1x1xf32>
    %66 = arith.addf %64, %65 : vector<16x1x1xf32>
    %cst_20 = arith.constant 1.000000e+00 : f32
    %67 = vector.broadcast %cst_20 : f32 to vector<16x1x1xf32>
    %68 = arith.divf %67, %66 : vector<16x1x1xf32>
    %69 = vector.broadcast %57 : vector<16x1x1xf32> to vector<16x8x256xf32>
    %70 = arith.subf %46, %69 : vector<16x8x256xf32>
    %71 = vector.broadcast %68 : vector<16x1x1xf32> to vector<16x8x256xf32>
    %72 = arith.mulf %70, %71 : vector<16x8x256xf32>
    %73 = vector.shape_cast %72 : vector<16x8x256xf32> to vector<128x256xf32>
    %cst_21 = arith.constant 0.000000e+00 : f32
    %74 = vector.broadcast %cst_21 : f32 to vector<128x256xf32>
    %75 = arith.cmpf ogt, %73, %74 : vector<128x256xf32>
    %cst_22 = arith.constant 0.00999999977 : f32
    %76 = vector.broadcast %cst_22 : f32 to vector<128x256xf32>
    %77 = arith.mulf %76, %73 : vector<128x256xf32>
    %78 = arith.select %75, %73, %77 : vector<128x256xi1>, vector<128x256xf32>
    %c0_23 = arith.constant 0 : index
    %c0_24 = arith.constant 0 : index
    %79 = vector.load %arg5[%c0_23, %c0_24] : memref<256x384xf32, #tpu.memory_space<vmem>>, vector<256x384xf32>
    %cst_25 = arith.constant dense<0.000000e+00> : vector<128x384xf32>
    %80 = tpu.matmul %78, %79, %cst_25 {dimension_numbers = #tpu.dot_dimension_numbers<[1], [0], [0], [1], [0, 0, 1, 1], [], []>} : vector<128x256xf32>, vector<256x384xf32>, vector<128x384xf32> -> vector<128x384xf32>
    %81 = vector.extract_strided_slice %80 {offsets = [0, 0], sizes = [128, 128], strides = [1, 1]} : vector<128x384xf32> to vector<128x128xf32>
    %cst_26 = arith.constant dense<0.000000e+00> : vector<128x128xf32>
    %82 = tpu.matmul %14, %81, %cst_26 {dimension_numbers = #tpu.dot_dimension_numbers<[1], [0], [0], [1], [0, 0, 1, 1], [], []>} : vector<128x128xf32>, vector<128x128xf32>, vector<128x128xf32> -> vector<128x128xf32>
    %83 = vector.extract_strided_slice %80 {offsets = [0, 128], sizes = [128, 128], strides = [1, 1]} : vector<128x384xf32> to vector<128x128xf32>
    %cst_27 = arith.constant dense<0.000000e+00> : vector<128x128xf32>
    %84 = tpu.matmul %19, %83, %cst_27 {dimension_numbers = #tpu.dot_dimension_numbers<[1], [0], [0], [1], [0, 0, 1, 1], [], []>} : vector<128x128xf32>, vector<128x128xf32>, vector<128x128xf32> -> vector<128x128xf32>
    %85 = arith.addf %82, %84 : vector<128x128xf32>
    %86 = vector.extract_strided_slice %80 {offsets = [0, 256], sizes = [128, 128], strides = [1, 1]} : vector<128x384xf32> to vector<128x128xf32>
    %cst_28 = arith.constant dense<0.000000e+00> : vector<128x128xf32>
    %87 = tpu.matmul %24, %86, %cst_28 {dimension_numbers = #tpu.dot_dimension_numbers<[1], [0], [0], [1], [0, 0, 1, 1], [], []>} : vector<128x128xf32>, vector<128x128xf32>, vector<128x128xf32> -> vector<128x128xf32>
    %88 = arith.addf %85, %87 : vector<128x128xf32>
    %c0_29 = arith.constant 0 : index
    %c0_30 = arith.constant 0 : index
    %89 = vector.load %arg6[%c0_29, %c0_30] : memref<1x128xf32, #tpu.memory_space<vmem>>, vector<1x128xf32>
    %90 = vector.broadcast %89 : vector<1x128xf32> to vector<128x128xf32>
    %91 = arith.addf %88, %90 : vector<128x128xf32>
    %92 = vector.broadcast %30 : vector<128x1xf32> to vector<128x128xf32>
    %93 = arith.mulf %91, %92 : vector<128x128xf32>
    %94 = vector.shape_cast %93 : vector<128x128xf32> to vector<16x8x128xf32>
    %cst_31 = arith.constant dense<0.000000e+00> : vector<16x8xf32>
    %95 = vector.multi_reduction <add>, %94, %cst_31 [2] : vector<16x8x128xf32> to vector<16x8xf32>
    %96 = vector.shape_cast %95 : vector<16x8xf32> to vector<16x8x1xf32>
    %cst_32 = arith.constant dense<0.000000e+00> : vector<16x1xf32>
    %97 = vector.multi_reduction <add>, %96, %cst_32 [1] : vector<16x8x1xf32> to vector<16x1xf32>
    %98 = vector.shape_cast %97 : vector<16x1xf32> to vector<16x1x1xf32>
    %99 = arith.mulf %94, %94 : vector<16x8x128xf32>
    %cst_33 = arith.constant dense<0.000000e+00> : vector<16x8xf32>
    %100 = vector.multi_reduction <add>, %99, %cst_33 [2] : vector<16x8x128xf32> to vector<16x8xf32>
    %101 = vector.shape_cast %100 : vector<16x8xf32> to vector<16x8x1xf32>
    %cst_34 = arith.constant dense<0.000000e+00> : vector<16x1xf32>
    %102 = vector.multi_reduction <add>, %101, %cst_34 [1] : vector<16x8x1xf32> to vector<16x1xf32>
    %103 = vector.shape_cast %102 : vector<16x1xf32> to vector<16x1x1xf32>
    %cst_35 = arith.constant 1.024000e+03 : f32
    %104 = vector.broadcast %cst_35 : f32 to vector<16x1x1xf32>
    %105 = arith.divf %98, %104 : vector<16x1x1xf32>
    %106 = arith.mulf %98, %105 : vector<16x1x1xf32>
    %107 = arith.subf %103, %106 : vector<16x1x1xf32>
    %cst_36 = arith.constant 1.023000e+03 : f32
    %108 = vector.broadcast %cst_36 : f32 to vector<16x1x1xf32>
    %109 = arith.divf %107, %108 : vector<16x1x1xf32>
    %cst_37 = arith.constant 0.000000e+00 : f32
    %110 = vector.broadcast %cst_37 : f32 to vector<16x1x1xf32>
    %111 = arith.maximumf %109, %110 : vector<16x1x1xf32>
    %112 = math.sqrt %111 : vector<16x1x1xf32>
    %cst_38 = arith.constant 9.99999974E-6 : f32
    %113 = vector.broadcast %cst_38 : f32 to vector<16x1x1xf32>
    %114 = arith.addf %112, %113 : vector<16x1x1xf32>
    %cst_39 = arith.constant 1.000000e+00 : f32
    %115 = vector.broadcast %cst_39 : f32 to vector<16x1x1xf32>
    %116 = arith.divf %115, %114 : vector<16x1x1xf32>
    %117 = vector.broadcast %105 : vector<16x1x1xf32> to vector<16x8x128xf32>
    %118 = arith.subf %94, %117 : vector<16x8x128xf32>
    %119 = vector.broadcast %116 : vector<16x1x1xf32> to vector<16x8x128xf32>
    %120 = arith.mulf %118, %119 : vector<16x8x128xf32>
    %121 = vector.shape_cast %120 : vector<16x8x128xf32> to vector<128x128xf32>
    %cst_40 = arith.constant 0.000000e+00 : f32
    %122 = vector.broadcast %cst_40 : f32 to vector<128x128xf32>
    %123 = arith.cmpf ogt, %121, %122 : vector<128x128xf32>
    %cst_41 = arith.constant 0.00999999977 : f32
    %124 = vector.broadcast %cst_41 : f32 to vector<128x128xf32>
    %125 = arith.mulf %124, %121 : vector<128x128xf32>
    %126 = arith.select %123, %121, %125 : vector<128x128xi1>, vector<128x128xf32>
    %c0_42 = arith.constant 0 : index
    %c0_43 = arith.constant 0 : index
    %127 = vector.load %arg7[%c0_42, %c0_43] : memref<128x192xf32, #tpu.memory_space<vmem>>, vector<128x192xf32>
    %cst_44 = arith.constant dense<0.000000e+00> : vector<128x192xf32>
    %128 = tpu.matmul %126, %127, %cst_44 {dimension_numbers = #tpu.dot_dimension_numbers<[1], [0], [0], [1], [0, 0, 1, 1], [], []>} : vector<128x128xf32>, vector<128x192xf32>, vector<128x192xf32> -> vector<128x192xf32>
    %129 = vector.extract_strided_slice %128 {offsets = [0, 0], sizes = [128, 64], strides = [1, 1]} : vector<128x192xf32> to vector<128x64xf32>
    %cst_45 = arith.constant dense<0.000000e+00> : vector<128x64xf32>
    %130 = tpu.matmul %14, %129, %cst_45 {dimension_numbers = #tpu.dot_dimension_numbers<[1], [0], [0], [1], [0, 0, 1, 1], [], []>} : vector<128x128xf32>, vector<128x64xf32>, vector<128x64xf32> -> vector<128x64xf32>
    %131 = vector.extract_strided_slice %128 {offsets = [0, 64], sizes = [128, 64], strides = [1, 1]} : vector<128x192xf32> to vector<128x64xf32>
    %cst_46 = arith.constant dense<0.000000e+00> : vector<128x64xf32>
    %132 = tpu.matmul %19, %131, %cst_46 {dimension_numbers = #tpu.dot_dimension_numbers<[1], [0], [0], [1], [0, 0, 1, 1], [], []>} : vector<128x128xf32>, vector<128x64xf32>, vector<128x64xf32> -> vector<128x64xf32>
    %133 = arith.addf %130, %132 : vector<128x64xf32>
    %134 = vector.extract_strided_slice %128 {offsets = [0, 128], sizes = [128, 64], strides = [1, 1]} : vector<128x192xf32> to vector<128x64xf32>
    %cst_47 = arith.constant dense<0.000000e+00> : vector<128x64xf32>
    %135 = tpu.matmul %24, %134, %cst_47 {dimension_numbers = #tpu.dot_dimension_numbers<[1], [0], [0], [1], [0, 0, 1, 1], [], []>} : vector<128x128xf32>, vector<128x64xf32>, vector<128x64xf32> -> vector<128x64xf32>
    %136 = arith.addf %133, %135 : vector<128x64xf32>
    %c0_48 = arith.constant 0 : index
    %c0_49 = arith.constant 0 : index
    %137 = vector.load %arg8[%c0_48, %c0_49] : memref<1x64xf32, #tpu.memory_space<vmem>>, vector<1x64xf32>
    %138 = vector.broadcast %137 : vector<1x64xf32> to vector<128x64xf32>
    %139 = arith.addf %136, %138 : vector<128x64xf32>
    %140 = vector.broadcast %30 : vector<128x1xf32> to vector<128x64xf32>
    %141 = arith.mulf %139, %140 : vector<128x64xf32>
    %142 = vector.shape_cast %141 : vector<128x64xf32> to vector<16x8x64xf32>
    %cst_50 = arith.constant dense<0.000000e+00> : vector<16x8xf32>
    %143 = vector.multi_reduction <add>, %142, %cst_50 [2] : vector<16x8x64xf32> to vector<16x8xf32>
    %144 = vector.shape_cast %143 : vector<16x8xf32> to vector<16x8x1xf32>
    %cst_51 = arith.constant dense<0.000000e+00> : vector<16x1xf32>
    %145 = vector.multi_reduction <add>, %144, %cst_51 [1] : vector<16x8x1xf32> to vector<16x1xf32>
    %146 = vector.shape_cast %145 : vector<16x1xf32> to vector<16x1x1xf32>
    %147 = arith.mulf %142, %142 : vector<16x8x64xf32>
    %cst_52 = arith.constant dense<0.000000e+00> : vector<16x8xf32>
    %148 = vector.multi_reduction <add>, %147, %cst_52 [2] : vector<16x8x64xf32> to vector<16x8xf32>
    %149 = vector.shape_cast %148 : vector<16x8xf32> to vector<16x8x1xf32>
    %cst_53 = arith.constant dense<0.000000e+00> : vector<16x1xf32>
    %150 = vector.multi_reduction <add>, %149, %cst_53 [1] : vector<16x8x1xf32> to vector<16x1xf32>
    %151 = vector.shape_cast %150 : vector<16x1xf32> to vector<16x1x1xf32>
    %cst_54 = arith.constant 5.120000e+02 : f32
    %152 = vector.broadcast %cst_54 : f32 to vector<16x1x1xf32>
    %153 = arith.divf %146, %152 : vector<16x1x1xf32>
    %154 = arith.mulf %146, %153 : vector<16x1x1xf32>
    %155 = arith.subf %151, %154 : vector<16x1x1xf32>
    %cst_55 = arith.constant 5.110000e+02 : f32
    %156 = vector.broadcast %cst_55 : f32 to vector<16x1x1xf32>
    %157 = arith.divf %155, %156 : vector<16x1x1xf32>
    %cst_56 = arith.constant 0.000000e+00 : f32
    %158 = vector.broadcast %cst_56 : f32 to vector<16x1x1xf32>
    %159 = arith.maximumf %157, %158 : vector<16x1x1xf32>
    %160 = math.sqrt %159 : vector<16x1x1xf32>
    %cst_57 = arith.constant 9.99999974E-6 : f32
    %161 = vector.broadcast %cst_57 : f32 to vector<16x1x1xf32>
    %162 = arith.addf %160, %161 : vector<16x1x1xf32>
    %cst_58 = arith.constant 1.000000e+00 : f32
    %163 = vector.broadcast %cst_58 : f32 to vector<16x1x1xf32>
    %164 = arith.divf %163, %162 : vector<16x1x1xf32>
    %165 = vector.broadcast %153 : vector<16x1x1xf32> to vector<16x8x64xf32>
    %166 = arith.subf %142, %165 : vector<16x8x64xf32>
    %167 = vector.broadcast %164 : vector<16x1x1xf32> to vector<16x8x64xf32>
    %168 = arith.mulf %166, %167 : vector<16x8x64xf32>
    %169 = vector.shape_cast %168 : vector<16x8x64xf32> to vector<128x64xf32>
    %170 = vector.shape_cast %169 : vector<128x64xf32> to vector<16x8x64xf32>
    %cst_59 = arith.constant dense<0xFF800000> : vector<16x64xf32>
    %171 = vector.multi_reduction <maximumf>, %170, %cst_59 [1] : vector<16x8x64xf32> to vector<16x64xf32>
    %172 = vector.shape_cast %171 : vector<16x64xf32> to vector<16x1x64xf32>
    %173 = vector.shape_cast %172 : vector<16x1x64xf32> to vector<16x64xf32>
    %c0_60 = arith.constant 0 : index
    %c0_61 = arith.constant 0 : index
    %174 = vector.load %arg9[%c0_60, %c0_61] : memref<64x32xf32, #tpu.memory_space<vmem>>, vector<64x32xf32>
    %cst_62 = arith.constant dense<0.000000e+00> : vector<16x32xf32>
    %175 = tpu.matmul %173, %174, %cst_62 {dimension_numbers = #tpu.dot_dimension_numbers<[1], [0], [0], [1], [0, 0, 1, 1], [], []>} : vector<16x64xf32>, vector<64x32xf32>, vector<16x32xf32> -> vector<16x32xf32>
    %c0_63 = arith.constant 0 : index
    %c0_64 = arith.constant 0 : index
    %176 = vector.load %arg10[%c0_63, %c0_64] : memref<1x32xf32, #tpu.memory_space<vmem>>, vector<1x32xf32>
    %177 = vector.broadcast %176 : vector<1x32xf32> to vector<16x32xf32>
    %178 = arith.addf %175, %177 : vector<16x32xf32>
    %cst_65 = arith.constant 0.000000e+00 : f32
    %179 = vector.broadcast %cst_65 : f32 to vector<16x32xf32>
    %180 = arith.cmpf ogt, %178, %179 : vector<16x32xf32>
    %cst_66 = arith.constant 0.00999999977 : f32
    %181 = vector.broadcast %cst_66 : f32 to vector<16x32xf32>
    %182 = arith.mulf %181, %178 : vector<16x32xf32>
    %183 = arith.select %180, %178, %182 : vector<16x32xi1>, vector<16x32xf32>
    %c0_67 = arith.constant 0 : index
    %c0_68 = arith.constant 0 : index
    %184 = vector.load %arg11[%c0_67, %c0_68] : memref<32x1xf32, #tpu.memory_space<vmem>>, vector<32x1xf32>
    %cst_69 = arith.constant dense<0.000000e+00> : vector<16x1xf32>
    %185 = tpu.matmul %183, %184, %cst_69 {dimension_numbers = #tpu.dot_dimension_numbers<[1], [0], [0], [1], [0, 0, 1, 1], [], []>} : vector<16x32xf32>, vector<32x1xf32>, vector<16x1xf32> -> vector<16x1xf32>
    %c0_70 = arith.constant 0 : index
    %c0_71 = arith.constant 0 : index
    %186 = vector.load %arg12[%c0_70, %c0_71] : memref<1x1xf32, #tpu.memory_space<vmem>>, vector<1x1xf32>
    %187 = vector.broadcast %186 : vector<1x1xf32> to vector<16x1xf32>
    %188 = arith.addf %185, %187 : vector<16x1xf32>
    %189 = tpu.iota {dimensions = array<i32: 0>} : vector<16x16xi32>
    %190 = tpu.iota {dimensions = array<i32: 1>} : vector<16x16xi32>
    %191 = arith.cmpi eq, %189, %190 : vector<16x16xi32>
    %192 = arith.extui %191 : vector<16x16xi1> to vector<16x16xi32>
    %193 = arith.sitofp %192 : vector<16x16xi32> to vector<16x16xf32>
    %194 = vector.broadcast %188 : vector<16x1xf32> to vector<16x16xf32>
    %195 = arith.mulf %193, %194 : vector<16x16xf32>
    %cst_72 = arith.constant dense<0.000000e+00> : vector<16xf32>
    %196 = vector.multi_reduction <add>, %195, %cst_72 [0] : vector<16x16xf32> to vector<16xf32>
    %197 = vector.shape_cast %196 : vector<16xf32> to vector<1x16xf32>
    %c0_73 = arith.constant 0 : index
    %c0_74 = arith.constant 0 : index
    %c0_75 = arith.constant 0 : index
    %198 = vector.load %arg13[%c0_73, %c0_74, %c0_75] : memref<1x1x16xf32, #tpu.memory_space<vmem>>, vector<1x1x16xf32>
    %199 = vector.shape_cast %198 : vector<1x1x16xf32> to vector<1x16xf32>
    %200 = vector.shape_cast %197 : vector<1x16xf32> to vector<1x1x16xf32>
    tpu.vector_store %arg13[%c0_73, %c0_74, %c0_75], %200 {strides = array<i32>} : memref<1x1x16xf32, #tpu.memory_space<vmem>>, vector<1x1x16xf32>,
    return
  }
  func.func @transform_0(%arg0: i32) -> (i32, i32, i32) {
    %c0_i32 = arith.constant 0 : i32
    %c0_i32_0 = arith.constant 0 : i32
    %c0_i32_1 = arith.constant 0 : i32
    return %arg0, %c0_i32, %c0_i32_0 : i32, i32, i32
  }
  func.func @transform_1(%arg0: i32) -> (i32, i32, i32) {
    %c0_i32 = arith.constant 0 : i32
    %c0_i32_0 = arith.constant 0 : i32
    %c0_i32_1 = arith.constant 0 : i32
    return %arg0, %c0_i32, %c0_i32_0 : i32, i32, i32
  }
  func.func @transform_2(%arg0: i32) -> (i32, i32) {
    %c0_i32 = arith.constant 0 : i32
    %c0_i32_0 = arith.constant 0 : i32
    %c0_i32_1 = arith.constant 0 : i32
    return %c0_i32, %c0_i32_0 : i32, i32
  }
  func.func @transform_3(%arg0: i32) -> (i32, i32) {
    %c0_i32 = arith.constant 0 : i32
    %c0_i32_0 = arith.constant 0 : i32
    %c0_i32_1 = arith.constant 0 : i32
    return %c0_i32, %c0_i32_0 : i32, i32
  }
  func.func @transform_4(%arg0: i32) -> (i32, i32) {
    %c0_i32 = arith.constant 0 : i32
    %c0_i32_0 = arith.constant 0 : i32
    %c0_i32_1 = arith.constant 0 : i32
    return %c0_i32, %c0_i32_0 : i32, i32
  }
  func.func @transform_5(%arg0: i32) -> (i32, i32) {
    %c0_i32 = arith.constant 0 : i32
    %c0_i32_0 = arith.constant 0 : i32
    %c0_i32_1 = arith.constant 0 : i32
    return %c0_i32, %c0_i32_0 : i32, i32
  }
  func.func @transform_6(%arg0: i32) -> (i32, i32) {
    %c0_i32 = arith.constant 0 : i32
    %c0_i32_0 = arith.constant 0 : i32
    %c0_i32_1 = arith.constant 0 : i32
    return %c0_i32, %c0_i32_0 : i32, i32
  }
  func.func @transform_7(%arg0: i32) -> (i32, i32) {
    %c0_i32 = arith.constant 0 : i32
    %c0_i32_0 = arith.constant 0 : i32
    %c0_i32_1 = arith.constant 0 : i32
    return %c0_i32, %c0_i32_0 : i32, i32
  }
  func.func @transform_8(%arg0: i32) -> (i32, i32) {
    %c0_i32 = arith.constant 0 : i32
    %c0_i32_0 = arith.constant 0 : i32
    %c0_i32_1 = arith.constant 0 : i32
    return %c0_i32, %c0_i32_0 : i32, i32
  }
  func.func @transform_9(%arg0: i32) -> (i32, i32) {
    %c0_i32 = arith.constant 0 : i32
    %c0_i32_0 = arith.constant 0 : i32
    %c0_i32_1 = arith.constant 0 : i32
    return %c0_i32, %c0_i32_0 : i32, i32
  }
  func.func @transform_10(%arg0: i32) -> (i32, i32) {
    %c0_i32 = arith.constant 0 : i32
    %c0_i32_0 = arith.constant 0 : i32
    %c0_i32_1 = arith.constant 0 : i32
    return %c0_i32, %c0_i32_0 : i32, i32
  }
  func.func @transform_11(%arg0: i32) -> (i32, i32) {
    %c0_i32 = arith.constant 0 : i32
    %c0_i32_0 = arith.constant 0 : i32
    %c0_i32_1 = arith.constant 0 : i32
    return %c0_i32, %c0_i32_0 : i32, i32
  }
  func.func @transform_12(%arg0: i32) -> (i32, i32, i32) {
    %c0_i32 = arith.constant 0 : i32
    %c0_i32_0 = arith.constant 0 : i32
    %c0_i32_1 = arith.constant 0 : i32
    return %arg0, %c0_i32, %c0_i32_0 : i32, i32, i32
  }
}

</mosaic_0001>

<bundles_post_ra>
// kernel: tpu_custom_call.1
= control target key start
LH: loop header
LB: loop body
LE: loop exit
PB: predicated region body
PF: predicated region fallthrough
CT: control target
= control target key end

     0   :  { %s12217_s0 = inlined_call_operand.hbm [shape: f32[32,8,8], index: 0, kind: input, shape index: {}]   ;;  %s12218_s1 = inlined_call_operand.hbm [shape: s32[32,8,3], index: 1, kind: input, shape index: {}]   ;;  %s12219_s2 = inlined_call_operand.hbm [shape: f32[8,768], index: 2, kind: input, shape index: {}]   ;;  %s12220_s3 = inlined_call_operand.hbm [shape: f32[1,256], index: 3, kind: input, shape index: {}]   ;;  %s12221_s4 = inlined_call_operand.hbm [shape: f32[256,384], index: 4, kind: input, shape index: {}]   ;;  %s12222_s5 = inlined_call_operand.hbm [shape: f32[1,128], index: 5, kind: input, shape index: {}]   ;;  %s12223_s6 = inlined_call_operand.hbm [shape: f32[128,192], index: 6, kind: input, shape index: {}]   ;;  %s12224_s7 = inlined_call_operand.hbm [shape: f32[1,64], index: 7, kind: input, shape index: {}]   ;;  %s12225_s8 = inlined_call_operand.hbm [shape: f32[64,32], index: 8, kind: input, shape index: {}]   ;;  %s12226_s9 = inlined_call_operand.hbm [shape: f32[1,32], index: 9, kind: input, shape index: {}]   ;;  %s12227_s10 = inlined_call_operand.hbm [shape: f32[32,1], index: 10, kind: input, shape index: {}]   ;;  %s12228_s11 = inlined_call_operand.<no memory space> [shape: f32[1,1], index: 11, kind: input, shape index: {}]   ;;  %s12229_s12 = inlined_call_operand.hbm [shape: f32[2,1,16], index: 12, kind: output, shape index: {}]  }
   0x1   :  { %12467 = sst [smem:[#allocation124_spill]] %s12217_s0  ;;  %v17_v0 = vstv %s12228_s11 }
   0x2   :  { %12468 = sst [smem:[#allocation125_spill]] %s12219_s2  ;;  %18 = vst [vmem:[#allocation2] sm:$0x1] %v17_v0 }
   0x3   :  { %12469 = sst [smem:[#allocation126_spill]] %s12220_s3 }
   0x4   :  { %12470 = sst [smem:[#allocation127_spill]] %s12221_s4 }
   0x5   :  { %12471 = sst [smem:[#allocation128_spill]] %s12222_s5 }
   0x6   :  { %12472 = sst [smem:[#allocation129_spill]] %s12223_s6 }
   0x7   :  { %12473 = sst [smem:[#allocation130_spill]] %s12224_s7 }
   0x8   :  { %12474 = sst [smem:[#allocation131_spill]] %s12225_s8 }
   0x9   :  { %12475 = sst [smem:[#allocation132_spill]] %s12229_s12 }
   0xa   :  { %19 = vsyncpa [#allocation4], 0 }
   0xb   :  { %21 = vsyncpa [#allocation4 + $0x1], 0 }
   0xc   :  { %22 = vsyncpa [#allocation7], 0 }
   0xd   :  { %24 = vsyncpa [#allocation7 + $0x1], 0 }
   0xe   :  { %25 = vsyncpa [#allocation10], 0 }
   0xf   :  { %26 = vsyncpa [#allocation13], 0 }
  0x10   :  { %27 = vsyncpa [#allocation16], 0 }
  0x11   :  { %28 = vsyncpa [#allocation19], 0 }
  0x12   :  { %29 = vsyncpa [#allocation5], 0 }
  0x13   :  { %31 = vsyncpa [#allocation5 + $0x1], 0  ;;  %s8560_s23 = smov 0   ;;  %s8562_s24 = smov 0  }
  0x14   :  { %s8564_s25 = smov 0   ;;  %s8566_s26 = smov 0  }
  0x15 LB: > { %s8468_s11 = smov [#allocation8]   ;;  %s8581_s28 = sadd.s32 4294967295, %s8466_s26   ;;  %s8466_s26 = sphi %s8566_s26, %s12928_s26   ;;  %s8462_s25 = sphi %s8564_s25, %s12927_s25   ;;  %s8458_s24 = sphi %s8562_s24, %s12926_s24   ;;  %s8454_s23 = sphi %s8560_s23, %s12925_s23  }
  0x16   : > { %s343_s27 = sshll.u32 %s8468_s11, 4  ;;  %p6161_p0 = scmp.ge.s32.totalorder %s8466_s26, 1  ;;  %s8586_s27 = int_to_ptr.vmem [resolvable:$true] %s343_s27 }
  0x17   : > { %p12232_p1 = scmp.eq.s32.totalorder %s8581_s28, 0  ;;  %p330_p2 = scmp.lt.s32.totalorder %s8466_s26, 3 }
  0x18   : > { %s8469_s30 = smov [#allocation9]   ;;  %s8470_s14 = smov [#allocation12]  }
  0x19   : > { %p8588_p3 = pnand %p6161_p0, %p330_p2  ;;  %s354_s13 = sshll.u32 %s8469_s30, 4  ;;  %s8595_s13 = int_to_ptr.vmem [resolvable:$true] %s354_s13 }
  0x1a   : > { %s378_s15 = sshll.u32 %s8470_s14, 4  ;;  %s8471_s17 = smov [#allocation15]   ;;  %s8603_s15 = int_to_ptr.vmem [resolvable:$true] %s378_s15 }
  0x1b   : > { %s12476_s29 = scalar_select %p8588_p3, 1, 0 }
  0x1c   : > { %p7712_p5 = pneg %p8588_p3  ;;  %s8605_s18 = sshll.u32 %s8471_s17, 4  ;;  %s403_s18 = int_to_ptr.vmem [resolvable:$true] %s8605_s18 }
  0x1d   : > { %12477 = sst [smem:[#allocation30_spill]] %s12476_s29 }
  0x1e   : > { %p8599_p6 = pnand %p7712_p5, %p12232_p1  ;;  %s12479_s2 = sld [smem:[#allocation125_spill]] }
  0x20   : > { %p8615_p8 = pneg %p8599_p6 }
  0x24   : > { %s8064_s21 = scalar_lea.hbm %s12479_s2, 768 }
  0x25   : > { %p8065_p7 = scmp.ne.s32.totalorder %s12479_s2, %s8064_s21  ;;  %p8071_p11 = scmp.lt.u32.totalorder %s8064_s21, %s12479_s2 }
  0x27   : > { %p8067_p9 = pnand %p8615_p8, %p8065_p7 }
  0x29   : > { %p8068_p10 = pneg %p8067_p9 }
  0x2b   : > { %p8073_p12 = pnand %p8071_p11, %p8068_p10 }
  0x2d   : > { %8076 = shalt.err (!%p8073_p12)
}
  0x2e   : > { %s8077_s19 = scalar_lea.vmem %s8586_s27, 768  ;;  %p8085_p5 = scmp.lt.s32.totalorder %s8586_s27, %s8586_s27 }
  0x2f   : > { %p8078_p13 = scmp.ne.s32.totalorder %s8586_s27, %s8077_s19  ;;  %p8086_p4 = scmp.lt.s32.totalorder %s8077_s19, %s8077_s19 }
  0x31   : > { %p8080_p0 = pnand %p8078_p13, %p8615_p8  ;;  %p8087_p7 = por %p8086_p4, %p8085_p5 }
  0x33   : > { %p8081_p2 = pneg %p8080_p0 }
  0x35   : > { %p8088_p9 = pnand %p8087_p7, %p8081_p2 }
  0x37   : > { %8091 = shalt.err (!%p8088_p9)
}
  0x38   : > { %7715 = dma.hbm_to_vmem [thread:$0]  (!%p8599_p6), %s12479_s2, 768, %s8586_s27, [#allocation7]  }
  0x39   : > { %s12481_s3 = sld [smem:[#allocation126_spill]] }
  0x3f   : > { %s8092_s14 = scalar_lea.hbm %s12481_s3, 32 }
  0x40   : > { %p8093_p10 = scmp.ne.s32.totalorder %s12481_s3, %s8092_s14  ;;  %p8099_p12 = scmp.lt.u32.totalorder %s8092_s14, %s12481_s3 }
  0x42   : > { %p8095_p4 = pnand %p8093_p10, %p8615_p8 }
  0x44   : > { %p8096_p11 = pneg %p8095_p4 }
  0x46   : > { %p8101_p13 = pnand %p8099_p12, %p8096_p11 }
  0x48   : > { %8104 = shalt.err (!%p8101_p13)
}
  0x49   : > { %s8105_s27 = scalar_lea.vmem %s8595_s13, 32  ;;  %p8113_p7 = scmp.lt.s32.totalorder %s8595_s13, %s8595_s13 }
  0x4a   : > { %p8106_p0 = scmp.ne.s32.totalorder %s8595_s13, %s8105_s27  ;;  %p8114_p9 = scmp.lt.s32.totalorder %s8105_s27, %s8105_s27 }
  0x4c   : > { %p8108_p2 = pnand %p8106_p0, %p8615_p8  ;;  %p8115_p10 = por %p8114_p9, %p8113_p7 }
  0x4e   : > { %p8109_p5 = pneg %p8108_p2 }
  0x50   : > { %p8116_p4 = pnand %p8115_p10, %p8109_p5 }
  0x52   : > { %8119 = shalt.err (!%p8116_p4)
}
  0x53   : > { %7718 = dma.hbm_to_vmem [thread:$0]  (!%p8599_p6), %s12481_s3, 32, %s8595_s13, [#allocation10]  }
  0x54   : > { %s12482_s5 = sld [smem:[#allocation128_spill]] }
  0x5a   : > { %s8120_s22 = scalar_lea.hbm %s12482_s5, 16 }
  0x5b   : > { %p8121_p11 = scmp.ne.s32.totalorder %s12482_s5, %s8120_s22  ;;  %p8127_p0 = scmp.lt.u32.totalorder %s8120_s22, %s12482_s5 }
  0x5d   : > { %p8123_p12 = pnand %p8121_p11, %p8615_p8 }
  0x5f   : > { %p8124_p13 = pneg %p8123_p12 }
  0x61   : > { %p8129_p2 = pnand %p8127_p0, %p8124_p13 }
  0x63   : > { %8132 = shalt.err (!%p8129_p2)
}
  0x64   : > { %s8133_s13 = scalar_lea.vmem %s8603_s15, 16  ;;  %s8140_s27 = scalar_lea.vmem %s8603_s15, 32 }
  0x65   : > { %p8134_p5 = scmp.ne.s32.totalorder %s8603_s15, %s8133_s13  ;;  %p8141_p10 = scmp.lt.s32.totalorder %s8603_s15, %s8603_s15 }
  0x66   : > { %p8142_p4 = scmp.lt.s32.totalorder %s8140_s27, %s8133_s13 }
  0x67   : > { %p8136_p7 = pnand %p8134_p5, %p8615_p8 }
  0x68   : > { %p8143_p11 = por %p8142_p4, %p8141_p10 }
  0x69   : > { %p8137_p9 = pneg %p8136_p7 }
  0x6b   : > { %p8144_p12 = pnand %p8143_p11, %p8137_p9 }
  0x6d   : > { %8147 = shalt.err (!%p8144_p12)
}
  0x6e   : > { %7724 = dma.hbm_to_vmem [thread:$0]  (!%p8599_p6), %s12482_s5, 16, %s8603_s15, [#allocation13]  }
  0x6f   : > { %s8472_s20 = smov [#allocation18]   ;;  %s12483_s7 = sld [smem:[#allocation130_spill]] }
  0x70   : > { %s426_s21 = sshll.u32 %s8472_s20, 4  ;;  %s427_s21 = int_to_ptr.vmem [resolvable:$true] %s426_s21 }
  0x75   : > { %s8148_s14 = scalar_lea.hbm %s12483_s7, 16 }
  0x76   : > { %p8149_p13 = scmp.ne.s32.totalorder %s12483_s7, %s8148_s14  ;;  %p8155_p5 = scmp.lt.u32.totalorder %s8148_s14, %s12483_s7 }
  0x78   : > { %p8151_p0 = pnand %p8149_p13, %p8615_p8 }
  0x7a   : > { %p8152_p2 = pneg %p8151_p0 }
  0x7c   : > { %p8157_p7 = pnand %p8155_p5, %p8152_p2 }
  0x7e   : > { %8160 = shalt.err (!%p8157_p7)
}
  0x7f   : > { %s8161_s15 = scalar_lea.vmem %s403_s18, 16  ;;  %s8168_s12 = scalar_lea.vmem %s403_s18, 32 }
  0x80   : > { %p8162_p9 = scmp.ne.s32.totalorder %s403_s18, %s8161_s15  ;;  %p8169_p11 = scmp.lt.s32.totalorder %s403_s18, %s403_s18 }
  0x81   : > { %p8170_p12 = scmp.lt.s32.totalorder %s8168_s12, %s8161_s15 }
  0x82   : > { %p8164_p10 = pnand %p8162_p9, %p8615_p8 }
  0x83   : > { %p8171_p1 = por %p8170_p12, %p8169_p11 }
  0x84   : > { %p8165_p4 = pneg %p8164_p10 }
  0x86   : > { %p8172_p3 = pnand %p8171_p1, %p8165_p4 }
  0x88   : > { %8175 = shalt.err (!%p8172_p3)
}
  0x89   : > { %7730 = dma.hbm_to_vmem [thread:$0]  (!%p8599_p6), %s12483_s7, 16, %s403_s18, [#allocation16]  }
  0x8a   : > { %s8176_s14 = scalar_lea.hbm %s12226_s9, 16 }
  0x8b   : > { %p8177_p13 = scmp.ne.s32.totalorder %s12226_s9, %s8176_s14  ;;  %p8183_p3 = scmp.lt.u32.totalorder %s8176_s14, %s12226_s9 }
  0x8d   : > { %p8179_p0 = pnand %p8177_p13, %p8615_p8 }
  0x8f   : > { %p8180_p1 = pneg %p8179_p0 }
  0x91   : > { %p8185_p2 = pnand %p8183_p3, %p8180_p1 }
  0x93   : > { %8188 = shalt.err (!%p8185_p2)
}
  0x94   : > { %s8189_s15 = scalar_lea.vmem %s427_s21, 16  ;;  %s8196_s18 = scalar_lea.vmem %s427_s21, 32 }
  0x95   : > { %p8190_p5 = scmp.ne.s32.totalorder %s427_s21, %s8189_s15  ;;  %p8197_p10 = scmp.lt.s32.totalorder %s427_s21, %s427_s21 }
  0x96   : > { %p8198_p4 = scmp.lt.s32.totalorder %s8196_s18, %s8189_s15 }
  0x97   : > { %p8192_p7 = pnand %p8190_p5, %p8615_p8 }
  0x98   : > { %p8199_p11 = por %p8198_p4, %p8197_p10 }
  0x99   : > { %p8193_p9 = pneg %p8192_p7 }
  0x9b   : > { %p8200_p12 = pnand %p8199_p11, %p8193_p9 }
  0x9d   : > { %8203 = shalt.err (!%p8200_p12)
}
  0x9e   : > { %7736 = dma.hbm_to_vmem [thread:$0]  (!%p8599_p6), %s12226_s9, 16, %s427_s21, [#allocation19]  }
  0x9f   : > { %s8473_s20 = smov [#allocation11]   ;;  %s12484_s4 = sld [smem:[#allocation127_spill]] }
  0xa0   : > { %s364_s22 = sshll.u32 %s8473_s20, 4  ;;  %s365_s22 = int_to_ptr.vmem [resolvable:$true] %s364_s22 }
  0xa5   : > { %s8204_s17 = scalar_lea.hbm %s12484_s4, 12288 }
  0xa6   : > { %p8205_p13 = scmp.ne.s32.totalorder %s12484_s4, %s8204_s17  ;;  %p8211_p3 = scmp.lt.u32.totalorder %s8204_s17, %s12484_s4 }
  0xa8   : > { %p8207_p0 = pnand %p8205_p13, %p8615_p8 }
  0xaa   : > { %p8208_p1 = pneg %p8207_p0 }
  0xac   : > { %p8213_p2 = pnand %p8211_p3, %p8208_p1 }
  0xae   : > { %8216 = shalt.err (!%p8213_p2)
}
  0xaf   : > { %s8217_s21 = scalar_lea.vmem %s365_s22, 12288  ;;  %p8225_p10 = scmp.lt.s32.totalorder %s365_s22, %s365_s22 }
  0xb0   : > { %p8218_p5 = scmp.ne.s32.totalorder %s365_s22, %s8217_s21  ;;  %p8226_p4 = scmp.lt.s32.totalorder %s8217_s21, %s8217_s21 }
  0xb2   : > { %p8220_p7 = pnand %p8218_p5, %p8615_p8  ;;  %p8227_p11 = por %p8226_p4, %p8225_p10 }
  0xb4   : > { %p8221_p9 = pneg %p8220_p7 }
  0xb6   : > { %p8228_p12 = pnand %p8227_p11, %p8221_p9 }
  0xb8   : > { %8231 = shalt.err (!%p8228_p12)
}
  0xb9   : > { %s8474_s18 = smov 384   ;;  %s8475_s12 = smov 24  }
  0xba   : > { %7721 = dma.hbm_to_vmem [thread:$0]  (!%p8599_p6), %s12484_s4, 12288, %s365_s22, [#allocation10], %s8474_s18, %s8474_s18, %s8475_s12  }
  0xbb   : > { %s8476_s11 = smov [#allocation14]   ;;  %s12485_s6 = sld [smem:[#allocation129_spill]] }
  0xbc   : > { %s388_s14 = sshll.u32 %s8476_s11, 4  ;;  %s389_s14 = int_to_ptr.vmem [resolvable:$true] %s388_s14 }
  0xc1   : > { %s8232_s13 = scalar_lea.hbm %s12485_s6, 4096 }
  0xc2   : > { %p8233_p13 = scmp.ne.s32.totalorder %s12485_s6, %s8232_s13  ;;  %p8239_p3 = scmp.lt.u32.totalorder %s8232_s13, %s12485_s6 }
  0xc4   : > { %p8235_p0 = pnand %p8233_p13, %p8615_p8 }
  0xc6   : > { %p8236_p1 = pneg %p8235_p0 }
  0xc8   : > { %p8241_p2 = pnand %p8239_p3, %p8236_p1 }
  0xca   : > { %8244 = shalt.err (!%p8241_p2)
}
  0xcb   : > { %s8245_s22 = scalar_lea.vmem %s389_s14, 4096  ;;  %p8253_p10 = scmp.lt.s32.totalorder %s389_s14, %s389_s14 }
  0xcc   : > { %p8246_p5 = scmp.ne.s32.totalorder %s389_s14, %s8245_s22  ;;  %p8254_p4 = scmp.lt.s32.totalorder %s8245_s22, %s8245_s22 }
  0xce   : > { %p8248_p7 = pnand %p8246_p5, %p8615_p8  ;;  %p8255_p11 = por %p8254_p4, %p8253_p10 }
  0xd0   : > { %p8249_p9 = pneg %p8248_p7 }
  0xd2   : > { %p8256_p12 = pnand %p8255_p11, %p8249_p9 }
  0xd4   : > { %8259 = shalt.err (!%p8256_p12)
}
  0xd5   : > { %s8477_s18 = smov 256   ;;  %s8478_s12 = smov 16  }
  0xd6   : > { %7727 = dma.hbm_to_vmem [thread:$0]  (!%p8599_p6), %s12485_s6, 4096, %s389_s14, [#allocation13], %s8477_s18, %s8477_s18, %s8478_s12  }
  0xd7   : > { %s8479_s20 = smov [#allocation17]   ;;  %s12486_s8 = sld [smem:[#allocation131_spill]] }
  0xd8   : > { %s412_s11 = sshll.u32 %s8479_s20, 4  ;;  %s413_s11 = int_to_ptr.vmem [resolvable:$true] %s412_s11 }
  0xdd   : > { %s8260_s13 = scalar_lea.hbm %s12486_s8, 1024 }
  0xde   : > { %p8261_p13 = scmp.ne.s32.totalorder %s12486_s8, %s8260_s13  ;;  %p8267_p3 = scmp.lt.u32.totalorder %s8260_s13, %s12486_s8 }
  0xe0   : > { %p8263_p0 = pnand %p8261_p13, %p8615_p8 }
  0xe2   : > { %p8264_p1 = pneg %p8263_p0 }
  0xe4   : > { %p8269_p2 = pnand %p8267_p3, %p8264_p1 }
  0xe6   : > { %8272 = shalt.err (!%p8269_p2)
}
  0xe7   : > { %s8273_s14 = scalar_lea.vmem %s413_s11, 1024  ;;  %p8281_p10 = scmp.lt.s32.totalorder %s413_s11, %s413_s11 }
  0xe8   : > { %p8274_p5 = scmp.ne.s32.totalorder %s413_s11, %s8273_s14  ;;  %p8282_p4 = scmp.lt.s32.totalorder %s8273_s14, %s8273_s14 }
  0xea   : > { %p8276_p7 = pnand %p8274_p5, %p8615_p8  ;;  %p8283_p11 = por %p8282_p4, %p8281_p10 }
  0xec   : > { %p8277_p9 = pneg %p8276_p7 }
  0xee   : > { %p8284_p12 = pnand %p8283_p11, %p8277_p9 }
  0xf0   : > { %8287 = shalt.err (!%p8284_p12)
}
  0xf1   : > { %s12234_s18 = smov 128   ;;  %s12236_s12 = smov 8  }
  0xf2   : > { %7733 = dma.hbm_to_vmem [thread:$0]  (!%p8599_p6), %s12486_s8, 1024, %s413_s11, [#allocation16], %s12234_s18, %s12234_s18, %s12236_s12  }
  0xf3   : > { %s8482_s20 = smov [#allocation20]   ;;  %s8288_s27 = scalar_lea.hbm %s12227_s10, 512 }
  0xf4   : > { %s436_s17 = sshll.u32 %s8482_s20, 4  ;;  %p8289_p13 = scmp.ne.s32.totalorder %s12227_s10, %s8288_s27  ;;  %s437_s17 = int_to_ptr.vmem [resolvable:$true] %s436_s17 }
  0xf5   : > { %p8295_p3 = scmp.lt.u32.totalorder %s8288_s27, %s12227_s10 }
  0xf6   : > { %p8291_p0 = pnand %p8289_p13, %p8615_p8 }
  0xf8   : > { %p8292_p1 = pneg %p8291_p0 }
  0xfa   : > { %p8297_p2 = pnand %p8295_p3, %p8292_p1 }
  0xfc   : > { %8300 = shalt.err (!%p8297_p2)
}
  0xfd   : > { %s8301_s11 = scalar_lea.vmem %s437_s17, 512  ;;  %p8309_p10 = scmp.lt.s32.totalorder %s437_s17, %s437_s17 }
  0xfe   : > { %p8302_p5 = scmp.ne.s32.totalorder %s437_s17, %s8301_s11  ;;  %p8310_p4 = scmp.lt.s32.totalorder %s8301_s11, %s8301_s11 }
 0x100   : > { %p8304_p7 = pnand %p8302_p5, %p8615_p8  ;;  %p8311_p11 = por %p8310_p4, %p8309_p10 }
 0x102   : > { %p8305_p9 = pneg %p8304_p7 }
 0x104   : > { %p8312_p12 = pnand %p8311_p11, %p8305_p9 }
 0x106   : > { %8315 = shalt.err (!%p8312_p12)
}
 0x107   : > { %7739 = dma.hbm_to_vmem [thread:$0]  (!%p8599_p6), %s12227_s10, 512, %s437_s17, [#allocation19], %s12234_s18, %s12234_s18, %s12236_s12  }
 0x108   : > { %s6160_s16 = sadd.s32 4294967294, %s8466_s26   ;;  %s8800_s30 = sadd.s32 1, %s8466_s26  }
 0x109   : > { %s44_s20 = sadd.s32 1, %s8462_s25  ;;  %s41_s19 = ssub.s32 %s8466_s26, %s8800_s30 }
 0x10a   : > { %p51_p8 = scmp.ne.s32.totalorder %s8462_s25, %s8458_s24  ;;  %p42_p13 = scmp.eq.s32.totalorder %s41_s19, 0 }
 0x10b   : > { %p52_p0 = scmp.eq.s32.totalorder %s8466_s26, 0  ;;  %p57_p1 = scmp.ne.s32.totalorder %s8458_s24, %s8454_s23 }
 0x10c   : > { %p317_p3 = scmp.eq.s32.totalorder %s8581_s28, 1  ;;  %p12487_p5 = scmp.eq.s32.totalorder %s8581_s28, 0 }
 0x10d   : > { %s8812_s13 = scalar_select %p42_p13, %s8462_s25, %s44_s20  }
 0x10e   : > { %p53_p2 = por %p52_p0, %p51_p8  ;;  %p8816_p7 = por %p12487_p5, %p57_p1 }
 0x10f   : > { %p8820_p6 = por %p317_p3, %p51_p8  ;;  %p323_p9 = scmp.eq.s32.totalorder %s6160_s16, 1 }
 0x110   : > { %p7760_p10 = scmp.lt.s32.totalorder %s8466_s26, 2  ;;  %s453_s15 = sand.u32 1, %s8462_s25  }
 0x111   : > { %s12489_s17 = scalar_select %p8820_p6, 1, 0 }
 0x112   : > { %p8826_p4 = por %p323_p9, %p57_p1  ;;  %s8830_s22 = sshll.u32 %s453_s15, 7 }
 0x113   : > { %s6444_s14 = sshll.u32 %s8466_s26, 11  ;;  %s12491_s0 = sld [smem:[#allocation124_spill]] }
 0x114   : > { %s12490_s21 = scalar_select %p8826_p4, 1, 0 }
 0x115   : > { %s457_s16 = scalar_lea.vmem [#allocation3], %s8830_s22  ;;  %p8839_p11 = pnand %p7760_p10, %p53_p2 }
 0x116   : > { %s464_s20 = sshll.u32 %s457_s16, 4  ;;  %s8848_s11 = scalar_lea.hbm %s12218_s1, %s6444_s14  ;;  %s8843_s20 = int_to_ptr.vmem [resolvable:$true] %s464_s20 }
 0x117   : > { %s8850_s2 = scalar_lea.sflag [#allocation4], %s453_s15  ;;  %p8318_p8 = pneg %p8839_p11 }
 0x119   : > { %s8836_s29 = scalar_lea.hbm %s12491_s0, %s6444_s14  ;;  %s8321_s5 = scalar_lea.hbm %s12491_s0, 4096 }
 0x11a   : > { %s8316_s3 = scalar_lea.hbm %s8836_s29, 2048  ;;  %p8322_p1 = scmp.lt.u32.totalorder %s8836_s29, %s12491_s0 }
 0x11b   : > { %p8317_p12 = scmp.ne.s32.totalorder %s8836_s29, %s8316_s3  ;;  %p8323_p3 = scmp.lt.u32.totalorder %s8321_s5, %s8316_s3 }
 0x11c   : > { %p8325_p5 = scmp.lt.u32.totalorder %s8316_s3, %s8836_s29 }
 0x11d   : > { %p8319_p13 = pnand %p8318_p8, %p8317_p12  ;;  %p8324_p2 = por %p8323_p3, %p8322_p1 }
 0x11f   : > { %p8320_p0 = pneg %p8319_p13  ;;  %p8326_p9 = por %p8325_p5, %p8324_p2 }
 0x121   : > { %p8327_p10 = pnand %p8326_p9, %p8320_p0 }
 0x123   : > { %8330 = shalt.err (!%p8327_p10)
}
 0x124   : > { %s8331_s18 = scalar_lea.vmem %s8843_s20, 2048  ;;  %s8483_s4 = smov [#allocation3]  }
 0x125   : > { %p8332_p12 = scmp.ne.s32.totalorder %s8843_s20, %s8331_s18  ;;  %s8336_s12 = sshll.u32 %s8483_s4, 4  ;;  %s8337_s12 = int_to_ptr.vmem [resolvable:$false] %s8336_s12 }
 0x126   : > { %s8338_s6 = scalar_lea.vmem %s8337_s12, 4096  ;;  %p8339_p6 = scmp.lt.s32.totalorder %s8843_s20, %s8337_s12 }
 0x127   : > { %p8334_p13 = pnand %p8332_p12, %p8318_p8  ;;  %p8340_p1 = scmp.lt.s32.totalorder %s8338_s6, %s8331_s18 }
 0x129   : > { %p8335_p4 = pneg %p8334_p13  ;;  %p8341_p3 = por %p8340_p1, %p8339_p6 }
 0x12b   : > { %p8342_p2 = pnand %p8341_p3, %p8335_p4 }
 0x12d   : > { %8345 = shalt.err (!%p8342_p2)
}
 0x12e   : > { %s12493_s3 = smov 8   ;;  %s12494_s5 = smov 128  }
 0x12f   : > { %7743 = dma.hbm_to_vmem [thread:$0]  (!%p8839_p11), %s8836_s29, 2048, %s8843_s20, %s8850_s2, %s12494_s5, %s12494_s5, %s12493_s3  }
 0x130   : > { %s478_s7 = scalar_lea.vmem [#allocation6], %s8830_s22  ;;  %s474_s14 = sand.u32 1, %s8466_s26  }
 0x131   : > { %s485_s15 = sshll.u32 %s478_s7, 4  ;;  %s8885_s16 = scalar_lea.sflag [#allocation7], %s474_s14  ;;  %s8883_s15 = int_to_ptr.vmem [resolvable:$true] %s485_s15 }
 0x132   : > { %s8346_s18 = scalar_lea.hbm %s8848_s11, 2048  ;;  %s8351_s6 = scalar_lea.hbm %s12218_s1, 4096 }
 0x133   : > { %p8347_p6 = scmp.ne.s32.totalorder %s8848_s11, %s8346_s18  ;;  %p8352_p5 = scmp.lt.u32.totalorder %s8848_s11, %s12218_s1 }
 0x134   : > { %p8353_p9 = scmp.lt.u32.totalorder %s8351_s6, %s8346_s18  ;;  %p8355_p12 = scmp.lt.u32.totalorder %s8346_s18, %s8848_s11 }
 0x135   : > { %p8349_p4 = pnand %p8347_p6, %p8318_p8 }
 0x136   : > { %p8354_p10 = por %p8353_p9, %p8352_p5 }
 0x137   : > { %p8350_p0 = pneg %p8349_p4 }
 0x138   : > { %p8356_p13 = por %p8355_p12, %p8354_p10 }
 0x13a   : > { %p8357_p1 = pnand %p8356_p13, %p8350_p0 }
 0x13c   : > { %8360 = shalt.err (!%p8357_p1)
}
 0x13d   : > { %s8361_s22 = scalar_lea.vmem %s8883_s15, 2048  ;;  %s8484_s29 = smov [#allocation6]  }
 0x13e   : > { %p8362_p3 = scmp.ne.s32.totalorder %s8883_s15, %s8361_s22  ;;  %s8366_s20 = sshll.u32 %s8484_s29, 4  ;;  %s8367_s20 = int_to_ptr.vmem [resolvable:$false] %s8366_s20 }
 0x13f   : > { %s8368_s0 = scalar_lea.vmem %s8367_s20, 4096  ;;  %p8369_p4 = scmp.lt.s32.totalorder %s8883_s15, %s8367_s20 }
 0x140   : > { %p8364_p2 = pnand %p8362_p3, %p8318_p8  ;;  %p8370_p5 = scmp.lt.s32.totalorder %s8368_s0, %s8361_s22 }
 0x142   : > { %p8365_p6 = pneg %p8364_p2  ;;  %p8371_p9 = por %p8370_p5, %p8369_p4 }
 0x144   : > { %p8372_p10 = pnand %p8371_p9, %p8365_p6 }
 0x146   : > { %8375 = shalt.err (!%p8372_p10)
}
 0x147   : > { %7746 = dma.hbm_to_vmem [thread:$0]  (!%p8839_p11), %s8848_s11, 2048, %s8883_s15, %s8885_s16, %s12494_s5, %s12494_s5, %s12493_s3  }
 0x148   : > { %s12495_s8 = sld [smem:[#allocation30_spill]] }
 0x14e   : > { %p12496_p8 = scmp.ne.s32.totalorder %s12495_s8, 0 }
 0x150   : > { %497 = sbr.rel (%p12496_p8) target bundleno = 3655 (0xe47), region = 68 }
 0x157   : > { %s8917_s2 = sand.u32 1, %s8458_s24  }
 0x158   : > { %s6179_s7 = sshll.u32 %s8917_s2, 7  ;;  %s500_s14 = scalar_lea.sflag [#allocation4], %s8917_s2 }
 0x159   : > { %s8921_s18 = scalar_lea.vmem [#allocation3], %s6179_s7 }
 0x15a   : > { %8421 = dma.done.wait (%p8816_p7), %s500_s14, 2048  }
 0x15b   : > { %8423 = vsyncadd (%p8816_p7), %s500_s14, 4294965248  ;;  %s508_s19 = sand.u32 1, %s8581_s28   ;;  %s8928_s3 = scalar_lea.vmem [#allocation6], %s6179_s7 }
 0x15c   : > { %s509_s11 = scalar_lea.sflag [#allocation7], %s508_s19 }
 0x15d   : > { %8425 = dma.done.wait (%p8816_p7), %s509_s11, 2048  }
 0x15e   : > { %8427 = vsyncadd (%p8816_p7), %s509_s11, 4294965248  ;;  %p12497_p11 = scmp.eq.s32.totalorder %s8581_s28, 0 }
 0x160   : > { %8429 = dma.done.wait (%p12497_p11), [#allocation7], 768   ;;  %p12498_p0 = pmov %p12497_p11 }
 0x162   : > { %8431 = vsyncadd (%p12498_p0), [#allocation7], 4294966528  ;;  %p12499_p12 = pmov %p12498_p0 }
 0x163   : > { %p12500_p13 = pmov %p12498_p0 }
 0x164   : > { %8433 = dma.done.wait (%p12499_p12), [#allocation10], 12320  }
 0x165   : > { %8435 = vsyncadd (%p12500_p13), [#allocation10], 4294954976  ;;  %p12501_p1 = pmov %p12498_p0 }
 0x166   : > { %p12502_p3 = pmov %p12498_p0 }
 0x167   : > { %8437 = dma.done.wait (%p12501_p1), [#allocation13], 4112  }
 0x168   : > { %8439 = vsyncadd (%p12502_p3), [#allocation13], 4294963184  ;;  %p12503_p7 = pmov %p12498_p0 }
 0x169   : > { %p12504_p2 = pmov %p12498_p0 }
 0x16a   : > { %8441 = dma.done.wait (%p12503_p7), [#allocation16], 1040  }
 0x16b   : > { %8443 = vsyncadd (%p12504_p2), [#allocation16], 4294966256  ;;  %p12505_p6 = pmov %p12498_p0 }
 0x16c   : > { %p12506_p4 = pmov %p12498_p0 }
 0x16d   : > { %8445 = dma.done.wait (%p12505_p6), [#allocation19], 528  }
 0x16e   : > { %8447 = vsyncadd (%p12506_p4), [#allocation19], 4294966768  ;;  %v12239_v1 = vmov 0.0   ;;  %v8486_v2 = vmov 1   ;;  %v938_v3 = vld [vmem:[#allocation8 + $0x8] sm:$0xff]  ;;  %v937_v4 = vld [vmem:[#allocation8] sm:$0xff] }
 0x16f   : > { %1056 = vmatprep.mubr.f32.mxu0 %v12239_v1  ;;  %1253 = vmatprep.mubr.f32.mxu1 %v12239_v1  ;;  %v8957_v5 = vld [vmem:[%s8921_s18] sm:$0xff]  ;;  %vm943_vm0 = vcmask 64512   ;;  %v940_v6 = vld [vmem:[#allocation8 + $0x18] sm:$0xff]  ;;  %v939_v7 = vld [vmem:[#allocation8 + $0x10] sm:$0xff]  ;;  %v8487_v56 = vmov 0   ;;  %v8488_v57 = vmov 2  }
 0x170   : > { %7824 = vset.pattern.permute.xlu0 %v8486_v2  ;;  %7825 = vset.pattern.permute.xlu1 %v8486_v2  ;;  %v8963_v8 = vld [vmem:[%s8921_s18 + $0x8] sm:$0xff]  ;;  %v8966_v9 = vld [vmem:[%s8921_s18 + $0x30] sm:$0xff]  ;;  %v8974_v11 = vld [vmem:[%s8928_s3] sm:$0xff]  ;;  %s8490_s27 = smov 64   ;;  %s6441_s5 = sshll.u32 %s8581_s28, 4 }
 0x171   : > { %992 = vmatprep.subr.mxu0 %v938_v3  ;;  %7540 = vmatprep.subr.mxu1 %v940_v6  ;;  %v942_v10 = vld [vmem:[#allocation8 + $0x28] sm:$0xff]  ;;  %v8979_v13 = vld [vmem:[%s8921_s18 + $0x10] sm:$0xff]  ;;  %v8983_v15 = vld [vmem:[%s8921_s18 + $0x38] sm:$0xff]  ;;  %s592_s15 = scalar_lea.vmem [#allocation21], %s8917_s2  ;;  %s12921_s6 = sld [smem:[#allocation132_spill]] }
 0x172   : > { %993 = vmatpush1.msra.mxu0 %v937_v4  ;;  %7541 = vmatpush1.msra.mxu1 %v939_v7  ;;  %v612_v12 = vld [vmem:[%s8928_s3 + $0x8] sm:$0xff]  ;;  %v613_v14 = vld [vmem:[%s8928_s3 + $0x10] sm:$0xff]  ;;  %v614_v18 = vld [vmem:[%s8928_s3 + $0x18] sm:$0xff]  ;;  %s5986_s16 = sshll.u32 %s592_s15, 4  ;;  %s5974_s29 = scalar_lea.sflag [#allocation5], %s8917_s2  ;;  %s12175_s16 = int_to_ptr.vmem [resolvable:$true] %s5986_s16 }
 0x173   : > { %6239 = vmatmul.mubr.msk.f32.vlgmr.msra.gmra.mrb[0].mxu0 %vm943_vm0, %v8957_v5  ;;  %1153 = vmatprep.subr.mxu0 %v940_v6  ;;  %v8986_v16 = vadd.s32 8, %v612_v12  ;;  %v8988_v17 = vadd.s32 16, %v613_v14  ;;  %v615_v19 = vld [vmem:[%s8928_s3 + $0x20] sm:$0xff]  ;;  %v8999_v20 = vld [vmem:[%s8921_s18 + $0x18] sm:$0xff]  ;;  %v9002_v21 = vadd.s32 24, %v614_v18  ;;  %v616_v24 = vld [vmem:[%s8928_s3 + $0x28] sm:$0xff] }
 0x174   : > { %1062 = vmatprep.mubr.f32.mxu0 %v12239_v1  ;;  %1154 = vmatpush1.msra.mxu0 %v939_v7  ;;  %v9005_v22 = vld [vmem:[%s8921_s18 + $0x40] sm:$0xff]  ;;  %v9008_v23 = vadd.s32 32, %v615_v19  ;;  %v617_v25 = vld [vmem:[%s8928_s3 + $0x30] sm:$0xff]  ;;  %v9022_v27 = vadd.s32 40, %v616_v24  ;;  %v9025_v28 = vld [vmem:[%s8921_s18 + $0x48] sm:$0xff]  ;;  %s8376_s20 = scalar_lea.vmem %s12175_s16, 16 }
 0x175   : > { %6261 = vmatmul.mubr.msk.f32.vlgmr.msra.gmra.mrb[0].mxu1 %vm943_vm0, %v8966_v9  ;;  %1314 = vmatprep.subr.mxu0 %v942_v10  ;;  %v9019_v26 = vld [vmem:[%s8921_s18 + $0x20] sm:$0xff]  ;;  %v9028_v29 = vadd.s32 48, %v617_v25  ;;  %v618_v30 = vld [vmem:[%s8928_s3 + $0x38] sm:$0xff]  ;;  %v9039_v32 = vld [vmem:[%s8921_s18 + $0x28] sm:$0xff]  ;;  %p8377_p5 = scmp.ne.s32.totalorder %s12175_s16, %s8376_s20  ;;  %p12922_p9 = scmp.ne.s32.totalorder %s12489_s17, 0 }
 0x176   : > { %1259 = vmatprep.mubr.f32.mxu1 %v12239_v1  ;;  %741 = vperm.xlu0 %7824, %v8974_v11   ;;  %v619_v31 = vld [vmem:[%s8928_s3 + $0x40] sm:$0xff]  ;;  %v9042_v33 = vadd.s32 56, %v618_v30  ;;  %v9045_v34 = vld [vmem:[%s8921_s18 + $0x50] sm:$0xff]  ;;  %v620_v36 = vld [vmem:[%s8928_s3 + $0x48] sm:$0xff]  ;;  %s8491_s28 = smov [#allocation21]  }
 0x177   : > { %6240 = vmatmul.mubr.msk.f32.gmra.mrb[2].mxu0 %vm943_vm0, %v8963_v8  ;;  %747 = vperm.xlu1 %7825, %v8988_v17   ;;  %v9048_v35 = vadd.s32 64, %v619_v31  ;;  %v621_v37 = vld [vmem:[%s8928_s3 + $0x50] sm:$0xff]  ;;  %v9059_v38 = vadd.s32 72, %v620_v36  ;;  %v9062_v39 = vld [vmem:[%s8921_s18 + $0x58] sm:$0xff]  ;;  %v623_v42 = vld [vmem:[%s8928_s3 + $0x60] sm:$0xff]  ;;  %s12173_s22 = scalar_lea.hbm %s12921_s6, %s6441_s5  ;;  %p8378_p10 = pnand %p8377_p5, %p12922_p9 }
 0x178   : > { %1068 = vmatprep.mubr.f32.mxu0 %v12239_v1  ;;  %v9065_v40 = vadd.s32 80, %v621_v37  ;;  %v622_v41 = vld [vmem:[%s8928_s3 + $0x58] sm:$0xff]  ;;  %v9079_v44 = vld [vmem:[%s8921_s18 + $0x60] sm:$0xff]  ;;  %v9082_v45 = vadd.s32 96, %v623_v42  ;;  %v624_v46 = vld [vmem:[%s8928_s3 + $0x68] sm:$0xff]  ;;  %s8380_s0 = sshll.u32 %s8491_s28, 4  ;;  %s8381_s0 = int_to_ptr.vmem [resolvable:$false] %s8380_s0 }
 0x179   : > { %6262 = vmatmul.mubr.msk.f32.gmra.mrb[2].mxu1 %vm943_vm0, %v8983_v15  ;;  %v9076_v43 = vadd.s32 88, %v622_v41  ;;  %v625_v47 = vld [vmem:[%s8928_s3 + $0x70] sm:$0xff]  ;;  %v9093_v48 = vadd.s32 104, %v624_v46  ;;  %v9096_v49 = vld [vmem:[%s8921_s18 + $0x68] sm:$0xff]  ;;  %v626_v51 = vld [vmem:[%s8928_s3 + $0x78] sm:$0xff]  ;;  %p8379_p8 = pneg %p8378_p10  ;;  %s8382_s8 = scalar_lea.vmem %s8381_s0, 32 }
 0x17a   : > { %1265 = vmatprep.mubr.f32.mxu1 %v12239_v1  ;;  %744 = vperm.xlu0 %7824, %v8986_v16   ;;  %v9099_v50 = vadd.s32 112, %v625_v47  ;;  %v9109_v52 = vadd.s32 120, %v626_v51  ;;  %v9112_v53 = vld [vmem:[%s8921_s18 + $0x70] sm:$0xff]  ;;  %v9123_v54 = vld [vmem:[%s8921_s18 + $0x78] sm:$0xff]  ;;  %v941_v55 = vld [vmem:[#allocation8 + $0x20] sm:$0xff]  ;;  %p8383_p11 = scmp.lt.s32.totalorder %s12175_s16, %s8381_s0  ;;  %p8384_p0 = scmp.lt.s32.totalorder %s8382_s8, %s8376_s20 }
 0x17b   : > { %6241 = vmatmul.mubr.msk.f32.gmra.mrb[4].mxu0 %vm943_vm0, %v8979_v13  ;;  %750 = vperm.xlu1 %7825, %v9002_v21  }
 0x17c   : > { %1074 = vmatprep.mubr.f32.mxu0 %v12239_v1  ;;  %p8385_p12 = por %p8384_p0, %p8383_p11 }
 0x17d   : > { %6263 = vmatmul.mubr.msk.f32.gmra.mrb[4].mxu1 %vm943_vm0, %v9005_v22 }
 0x17e   : > { %1271 = vmatprep.mubr.f32.mxu1 %v12239_v1  ;;  %753 = vperm.xlu0 %7824, %v9008_v23   ;;  %p8386_p13 = pnand %p8385_p12, %p8379_p8 }
 0x17f   : > { %6242 = vmatmul.mubr.msk.f32.gmra.mrb[6].mxu0 %vm943_vm0, %v8999_v20  ;;  %756 = vperm.xlu1 %7825, %v9022_v27  }
 0x180   : > { %1080 = vmatprep.mubr.f32.mxu0 %v12239_v1 }
 0x181   : > { %6264 = vmatmul.mubr.msk.f32.gmra.mrb[6].mxu1 %vm943_vm0, %v9025_v28 }
 0x182   : > { %1277 = vmatprep.mubr.f32.mxu1 %v12239_v1  ;;  %759 = vperm.xlu0 %7824, %v9028_v29  }
 0x183   : > { %6243 = vmatmul.mubr.msk.f32.gmra.mrb[8].mxu0 %vm943_vm0, %v9019_v26  ;;  %762 = vperm.xlu1 %7825, %v9042_v33  }
 0x184   : > { %1086 = vmatprep.mubr.f32.mxu0 %v12239_v1 }
 0x185   : > { %6265 = vmatmul.mubr.msk.f32.gmra.mrb[8].mxu1 %vm943_vm0, %v9045_v34 }
 0x186   : > { %1283 = vmatprep.mubr.f32.mxu1 %v12239_v1  ;;  %765 = vperm.xlu0 %7824, %v9048_v35  }
 0x187   : > { %6244 = vmatmul.mubr.msk.f32.gmra.mrb[10].mxu0 %vm943_vm0, %v9039_v32  ;;  %768 = vperm.xlu1 %7825, %v9059_v38  }
 0x188   : > { %1092 = vmatprep.mubr.f32.mxu0 %v12239_v1 }
 0x189   : > { %6266 = vmatmul.mubr.msk.f32.gmra.mrb[10].mxu1 %vm943_vm0, %v9062_v39 }
 0x18a   : > { %1289 = vmatprep.mubr.f32.mxu1 %v12239_v1  ;;  %771 = vperm.xlu0 %7824, %v9065_v40  }
 0x18b   : > { %6245 = vmatmul.mubr.msk.f32.gmra.mrb[12].mxu0 %vm943_vm0, %v8966_v9  ;;  %774 = vperm.xlu1 %7825, %v9076_v43  }
 0x18c   : > { %1098 = vmatprep.mubr.f32.mxu0 %v12239_v1 }
 0x18d   : > { %6267 = vmatmul.mubr.msk.f32.gmra.mrb[12].mxu1 %vm943_vm0, %v9079_v44 }
 0x18e   : > { %1295 = vmatprep.mubr.f32.mxu1 %v12239_v1  ;;  %777 = vperm.xlu0 %7824, %v9082_v45  }
 0x18f   : > { %6246 = vmatmul.mubr.msk.f32.gmra.mrb[14].mxu0 %vm943_vm0, %v8983_v15  ;;  %780 = vperm.xlu1 %7825, %v9093_v48  }
 0x190   : > { %1104 = vmatprep.mubr.f32.mxu0 %v12239_v1 }
 0x191   : > { %6268 = vmatmul.mubr.msk.f32.gmra.mrb[14].mxu1 %vm943_vm0, %v9096_v49 }
 0x192   : > { %1301 = vmatprep.mubr.f32.mxu1 %v12239_v1  ;;  %783 = vperm.xlu0 %7824, %v9099_v50  }
 0x193   : > { %6247 = vmatmul.mubr.msk.f32.gmra.mrb[16].mxu0 %vm943_vm0, %v9005_v22  ;;  %786 = vperm.xlu1 %7825, %v9109_v52  }
 0x194   : > { %1110 = vmatprep.mubr.f32.mxu0 %v12239_v1 }
 0x195   : > { %6269 = vmatmul.mubr.msk.f32.gmra.mrb[16].mxu1 %vm943_vm0, %v9112_v53 }
 0x196   : > { %1307 = vmatprep.mubr.f32.mxu1 %v12239_v1  ;;  %7826 = vset.pattern.permute.xlu0 %v8487_v56 }
 0x197   : > { %6248 = vmatmul.mubr.msk.f32.gmra.mrb[18].mxu0 %vm943_vm0, %v9025_v28  ;;  %645 = vperm.xlu0 %7826, %v8974_v11  }
 0x198   : > { %1116 = vmatprep.mubr.f32.mxu0 %v12239_v1  ;;  %7827 = vset.pattern.permute.xlu1 %v8487_v56 }
 0x199   : > { %6270 = vmatmul.mubr.msk.f32.gmra.mrb[18].mxu1 %vm943_vm0, %v9123_v54  ;;  %648 = vperm.xlu1 %7827, %v8986_v16  }
 0x19a   : > { %1539 = vmatprep.mubr.f32.mxu1 %v12239_v1 }
 0x19b   : > { %6249 = vmatmul.mubr.msk.f32.gmra.mrb[20].mxu0 %vm943_vm0, %v9045_v34  ;;  %654 = vperm.xlu0 %7826, %v9002_v21  }
 0x19c   : > { %1122 = vmatprep.mubr.f32.mxu0 %v12239_v1 }
 0x19d   : > { %651 = vperm.xlu1 %7827, %v8988_v17  }
 0x19f   : > { %6250 = vmatmul.mubr.msk.f32.gmra.mrb[22].mxu0 %vm943_vm0, %v9062_v39  ;;  %660 = vperm.xlu0 %7826, %v9022_v27  }
 0x1a0   : > { %1128 = vmatprep.mubr.f32.mxu0 %v12239_v1 }
 0x1a1   : > { %657 = vperm.xlu1 %7827, %v9008_v23  }
 0x1a3   : > { %6251 = vmatmul.mubr.msk.f32.gmra.mrb[24].mxu0 %vm943_vm0, %v9079_v44  ;;  %666 = vperm.xlu0 %7826, %v9042_v33  }
 0x1a4   : > { %1134 = vmatprep.mubr.f32.mxu0 %v12239_v1 }
 0x1a5   : > { %663 = vperm.xlu1 %7827, %v9028_v29  }
 0x1a7   : > { %6252 = vmatmul.mubr.msk.f32.gmra.mrb[26].mxu0 %vm943_vm0, %v9096_v49  ;;  %672 = vperm.xlu0 %7826, %v9059_v38  }
 0x1a8   : > { %1140 = vmatprep.mubr.f32.mxu0 %v12239_v1 }
 0x1a9   : > { %669 = vperm.xlu1 %7827, %v9048_v35  }
 0x1ab   : > { %6253 = vmatmul.mubr.msk.f32.gmra.mrb[28].mxu0 %vm943_vm0, %v9112_v53  ;;  %678 = vperm.xlu0 %7826, %v9076_v43  }
 0x1ac   : > { %1146 = vmatprep.mubr.f32.mxu0 %v12239_v1 }
 0x1ad   : > { %675 = vperm.xlu1 %7827, %v9065_v40  }
 0x1af   : > { %6254 = vmatmul.mubr.msk.f32.gmra.mrb[30].mxu0 %vm943_vm0, %v9123_v54  ;;  %684 = vperm.xlu0 %7826, %v9093_v48  }
 0x1b0   : > { %1217 = vmatprep.mubr.f32.mxu0 %v12239_v1 }
 0x1b1   : > { %681 = vperm.xlu1 %7827, %v9082_v45  }
 0x1b3   : > { %6255 = vmatmul.mubr.msk.f32.vlgmr.msra.gmra.mrb[32].mxu0 %vm943_vm0, %v8957_v5  ;;  %690 = vperm.xlu0 %7826, %v9109_v52  }
 0x1b4   : > { %1223 = vmatprep.mubr.f32.mxu0 %v12239_v1  ;;  %1315 = vmatpush1.msra.mxu0 %v941_v55 }
 0x1b5   : > { %687 = vperm.xlu1 %7827, %v9099_v50  }
 0x1b7   : > { %6256 = vmatmul.mubr.msk.f32.gmra.mrb[34].mxu0 %vm943_vm0, %v8963_v8  ;;  %7829 = vset.pattern.permute.xlu0 %v8488_v57 }
 0x1b8   : > { %1229 = vmatprep.mubr.f32.mxu0 %v12239_v1  ;;  %840 = vperm.xlu0 %7829, %v8986_v16  }
 0x1b9   : > { %7828 = vset.pattern.permute.xlu1 %v8488_v57 }
 0x1ba   : > { %837 = vperm.xlu1 %7828, %v8974_v11  }
 0x1bb   : > { %6257 = vmatmul.mubr.msk.f32.gmra.mrb[36].mxu0 %vm943_vm0, %v8979_v13 }
 0x1bc   : > { %1235 = vmatprep.mubr.f32.mxu0 %v12239_v1  ;;  %849 = vperm.xlu0 %7829, %v9008_v23  }
 0x1be   : > { %843 = vperm.xlu1 %7828, %v8988_v17  }
 0x1bf   : > { %6258 = vmatmul.mubr.msk.f32.gmra.mrb[38].mxu0 %vm943_vm0, %v8999_v20 }
 0x1c0   : > { %1241 = vmatprep.mubr.f32.mxu0 %v12239_v1  ;;  %855 = vperm.xlu0 %7829, %v9028_v29  }
 0x1c2   : > { %846 = vperm.xlu1 %7828, %v9002_v21  }
 0x1c3   : > { %6259 = vmatmul.mubr.msk.f32.gmra.mrb[40].mxu0 %vm943_vm0, %v9019_v26 }
 0x1c4   : > { %1247 = vmatprep.mubr.f32.mxu0 %v12239_v1  ;;  %861 = vperm.xlu0 %7829, %v9048_v35  }
 0x1c6   : > { %852 = vperm.xlu1 %7828, %v9022_v27  }
 0x1c7   : > { %6260 = vmatmul.mubr.msk.f32.gmra.mrb[42].mxu0 %vm943_vm0, %v9039_v32 }
 0x1c8   : > { %1378 = vmatprep.mubr.f32.mxu0 %v12239_v1  ;;  %867 = vperm.xlu0 %7829, %v9065_v40  }
 0x1ca   : > { %858 = vperm.xlu1 %7828, %v9042_v33  }
 0x1cb   : > { %6271 = vmatmul.mubr.msk.f32.vlgmr.msra.gmra.mrb[44].mxu0 %vm943_vm0, %v8957_v5 }
 0x1cc   : > { %1384 = vmatprep.mubr.f32.mxu0 %v12239_v1  ;;  %873 = vperm.xlu0 %7829, %v9082_v45  }
 0x1ce   : > { %864 = vperm.xlu1 %7828, %v9059_v38  }
 0x1cf   : > { %6272 = vmatmul.mubr.msk.f32.gmra.mrb[46].mxu0 %vm943_vm0, %v8963_v8 }
 0x1d0   : > { %1390 = vmatprep.mubr.f32.mxu0 %v12239_v1  ;;  %879 = vperm.xlu0 %7829, %v9099_v50  }
 0x1d2   : > { %870 = vperm.xlu1 %7828, %v9076_v43  }
 0x1d3   : > { %6273 = vmatmul.mubr.msk.f32.gmra.mrb[48].mxu0 %vm943_vm0, %v8979_v13 }
 0x1d4   : > { %1396 = vmatprep.mubr.f32.mxu0 %v12239_v1  ;;  %7871 = vset.pattern.permute.xlu0 %v8487_v56 }
 0x1d6   : > { %876 = vperm.xlu1 %7828, %v9093_v48  }
 0x1d7   : > { %6274 = vmatmul.mubr.msk.f32.gmra.mrb[50].mxu0 %vm943_vm0, %v8999_v20 }
 0x1d8   : > { %1402 = vmatprep.mubr.f32.mxu0 %v12239_v1 }
 0x1da   : > { %882 = vperm.xlu1 %7828, %v9109_v52  }
 0x1db   : > { %6275 = vmatmul.mubr.msk.f32.gmra.mrb[52].mxu0 %vm943_vm0, %v9019_v26 }
 0x1dc   : > { %1408 = vmatprep.mubr.f32.mxu0 %v12239_v1 }
 0x1de   : > { %7870 = vset.pattern.permute.xlu1 %v8487_v56 }
 0x1df   : > { %6276 = vmatmul.mubr.msk.f32.gmra.mrb[54].mxu0 %vm943_vm0, %v9039_v32 }
 0x1e0   : > { %1414 = vmatprep.mubr.f32.mxu0 %v12239_v1 }
 0x1e3   : > { %6277 = vmatmul.mubr.msk.f32.gmra.mrb[56].mxu0 %vm943_vm0, %v8966_v9 }
 0x1e4   : > { %1420 = vmatprep.mubr.f32.mxu0 %v12239_v1 }
 0x1e7   : > { %6278 = vmatmul.mubr.msk.f32.gmra.mrb[58].mxu0 %vm943_vm0, %v8983_v15 }
 0x1e8   : > { %1426 = vmatprep.mubr.f32.mxu0 %v12239_v1 }
 0x1eb   : > { %6279 = vmatmul.mubr.msk.f32.gmra.mrb[60].mxu0 %vm943_vm0, %v9005_v22 }
 0x1ec   : > { %1432 = vmatprep.mubr.f32.mxu0 %v12239_v1 }
 0x1ef   : > { %6280 = vmatmul.mubr.msk.f32.gmra.mrb[62].mxu0 %vm943_vm0, %v9025_v28 }
 0x1f0   : > { %1438 = vmatprep.mubr.f32.mxu0 %v12239_v1 }
 0x1f3   : > { %6281 = vmatmul.mubr.msk.f32.gmra.mrb[64].mxu0 %vm943_vm0, %v9045_v34 }
 0x1f4   : > { %1444 = vmatprep.mubr.f32.mxu0 %v12239_v1 }
 0x1f7   : > { %6282 = vmatmul.mubr.msk.f32.gmra.mrb[66].mxu0 %vm943_vm0, %v9062_v39 }
 0x1f8   : > { %1450 = vmatprep.mubr.f32.mxu0 %v12239_v1 }
 0x1fb   : > { %6283 = vmatmul.mubr.msk.f32.gmra.mrb[68].mxu0 %vm943_vm0, %v9079_v44 }
 0x1fc   : > { %1456 = vmatprep.mubr.f32.mxu0 %v12239_v1 }
 0x1ff   : > { %6284 = vmatmul.mubr.msk.f32.gmra.mrb[70].mxu0 %vm943_vm0, %v9096_v49 }
 0x200   : > { %1462 = vmatprep.mubr.f32.mxu0 %v12239_v1 }
 0x203   : > { %6285 = vmatmul.mubr.msk.f32.gmra.mrb[72].mxu0 %vm943_vm0, %v9112_v53 }
 0x204   : > { %1468 = vmatprep.mubr.f32.mxu0 %v12239_v1 }
 0x207   : > { %6286 = vmatmul.mubr.msk.f32.gmra.mrb[74].mxu0 %vm943_vm0, %v9123_v54 }
 0x246   : > { %v9243_v58 = vpop.f32.mrb[0].mxu0 }
 0x247   : > { %v9245_v59 = vpop.f32.mrb[1].mxu0 }
 0x248   : > { %v9247_v60 = vpop.f32.mrb[0].mxu1 }
 0x249   : > { %v9251_v62 = vpop.f32.mrb[1].mxu1 }
 0x24a   : > { %v9249_v61 = vpop.f32.mrb[2].mxu0 }
 0x24b   : > { %v9255_v0 = vpop.f32.mrb[3].mxu0 }
 0x24c   : > { %v9259_v3 = vpop.f32.mrb[2].mxu1 }
 0x24d   : > { %v9265_v6 = vpop.f32.mrb[3].mxu1 }
 0x24e   : > { %v9261_v4 = vpop.f32.mrb[4].mxu0 }
 0x24f   : > { %v9267_v7 = vpop.f32.mrb[5].mxu0 }
 0x250   : > { %v9271_v9 = vpop.f32.mrb[4].mxu1 }
 0x251   : > { %v9275_v11 = vpop.f32.mrb[5].mxu1 }
 0x252   : > { %v9273_v10 = vpop.f32.mrb[6].mxu0 }
 0x253   : > { %v9279_v13 = vpop.f32.mrb[7].mxu0 }
 0x254   : > { %v9283_v15 = vpop.f32.mrb[6].mxu1 }
 0x255   : > { %v9289_v18 = vpop.f32.mrb[7].mxu1 }
 0x256   : > { %v9285_v16 = vpop.f32.mrb[8].mxu0 }
 0x257   : > { %v9291_v19 = vpop.f32.mrb[9].mxu0 }
 0x258   : > { %v9295_v21 = vpop.f32.mrb[8].mxu1 }
 0x259   : > { %v9299_v23 = vpop.f32.mrb[9].mxu1 }
 0x25a   : > { %v9297_v22 = vpop.f32.mrb[10].mxu0 }
 0x25b   : > { %v9303_v25 = vpop.f32.mrb[11].mxu0 }
 0x25c   : > { %v9307_v27 = vpop.f32.mrb[10].mxu1 }
 0x25d   : > { %v9313_v30 = vpop.f32.mrb[11].mxu1 }
 0x25e   : > { %v9309_v28 = vpop.f32.mrb[12].mxu0 }
 0x25f   : > { %v9315_v31 = vpop.f32.mrb[13].mxu0 }
 0x260   : > { %v9319_v33 = vpop.f32.mrb[12].mxu1 }
 0x261   : > { %v9323_v35 = vpop.f32.mrb[13].mxu1 }
 0x262   : > { %v9321_v34 = vpop.f32.mrb[14].mxu0 }
 0x263   : > { %v9327_v37 = vpop.f32.mrb[15].mxu0 }
 0x264   : > { %v9331_v39 = vpop.f32.mrb[14].mxu1 }
 0x265   : > { %v9337_v42 = vpop.f32.mrb[15].mxu1 }
 0x266   : > { %v9333_v40 = vpop.f32.mrb[16].mxu0 }
 0x267   : > { %v9339_v43 = vpop.f32.mrb[17].mxu0 }
 0x268   : > { %v9343_v45 = vpop.f32.mrb[16].mxu1 }
 0x269   : > { %v9347_v47 = vpop.f32.mrb[17].mxu1 }
 0x26a   : > { %v9345_v46 = vpop.f32.mrb[18].mxu0 }
 0x26b   : > { %v9351_v49 = vpop.f32.mrb[19].mxu0 }
 0x26c   : > { %v9355_v51 = vpop.f32.mrb[18].mxu1 }
 0x26d   : > { %v9361_v54 = vpop.f32.mrb[19].mxu1 }
 0x26e   : > { %v9357_v52 = vpop.f32.mrb[20].mxu0 }
 0x26f   : > { %v9363_v55 = vpop.f32.mrb[21].mxu0 }
 0x272   : > { %v9367_v57 = vpop.f32.mrb[22].mxu0 }
 0x273   : > { %v9371_v50 = vpop.f32.mrb[23].mxu0 }
 0x276   : > { %v9375_v38 = vpop.f32.mrb[24].mxu0 }
 0x277   : > { %12507 = vst [vmem:[#allocation31_spill] sm:$0xff] %v9375_v38  ;;  %v9377_v24 = vpop.f32.mrb[25].mxu0 }
 0x27a   : > { %v9379_v26 = vpop.f32.mrb[26].mxu0 }
 0x27b   : > { %12508 = vst [vmem:[#allocation32_spill] sm:$0xff] %v9379_v26  ;;  %v9383_v14 = vpop.f32.mrb[27].mxu0 }
 0x27e   : > { %v9387_v48 = vpop.f32.mrb[28].mxu0 }
 0x27f   : > { %12509 = vst [vmem:[#allocation33_spill] sm:$0xff] %v9387_v48  ;;  %v9389_v63 = vpop.f32.mrb[29].mxu0 }
 0x280   : > { %12510 = vst [vmem:[#allocation34_spill] sm:$0xff] %v9389_v63 }
 0x282   : > { %v9391_v2 = vpop.f32.mrb[30].mxu0 }
 0x283   : > { %12511 = vst [vmem:[#allocation35_spill] sm:$0xff] %v9391_v2  ;;  %v9395_v53 = vpop.f32.mrb[31].mxu0 }
 0x284   : > { %12512 = vst [vmem:[#allocation36_spill] sm:$0xff] %v9395_v53 }
 0x286   : > { %v1219_v12 = vpop.f32.mrb[32].mxu0 }
 0x287   : > { %v1221_v41 = vpop.f32.mrb[33].mxu0 }
 0x28a   : > { %v1225_v44 = vpop.f32.mrb[34].mxu0 }
 0x28b   : > { %v7102_v29 = vpack.c.bf16 %v1225_v44, %v1219_v12  ;;  %v1227_v32 = vpop.f32.mrb[35].mxu0  ;;  %v12525_v44 = vpack.c.bf16 %v9255_v0, %v9245_v59  ;;  %v12529_v0 = vpack.c.bf16 %v9279_v13, %v9267_v7 }
 0x28c   : > { %v7100_v1 = vpack.c.bf16 %v1227_v32, %v1221_v41 }
 0x28e   : > { %v1231_v17 = vpop.f32.mrb[36].mxu0  ;;  %7101 = vmatprep.subr.bf16.mxu1 %v7100_v1  ;;  %v12513_v1 = vpack.c.bf16 %v9265_v6, %v9251_v62  ;;  %v12516_v6 = vpack.c.bf16 %v9283_v15, %v9271_v9  ;;  %v12519_v9 = vpack.c.bf16 %v9337_v42, %v9323_v35  ;;  %v9457_v35 = vpop.permute.xlu0 %741  ;;  %v12524_v42 = vpack.c.bf16 %v9355_v51, %v9343_v45 }
 0x28f   : > { %v1233_v20 = vpop.f32.mrb[37].mxu0  ;;  %7103 = vmatpush1.bf16.msra.mxu1 %v7102_v29  ;;  %v12247_v29 = vlaneseq  ;;  %12523 = vst [vmem:[#allocation38_spill] sm:$0xff] %v9457_v35  ;;  %v12526_v51 = vpack.c.bf16 %v9249_v61, %v9243_v58  ;;  %v12531_v61 = vpack.c.bf16 %v9273_v10, %v9261_v4  ;;  %v12533_v10 = vpack.c.bf16 %v9297_v22, %v9285_v16 }
 0x290   : > { %v12536_v22 = vpack.c.bf16 %v9321_v34, %v9309_v28  ;;  %v12539_v34 = vpack.c.bf16 %v9345_v46, %v9333_v40  ;;  %v12542_v46 = vpack.c.bf16 %v9367_v57, %v9357_v52  ;;  %v12545_v57 = vld [vmem:[#allocation32_spill] sm:$0xff] }
 0x292   : > { %v1237_v5 = vpop.f32.mrb[38].mxu0  ;;  %v9487_v59 = vpop.permute.xlu0 %744 }
 0x293   : > { %v7106_v8 = vpack.c.bf16 %v1237_v5, %v1231_v17  ;;  %v1239_v38 = vpop.f32.mrb[39].mxu0  ;;  %v12514_v17 = vpack.c.bf16 %v9259_v3, %v9247_v60  ;;  %v12517_v3 = vpack.c.bf16 %v9313_v30, %v9299_v23  ;;  %v9447_v30 = vand.u32 127, %v12247_v29  ;;  %12528 = vst [vmem:[#allocation39_spill] sm:$0xff] %v9487_v59 }
 0x294   : > { %v7104_v26 = vpack.c.bf16 %v1239_v38, %v1233_v20  ;;  %v12522_v38 = vpack.c.bf16 %v9361_v54, %v9347_v47 }
 0x295   : > { %12520 = vst [vmem:[#allocation37_spill] sm:$0xff] %v9447_v30  ;;  %vm788_vm1 = vcmp.eq.s32.totalorder %v9447_v30, %v9457_v35  ;;  %vm789_vm2 = vcmp.eq.s32.totalorder %v9447_v30, %v9487_v59 }
 0x296   : > { %v1243_v36 = vpop.f32.mrb[40].mxu0  ;;  %7105 = vmatprep.subr.bf16.mxu1 %v7104_v26 }
 0x297   : > { %v1245_v48 = vpop.f32.mrb[41].mxu0  ;;  %7107 = vmatpush1.bf16.msra.mxu1 %v7106_v8  ;;  %v12515_v8 = vpack.c.bf16 %v9289_v18, %v9275_v11  ;;  %v12518_v11 = vpack.c.bf16 %v9307_v27, %v9295_v21  ;;  %v12521_v21 = vpack.c.bf16 %v9331_v39, %v9319_v33 }
 0x29a   : > { %v1249_v2 = vpop.f32.mrb[42].mxu0 }
 0x29b   : > { %v7110_v56 = vpack.c.bf16 %v1249_v2, %v1243_v36  ;;  %v1251_v63 = vpop.f32.mrb[43].mxu0 }
 0x29c   : > { %v7108_v53 = vpack.c.bf16 %v1251_v63, %v1245_v48  ;;  %v12280_v48 = vmov 1.0  }
 0x29e   : > { %7109 = vmatprep.subr.bf16.mxu1 %v7108_v53  ;;  %v9399_v12 = vpop.f32.mrb[44].mxu0  ;;  %v12527_v53 = vmov 0.0  }
 0x29f   : > { %7111 = vmatpush1.bf16.msra.mxu1 %v7110_v56  ;;  %v9401_v32 = vpop.f32.mrb[45].mxu0  ;;  %v9494_v56 = vpop.permute.xlu1 %747 }
 0x2a0   : > { %7113 = vmatprep.subr.bf16.mxu1 %v12513_v1  ;;  %12530 = vst [vmem:[#allocation40_spill] sm:$0xff] %v9494_v56  ;;  %vm790_vm3 = vcmp.eq.s32.totalorder %v9447_v30, %v9494_v56  ;;  %v12532_v1 = vpack.c.bf16 %v9303_v25, %v9291_v19  ;;  %v12535_v25 = vpack.c.bf16 %v9327_v37, %v9315_v31 }
 0x2a2   : > { %v9406_v5 = vpop.f32.mrb[46].mxu0 }
 0x2a3   : > { %7115 = vmatpush1.bf16.msra.mxu1 %v12514_v17  ;;  %v7166_v2 = vpack.c.bf16 %v9406_v5, %v9399_v12  ;;  %v9413_v63 = vpop.f32.mrb[47].mxu0  ;;  %v9529_v19 = vpop.permute.xlu1 %750 }
 0x2a4   : > { %7117 = vmatprep.subr.bf16.mxu1 %v12515_v8  ;;  %v7164_v20 = vpack.c.bf16 %v9413_v63, %v9401_v32  ;;  %12534 = vst [vmem:[#allocation41_spill] sm:$0xff] %v9529_v19  ;;  %vm791_vm4 = vcmp.eq.s32.totalorder %v9447_v30, %v9529_v19 }
 0x2a6   : > { %v9420_v62 = vpop.f32.mrb[48].mxu0 }
 0x2a7   : > { %7119 = vmatpush1.bf16.msra.mxu1 %v12516_v6  ;;  %v9425_v60 = vpop.f32.mrb[49].mxu0  ;;  %v9550_v6 = vpop.permute.xlu0 %753 }
 0x2a8   : > { %7121 = vmatprep.subr.bf16.mxu1 %v12517_v3  ;;  %12537 = vst [vmem:[#allocation42_spill] sm:$0xff] %v9550_v6  ;;  %v12538_v3 = vpack.c.bf16 %v9351_v49, %v9339_v43  ;;  %vm792_vm5 = vcmp.eq.s32.totalorder %v9447_v30, %v9550_v6  ;;  %v9571_v49 = vpop.permute.xlu1 %756 }
 0x2a9   : > { %12540 = vst [vmem:[#allocation43_spill] sm:$0xff] %v9571_v49  ;;  %vm793_vm6 = vcmp.eq.s32.totalorder %v9447_v30, %v9571_v49 }
 0x2aa   : > { %v9430_v26 = vpop.f32.mrb[50].mxu0 }
 0x2ab   : > { %7123 = vmatpush1.bf16.msra.mxu1 %v12518_v11  ;;  %v7170_v18 = vpack.c.bf16 %v9430_v26, %v9420_v62  ;;  %v9437_v36 = vpop.f32.mrb[51].mxu0 }
 0x2ac   : > { %7125 = vmatprep.subr.bf16.mxu1 %v12519_v9  ;;  %v7168_v15 = vpack.c.bf16 %v9437_v36, %v9425_v60  ;;  %v12541_v9 = vpack.c.bf16 %v9371_v50, %v9363_v55 }
 0x2ae   : > { %v9444_v23 = vpop.f32.mrb[52].mxu0 }
 0x2af   : > { %7127 = vmatpush1.bf16.msra.mxu1 %v12521_v21  ;;  %v9452_v27 = vpop.f32.mrb[53].mxu0  ;;  %v9592_v21 = vpop.permute.xlu0 %759 }
 0x2b0   : > { %7129 = vmatprep.subr.bf16.mxu1 %v12522_v38  ;;  %12543 = vst [vmem:[#allocation44_spill] sm:$0xff] %v9592_v21  ;;  %v12544_v38 = vpack.c.bf16 %v9383_v14, %v9377_v24  ;;  %vm794_vm7 = vcmp.eq.s32.totalorder %v9447_v30, %v9592_v21  ;;  %v9613_v24 = vpop.permute.xlu1 %762  ;;  %v10313_v21 = vld [vmem:[#allocation11 + $0x88] sm:$0xff] }
 0x2b1   : > { %12548 = vst [vmem:[#allocation32_spill] sm:$0xff] %v9613_v24  ;;  %vm795_vm8 = vcmp.eq.s32.totalorder %v9447_v30, %v9613_v24  ;;  %v10311_v24 = vld [vmem:[#allocation11 + $0x70] sm:$0xff]  ;;  %12625 = vst [vmem:[#allocation106_spill] sm:$0xff] %v10313_v21 }
 0x2b2   : > { %v9459_v41 = vpop.f32.mrb[54].mxu0  ;;  %12624 = vst [vmem:[#allocation105_spill] sm:$0xff] %v10311_v24 }
 0x2b3   : > { %7131 = vmatpush1.bf16.msra.mxu1 %v12524_v42  ;;  %v7174_v33 = vpack.c.bf16 %v9459_v41, %v9444_v23  ;;  %v9468_v39 = vpop.f32.mrb[55].mxu0 }
 0x2b4   : > { %7133 = vmatprep.subr.bf16.mxu1 %v12525_v44  ;;  %v7172_v47 = vpack.c.bf16 %v9468_v39, %v9452_v27  ;;  %v12546_v44 = vld [vmem:[#allocation31_spill] sm:$0xff] }
 0x2b6   : > { %6287 = vmatmul.mubr.msk.f32.vlgmr.msra.gmra.mrb[20].mxu1 %vm788_vm1, %v12280_v48  ;;  %v9479_v45 = vpop.f32.mrb[56].mxu0 }
 0x2b7   : > { %7135 = vmatpush1.bf16.msra.mxu1 %v12526_v51  ;;  %1545 = vmatprep.mubr.f32.mxu1 %v12527_v53  ;;  %v9485_v54 = vpop.f32.mrb[57].mxu0  ;;  %v12547_v51 = vpack.c.bf16 %v12545_v57, %v12546_v44 }
 0x2b8   : > { %7137 = vmatprep.subr.bf16.mxu1 %v12529_v0  ;;  %v12549_v0 = vld [vmem:[#allocation36_spill] sm:$0xff] }
 0x2ba   : > { %6288 = vmatmul.mubr.msk.f32.gmra.mrb[22].mxu1 %vm789_vm2, %v12280_v48  ;;  %v9500_v58 = vpop.f32.mrb[58].mxu0 }
 0x2bb   : > { %7139 = vmatpush1.bf16.msra.mxu1 %v12531_v61  ;;  %1551 = vmatprep.mubr.f32.mxu1 %v12527_v53  ;;  %v7178_v7 = vpack.c.bf16 %v9500_v58, %v9479_v45  ;;  %v9510_v13 = vpop.f32.mrb[59].mxu0  ;;  %v12550_v61 = vld [vmem:[#allocation34_spill] sm:$0xff] }
 0x2bc   : > { %7141 = vmatprep.subr.bf16.mxu1 %v12532_v1  ;;  %v7176_v17 = vpack.c.bf16 %v9510_v13, %v9485_v54  ;;  %v12551_v1 = vpack.c.bf16 %v12549_v0, %v12550_v61 }
 0x2be   : > { %6289 = vmatmul.mubr.msk.f32.gmra.mrb[24].mxu1 %vm790_vm3, %v12280_v48  ;;  %v9521_v4 = vpop.f32.mrb[60].mxu0 }
 0x2bf   : > { %7143 = vmatpush1.bf16.msra.mxu1 %v12533_v10  ;;  %1557 = vmatprep.mubr.f32.mxu1 %v12527_v53  ;;  %v9527_v8 = vpop.f32.mrb[61].mxu0 }
 0x2c0   : > { %7145 = vmatprep.subr.bf16.mxu1 %v12535_v25  ;;  %v12552_v25 = vld [vmem:[#allocation35_spill] sm:$0xff] }
 0x2c2   : > { %6290 = vmatmul.mubr.msk.f32.gmra.mrb[26].mxu1 %vm791_vm4, %v12280_v48  ;;  %v9540_v16 = vpop.f32.mrb[62].mxu0 }
 0x2c3   : > { %7147 = vmatpush1.bf16.msra.mxu1 %v12536_v22  ;;  %1563 = vmatprep.mubr.f32.mxu1 %v12527_v53  ;;  %v7182_v31 = vpack.c.bf16 %v9540_v16, %v9521_v4  ;;  %v9548_v37 = vpop.f32.mrb[63].mxu0  ;;  %v12553_v22 = vld [vmem:[#allocation33_spill] sm:$0xff] }
 0x2c4   : > { %7149 = vmatprep.subr.bf16.mxu1 %v12538_v3  ;;  %v7180_v11 = vpack.c.bf16 %v9548_v37, %v9527_v8  ;;  %v12554_v3 = vpack.c.bf16 %v12552_v25, %v12553_v22 }
 0x2c6   : > { %6291 = vmatmul.mubr.msk.f32.gmra.mrb[28].mxu1 %vm792_vm5, %v12280_v48  ;;  %v9563_v28 = vpop.f32.mrb[64].mxu0 }
 0x2c7   : > { %7151 = vmatpush1.bf16.msra.mxu1 %v12539_v34  ;;  %1569 = vmatprep.mubr.f32.mxu1 %v12527_v53  ;;  %v9569_v43 = vpop.f32.mrb[65].mxu0 }
 0x2c8   : > { %7153 = vmatprep.subr.bf16.mxu1 %v12541_v9 }
 0x2ca   : > { %6292 = vmatmul.mubr.msk.f32.gmra.mrb[30].mxu1 %vm793_vm6, %v12280_v48  ;;  %v9582_v40 = vpop.f32.mrb[66].mxu0 }
 0x2cb   : > { %7155 = vmatpush1.bf16.msra.mxu1 %v12542_v46  ;;  %1575 = vmatprep.mubr.f32.mxu1 %v12527_v53  ;;  %v7186_v50 = vpack.c.bf16 %v9582_v40, %v9563_v28  ;;  %v9590_v55 = vpop.f32.mrb[67].mxu0  ;;  %v9634_v46 = vpop.permute.xlu0 %765 }
 0x2cc   : > { %7157 = vmatprep.subr.bf16.mxu1 %v12544_v38  ;;  %v7184_v42 = vpack.c.bf16 %v9590_v55, %v9569_v43  ;;  %12555 = vst [vmem:[#allocation31_spill] sm:$0xff] %v9634_v46  ;;  %vm796_vm9 = vcmp.eq.s32.totalorder %v9447_v30, %v9634_v46 }
 0x2ce   : > { %6293 = vmatmul.mubr.msk.f32.gmra.mrb[32].mxu1 %vm794_vm7, %v12280_v48  ;;  %v9605_v52 = vpop.f32.mrb[68].mxu0 }
 0x2cf   : > { %7159 = vmatpush1.bf16.msra.mxu1 %v12547_v51  ;;  %1581 = vmatprep.mubr.f32.mxu1 %v12527_v53  ;;  %v9611_v14 = vpop.f32.mrb[69].mxu0  ;;  %v9652_v51 = vpop.permute.xlu1 %768 }
 0x2d0   : > { %7161 = vmatprep.subr.bf16.mxu1 %v12551_v1  ;;  %12556 = vst [vmem:[#allocation36_spill] sm:$0xff] %v9652_v51  ;;  %vm797_vm10 = vcmp.eq.s32.totalorder %v9447_v30, %v9652_v51  ;;  %v9667_v0 = vpop.permute.xlu0 %771 }
 0x2d1   : > { %12557 = vst [vmem:[#allocation34_spill] sm:$0xff] %v9667_v0  ;;  %vm12444_vm11 = vcmp.eq.s32.totalorder %v9447_v30, %v9667_v0 }
 0x2d2   : > { %6294 = vmatmul.mubr.msk.f32.gmra.mrb[34].mxu1 %vm795_vm8, %v12280_v48  ;;  %v9624_v10 = vpop.f32.mrb[70].mxu0 }
 0x2d3   : > { %7163 = vmatpush1.bf16.msra.mxu1 %v12554_v3  ;;  %1587 = vmatprep.mubr.f32.mxu1 %v12527_v53  ;;  %v9632_v9 = vpop.f32.mrb[71].mxu0  ;;  %v9678_v1 = vpop.permute.xlu1 %774  ;;  %v12570_v60 = vpack.c.bf16 %v9624_v10, %v9605_v52  ;;  %v2792_v52 = vld [vmem:[#allocation11 + $0x20] sm:$0xff] }
 0x2d4   : > { %7165 = vmatprep.subr.bf16.mxu1 %v7164_v20  ;;  %v7188_v38 = vpack.c.bf16 %v9632_v9, %v9611_v14  ;;  %12558 = vst [vmem:[#allocation35_spill] sm:$0xff] %v9678_v1  ;;  %vm12443_vm12 = vcmp.eq.s32.totalorder %v9447_v30, %v9678_v1  ;;  %v9687_v25 = vpop.permute.xlu0 %777  ;;  %v2788_v14 = vld [vmem:[#allocation11] sm:$0xff]  ;;  %v2791_v9 = vld [vmem:[#allocation11 + $0x18] sm:$0xff] }
 0x2d5   : > { %12559 = vst [vmem:[#allocation33_spill] sm:$0xff] %v9687_v25  ;;  %vm12442_vm13 = vcmp.eq.s32.totalorder %v9447_v30, %v9687_v25  ;;  %v2872_v25 = vld [vmem:[#allocation11 + $0x2a0] sm:$0xff]  ;;  %v2875_v1 = vld [vmem:[#allocation11 + $0x2b8] sm:$0xff] }
 0x2d6   : > { %6295 = vmatmul.mubr.msk.f32.gmra.mrb[36].mxu1 %vm796_vm9, %v12280_v48  ;;  %v9647_v57 = vpop.f32.mrb[72].mxu0 }
 0x2d7   : > { %1593 = vmatprep.mubr.f32.mxu1 %v12527_v53  ;;  %v9650_v44 = vpop.f32.mrb[73].mxu0  ;;  %v9696_v22 = vpop.permute.xlu1 %780 }
 0x2d8   : > { %12560 = vst [vmem:[#allocation45_spill] sm:$0xff] %v9696_v22  ;;  %vm12248_vm14 = vcmp.eq.s32.totalorder %v9447_v30, %v9696_v22  ;;  %v9700_v3 = vpop.permute.xlu0 %783 }
 0x2d9   : > { %12561 = vst [vmem:[#allocation46_spill] sm:$0xff] %v9700_v3  ;;  %vm12249_vm15 = vcmp.eq.s32.totalorder %v9447_v30, %v9700_v3 }
 0x2da   : > { %6296 = vmatmul.mubr.msk.f32.gmra.mrb[38].mxu1 %vm797_vm10, %v12280_v48  ;;  %v9660_v32 = vpop.f32.mrb[74].mxu0 }
 0x2db   : > { %1599 = vmatprep.mubr.f32.mxu1 %v12527_v53  ;;  %v9665_v20 = vpop.f32.mrb[75].mxu0  ;;  %v9709_v29 = vpop.permute.xlu1 %786  ;;  %v12573_v36 = vpack.c.bf16 %v9660_v32, %v9647_v57  ;;  %v2798_v57 = vld [vmem:[#allocation11 + $0x50] sm:$0xff] }
 0x2dc   : > { %12562 = vst [vmem:[#allocation47_spill] sm:$0xff] %v9709_v29  ;;  %vm12258_vm0 = vcmp.eq.s32.totalorder %v9447_v30, %v9709_v29  ;;  %v9718_v63 = vpop.permute.xlu0 %645 }
 0x2dd   : > { %12563 = vst [vmem:[#allocation48_spill] sm:$0xff] %v9718_v63 }
 0x2de   : > { %6297 = vmatmul.mubr.msk.f32.gmra.mrb[40].mxu1 %vm12444_vm11, %v12280_v48 }
 0x2df   : > { %1605 = vmatprep.mubr.f32.mxu1 %v12527_v53  ;;  %v9727_v61 = vpop.permute.xlu1 %648 }
 0x2e0   : > { %12564 = vst [vmem:[#allocation49_spill] sm:$0xff] %v9727_v61  ;;  %v9765_v12 = vpop.permute.xlu0 %654 }
 0x2e1   : > { %12566 = vst [vmem:[#allocation51_spill] sm:$0xff] %v9765_v12 }
 0x2e2   : > { %6298 = vmatmul.mubr.msk.f32.gmra.mrb[42].mxu1 %vm12443_vm12, %v12280_v48 }
 0x2e3   : > { %1611 = vmatprep.mubr.f32.mxu1 %v12527_v53  ;;  %v9750_v34 = vpop.permute.xlu1 %651 }
 0x2e4   : > { %12565 = vst [vmem:[#allocation50_spill] sm:$0xff] %v9750_v34 }
 0x2e6   : > { %6299 = vmatmul.mubr.msk.f32.gmra.mrb[44].mxu1 %vm12442_vm13, %v12280_v48 }
 0x2e7   : > { %1617 = vmatprep.mubr.f32.mxu1 %v12527_v53  ;;  %v9780_v5 = vpop.permute.xlu1 %657 }
 0x2e8   : > { %12567 = vst [vmem:[#allocation52_spill] sm:$0xff] %v9780_v5 }
 0x2ea   : > { %6300 = vmatmul.mubr.msk.f32.gmra.mrb[46].mxu1 %vm12248_vm14, %v12280_v48  ;;  %vm12250_vm14 = vcmp.eq.s32.totalorder %v9447_v30, %v9718_v63  ;;  %v2848_v63 = vld [vmem:[#allocation11 + $0x1e0] sm:$0xff] }
 0x2eb   : > { %1623 = vmatprep.mubr.f32.mxu1 %v12527_v53  ;;  %v9810_v62 = vpop.permute.xlu1 %663 }
 0x2ec   : > { %12569 = vst [vmem:[#allocation54_spill] sm:$0xff] %v9810_v62 }
 0x2ee   : > { %6301 = vmatmul.mubr.msk.f32.gmra.mrb[48].mxu1 %vm12249_vm15, %v12280_v48  ;;  %vm12251_vm15 = vcmp.eq.s32.totalorder %v9447_v30, %v9727_v61 }
 0x2ef   : > { %1629 = vmatprep.mubr.f32.mxu1 %v12527_v53 }
 0x2f2   : > { %6302 = vmatmul.mubr.msk.f32.gmra.mrb[50].mxu1 %vm12258_vm0, %v12280_v48 }
 0x2f3   : > { %1700 = vmatprep.mubr.f32.mxu1 %v12527_v53 }
 0x2f6   : > { %6303 = vmatmul.mubr.msk.f32.vlgmr.msra.gmra.mrb[20].mxu1 %vm12250_vm14, %v12280_v48  ;;  %vm12252_vm14 = vcmp.eq.s32.totalorder %v9447_v30, %v9750_v34 }
 0x2f7   : > { %7167 = vmatpush1.bf16.msra.mxu1 %v7166_v2  ;;  %1706 = vmatprep.mubr.f32.mxu1 %v12527_v53  ;;  %v9795_v2 = vpop.permute.xlu0 %660 }
 0x2f8   : > { %7169 = vmatprep.subr.bf16.mxu1 %v7168_v15  ;;  %12568 = vst [vmem:[#allocation53_spill] sm:$0xff] %v9795_v2  ;;  %v9840_v15 = vpop.permute.xlu1 %669 }
 0x2f9   : > { %12574 = vst [vmem:[#allocation56_spill] sm:$0xff] %v9840_v15 }
 0x2fa   : > { %6304 = vmatmul.mubr.msk.f32.gmra.mrb[22].mxu1 %vm12251_vm15, %v12280_v48  ;;  %vm12253_vm15 = vcmp.eq.s32.totalorder %v9447_v30, %v9765_v12 }
 0x2fb   : > { %1712 = vmatprep.mubr.f32.mxu1 %v12527_v53  ;;  %7171 = vmatpush1.bf16.msra.mxu1 %v7170_v18  ;;  %v9825_v26 = vpop.permute.xlu0 %666  ;;  %v12572_v18 = vpack.c.bf16 %v9665_v20, %v9650_v44  ;;  %v7198_v44 = vpack.c.bf16 %v2791_v9, %v2788_v14  ;;  %v2794_v20 = vld [vmem:[#allocation11 + $0x30] sm:$0xff] }
 0x2fc   : > { %7173 = vmatprep.subr.bf16.mxu1 %v7172_v47  ;;  %12571 = vst [vmem:[#allocation55_spill] sm:$0xff] %v9825_v26  ;;  %v9858_v27 = vpop.permute.xlu1 %675 }
 0x2fd   : > { %12576 = vst [vmem:[#allocation58_spill] sm:$0xff] %v9858_v27  ;;  %vm12261_vm0 = vcmp.eq.s32.totalorder %v9447_v30, %v9858_v27 }
 0x2fe   : > { %6305 = vmatmul.mubr.msk.f32.gmra.mrb[24].mxu1 %vm12252_vm14, %v12280_v48  ;;  %vm12254_vm14 = vcmp.eq.s32.totalorder %v9447_v30, %v9780_v5 }
 0x2ff   : > { %1718 = vmatprep.mubr.f32.mxu1 %v12527_v53  ;;  %7175 = vmatpush1.bf16.msra.mxu1 %v7174_v33  ;;  %v9849_v23 = vpop.permute.xlu0 %672 }
 0x300   : > { %7177 = vmatprep.subr.bf16.mxu1 %v7176_v17  ;;  %12575 = vst [vmem:[#allocation57_spill] sm:$0xff] %v9849_v23  ;;  %v9876_v33 = vpop.permute.xlu1 %681 }
 0x301   : > { %12578 = vst [vmem:[#allocation60_spill] sm:$0xff] %v9876_v33 }
 0x302   : > { %6306 = vmatmul.mubr.msk.f32.gmra.mrb[26].mxu1 %vm12253_vm15, %v12280_v48  ;;  %vm12255_vm15 = vcmp.eq.s32.totalorder %v9447_v30, %v9795_v2 }
 0x303   : > { %1724 = vmatprep.mubr.f32.mxu1 %v12527_v53  ;;  %7179 = vmatpush1.bf16.msra.mxu1 %v7178_v7  ;;  %v9867_v41 = vpop.permute.xlu0 %678 }
 0x304   : > { %7181 = vmatprep.subr.bf16.mxu1 %v7180_v11  ;;  %12577 = vst [vmem:[#allocation59_spill] sm:$0xff] %v9867_v41  ;;  %v9889_v47 = vpop.permute.xlu1 %687 }
 0x305   : > { %12580 = vst [vmem:[#allocation62_spill] sm:$0xff] %v9889_v47 }
 0x306   : > { %6307 = vmatmul.mubr.msk.f32.gmra.mrb[28].mxu1 %vm12254_vm14, %v12280_v48  ;;  %vm12256_vm14 = vcmp.eq.s32.totalorder %v9447_v30, %v9810_v62 }
 0x307   : > { %1730 = vmatprep.mubr.f32.mxu1 %v12527_v53  ;;  %7183 = vmatpush1.bf16.msra.mxu1 %v7182_v31  ;;  %v9885_v39 = vpop.permute.xlu0 %684 }
 0x308   : > { %7185 = vmatprep.subr.bf16.mxu1 %v7184_v42  ;;  %12579 = vst [vmem:[#allocation61_spill] sm:$0xff] %v9885_v39  ;;  %v9907_v54 = vpop.permute.xlu1 %837  ;;  %v2789_v42 = vld [vmem:[#allocation11 + $0x8] sm:$0xff] }
 0x309   : > { %12582 = vst [vmem:[#allocation64_spill] sm:$0xff] %v9907_v54  ;;  %v7196_v10 = vpack.c.bf16 %v2792_v52, %v2789_v42 }
 0x30a   : > { %6308 = vmatmul.mubr.msk.f32.gmra.mrb[30].mxu1 %vm12255_vm15, %v12280_v48  ;;  %vm12257_vm15 = vcmp.eq.s32.totalorder %v9447_v30, %v9825_v26 }
 0x30b   : > { %1736 = vmatprep.mubr.f32.mxu1 %v12527_v53  ;;  %7187 = vmatpush1.bf16.msra.mxu1 %v7186_v50  ;;  %v9898_v45 = vpop.permute.xlu0 %690 }
 0x30c   : > { %7189 = vmatprep.subr.bf16.mxu1 %v7188_v38  ;;  %12581 = vst [vmem:[#allocation63_spill] sm:$0xff] %v9898_v45  ;;  %v9925_v7 = vpop.permute.xlu1 %843  ;;  %v2795_v38 = vld [vmem:[#allocation11 + $0x38] sm:$0xff]  ;;  %7197 = vmatprep.subr.bf16.mxu0 %v7196_v10 }
 0x30d   : > { %12584 = vst [vmem:[#allocation66_spill] sm:$0xff] %v9925_v7  ;;  %v7200_v32 = vpack.c.bf16 %v2798_v57, %v2795_v38  ;;  %7199 = vmatpush1.bf16.msra.mxu0 %v7198_v44 }
 0x30e   : > { %6309 = vmatmul.mubr.msk.f32.gmra.mrb[32].mxu1 %vm12256_vm14, %v12280_v48  ;;  %vm12259_vm14 = vcmp.eq.s32.totalorder %v9447_v30, %v9840_v15 }
 0x30f   : > { %1742 = vmatprep.mubr.f32.mxu1 %v12527_v53  ;;  %7191 = vmatpush1.bf16.msra.mxu1 %v12570_v60  ;;  %v9916_v58 = vpop.permute.xlu0 %840  ;;  %v2797_v60 = vld [vmem:[#allocation11 + $0x48] sm:$0xff] }
 0x310   : > { %7193 = vmatprep.subr.bf16.mxu1 %v12572_v18  ;;  %12583 = vst [vmem:[#allocation65_spill] sm:$0xff] %v9916_v58  ;;  %v9939_v13 = vpop.permute.xlu1 %846  ;;  %v7202_v18 = vpack.c.bf16 %v2797_v60, %v2794_v20  ;;  %7201 = vmatprep.subr.bf16.mxu0 %v7200_v32 }
 0x311   : > { %12585 = vst [vmem:[#allocation67_spill] sm:$0xff] %v9939_v13 }
 0x312   : > { %6310 = vmatmul.mubr.msk.f32.gmra.mrb[34].mxu1 %vm12257_vm15, %v12280_v48  ;;  %vm12260_vm15 = vcmp.eq.s32.totalorder %v9447_v30, %v9849_v23  ;;  %7203 = vmatpush1.bf16.msra.mxu0 %v7202_v18 }
 0x313   : > { %1748 = vmatprep.mubr.f32.mxu1 %v12527_v53  ;;  %7195 = vmatpush1.bf16.msra.mxu1 %v12573_v36  ;;  %v9948_v17 = vpop.permute.xlu0 %849  ;;  %v12598_v36 = vlaneseq }
 0x314   : > { %12586 = vst [vmem:[#allocation68_spill] sm:$0xff] %v9948_v17  ;;  %v9957_v4 = vpop.permute.xlu1 %852 }
 0x315   : > { %12587 = vst [vmem:[#allocation69_spill] sm:$0xff] %v9957_v4 }
 0x316   : > { %6311 = vmatmul.mubr.msk.f32.gmra.mrb[36].mxu1 %vm12259_vm14, %v12280_v48  ;;  %vm12262_vm14 = vcmp.eq.s32.totalorder %v9447_v30, %v9867_v41 }
 0x317   : > { %1754 = vmatprep.mubr.f32.mxu1 %v12527_v53  ;;  %v9966_v8 = vpop.permute.xlu0 %855 }
 0x318   : > { %12588 = vst [vmem:[#allocation70_spill] sm:$0xff] %v9966_v8  ;;  %v9975_v16 = vpop.permute.xlu1 %858 }
 0x319   : > { %12589 = vst [vmem:[#allocation71_spill] sm:$0xff] %v9975_v16 }
 0x31a   : > { %6312 = vmatmul.mubr.msk.f32.gmra.mrb[38].mxu1 %vm12260_vm15, %v12280_v48  ;;  %vm12263_vm15 = vcmp.eq.s32.totalorder %v9447_v30, %v9876_v33 }
 0x31b   : > { %1760 = vmatprep.mubr.f32.mxu1 %v12527_v53  ;;  %v9984_v31 = vpop.permute.xlu0 %861 }
 0x31c   : > { %12590 = vst [vmem:[#allocation72_spill] sm:$0xff] %v9984_v31  ;;  %v9993_v37 = vpop.permute.xlu1 %864 }
 0x31d   : > { %12591 = vst [vmem:[#allocation73_spill] sm:$0xff] %v9993_v37 }
 0x31e   : > { %6313 = vmatmul.mubr.msk.f32.gmra.mrb[40].mxu1 %vm12261_vm0, %v12280_v48  ;;  %vm12264_vm0 = vcmp.eq.s32.totalorder %v9447_v30, %v9885_v39 }
 0x31f   : > { %1766 = vmatprep.mubr.f32.mxu1 %v12527_v53  ;;  %v10002_v11 = vpop.permute.xlu0 %867 }
 0x320   : > { %12592 = vst [vmem:[#allocation74_spill] sm:$0xff] %v10002_v11  ;;  %v10011_v28 = vpop.permute.xlu1 %870 }
 0x321   : > { %12593 = vst [vmem:[#allocation75_spill] sm:$0xff] %v10011_v28 }
 0x322   : > { %6314 = vmatmul.mubr.msk.f32.gmra.mrb[42].mxu1 %vm12262_vm14, %v12280_v48  ;;  %vm12265_vm14 = vcmp.eq.s32.totalorder %v9447_v30, %v9889_v47 }
 0x323   : > { %1772 = vmatprep.mubr.f32.mxu1 %v12527_v53  ;;  %v10020_v43 = vpop.permute.xlu0 %873 }
 0x324   : > { %12594 = vst [vmem:[#allocation76_spill] sm:$0xff] %v10020_v43  ;;  %v10029_v40 = vpop.permute.xlu1 %876 }
 0x325   : > { %12595 = vst [vmem:[#allocation77_spill] sm:$0xff] %v10029_v40 }
 0x326   : > { %6315 = vmatmul.mubr.msk.f32.gmra.mrb[44].mxu1 %vm12263_vm15, %v12280_v48  ;;  %vm12266_vm15 = vcmp.eq.s32.totalorder %v9447_v30, %v9898_v45 }
 0x327   : > { %1778 = vmatprep.mubr.f32.mxu1 %v12527_v53  ;;  %v10033_v50 = vpop.permute.xlu0 %879 }
 0x328   : > { %12596 = vst [vmem:[#allocation78_spill] sm:$0xff] %v10033_v50  ;;  %v10042_v55 = vpop.permute.xlu1 %882 }
 0x329   : > { %12597 = vst [vmem:[#allocation79_spill] sm:$0xff] %v10042_v55 }
 0x32a   : > { %6316 = vmatmul.mubr.msk.f32.gmra.mrb[46].mxu1 %vm12264_vm0, %v12280_v48  ;;  %vm12267_vm0 = vcmp.eq.s32.totalorder %v9447_v30, %v9907_v54 }
 0x32b   : > { %1784 = vmatprep.mubr.f32.mxu1 %v12527_v53 }
 0x32e   : > { %6317 = vmatmul.mubr.msk.f32.gmra.mrb[48].mxu1 %vm12265_vm14, %v12280_v48  ;;  %vm12268_vm14 = vcmp.eq.s32.totalorder %v9447_v30, %v9916_v58 }
 0x32f   : > { %1790 = vmatprep.mubr.f32.mxu1 %v12527_v53 }
 0x332   : > { %6318 = vmatmul.mubr.msk.f32.gmra.mrb[50].mxu1 %vm12266_vm15, %v12280_v48  ;;  %vm12269_vm15 = vcmp.eq.s32.totalorder %v9447_v30, %v9925_v7  ;;  %v2803_v7 = vld [vmem:[#allocation11 + $0x78] sm:$0xff] }
 0x333   : > { %1861 = vmatprep.mubr.f32.mxu1 %v12527_v53 }
 0x336   : > { %6319 = vmatmul.mubr.msk.f32.vlgmr.msra.gmra.mrb[20].mxu1 %vm12267_vm0, %v12280_v48  ;;  %vm12270_vm0 = vcmp.eq.s32.totalorder %v9447_v30, %v9939_v13  ;;  %v2800_v13 = vld [vmem:[#allocation11 + $0x60] sm:$0xff] }
 0x337   : > { %1867 = vmatprep.mubr.f32.mxu1 %v12527_v53 }
 0x33a   : > { %6320 = vmatmul.mubr.msk.f32.gmra.mrb[22].mxu1 %vm12268_vm14, %v12280_v48  ;;  %vm12271_vm14 = vcmp.eq.s32.totalorder %v9447_v30, %v9948_v17 }
 0x33b   : > { %1873 = vmatprep.mubr.f32.mxu1 %v12527_v53 }
 0x33e   : > { %6321 = vmatmul.mubr.msk.f32.gmra.mrb[24].mxu1 %vm12269_vm15, %v12280_v48  ;;  %vm12272_vm15 = vcmp.eq.s32.totalorder %v9447_v30, %v9957_v4 }
 0x33f   : > { %1879 = vmatprep.mubr.f32.mxu1 %v12527_v53 }
 0x342   : > { %6322 = vmatmul.mubr.msk.f32.gmra.mrb[26].mxu1 %vm12270_vm0, %v12280_v48  ;;  %vm12273_vm0 = vcmp.eq.s32.totalorder %v9447_v30, %v9966_v8  ;;  %v2804_v8 = vld [vmem:[#allocation11 + $0x80] sm:$0xff] }
 0x343   : > { %1885 = vmatprep.mubr.f32.mxu1 %v12527_v53 }
 0x346   : > { %6323 = vmatmul.mubr.msk.f32.gmra.mrb[28].mxu1 %vm12271_vm14, %v12280_v48  ;;  %vm12274_vm14 = vcmp.eq.s32.totalorder %v9447_v30, %v9975_v16 }
 0x347   : > { %1891 = vmatprep.mubr.f32.mxu1 %v12527_v53 }
 0x34a   : > { %6324 = vmatmul.mubr.msk.f32.gmra.mrb[30].mxu1 %vm12272_vm15, %v12280_v48  ;;  %vm12275_vm15 = vcmp.eq.s32.totalorder %v9447_v30, %v9984_v31 }
 0x34b   : > { %1897 = vmatprep.mubr.f32.mxu1 %v12527_v53 }
 0x34e   : > { %6325 = vmatmul.mubr.msk.f32.gmra.mrb[32].mxu1 %vm12273_vm0, %v12280_v48  ;;  %vm12276_vm0 = vcmp.eq.s32.totalorder %v9447_v30, %v9993_v37 }
 0x34f   : > { %1903 = vmatprep.mubr.f32.mxu1 %v12527_v53 }
 0x352   : > { %6326 = vmatmul.mubr.msk.f32.gmra.mrb[34].mxu1 %vm12274_vm14, %v12280_v48  ;;  %vm12277_vm14 = vcmp.eq.s32.totalorder %v9447_v30, %v10002_v11 }
 0x353   : > { %1909 = vmatprep.mubr.f32.mxu1 %v12527_v53 }
 0x356   : > { %6327 = vmatmul.mubr.msk.f32.gmra.mrb[36].mxu1 %vm12275_vm15, %v12280_v48  ;;  %vm12278_vm15 = vcmp.eq.s32.totalorder %v9447_v30, %v10011_v28 }
 0x357   : > { %1915 = vmatprep.mubr.f32.mxu1 %v12527_v53 }
 0x35a   : > { %6328 = vmatmul.mubr.msk.f32.gmra.mrb[38].mxu1 %vm12276_vm0, %v12280_v48  ;;  %vm12279_vm0 = vcmp.eq.s32.totalorder %v9447_v30, %v10020_v43 }
 0x35b   : > { %1921 = vmatprep.mubr.f32.mxu1 %v12527_v53 }
 0x35e   : > { %6329 = vmatmul.mubr.msk.f32.gmra.mrb[40].mxu1 %vm12277_vm14, %v12280_v48  ;;  %vm12441_vm14 = vcmp.eq.s32.totalorder %v9447_v30, %v10029_v40 }
 0x35f   : > { %1927 = vmatprep.mubr.f32.mxu1 %v12527_v53 }
 0x362   : > { %6330 = vmatmul.mubr.msk.f32.gmra.mrb[42].mxu1 %vm12278_vm15, %v12280_v48  ;;  %vm12428_vm15 = vcmp.eq.s32.totalorder %v9447_v30, %v10033_v50  ;;  %v1990_v50 = vld [vmem:[#allocation9] sm:$0x3] }
 0x363   : > { %1933 = vmatprep.mubr.f32.mxu1 %v12527_v53 }
 0x366   : > { %6331 = vmatmul.mubr.msk.f32.gmra.mrb[44].mxu1 %vm12279_vm0, %v12280_v48  ;;  %vm12286_vm0 = vcmp.eq.s32.totalorder %v9447_v30, %v10042_v55 }
 0x367   : > { %1939 = vmatprep.mubr.f32.mxu1 %v12527_v53 }
 0x36a   : > { %6332 = vmatmul.mubr.msk.f32.gmra.mrb[46].mxu1 %vm12441_vm14, %v12280_v48 }
 0x36b   : > { %1945 = vmatprep.mubr.f32.mxu1 %v12527_v53 }
 0x36e   : > { %6333 = vmatmul.mubr.msk.f32.gmra.mrb[48].mxu1 %vm12428_vm15, %v12280_v48 }
 0x36f   : > { %1951 = vmatprep.mubr.f32.mxu1 %v12527_v53 }
 0x372   : > { %6334 = vmatmul.mubr.msk.f32.gmra.mrb[50].mxu1 %vm12286_vm0, %v12280_v48  ;;  %v10057_v48 = vshrl.u32 %v12598_v36, 7 }
 0x373   : > { %4370 = vmatprep.mubr.f32.mxu1 %v12527_v53 }
 0x374   : > { %12599 = vst [vmem:[#allocation80_spill] sm:$0xff] %v10057_v48  ;;  %v1994_v55 = vsub.s32 0, %v10057_v48  ;;  %v1998_v42 = vsub.s32 1, %v10057_v48  ;;  %vm934_vm0 = vcmp.ne.s32.totalorder %v10057_v48, 0 }
 0x375   : > { %v10067_v10 = vsel %vm934_vm0, 1.0, %v12527_v53 }
 0x376   : > { %v10062_v52 = vrot.slane %v1990_v50, %v1994_v55  ;;  %v10064_v14 = vrot.slane %v1990_v50, %v1998_v42  ;;  %12600 = vst [vmem:[#allocation81_spill] sm:$0xff] %v10067_v10 }
 0x409   : > { %v1863_v9 = vpop.f32.mrb[20].mxu1 }
 0x40a   : > { %v2002_v38 = vadd.f32 %v10062_v52, %v1863_v9  ;;  %v1865_v57 = vpop.f32.mrb[21].mxu1 }
 0x40b   : > { %v2003_v44 = vadd.f32 %v10064_v14, %v1865_v57 }
 0x40c   : > { %v10072_v32 = vmul.f32 %v10067_v10, %v2002_v38 }
 0x40d   : > { %v10075_v20 = vmul.f32 %v10067_v10, %v2003_v44  ;;  %v1869_v60 = vpop.f32.mrb[22].mxu1 }
 0x40e   : > { %v2004_v55 = vadd.f32 %v10062_v52, %v1869_v60  ;;  %v1871_v50 = vpop.f32.mrb[23].mxu1  ;;  %v2210_v42 = vmul.f32 %v10072_v32, %v10072_v32 }
 0x40f   : > { %v2005_v18 = vadd.f32 %v10064_v14, %v1871_v50  ;;  %v2066_v36 = vadd.f32 %v10075_v20, %v10072_v32  ;;  %v2211_v9 = vmul.f32 %v10075_v20, %v10075_v20 }
 0x410   : > { %v10086_v38 = vmul.f32 %v10067_v10, %v2004_v55 }
 0x411   : > { %v10089_v57 = vmul.f32 %v10067_v10, %v2005_v18  ;;  %2067 = vadd.xlane.f32.xlu0 %v2066_v36  ;;  %v1875_v44 = vpop.f32.mrb[24].mxu1  ;;  %v2242_v40 = vadd.f32 %v2211_v9, %v2210_v42 }
 0x412   : > { %v2006_v60 = vadd.f32 %v10062_v52, %v1875_v44  ;;  %v1877_v50 = vpop.f32.mrb[25].mxu1  ;;  %v2212_v48 = vmul.f32 %v10086_v38, %v10086_v38 }
 0x413   : > { %v2007_v53 = vadd.f32 %v10064_v14, %v1877_v50  ;;  %v2069_v43 = vadd.f32 %v10089_v57, %v10086_v38  ;;  %v2213_v55 = vmul.f32 %v10089_v57, %v10089_v57 }
 0x414   : > { %v10100_v18 = vmul.f32 %v10067_v10, %v2006_v60 }
 0x415   : > { %v10103_v36 = vmul.f32 %v10067_v10, %v2007_v53  ;;  %2243 = vadd.xlane.f32.xlu0 %v2242_v40  ;;  %2070 = vadd.xlane.f32.xlu1 %v2069_v43  ;;  %v1881_v44 = vpop.f32.mrb[26].mxu1  ;;  %v2245_v50 = vadd.f32 %v2213_v55, %v2212_v48 }
 0x416   : > { %v2008_v28 = vadd.f32 %v10062_v52, %v1881_v44  ;;  %v1883_v11 = vpop.f32.mrb[27].mxu1  ;;  %v2214_v37 = vmul.f32 %v10100_v18, %v10100_v18 }
 0x417   : > { %v2009_v42 = vadd.f32 %v10064_v14, %v1883_v11  ;;  %v2072_v9 = vadd.f32 %v10103_v36, %v10100_v18  ;;  %v2215_v60 = vmul.f32 %v10103_v36, %v10103_v36 }
 0x418   : > { %v10114_v53 = vmul.f32 %v10067_v10, %v2008_v28 }
 0x419   : > { %v10117_v43 = vmul.f32 %v10067_v10, %v2009_v42  ;;  %2246 = vadd.xlane.f32.xlu1 %v2245_v50  ;;  %2073 = vadd.xlane.f32.xlu0 %v2072_v9  ;;  %v1887_v48 = vpop.f32.mrb[28].mxu1  ;;  %v2248_v31 = vadd.f32 %v2215_v60, %v2214_v37 }
 0x41a   : > { %v2010_v11 = vadd.f32 %v10062_v52, %v1887_v48  ;;  %v1889_v40 = vpop.f32.mrb[29].mxu1  ;;  %v2216_v55 = vmul.f32 %v10114_v53, %v10114_v53  ;;  %v2801_v48 = vld [vmem:[#allocation11 + $0x68] sm:$0xff] }
 0x41b   : > { %v2011_v44 = vadd.f32 %v10064_v14, %v1889_v40  ;;  %v2075_v16 = vadd.f32 %v10117_v43, %v10114_v53  ;;  %v2217_v28 = vmul.f32 %v10117_v43, %v10117_v43  ;;  %v7204_v17 = vpack.c.bf16 %v2804_v8, %v2801_v48 }
 0x41c   : > { %v10128_v42 = vmul.f32 %v10067_v10, %v2010_v11 }
 0x41d   : > { %v10131_v50 = vmul.f32 %v10067_v10, %v2011_v44  ;;  %2249 = vadd.xlane.f32.xlu1 %v2248_v31  ;;  %2076 = vadd.xlane.f32.xlu0 %v2075_v16  ;;  %v1893_v9 = vpop.f32.mrb[30].mxu1  ;;  %v2251_v60 = vadd.f32 %v2217_v28, %v2216_v55  ;;  %v7206_v31 = vpack.c.bf16 %v2803_v7, %v2800_v13  ;;  %v2807_v28 = vld [vmem:[#allocation11 + $0x98] sm:$0xff]  ;;  %v2806_v13 = vld [vmem:[#allocation11 + $0x90] sm:$0xff] }
 0x41e   : > { %12601 = vst [vmem:[#allocation82_spill] sm:$0xff] %v10128_v42  ;;  %v2012_v40 = vadd.f32 %v10062_v52, %v1893_v9  ;;  %v1895_v37 = vpop.f32.mrb[31].mxu1  ;;  %v2218_v4 = vmul.f32 %v10128_v42, %v10128_v42  ;;  %7205 = vmatprep.subr.bf16.mxu0 %v7204_v17  ;;  %v2810_v9 = vld [vmem:[#allocation11 + $0xb0] sm:$0xff] }
 0x41f   : > { %v2013_v11 = vadd.f32 %v10064_v14, %v1895_v37  ;;  %v2078_v44 = vadd.f32 %v10131_v50, %v10128_v42  ;;  %v2219_v16 = vmul.f32 %v10131_v50, %v10131_v50  ;;  %7207 = vmatpush1.bf16.msra.mxu0 %v7206_v31  ;;  %v7208_v7 = vpack.c.bf16 %v2810_v9, %v2807_v28  ;;  %v2813_v31 = vld [vmem:[#allocation11 + $0xc8] sm:$0xff]  ;;  %v2816_v28 = vld [vmem:[#allocation11 + $0xe0] sm:$0xff] }
 0x420   : > { %v10142_v58 = vmul.f32 %v10067_v10, %v2012_v40  ;;  %v2809_v40 = vld [vmem:[#allocation11 + $0xa8] sm:$0xff] }
 0x421   : > { %v10145_v55 = vmul.f32 %v10067_v10, %v2013_v11  ;;  %2252 = vadd.xlane.f32.xlu1 %v2251_v60  ;;  %2079 = vadd.xlane.f32.xlu0 %v2078_v44  ;;  %v1899_v8 = vpop.f32.mrb[32].mxu1  ;;  %v2254_v54 = vadd.f32 %v2219_v16, %v2218_v4  ;;  %v7210_v44 = vpack.c.bf16 %v2809_v40, %v2806_v13  ;;  %v2815_v40 = vld [vmem:[#allocation11 + $0xd8] sm:$0xff] }
 0x422   : > { %12602 = vst [vmem:[#allocation83_spill] sm:$0xff] %v10142_v58  ;;  %v2014_v48 = vadd.f32 %v10062_v52, %v1899_v8  ;;  %v1901_v37 = vpop.f32.mrb[33].mxu1  ;;  %v2220_v45 = vmul.f32 %v10142_v58, %v10142_v58  ;;  %7209 = vmatprep.subr.bf16.mxu0 %v7208_v7  ;;  %v7212_v13 = vpack.c.bf16 %v2816_v28, %v2813_v31  ;;  %v2822_v31 = vld [vmem:[#allocation11 + $0x110] sm:$0xff] }
 0x423   : > { %12603 = vst [vmem:[#allocation84_spill] sm:$0xff] %v10145_v55  ;;  %v2015_v17 = vadd.f32 %v10064_v14, %v1901_v37  ;;  %v2081_v60 = vadd.f32 %v10145_v55, %v10142_v58  ;;  %v2221_v11 = vmul.f32 %v10145_v55, %v10145_v55  ;;  %7211 = vmatpush1.bf16.msra.mxu0 %v7210_v44  ;;  %v2819_v44 = vld [vmem:[#allocation11 + $0xf8] sm:$0xff] }
 0x424   : > { %v10156_v8 = vmul.f32 %v10067_v10, %v2014_v48  ;;  %v2812_v48 = vld [vmem:[#allocation11 + $0xc0] sm:$0xff]  ;;  %7213 = vmatprep.subr.bf16.mxu0 %v7212_v13 }
 0x425   : > { %v10159_v4 = vmul.f32 %v10067_v10, %v2015_v17  ;;  %2255 = vadd.xlane.f32.xlu1 %v2254_v54  ;;  %2082 = vadd.xlane.f32.xlu0 %v2081_v60  ;;  %v1905_v16 = vpop.f32.mrb[34].mxu1  ;;  %v2257_v47 = vadd.f32 %v2221_v11, %v2220_v45  ;;  %v7214_v60 = vpack.c.bf16 %v2815_v40, %v2812_v48  ;;  %v2821_v40 = vld [vmem:[#allocation11 + $0x108] sm:$0xff] }
 0x426   : > { %12604 = vst [vmem:[#allocation85_spill] sm:$0xff] %v10156_v8  ;;  %v2016_v9 = vadd.f32 %v10062_v52, %v1905_v16  ;;  %v1907_v37 = vpop.f32.mrb[35].mxu1  ;;  %v2222_v39 = vmul.f32 %v10156_v8, %v10156_v8  ;;  %v7216_v48 = vpack.c.bf16 %v2822_v31, %v2819_v44  ;;  %v2828_v44 = vld [vmem:[#allocation11 + $0x140] sm:$0xff] }
 0x427   : > { %12605 = vst [vmem:[#allocation86_spill] sm:$0xff] %v10159_v4  ;;  %v2017_v7 = vadd.f32 %v10064_v14, %v1907_v37  ;;  %v2084_v54 = vadd.f32 %v10159_v4, %v10156_v8  ;;  %v2223_v17 = vmul.f32 %v10159_v4, %v10159_v4  ;;  %7215 = vmatpush1.bf16.msra.mxu0 %v7214_v60  ;;  %v2825_v60 = vld [vmem:[#allocation11 + $0x128] sm:$0xff] }
 0x428   : > { %v10170_v16 = vmul.f32 %v10067_v10, %v2016_v9  ;;  %v2818_v9 = vld [vmem:[#allocation11 + $0xf0] sm:$0xff]  ;;  %7217 = vmatprep.subr.bf16.mxu0 %v7216_v48 }
 0x429   : > { %v10173_v45 = vmul.f32 %v10067_v10, %v2017_v7  ;;  %2258 = vadd.xlane.f32.xlu1 %v2257_v47  ;;  %2085 = vadd.xlane.f32.xlu0 %v2084_v54  ;;  %v1911_v11 = vpop.f32.mrb[36].mxu1  ;;  %v2260_v33 = vadd.f32 %v2223_v17, %v2222_v39  ;;  %v7218_v54 = vpack.c.bf16 %v2821_v40, %v2818_v9  ;;  %v2827_v40 = vld [vmem:[#allocation11 + $0x138] sm:$0xff] }
 0x42a   : > { %12606 = vst [vmem:[#allocation87_spill] sm:$0xff] %v10170_v16  ;;  %v2018_v28 = vadd.f32 %v10062_v52, %v1911_v11  ;;  %v1913_v37 = vpop.f32.mrb[37].mxu1  ;;  %v2224_v41 = vmul.f32 %v10170_v16, %v10170_v16  ;;  %v7220_v9 = vpack.c.bf16 %v2828_v44, %v2825_v60 }
 0x42b   : > { %12607 = vst [vmem:[#allocation88_spill] sm:$0xff] %v10173_v45  ;;  %v2019_v13 = vadd.f32 %v10064_v14, %v1913_v37  ;;  %v2087_v47 = vadd.f32 %v10173_v45, %v10170_v16  ;;  %v2225_v7 = vmul.f32 %v10173_v45, %v10173_v45  ;;  %7219 = vmatpush1.bf16.msra.mxu0 %v7218_v54 }
 0x42c   : > { %v10184_v11 = vmul.f32 %v10067_v10, %v2018_v28  ;;  %v2824_v28 = vld [vmem:[#allocation11 + $0x120] sm:$0xff]  ;;  %7221 = vmatprep.subr.bf16.mxu0 %v7220_v9 }
 0x42d   : > { %v10187_v39 = vmul.f32 %v10067_v10, %v2019_v13  ;;  %2261 = vadd.xlane.f32.xlu1 %v2260_v33  ;;  %2088 = vadd.xlane.f32.xlu0 %v2087_v47  ;;  %v1917_v17 = vpop.f32.mrb[38].mxu1  ;;  %v2263_v27 = vadd.f32 %v2225_v7, %v2224_v41  ;;  %v7222_v47 = vpack.c.bf16 %v2827_v40, %v2824_v28  ;;  %v2831_v40 = vld [vmem:[#allocation11 + $0x158] sm:$0xff] }
 0x42e   : > { %12608 = vst [vmem:[#allocation89_spill] sm:$0xff] %v10184_v11  ;;  %v2020_v31 = vadd.f32 %v10062_v52, %v1917_v17  ;;  %v1919_v37 = vpop.f32.mrb[39].mxu1  ;;  %v2226_v23 = vmul.f32 %v10184_v11, %v10184_v11 }
 0x42f   : > { %12609 = vst [vmem:[#allocation90_spill] sm:$0xff] %v10187_v39  ;;  %v2021_v48 = vadd.f32 %v10064_v14, %v1919_v37  ;;  %v2090_v33 = vadd.f32 %v10187_v39, %v10184_v11  ;;  %v2227_v13 = vmul.f32 %v10187_v39, %v10187_v39  ;;  %7223 = vmatpush1.bf16.msra.mxu0 %v7222_v47  ;;  %v2830_v47 = vld [vmem:[#allocation11 + $0x150] sm:$0xff] }
 0x430   : > { %v10198_v17 = vmul.f32 %v10067_v10, %v2020_v31 }
 0x431   : > { %v10201_v41 = vmul.f32 %v10067_v10, %v2021_v48  ;;  %2264 = vadd.xlane.f32.xlu1 %v2263_v27  ;;  %2091 = vadd.xlane.f32.xlu0 %v2090_v33  ;;  %v1923_v7 = vpop.f32.mrb[40].mxu1  ;;  %v2266_v44 = vadd.f32 %v2227_v13, %v2226_v23  ;;  %v2834_v48 = vld [vmem:[#allocation11 + $0x170] sm:$0xff] }
 0x432   : > { %12610 = vst [vmem:[#allocation91_spill] sm:$0xff] %v10198_v17  ;;  %v2022_v54 = vadd.f32 %v10062_v52, %v1923_v7  ;;  %v1925_v60 = vpop.f32.mrb[41].mxu1  ;;  %v2228_v31 = vmul.f32 %v10198_v17, %v10198_v17  ;;  %v7224_v13 = vpack.c.bf16 %v2834_v48, %v2831_v40  ;;  %v2833_v7 = vld [vmem:[#allocation11 + $0x168] sm:$0xff]  ;;  %v2840_v48 = vld [vmem:[#allocation11 + $0x1a0] sm:$0xff] }
 0x433   : > { %12611 = vst [vmem:[#allocation92_spill] sm:$0xff] %v10201_v41  ;;  %v2023_v37 = vadd.f32 %v10064_v14, %v1925_v60  ;;  %v2093_v28 = vadd.f32 %v10201_v41, %v10198_v17  ;;  %v2229_v9 = vmul.f32 %v10201_v41, %v10201_v41  ;;  %v7226_v62 = vpack.c.bf16 %v2833_v7, %v2830_v47  ;;  %v2837_v40 = vld [vmem:[#allocation11 + $0x188] sm:$0xff]  ;;  %v2839_v47 = vld [vmem:[#allocation11 + $0x198] sm:$0xff] }
 0x434   : > { %v10212_v27 = vmul.f32 %v10067_v10, %v2022_v54  ;;  %7225 = vmatprep.subr.bf16.mxu0 %v7224_v13 }
 0x435   : > { %v10215_v33 = vmul.f32 %v10067_v10, %v2023_v37  ;;  %2267 = vadd.xlane.f32.xlu1 %v2266_v44  ;;  %2094 = vadd.xlane.f32.xlu0 %v2093_v28  ;;  %v1929_v23 = vpop.f32.mrb[42].mxu1  ;;  %v2269_v2 = vadd.f32 %v2229_v9, %v2228_v31  ;;  %v7228_v31 = vpack.c.bf16 %v2840_v48, %v2837_v40  ;;  %v2836_v9 = vld [vmem:[#allocation11 + $0x180] sm:$0xff]  ;;  %v2843_v40 = vld [vmem:[#allocation11 + $0x1b8] sm:$0xff]  ;;  %v2846_v48 = vld [vmem:[#allocation11 + $0x1d0] sm:$0xff] }
 0x436   : > { %12612 = vst [vmem:[#allocation93_spill] sm:$0xff] %v10212_v27  ;;  %v2024_v60 = vadd.f32 %v10062_v52, %v1929_v23  ;;  %v1931_v15 = vpop.f32.mrb[43].mxu1  ;;  %v2230_v26 = vmul.f32 %v10212_v27, %v10212_v27  ;;  %7227 = vmatpush1.bf16.msra.mxu0 %v7226_v62  ;;  %v7230_v13 = vpack.c.bf16 %v2839_v47, %v2836_v9  ;;  %v2845_v9 = vld [vmem:[#allocation11 + $0x1c8] sm:$0xff] }
 0x437   : > { %12613 = vst [vmem:[#allocation94_spill] sm:$0xff] %v10215_v33  ;;  %v2025_v54 = vadd.f32 %v10064_v14, %v1931_v15  ;;  %v2096_v37 = vadd.f32 %v10215_v33, %v10212_v27  ;;  %v2231_v44 = vmul.f32 %v10215_v33, %v10215_v33  ;;  %7229 = vmatprep.subr.bf16.mxu0 %v7228_v31 }
 0x438   : > { %v10226_v28 = vmul.f32 %v10067_v10, %v2024_v60 }
 0x439   : > { %v10229_v23 = vmul.f32 %v10067_v10, %v2025_v54  ;;  %2270 = vadd.xlane.f32.xlu1 %v2269_v2  ;;  %2097 = vadd.xlane.f32.xlu0 %v2096_v37  ;;  %v1935_v15 = vpop.f32.mrb[44].mxu1  ;;  %v2272_v12 = vadd.f32 %v2231_v44, %v2230_v26  ;;  %v7232_v44 = vpack.c.bf16 %v2846_v48, %v2843_v40 }
 0x43a   : > { %12614 = vst [vmem:[#allocation95_spill] sm:$0xff] %v10226_v28  ;;  %v2026_v7 = vadd.f32 %v10062_v52, %v1935_v15  ;;  %v1937_v5 = vpop.f32.mrb[45].mxu1  ;;  %v2232_v54 = vmul.f32 %v10226_v28, %v10226_v28  ;;  %7231 = vmatpush1.bf16.msra.mxu0 %v7230_v13  ;;  %v2842_v15 = vld [vmem:[#allocation11 + $0x1b0] sm:$0xff] }
 0x43b   : > { %12615 = vst [vmem:[#allocation96_spill] sm:$0xff] %v10229_v23  ;;  %v2027_v60 = vadd.f32 %v10064_v14, %v1937_v5  ;;  %v2099_v62 = vadd.f32 %v10229_v23, %v10226_v28  ;;  %v2233_v2 = vmul.f32 %v10229_v23, %v10229_v23  ;;  %7233 = vmatprep.subr.bf16.mxu0 %v7232_v44  ;;  %v10343_v23 = vld [vmem:[#allocation11 + $0x268] sm:$0xff] }
 0x43c   : > { %v10240_v37 = vmul.f32 %v10067_v10, %v2026_v7  ;;  %v7234_v7 = vpack.c.bf16 %v2845_v9, %v2842_v15  ;;  %12631 = vst [vmem:[#allocation112_spill] sm:$0xff] %v10343_v23 }
 0x43d   : > { %v10243_v26 = vmul.f32 %v10067_v10, %v2027_v60  ;;  %2273 = vadd.xlane.f32.xlu1 %v2272_v12  ;;  %2100 = vadd.xlane.f32.xlu0 %v2099_v62  ;;  %v1941_v5 = vpop.f32.mrb[46].mxu1  ;;  %v2275_v61 = vadd.f32 %v2233_v2, %v2232_v54 }
 0x43e   : > { %12616 = vst [vmem:[#allocation97_spill] sm:$0xff] %v10240_v37  ;;  %v2028_v47 = vadd.f32 %v10062_v52, %v1941_v5  ;;  %v1943_v34 = vpop.f32.mrb[47].mxu1  ;;  %v2234_v31 = vmul.f32 %v10240_v37, %v10240_v37  ;;  %7235 = vmatpush1.bf16.msra.mxu0 %v7234_v7  ;;  %v2849_v5 = vld [vmem:[#allocation11 + $0x1e8] sm:$0xff] }
 0x43f   : > { %12617 = vst [vmem:[#allocation98_spill] sm:$0xff] %v10243_v26  ;;  %v2029_v13 = vadd.f32 %v10064_v14, %v1943_v34  ;;  %v2102_v60 = vadd.f32 %v10243_v26, %v10240_v37  ;;  %v2235_v12 = vmul.f32 %v10243_v26, %v10243_v26  ;;  %v2852_v34 = vld [vmem:[#allocation11 + $0x200] sm:$0xff]  ;;  %v10334_v37 = vld [vmem:[#allocation11 + $0xb8] sm:$0xff] }
 0x440   : > { %v10254_v62 = vmul.f32 %v10067_v10, %v2028_v47  ;;  %v7236_v44 = vpack.c.bf16 %v2852_v34, %v2849_v5  ;;  %v2851_v47 = vld [vmem:[#allocation11 + $0x1f8] sm:$0xff]  ;;  %v2858_v5 = vld [vmem:[#allocation11 + $0x230] sm:$0xff]  ;;  %12629 = vst [vmem:[#allocation110_spill] sm:$0xff] %v10334_v37 }
 0x441   : > { %v10257_v40 = vmul.f32 %v10067_v10, %v2029_v13  ;;  %2276 = vadd.xlane.f32.xlu1 %v2275_v61  ;;  %2103 = vadd.xlane.f32.xlu0 %v2102_v60  ;;  %v1947_v48 = vpop.f32.mrb[48].mxu1  ;;  %v2278_v15 = vadd.f32 %v2235_v12, %v2234_v31  ;;  %v7238_v60 = vpack.c.bf16 %v2851_v47, %v2848_v63  ;;  %v2857_v47 = vld [vmem:[#allocation11 + $0x228] sm:$0xff] }
 0x442   : > { %12618 = vst [vmem:[#allocation99_spill] sm:$0xff] %v10254_v62  ;;  %v2030_v54 = vadd.f32 %v10062_v52, %v1947_v48  ;;  %v1949_v2 = vpop.f32.mrb[49].mxu1  ;;  %v2236_v9 = vmul.f32 %v10254_v62, %v10254_v62  ;;  %7237 = vmatprep.subr.bf16.mxu0 %v7236_v44  ;;  %v2855_v48 = vld [vmem:[#allocation11 + $0x218] sm:$0xff] }
 0x443   : > { %12619 = vst [vmem:[#allocation100_spill] sm:$0xff] %v10257_v40  ;;  %v2031_v7 = vadd.f32 %v10064_v14, %v1949_v2  ;;  %v2105_v13 = vadd.f32 %v10257_v40, %v10254_v62  ;;  %v2237_v61 = vmul.f32 %v10257_v40, %v10257_v40  ;;  %7239 = vmatpush1.bf16.msra.mxu0 %v7238_v60  ;;  %v2864_v60 = vld [vmem:[#allocation11 + $0x260] sm:$0xff]  ;;  %v10341_v62 = vld [vmem:[#allocation11 + $0x250] sm:$0xff] }
 0x444   : > { %v10268_v29 = vmul.f32 %v10067_v10, %v2030_v54  ;;  %v7240_v63 = vpack.c.bf16 %v2858_v5, %v2855_v48  ;;  %v2854_v54 = vld [vmem:[#allocation11 + $0x210] sm:$0xff]  ;;  %v2860_v48 = vld [vmem:[#allocation11 + $0x240] sm:$0xff]  ;;  %v2863_v5 = vld [vmem:[#allocation11 + $0x258] sm:$0xff]  ;;  %12630 = vst [vmem:[#allocation111_spill] sm:$0xff] %v10341_v62 }
 0x445   : > { %v10271_v31 = vmul.f32 %v10067_v10, %v2031_v7  ;;  %2279 = vadd.xlane.f32.xlu1 %v2278_v15  ;;  %2106 = vadd.xlane.f32.xlu0 %v2105_v13  ;;  %v1953_v12 = vpop.f32.mrb[50].mxu1  ;;  %v2281_v3 = vadd.f32 %v2237_v61, %v2236_v9  ;;  %v7242_v13 = vpack.c.bf16 %v2857_v47, %v2854_v54  ;;  %v2861_v61 = vld [vmem:[#allocation11 + $0x248] sm:$0xff]  ;;  %v2870_v47 = vld [vmem:[#allocation11 + $0x290] sm:$0xff]  ;;  %v10332_v40 = vld [vmem:[#allocation11 + $0xa0] sm:$0xff] }
 0x446   : > { %12620 = vst [vmem:[#allocation101_spill] sm:$0xff] %v10268_v29  ;;  %v2032_v34 = vadd.f32 %v10062_v52, %v1953_v12  ;;  %v1955_v2 = vpop.f32.mrb[51].mxu1  ;;  %v2238_v22 = vmul.f32 %v10268_v29, %v10268_v29  ;;  %7241 = vmatprep.subr.bf16.mxu0 %v7240_v63  ;;  %v7246_v54 = vpack.c.bf16 %v2863_v5, %v2860_v48  ;;  %12628 = vst [vmem:[#allocation109_spill] sm:$0xff] %v10332_v40 }
 0x447   : > { %12621 = vst [vmem:[#allocation102_spill] sm:$0xff] %v10271_v31  ;;  %v2033_v44 = vadd.f32 %v10064_v14, %v1955_v2  ;;  %v2108_v15 = vadd.f32 %v10271_v31, %v10268_v29  ;;  %v2239_v7 = vmul.f32 %v10271_v31, %v10271_v31  ;;  %7243 = vmatpush1.bf16.msra.mxu0 %v7242_v13 }
 0x448   : > { %v10282_v52 = vmul.f32 %v10067_v10, %v2032_v34  ;;  %v7244_v14 = vpack.c.bf16 %v2864_v60, %v2861_v61  ;;  %v2873_v61 = vld [vmem:[#allocation11 + $0x2a8] sm:$0xff]  ;;  %v2876_v60 = vld [vmem:[#allocation11 + $0x2c0] sm:$0xff]  ;;  %v7254_v48 = vpack.c.bf16 %v2875_v1, %v2872_v25 }
 0x449   : > { %v10285_v9 = vmul.f32 %v10067_v10, %v2033_v44  ;;  %2282 = vadd.xlane.f32.xlu1 %v2281_v3  ;;  %2109 = vadd.xlane.f32.xlu0 %v2108_v15  ;;  %v2284_v12 = vadd.f32 %v2239_v7, %v2238_v22  ;;  %v2867_v3 = vld [vmem:[#allocation11 + $0x278] sm:$0xff]  ;;  %v2866_v44 = vld [vmem:[#allocation11 + $0x270] sm:$0xff]  ;;  %v2869_v15 = vld [vmem:[#allocation11 + $0x288] sm:$0xff]  ;;  %v7252_v10 = vpack.c.bf16 %v2876_v60, %v2873_v61 }
 0x44a   : > { %12622 = vst [vmem:[#allocation103_spill] sm:$0xff] %v10282_v52  ;;  %v2240_v34 = vmul.f32 %v10282_v52, %v10282_v52  ;;  %7245 = vmatprep.subr.bf16.mxu0 %v7244_v14  ;;  %v7248_v22 = vpack.c.bf16 %v2870_v47, %v2867_v3  ;;  %v7250_v13 = vpack.c.bf16 %v2869_v15, %v2866_v44  ;;  %v2882_v14 = vld [vmem:[#allocation11 + $0x2f0] sm:$0xff] }
 0x44b   : > { %12623 = vst [vmem:[#allocation104_spill] sm:$0xff] %v10285_v9  ;;  %v2111_v2 = vadd.f32 %v10285_v9, %v10282_v52  ;;  %v2241_v63 = vmul.f32 %v10285_v9, %v10285_v9  ;;  %7247 = vmatpush1.bf16.msra.mxu0 %v7246_v54  ;;  %v2881_v54 = vld [vmem:[#allocation11 + $0x2e8] sm:$0xff] }
 0x44c   : > { %7249 = vmatprep.subr.bf16.mxu0 %v7248_v22 }
 0x44d   : > { %2285 = vadd.xlane.f32.xlu1 %v2284_v12  ;;  %2112 = vadd.xlane.f32.xlu0 %v2111_v2  ;;  %v2287_v7 = vadd.f32 %v2241_v63, %v2240_v34  ;;  %v2879_v12 = vld [vmem:[#allocation11 + $0x2d8] sm:$0xff]  ;;  %v2878_v2 = vld [vmem:[#allocation11 + $0x2d0] sm:$0xff]  ;;  %v2841_v63 = vld [vmem:[#allocation11 + $0x1a8] sm:$0xff] }
 0x44e   : > { %v7256_v5 = vpack.c.bf16 %v2882_v14, %v2879_v12  ;;  %v7258_v3 = vpack.c.bf16 %v2881_v54, %v2878_v2  ;;  %v2838_v34 = vld [vmem:[#allocation11 + $0x190] sm:$0xff]  ;;  %v10295_v14 = vld [vmem:[#allocation11 + $0x28] sm:$0xff] }
 0x44f   : > { %7251 = vmatpush1.bf16.msra.mxu0 %v7250_v13  ;;  %v7260_v47 = vpack.c.bf16 %v2841_v63, %v2838_v34  ;;  %v10293_v12 = vld [vmem:[#allocation11 + $0x10] sm:$0xff]  ;;  %v10301_v34 = vld [vmem:[#allocation11 + $0x40] sm:$0xff]  ;;  %v10303_v63 = vld [vmem:[#allocation11 + $0x58] sm:$0xff] }
 0x450   : > { %7253 = vmatprep.subr.bf16.mxu0 %v7252_v10 }
 0x451   : > { %2288 = vadd.xlane.f32.xlu0 %v2287_v7 }
 0x453   : > { %7255 = vmatpush1.bf16.msra.mxu0 %v7254_v48 }
 0x454   : > { %7257 = vmatprep.subr.bf16.mxu0 %v7256_v5  ;;  %v10297_v5 = vld [vmem:[#allocation11 + $0x1c0] sm:$0xff] }
 0x457   : > { %7259 = vmatpush1.bf16.msra.mxu0 %v7258_v3  ;;  %v10299_v3 = vld [vmem:[#allocation11 + $0x1d8] sm:$0xff] }
 0x458   : > { %7261 = vmatprep.subr.bf16.mxu0 %v7260_v47 }
 0x49e   : > { %v2068_v22 = vpop.xlane.xlu0 %2067 }
 0x49f   : > { %v2114_v44 = vrot.slane %v2068_v22, 4 }
 0x4a1   : > { %v2115_v15 = vadd.f32 %v2114_v44, %v2068_v22 }
 0x4a2   : > { %v2244_v7 = vpop.xlane.xlu0 %2243  ;;  %v2071_v13 = vpop.xlane.xlu1 %2070 }
 0x4a3   : > { %v2116_v1 = vrot.slane %v2115_v15, 2  ;;  %v2290_v25 = vrot.slane %v2244_v7, 4  ;;  %v2120_v10 = vrot.slane %v2071_v13, 4 }
 0x4a5   : > { %v2117_v61 = vadd.f32 %v2116_v1, %v2115_v15  ;;  %v2291_v60 = vadd.f32 %v2290_v25, %v2244_v7  ;;  %v2121_v48 = vadd.f32 %v2120_v10, %v2071_v13  ;;  %v10305_v7 = vld [vmem:[#allocation11 + $0x1f0] sm:$0xff]  ;;  %v10307_v13 = vld [vmem:[#allocation11 + $0x208] sm:$0xff] }
 0x4a6   : > { %v2247_v2 = vpop.xlane.xlu1 %2246  ;;  %v2074_v54 = vpop.xlane.xlu0 %2073 }
 0x4a7   : > { %v2118_v47 = vrot.slane %v2117_v61, 1  ;;  %v2292_v22 = vrot.slane %v2291_v60, 2  ;;  %v2122_v44 = vrot.slane %v2121_v48, 2  ;;  %v2296_v15 = vrot.slane %v2247_v2, 4 }
 0x4a8   : > { %v2126_v1 = vrot.slane %v2074_v54, 4 }
 0x4a9   : > { %v2119_v10 = vadd.f32 %v2118_v47, %v2117_v61  ;;  %v2293_v0 = vadd.f32 %v2292_v22, %v2291_v60  ;;  %v2123_v51 = vadd.f32 %v2122_v44, %v2121_v48  ;;  %v2297_v46 = vadd.f32 %v2296_v15, %v2247_v2  ;;  %v10323_v47 = vld [vmem:[#allocation11 + $0x220] sm:$0xff]  ;;  %v10325_v22 = vld [vmem:[#allocation11 + $0x238] sm:$0xff] }
 0x4aa   : > { %v2127_v49 = vadd.f32 %v2126_v1, %v2074_v54  ;;  %v2250_v6 = vpop.xlane.xlu1 %2249  ;;  %v2077_v19 = vpop.xlane.xlu0 %2076  ;;  %12626 = vst [vmem:[#allocation107_spill] sm:$0xff] %v10323_v47  ;;  %12627 = vst [vmem:[#allocation108_spill] sm:$0xff] %v10325_v22 }
 0x4ab   : > { %v10321_v61 = vmul.f32 0.00048828125, %v2119_v10  ;;  %v2294_v60 = vrot.slane %v2293_v0, 1  ;;  %v2124_v48 = vrot.slane %v2123_v51, 1  ;;  %v2298_v2 = vrot.slane %v2297_v46, 2 }
 0x4ac   : > { %v2128_v54 = vrot.slane %v2127_v49, 2  ;;  %v2302_v44 = vrot.slane %v2250_v6, 4  ;;  %v2132_v15 = vrot.slane %v2077_v19, 4 }
 0x4ad   : > { %v2403_v59 = vmul.f32 %v10321_v61, %v2119_v10  ;;  %v2295_v56 = vadd.f32 %v2294_v60, %v2293_v0  ;;  %v2125_v35 = vadd.f32 %v2124_v48, %v2123_v51  ;;  %v2299_v25 = vadd.f32 %v2298_v2, %v2297_v46 }
 0x4ae   : > { %v2129_v30 = vadd.f32 %v2128_v54, %v2127_v49  ;;  %v2303_v52 = vadd.f32 %v2302_v44, %v2250_v6  ;;  %v2133_v9 = vadd.f32 %v2132_v15, %v2077_v19  ;;  %v2253_v29 = vpop.xlane.xlu1 %2252  ;;  %v2080_v31 = vpop.xlane.xlu0 %2079 }
 0x4af   : > { %v2419_v26 = vsub.f32 %v2295_v56, %v2403_v59  ;;  %v10336_v28 = vmul.f32 0.00048828125, %v2125_v35  ;;  %v2300_v1 = vrot.slane %v2299_v25, 1  ;;  %v2308_v10 = vrot.slane %v2253_v29, 4 }
 0x4b0   : > { %v2130_v0 = vrot.slane %v2129_v30, 1  ;;  %v2304_v51 = vrot.slane %v2303_v52, 2  ;;  %v2134_v46 = vrot.slane %v2133_v9, 2  ;;  %v2138_v49 = vrot.slane %v2080_v31, 4 }
 0x4b1   : > { %v2404_v19 = vmul.f32 %v10336_v28, %v2125_v35  ;;  %v2301_v6 = vadd.f32 %v2300_v1, %v2299_v25  ;;  %v2309_v60 = vadd.f32 %v2308_v10, %v2253_v29  ;;  %v2436_v27 = vmul.f32 0.0004885198, %v2419_v26 }
 0x4b2   : > { %v2131_v2 = vadd.f32 %v2130_v0, %v2129_v30  ;;  %v2305_v54 = vadd.f32 %v2304_v51, %v2303_v52  ;;  %v2135_v44 = vadd.f32 %v2134_v46, %v2133_v9  ;;  %v2139_v15 = vadd.f32 %v2138_v49, %v2080_v31  ;;  %v2256_v59 = vpop.xlane.xlu1 %2255  ;;  %v2083_v56 = vpop.xlane.xlu0 %2082 }
 0x4b3   : > { %v2420_v33 = vsub.f32 %v2301_v6, %v2404_v19  ;;  %v2310_v17 = vrot.slane %v2309_v60, 2  ;;  %v2314_v41 = vrot.slane %v2256_v59, 4  ;;  %v10350_v19 = vmax.f32 %v2436_v27, 0.0 }
 0x4b4   : > { %v10345_v35 = vmul.f32 0.00048828125, %v2131_v2  ;;  %v2306_v29 = vrot.slane %v2305_v54, 1  ;;  %v2136_v25 = vrot.slane %v2135_v44, 1  ;;  %v2140_v1 = vrot.slane %v2139_v15, 2 }
 0x4b5   : > { %v2437_v10 = vmul.f32 0.0004885198, %v2420_v33  ;;  %v2311_v30 = vadd.f32 %v2310_v17, %v2309_v60  ;;  %v2315_v52 = vadd.f32 %v2314_v41, %v2256_v59  ;;  %v2144_v11 = vrot.slane %v2083_v56, 4 }
 0x4b6   : > { %v2405_v9 = vmul.f32 %v10345_v35, %v2131_v2  ;;  %v2307_v0 = vadd.f32 %v2306_v29, %v2305_v54  ;;  %v2137_v51 = vadd.f32 %v2136_v25, %v2135_v44  ;;  %v2141_v46 = vadd.f32 %v2140_v1, %v2139_v15  ;;  %v2259_v26 = vpop.xlane.xlu1 %2258  ;;  %v2086_v49 = vpop.xlane.xlu0 %2085 }
 0x4b7   : > { %v2312_v6 = vrot.slane %v2311_v30, 1  ;;  %v2316_v48 = vrot.slane %v2315_v52, 2  ;;  %v2320_v41 = vrot.slane %v2259_v26, 4  ;;  %v10354_v33 = vmax.f32 %v2437_v10, 0.0 }
 0x4b8   : > { %v2421_v39 = vsub.f32 %v2307_v0, %v2405_v9  ;;  %v10352_v16 = vmul.f32 0.00048828125, %v2137_v51  ;;  %v2142_v17 = vrot.slane %v2141_v46, 1  ;;  %v2145_v2 = vadd.f32 %v2144_v11, %v2083_v56 }
 0x4b9   : > { %v2313_v60 = vadd.f32 %v2312_v6, %v2311_v30  ;;  %v2317_v59 = vadd.f32 %v2316_v48, %v2315_v52  ;;  %v2321_v29 = vadd.f32 %v2320_v41, %v2259_v26  ;;  %v2150_v45 = vrot.slane %v2086_v49, 4 }
 0x4ba   : > { %v2438_v54 = vmul.f32 0.0004885198, %v2421_v39  ;;  %v2406_v44 = vmul.f32 %v10352_v16, %v2137_v51  ;;  %v2143_v15 = vadd.f32 %v2142_v17, %v2141_v46  ;;  %v2262_v27 = vpop.xlane.xlu1 %2261  ;;  %v2089_v25 = vpop.xlane.xlu0 %2088  ;;  %v2146_v31 = vrot.slane %v2145_v2, 2 }
 0x4bb   : > { %v2318_v1 = vrot.slane %v2317_v59, 1  ;;  %v2326_v9 = vrot.slane %v2262_v27, 4  ;;  %7872 = vrsqrt.f32 %v10350_v19  ;;  %v2322_v10 = vrot.slane %v2321_v29, 2 }
 0x4bc   : > { %v2422_v0 = vsub.f32 %v2313_v60, %v2406_v44  ;;  %v10358_v8 = vmul.f32 0.00048828125, %v2143_v15  ;;  %v2147_v48 = vadd.f32 %v2146_v31, %v2145_v2  ;;  %v2151_v11 = vadd.f32 %v2150_v45, %v2086_v49 }
 0x4bd   : > { %v2319_v30 = vadd.f32 %v2318_v1, %v2317_v59  ;;  %v2327_v39 = vadd.f32 %v2326_v9, %v2262_v27  ;;  %7874 = vrsqrt.f32 %v10354_v33  ;;  %v10361_v56 = vmax.f32 %v2438_v54, 0.0 }
 0x4be   : > { %v2407_v52 = vmul.f32 %v10358_v8, %v2143_v15  ;;  %v2323_v51 = vadd.f32 %v2322_v10, %v2321_v29  ;;  %v2265_v46 = vpop.xlane.xlu1 %2264  ;;  %v2092_v26 = vpop.xlane.xlu0 %2091  ;;  %v2148_v6 = vrot.slane %v2147_v48, 1  ;;  %v2152_v17 = vrot.slane %v2151_v11, 2 }
 0x4bf   : > { %v2328_v41 = vrot.slane %v2327_v39, 2  ;;  %v2156_v60 = vrot.slane %v2089_v25, 4  ;;  %v2439_v44 = vmul.f32 0.0004885198, %v2422_v0  ;;  %v2332_v59 = vrot.slane %v2265_v46, 4 }
 0x4c0   : > { %v2423_v4 = vsub.f32 %v2319_v30, %v2407_v52  ;;  %v2324_v58 = vrot.slane %v2323_v51, 1  ;;  %v2149_v31 = vadd.f32 %v2148_v6, %v2147_v48  ;;  %v2153_v45 = vadd.f32 %v2152_v17, %v2151_v11 }
 0x4c1   : > { %v2329_v49 = vadd.f32 %v2328_v41, %v2327_v39  ;;  %v2157_v2 = vadd.f32 %v2156_v60, %v2089_v25  ;;  %7876 = vrsqrt.f32 %v10361_v56  ;;  %v2333_v15 = vadd.f32 %v2332_v59, %v2265_v46 }
 0x4c2   : > { %v2440_v54 = vmul.f32 0.0004885198, %v2423_v4  ;;  %v2325_v27 = vadd.f32 %v2324_v58, %v2323_v51  ;;  %v2268_v29 = vpop.xlane.xlu1 %2267  ;;  %v2095_v1 = vpop.xlane.xlu0 %2094  ;;  %v10365_v9 = vmul.f32 0.00048828125, %v2149_v31  ;;  %v2154_v10 = vrot.slane %v2153_v45, 1 }
 0x4c3   : > { %v2330_v62 = vrot.slane %v2329_v49, 1  ;;  %v2158_v23 = vrot.slane %v2157_v2, 2  ;;  %v10367_v0 = vmax.f32 %v2439_v44, 0.0  ;;  %v2334_v30 = vrot.slane %v2333_v15, 2 }
 0x4c4   : > { %12632 = vst [vmem:[#allocation113_spill] sm:$0xff] %v10365_v9  ;;  %v2162_v52 = vrot.slane %v2092_v26, 4  ;;  %v2338_v48 = vrot.slane %v2268_v29, 4  ;;  %v10369_v11 = vmax.f32 %v2440_v54, 0.0  ;;  %v2408_v25 = vmul.f32 %v10365_v9, %v2149_v31 }
 0x4c5   : > { %v2155_v39 = vadd.f32 %v2154_v10, %v2153_v45  ;;  %v2159_v4 = vadd.f32 %v2158_v23, %v2157_v2  ;;  %v10372_v58 = vpop.eup %7872  ;;  %v2331_v51 = vadd.f32 %v2330_v62, %v2329_v49  ;;  %v2335_v46 = vadd.f32 %v2334_v30, %v2333_v15 }
 0x4c6   : > { %v2163_v6 = vadd.f32 %v2162_v52, %v2092_v26  ;;  %v2339_v17 = vadd.f32 %v2338_v48, %v2268_v29  ;;  %v2271_v41 = vpop.xlane.xlu1 %2270  ;;  %v2098_v60 = vpop.xlane.xlu0 %2097  ;;  %v2424_v59 = vsub.f32 %v2325_v27, %v2408_v25  ;;  %v2168_v40 = vrot.slane %v2095_v1, 4 }
 0x4c7   : > { %v10374_v44 = vmul.f32 0.00048828125, %v2155_v39  ;;  %v2160_v55 = vrot.slane %v2159_v4, 1  ;;  %v10376_v37 = vpop.eup %7874  ;;  %v2336_v54 = vrot.slane %v2335_v46, 1  ;;  %v2344_v45 = vrot.slane %v2271_v41, 4 }
 0x4c8   : > { %v2164_v47 = vrot.slane %v2163_v6, 2  ;;  %v2340_v31 = vrot.slane %v2339_v17, 2  ;;  %v2441_v23 = vmul.f32 0.0004885198, %v2424_v59  ;;  %v2169_v49 = vadd.f32 %v2168_v40, %v2095_v1 }
 0x4c9   : > { %12633 = vst [vmem:[#allocation114_spill] sm:$0xff] %v10374_v44  ;;  %v2409_v2 = vmul.f32 %v10374_v44, %v2155_v39  ;;  %v2161_v62 = vadd.f32 %v2160_v55, %v2159_v4  ;;  %7878 = vrsqrt.f32 %v10367_v0  ;;  %v2345_v27 = vadd.f32 %v2344_v45, %v2271_v41 }
 0x4ca   : > { %v2165_v26 = vadd.f32 %v2164_v47, %v2163_v6  ;;  %v2341_v15 = vadd.f32 %v2340_v31, %v2339_v17  ;;  %v2274_v29 = vpop.xlane.xlu1 %2273  ;;  %v2337_v52 = vadd.f32 %v2336_v54, %v2335_v46  ;;  %v2170_v48 = vrot.slane %v2169_v49, 2  ;;  %v2101_v25 = vpop.xlane.xlu0 %2100 }
 0x4cb   : > { %v2425_v10 = vsub.f32 %v2331_v51, %v2409_v2  ;;  %v10380_v30 = vmul.f32 0.00048828125, %v2161_v62  ;;  %v10382_v9 = vpop.eup %7876  ;;  %v2346_v42 = vrot.slane %v2345_v27, 2  ;;  %v2174_v39 = vrot.slane %v2098_v60, 4 }
 0x4cc   : > { %v2166_v22 = vrot.slane %v2165_v26, 1  ;;  %v2342_v59 = vrot.slane %v2341_v15, 1  ;;  %7880 = vrsqrt.f32 %v10369_v11  ;;  %v10385_v55 = vmax.f32 %v2441_v23, 0.0 }
 0x4cd   : > { %12634 = vst [vmem:[#allocation115_spill] sm:$0xff] %v10380_v30  ;;  %v2410_v40 = vmul.f32 %v10380_v30, %v2161_v62  ;;  %v2171_v47 = vadd.f32 %v2170_v48, %v2169_v49  ;;  %v2442_v1 = vmul.f32 0.0004885198, %v2425_v10  ;;  %v2347_v51 = vadd.f32 %v2346_v42, %v2345_v27 }
 0x4ce   : > { %12635 = vst [vmem:[#allocation116_spill] sm:$0xff] %v10385_v55  ;;  %v2167_v4 = vadd.f32 %v2166_v22, %v2165_v26  ;;  %v2175_v6 = vadd.f32 %v2174_v39, %v2098_v60  ;;  %v2277_v46 = vpop.xlane.xlu1 %2276  ;;  %v2343_v41 = vadd.f32 %v2342_v59, %v2341_v15  ;;  %v2350_v31 = vrot.slane %v2274_v29, 4  ;;  %v2104_v49 = vpop.xlane.xlu0 %2103 }
 0x4cf   : > { %v2426_v17 = vsub.f32 %v2337_v52, %v2410_v40  ;;  %v2172_v54 = vrot.slane %v2171_v47, 1  ;;  %v2348_v2 = vrot.slane %v2347_v51, 1  ;;  %v2180_v24 = vrot.slane %v2101_v25, 4 }
 0x4d0   : > { %v10388_v45 = vmul.f32 0.00048828125, %v2167_v4  ;;  %v2176_v44 = vrot.slane %v2175_v6, 2  ;;  %7882 = vrsqrt.f32 %v10385_v55  ;;  %v2351_v62 = vadd.f32 %v2350_v31, %v2274_v29 }
 0x4d1   : > { %v2443_v23 = vmul.f32 0.0004885198, %v2426_v17  ;;  %v2173_v21 = vadd.f32 %v2172_v54, %v2171_v47  ;;  %v10391_v10 = vmax.f32 %v2442_v1, 0.0  ;;  %v2181_v60 = vadd.f32 %v2180_v24, %v2101_v25 }
 0x4d2   : > { %12636 = vst [vmem:[#allocation117_spill] sm:$0xff] %v10388_v45  ;;  %v2411_v42 = vmul.f32 %v10388_v45, %v2167_v4  ;;  %v2177_v22 = vadd.f32 %v2176_v44, %v2175_v6  ;;  %v2349_v15 = vadd.f32 %v2348_v2, %v2347_v51  ;;  %v2352_v27 = vrot.slane %v2351_v62, 2  ;;  %v2280_v47 = vpop.xlane.xlu1 %2279  ;;  %v2107_v55 = vpop.xlane.xlu0 %2106 }
 0x4d3   : > { %v10394_v26 = vmul.f32 0.00048828125, %v2173_v21  ;;  %v2356_v52 = vrot.slane %v2277_v46, 4  ;;  %v10396_v48 = vpop.eup %7878  ;;  %v2182_v40 = vrot.slane %v2181_v60, 2  ;;  %v2186_v17 = vrot.slane %v2104_v49, 4 }
 0x4d4   : > { %v2427_v59 = vsub.f32 %v2343_v41, %v2411_v42  ;;  %v2178_v39 = vrot.slane %v2177_v22, 1  ;;  %v10398_v29 = vmax.f32 %v2443_v23, 0.0  ;;  %v2353_v54 = vadd.f32 %v2352_v27, %v2351_v62 }
 0x4d5   : > { %12637 = vst [vmem:[#allocation118_spill] sm:$0xff] %v10394_v26  ;;  %v2412_v1 = vmul.f32 %v10394_v26, %v2173_v21  ;;  %v2357_v4 = vadd.f32 %v2356_v52, %v2277_v46  ;;  %v2183_v25 = vadd.f32 %v2182_v40, %v2181_v60  ;;  %v2187_v6 = vadd.f32 %v2186_v17, %v2104_v49 }
 0x4d6   : > { %v2444_v44 = vmul.f32 0.0004885198, %v2427_v59  ;;  %v2179_v24 = vadd.f32 %v2178_v39, %v2177_v22  ;;  %v10401_v51 = vpop.eup %7880  ;;  %v2354_v2 = vrot.slane %v2353_v54, 1  ;;  %v2362_v41 = vrot.slane %v2280_v47, 4 }
 0x4d7   : > { %v2428_v31 = vsub.f32 %v2349_v15, %v2412_v1  ;;  %v2358_v45 = vrot.slane %v2357_v4, 2  ;;  %7884 = vrsqrt.f32 %v10391_v10  ;;  %v2184_v23 = vrot.slane %v2183_v25, 1 }
 0x4d8   : > { %v10404_v42 = vmul.f32 0.00048828125, %v2179_v24  ;;  %v2188_v30 = vrot.slane %v2187_v6, 2  ;;  %v10406_v21 = vmax.f32 %v2444_v44, 0.0  ;;  %v2355_v46 = vadd.f32 %v2354_v2, %v2353_v54 }
 0x4d9   : > { %v2359_v62 = vadd.f32 %v2358_v45, %v2357_v4  ;;  %v2363_v22 = vadd.f32 %v2362_v41, %v2280_v47  ;;  %7886 = vrsqrt.f32 %v10398_v29  ;;  %v2185_v60 = vadd.f32 %v2184_v23, %v2183_v25 }
 0x4da   : > { %12638 = vst [vmem:[#allocation119_spill] sm:$0xff] %v10404_v42  ;;  %v2413_v49 = vmul.f32 %v10404_v42, %v2179_v24  ;;  %v2189_v15 = vadd.f32 %v2188_v30, %v2187_v6  ;;  %v10410_v27 = vpop.eup %7882  ;;  %v2445_v52 = vmul.f32 0.0004885198, %v2428_v31  ;;  %v2192_v40 = vrot.slane %v2107_v55, 4  ;;  %v2283_v6 = vpop.xlane.xlu1 %2282 }
 0x4db   : > { %v2360_v59 = vrot.slane %v2359_v62, 1  ;;  %v2364_v39 = vrot.slane %v2363_v22, 2  ;;  %v10412_v1 = vmul.f32 0.00048828125, %v2185_v60  ;;  %v2469_v45 = vmul.f32 %v10372_v58, %v10350_v19  ;;  %v2110_v31 = vpop.xlane.xlu0 %2109 }
 0x4dc   : > { %v2429_v17 = vsub.f32 %v2355_v46, %v2413_v49  ;;  %v2190_v44 = vrot.slane %v2189_v15, 1  ;;  %7888 = vrsqrt.f32 %v10406_v21  ;;  %v2193_v4 = vadd.f32 %v2192_v40, %v2107_v55 }
 0x4dd   : > { %12639 = vst [vmem:[#allocation120_spill] sm:$0xff] %v10412_v1  ;;  %v2361_v47 = vadd.f32 %v2360_v59, %v2359_v62  ;;  %v2365_v54 = vadd.f32 %v2364_v39, %v2363_v22  ;;  %v2414_v30 = vmul.f32 %v10412_v1, %v2185_v60  ;;  %vm2470_vm0 = vcmp.eq.f32.partialorder %v10350_v19, inf  ;;  %v10426_v59 = vld [vmem:[#allocation11 + $0xd0] sm:$0xff]  ;;  %v10428_v39 = vld [vmem:[#allocation11 + $0xe8] sm:$0xff] }
 0x4de   : > { %v2446_v24 = vmul.f32 0.0004885198, %v2429_v17  ;;  %v2191_v25 = vadd.f32 %v2190_v44, %v2189_v15  ;;  %v10419_v2 = vmax.f32 %v2445_v52, 0.0  ;;  %v2194_v23 = vrot.slane %v2193_v4, 2 }
 0x4df   : > { %v2366_v41 = vrot.slane %v2365_v54, 1  ;;  %v2471_v46 = vsel %vm2470_vm0, %v10350_v19, %v2469_v45  ;;  %v2430_v58 = vsub.f32 %v2361_v47, %v2414_v30  ;;  %vm2472_vm15 = vcmp.eq.f32.partialorder %v10350_v19, 0.0 }
 0x4e0   : > { %v10422_v49 = vmul.f32 0.00048828125, %v2191_v25  ;;  %v2473_v55 = vand.u32 2147483648, %v10350_v19  ;;  %v2195_v22 = vadd.f32 %v2194_v23, %v2193_v4  ;;  %v2368_v60 = vrot.slane %v2283_v6, 4 }
 0x4e1   : > { %v2367_v62 = vadd.f32 %v2366_v41, %v2365_v54  ;;  %v2198_v15 = vrot.slane %v2110_v31, 4  ;;  %v10430_v52 = vpop.eup %7884  ;;  %v10432_v40 = vmax.f32 %v2446_v24, 0.0  ;;  %v2447_v17 = vmul.f32 0.0004885198, %v2430_v58 }
 0x4e2   : > { %12640 = vst [vmem:[#allocation121_spill] sm:$0xff] %v10422_v49  ;;  %v2415_v44 = vmul.f32 %v10422_v49, %v2191_v25  ;;  %v2474_v45 = vsel %vm2472_vm15, %v2473_v55, %v2471_v46  ;;  %v2196_v47 = vrot.slane %v2195_v22, 1  ;;  %v2369_v1 = vadd.f32 %v2368_v60, %v2283_v6  ;;  %v2286_v46 = vpop.xlane.xlu1 %2285  ;;  %v2113_v55 = vpop.xlane.xlu0 %2112 }
 0x4e3   : > { %v2580_v30 = vadd.f32 1e-05, %v2474_v45  ;;  %v2199_v19 = vadd.f32 %v2198_v15, %v2110_v31  ;;  %v10435_v54 = vpop.eup %7886  ;;  %7890 = vrsqrt.f32 %v10419_v2  ;;  %v2476_v41 = vmul.f32 %v10376_v37, %v10354_v33 }
 0x4e4   : > { %v2431_v4 = vsub.f32 %v2367_v62, %v2415_v44  ;;  %v2197_v23 = vadd.f32 %v2196_v47, %v2195_v22  ;;  %v2370_v58 = vrot.slane %v2369_v1, 2  ;;  %v10443_v6 = vmax.f32 %v2447_v17, 0.0 }
 0x4e5   : > { %7892 = vrcp.f32 %v2580_v30  ;;  %v2200_v25 = vrot.slane %v2199_v19, 2  ;;  %v2629_v31 = vsub.f32 %v10075_v20, %v10321_v61  ;;  %vm2477_vm15 = vcmp.eq.f32.partialorder %v10354_v33, inf }
 0x4e6   : > { %7894 = vrsqrt.f32 %v10432_v40  ;;  %12641 = vst [vmem:[#allocation122_spill] sm:$0xff] %v10443_v6  ;;  %v10448_v62 = vpop.eup %7888  ;;  %v10450_v37 = vmul.f32 0.00048828125, %v2197_v23  ;;  %v2371_v60 = vadd.f32 %v2370_v58, %v2369_v1  ;;  %v2478_v15 = vsel %vm2477_vm15, %v10354_v33, %v2476_v41 }
 0x4e7   : > { %v2201_v22 = vadd.f32 %v2200_v25, %v2199_v19  ;;  %v2448_v44 = vmul.f32 0.0004885198, %v2431_v4  ;;  %vm2479_vm0 = vcmp.eq.f32.partialorder %v10354_v33, 0.0  ;;  %v2480_v17 = vand.u32 2147483648, %v10354_v33 }
 0x4e8   : > { %12642 = vst [vmem:[#allocation123_spill] sm:$0xff] %v10450_v37  ;;  %v2374_v45 = vrot.slane %v2286_v46, 4  ;;  %v2416_v47 = vmul.f32 %v10450_v37, %v2197_v23  ;;  %v2372_v20 = vrot.slane %v2371_v60, 1  ;;  %v2204_v24 = vrot.slane %v2113_v55, 4  ;;  %v2289_v37 = vpop.xlane.xlu0 %2288 }
 0x4e9   : > { %v2202_v30 = vrot.slane %v2201_v22, 1  ;;  %7896 = vrsqrt.f32 %v10443_v6  ;;  %v2628_v49 = vsub.f32 %v10072_v32, %v10321_v61  ;;  %v2481_v1 = vsel %vm2479_vm0, %v2480_v17, %v2478_v15 }
 0x4ea   : > { %v2375_v19 = vadd.f32 %v2374_v45, %v2286_v46  ;;  %v2373_v58 = vadd.f32 %v2372_v20, %v2371_v60  ;;  %v2581_v4 = vadd.f32 1e-05, %v2481_v1  ;;  %v2205_v25 = vadd.f32 %v2204_v24, %v2113_v55 }
 0x4eb   : > { %v2203_v41 = vadd.f32 %v2202_v30, %v2201_v22  ;;  %v10459_v42 = vmax.f32 %v2448_v44, 0.0  ;;  %v2483_v23 = vmul.f32 %v10382_v9, %v10361_v56  ;;  %vm2484_vm15 = vcmp.eq.f32.partialorder %v10361_v56, inf }
 0x4ec   : > { %v2376_v33 = vrot.slane %v2375_v19, 2  ;;  %v2432_v26 = vsub.f32 %v2373_v58, %v2416_v47  ;;  %7898 = vrcp.f32 %v2581_v4  ;;  %v2206_v32 = vrot.slane %v2205_v25, 2 }
 0x4ed   : > { %v10464_v6 = vmul.f32 0.00048828125, %v2203_v41  ;;  %v10466_v61 = vpop.eup %7890  ;;  %v2631_v46 = vsub.f32 %v10089_v57, %v10336_v28  ;;  %v2485_v55 = vsel %vm2484_vm15, %v10361_v56, %v2483_v23  ;;  %v2487_v60 = vand.u32 2147483648, %v10361_v56 }
 0x4ee   : > { %v2377_v24 = vadd.f32 %v2376_v33, %v2375_v19  ;;  %v2449_v9 = vmul.f32 0.0004885198, %v2432_v26  ;;  %v2207_v15 = vadd.f32 %v2206_v32, %v2205_v25  ;;  %vm2486_vm0 = vcmp.eq.f32.partialorder %v10361_v56, 0.0 }
 0x4ef   : > { %v7893_v22 = vpop.eup %7892  ;;  %v2380_v44 = vrot.slane %v2289_v37, 4  ;;  %v2488_v30 = vsel %vm2486_vm0, %v2487_v60, %v2485_v55  ;;  %v2417_v1 = vmul.f32 %v10464_v6, %v2203_v41  ;;  %7900 = vrsqrt.f32 %v10459_v42 }
 0x4f0   : > { %v10473_v17 = vpop.eup %7894  ;;  %v2661_v45 = vmul.f32 %v7893_v22, %v2629_v31  ;;  %v2660_v47 = vmul.f32 %v7893_v22, %v2628_v49  ;;  %v2378_v20 = vrot.slane %v2377_v24, 1  ;;  %v2208_v57 = vrot.slane %v2207_v15, 1 }
 0x4f1   : > { %v2582_v19 = vadd.f32 1e-05, %v2488_v30  ;;  %v2381_v58 = vadd.f32 %v2380_v44, %v2289_v37  ;;  %v2630_v41 = vsub.f32 %v10086_v38, %v10336_v28  ;;  %v10490_v60 = vmax.f32 %v2449_v9, 0.0 }
 0x4f2   : > { %vm2693_vm15 = vcmp.gt.f32.partialorder %v2661_v45, 0.0  ;;  %v2725_v4 = vmul.f32 0.01, %v2661_v45  ;;  %vm2692_vm14 = vcmp.gt.f32.partialorder %v2660_v47, 0.0  ;;  %v2724_v33 = vmul.f32 0.01, %v2660_v47 }
 0x4f3   : > { %v2379_v26 = vadd.f32 %v2378_v20, %v2377_v24  ;;  %v2209_v56 = vadd.f32 %v2208_v57, %v2207_v15  ;;  %v2382_v25 = vrot.slane %v2381_v58, 2  ;;  %v10477_v23 = vpop.eup %7896  ;;  %7902 = vrcp.f32 %v2582_v19 }
 0x4f4   : > { %v10479_v31 = vsel %vm2693_vm15, %v2661_v45, %v2725_v4  ;;  %v10481_v49 = vsel %vm2692_vm14, %v2660_v47, %v2724_v33  ;;  %v2490_v24 = vmul.f32 %v10396_v48, %v10367_v0  ;;  %vm2491_vm14 = vcmp.eq.f32.partialorder %v10367_v0, inf }
 0x4f5   : > { %2948 = vmatprep.mubr.f32.mxu0 %v10479_v31  ;;  %v2433_v37 = vsub.f32 %v2379_v26, %v2417_v1  ;;  %v10486_v32 = vmul.f32 0.00048828125, %v2209_v56  ;;  %v2383_v55 = vadd.f32 %v2382_v25, %v2381_v58  ;;  %vm2493_vm0 = vcmp.eq.f32.partialorder %v10367_v0, 0.0 }
 0x4f6   : > { %2949 = vmatmul.mubr.f32.vlgmr.msra.gmra.mrb[76].mxu0 %v10481_v49  ;;  %v2494_v38 = vand.u32 2147483648, %v10367_v0  ;;  %v7899_v28 = vpop.eup %7898  ;;  %v12643_v44 = vpack.c.bf16 %v10295_v14, %v10293_v12  ;;  %v2492_v48 = vsel %vm2491_vm14, %v10367_v0, %v2490_v24  ;;  %v2633_v20 = vsub.f32 %v10103_v36, %v10345_v35 }
 0x4f7   : > { %v2450_v22 = vmul.f32 0.0004885198, %v2433_v37  ;;  %v2418_v15 = vmul.f32 %v10486_v32, %v2209_v56  ;;  %v2384_v45 = vrot.slane %v2383_v55, 1  ;;  %v2663_v9 = vmul.f32 %v7899_v28, %v2631_v46 }
 0x4f8   : > { %7263 = vmatpush3.bf16.msra.mxu0 %v12643_v44  ;;  %v2662_v47 = vmul.f32 %v7899_v28, %v2630_v41  ;;  %v2495_v30 = vsel %vm2493_vm0, %v2494_v38, %v2492_v48  ;;  %v12644_v1 = vpack.c.bf16 %v10299_v3, %v10297_v5  ;;  %v2497_v12 = vmul.f32 %v10401_v51, %v10369_v11  ;;  %v12651_v38 = vld [vmem:[#allocation82_spill] sm:$0xff]  ;;  %v12653_v44 = vld [vmem:[#allocation107_spill] sm:$0xff] }
 0x4f9   : > { %v10506_v57 = vmax.f32 %v2450_v22, 0.0  ;;  %v2385_v19 = vadd.f32 %v2384_v45, %v2383_v55  ;;  %v2583_v58 = vadd.f32 1e-05, %v2495_v30  ;;  %vm2695_vm15 = vcmp.gt.f32.partialorder %v2663_v9, 0.0  ;;  %v10525_v26 = vpop.eup %7900 }
 0x4fa   : > { %7265 = vmatprep.subr.bf16.mxu0 %v12644_v1  ;;  %v2727_v14 = vmul.f32 0.01, %v2663_v9  ;;  %vm2694_vm14 = vcmp.gt.f32.partialorder %v2662_v47, 0.0  ;;  %v2726_v0 = vmul.f32 0.01, %v2662_v47  ;;  %7904 = vrsqrt.f32 %v10490_v60 }
 0x4fb   : > { %v2434_v46 = vsub.f32 %v2385_v19, %v2418_v15  ;;  %v2632_v36 = vsub.f32 %v10100_v18, %v10345_v35  ;;  %vm2498_vm0 = vcmp.eq.f32.partialorder %v10369_v11, inf  ;;  %v12645_v5 = vpack.c.bf16 %v10303_v63, %v10301_v34  ;;  %v12652_v15 = vld [vmem:[#allocation108_spill] sm:$0xff]  ;;  %v12655_v19 = vld [vmem:[#allocation110_spill] sm:$0xff] }
 0x4fc   : > { %v10517_v3 = vsel %vm2695_vm15, %v2663_v9, %v2727_v14  ;;  %v10519_v4 = vsel %vm2694_vm14, %v2662_v47, %v2726_v0  ;;  %7906 = vrcp.f32 %v2583_v58  ;;  %v2499_v51 = vsel %vm2498_vm0, %v10369_v11, %v2497_v12  ;;  %v12656_v58 = vld [vmem:[#allocation109_spill] sm:$0xff] }
 0x4fd   : > { %7267 = vmatpush3.bf16.msra.mxu0 %v12645_v5  ;;  %v12646_v33 = vpack.c.bf16 %v10307_v13, %v10305_v7  ;;  %2954 = vmatprep.mubr.f32.mxu0 %v10517_v3  ;;  %7908 = vrsqrt.f32 %v10506_v57  ;;  %v2635_v18 = vsub.f32 %v10117_v43, %v10352_v16  ;;  %v2634_v34 = vsub.f32 %v10114_v53, %v10352_v16  ;;  %v7903_v35 = vpop.eup %7902  ;;  %v12647_v13 = vld [vmem:[#allocation116_spill] sm:$0xff]  ;;  %v12648_v53 = vld [vmem:[#allocation106_spill] sm:$0xff]  ;;  %v12649_v16 = vld [vmem:[#allocation105_spill] sm:$0xff] }
 0x4fe   : > { %v2501_v63 = vand.u32 2147483648, %v10369_v11  ;;  %2955 = vmatmul.mubr.f32.gmra.mrb[78].mxu0 %v10519_v4  ;;  %v2451_v56 = vmul.f32 0.0004885198, %v2434_v46  ;;  %vm2500_vm15 = vcmp.eq.f32.partialorder %v10369_v11, 0.0  ;;  %v2637_v7 = vsub.f32 %v10131_v50, %v10358_v8  ;;  %v12658_v0 = vld [vmem:[#allocation113_spill] sm:$0xff]  ;;  %v12659_v46 = vld [vmem:[#allocation84_spill] sm:$0xff] }
 0x4ff   : > { %7269 = vmatprep.subr.bf16.mxu0 %v12646_v33  ;;  %v2504_v25 = vmul.f32 %v10410_v27, %v12647_v13  ;;  %v2665_v41 = vmul.f32 %v7903_v35, %v2633_v20  ;;  %v2664_v37 = vmul.f32 %v7903_v35, %v2632_v36  ;;  %vm2505_vm14 = vcmp.eq.f32.partialorder %v12647_v13, inf  ;;  %v12661_v33 = vld [vmem:[#allocation111_spill] sm:$0xff] }
 0x500   : > { %v2502_v43 = vsel %vm2500_vm15, %v2501_v63, %v2499_v51  ;;  %v12650_v55 = vpack.c.bf16 %v12648_v53, %v12649_v16  ;;  %v2636_v28 = vsub.f32 %v12651_v38, %v10358_v8  ;;  %v2508_v22 = vand.u32 2147483648, %v12647_v13  ;;  %v12660_v51 = vld [vmem:[#allocation112_spill] sm:$0xff] }
 0x501   : > { %v2584_v24 = vadd.f32 1e-05, %v2502_v43  ;;  %v2506_v11 = vsel %vm2505_vm14, %v12647_v13, %v2504_v25  ;;  %v12654_v27 = vpack.c.bf16 %v12652_v15, %v12653_v44  ;;  %vm2697_vm0 = vcmp.gt.f32.partialorder %v2665_v41, 0.0  ;;  %v12666_v44 = vld [vmem:[#allocation86_spill] sm:$0xff] }
 0x502   : > { %7271 = vmatpush3.bf16.msra.mxu0 %v12650_v55  ;;  %v2729_v45 = vmul.f32 0.01, %v2665_v41  ;;  %vm2696_vm15 = vcmp.gt.f32.partialorder %v2664_v37, 0.0  ;;  %vm2507_vm13 = vcmp.eq.f32.partialorder %v12647_v13, 0.0  ;;  %v2728_v48 = vmul.f32 0.01, %v2664_v37 }
 0x503   : > { %7273 = vmatprep.subr.bf16.mxu0 %v12654_v27  ;;  %7910 = vrcp.f32 %v2584_v24  ;;  %v2509_v9 = vsel %vm2507_vm13, %v2508_v22, %v2506_v11  ;;  %v2511_v47 = vmul.f32 %v10430_v52, %v10391_v10  ;;  %v10556_v30 = vmax.f32 %v2451_v56, 0.0  ;;  %v12663_v56 = vld [vmem:[#allocation83_spill] sm:$0xff] }
 0x504   : > { %v10554_v20 = vsel %vm2697_vm0, %v2665_v41, %v2729_v45  ;;  %v2585_v1 = vadd.f32 1e-05, %v2509_v9  ;;  %vm2512_vm14 = vcmp.eq.f32.partialorder %v10391_v10, inf  ;;  %v12657_v12 = vpack.c.bf16 %v12655_v19, %v12656_v58  ;;  %v10572_v35 = vpop.eup %7904  ;;  %v12669_v19 = vld [vmem:[#allocation88_spill] sm:$0xff] }
 0x505   : > { %2960 = vmatprep.mubr.f32.mxu0 %v10554_v20  ;;  %v10563_v14 = vsel %vm2696_vm15, %v2664_v37, %v2728_v48  ;;  %v2639_v36 = vsub.f32 %v12659_v46, %v12658_v0  ;;  %v2513_v52 = vsel %vm2512_vm14, %v10391_v10, %v2511_v47  ;;  %v2515_v5 = vand.u32 2147483648, %v10391_v10  ;;  %v12667_v48 = vld [vmem:[#allocation85_spill] sm:$0xff] }
 0x506   : > { %7275 = vmatpush3.bf16.msra.mxu0 %v12657_v12  ;;  %v12662_v63 = vpack.c.bf16 %v12660_v51, %v12661_v33  ;;  %7912 = vrcp.f32 %v2585_v1  ;;  %v2638_v13 = vsub.f32 %v12663_v56, %v12658_v0  ;;  %vm2514_vm13 = vcmp.eq.f32.partialorder %v10391_v10, 0.0  ;;  %v7907_v41 = vpop.eup %7906  ;;  %v12668_v1 = vld [vmem:[#allocation115_spill] sm:$0xff] }
 0x507   : > { %2961 = vmatmul.mubr.f32.gmra.mrb[80].mxu0 %v10563_v14  ;;  %v2518_v25 = vmul.f32 %v10435_v54, %v10398_v29  ;;  %v2516_v37 = vsel %vm2514_vm13, %v2515_v5, %v2513_v52  ;;  %vm2519_vm0 = vcmp.eq.f32.partialorder %v10398_v29, inf  ;;  %vm2521_vm15 = vcmp.eq.f32.partialorder %v10398_v29, 0.0  ;;  %v10583_v53 = vpop.eup %7908  ;;  %v12670_v56 = vld [vmem:[#allocation87_spill] sm:$0xff] }
 0x508   : > { %7277 = vmatprep.subr.bf16.mxu0 %v12662_v63  ;;  %v2522_v43 = vand.u32 2147483648, %v10398_v29  ;;  %v2667_v16 = vmul.f32 %v7907_v41, %v2635_v18  ;;  %v2666_v55 = vmul.f32 %v7907_v41, %v2634_v34  ;;  %v2586_v24 = vadd.f32 1e-05, %v2516_v37  ;;  %v12665_v34 = vld [vmem:[#allocation114_spill] sm:$0xff] }
 0x509   : > { %v2520_v11 = vsel %vm2519_vm0, %v10398_v29, %v2518_v25  ;;  %v12664_v10 = vpack.c.bf16 %v10428_v39, %v10426_v59  ;;  %7914 = vrsqrt.f32 %v10556_v30  ;;  %v2525_v22 = vmul.f32 %v10448_v62, %v10406_v21 }
 0x50a   : > { %v2523_v54 = vsel %vm2521_vm15, %v2522_v43, %v2520_v11  ;;  %vm2526_vm14 = vcmp.eq.f32.partialorder %v10406_v21, inf  ;;  %vm2699_vm13 = vcmp.gt.f32.partialorder %v2667_v16, 0.0  ;;  %v2731_v15 = vmul.f32 0.01, %v2667_v16 }
 0x50b   : > { %7279 = vmatpush3.bf16.msra.mxu0 %v12664_v10  ;;  %vm2698_vm12 = vcmp.gt.f32.partialorder %v2666_v55, 0.0  ;;  %v2730_v18 = vmul.f32 0.01, %v2666_v55  ;;  %7916 = vrcp.f32 %v2586_v24  ;;  %v2641_v29 = vsub.f32 %v12666_v44, %v12665_v34 }
 0x50c   : > { %v2587_v27 = vadd.f32 1e-05, %v2523_v54  ;;  %v2527_v59 = vsel %vm2526_vm14, %v10406_v21, %v2525_v22  ;;  %v10596_v39 = vsel %vm2699_vm13, %v2667_v16, %v2731_v15  ;;  %v2640_v62 = vsub.f32 %v12667_v48, %v12665_v34 }
 0x50d   : > { %v10598_v45 = vsel %vm2698_vm12, %v2666_v55, %v2730_v18  ;;  %v2529_v9 = vand.u32 2147483648, %v10406_v21  ;;  %v7911_v47 = vpop.eup %7910  ;;  %2966 = vmatprep.mubr.f32.mxu0 %v10596_v39  ;;  %v2643_v58 = vsub.f32 %v12669_v19, %v12668_v1  ;;  %vm2528_vm0 = vcmp.eq.f32.partialorder %v10406_v21, 0.0  ;;  %v12673_v55 = vld [vmem:[#allocation89_spill] sm:$0xff] }
 0x50e   : > { %7918 = vrcp.f32 %v2587_v27  ;;  %v2532_v12 = vmul.f32 %v10466_v61, %v10419_v2  ;;  %2967 = vmatmul.mubr.f32.gmra.mrb[82].mxu0 %v10598_v45  ;;  %v2669_v0 = vmul.f32 %v7911_v47, %v2637_v7  ;;  %v2668_v46 = vmul.f32 %v7911_v47, %v2636_v28  ;;  %v12676_v47 = vld [vmem:[#allocation122_spill] sm:$0xff] }
 0x50f   : > { %v2530_v52 = vsel %vm2528_vm0, %v2529_v9, %v2527_v59  ;;  %vm2533_vm12 = vcmp.eq.f32.partialorder %v10419_v2, inf  ;;  %vm2535_vm15 = vcmp.eq.f32.partialorder %v10419_v2, 0.0  ;;  %v2536_v21 = vand.u32 2147483648, %v10419_v2  ;;  %v12674_v59 = vld [vmem:[#allocation118_spill] sm:$0xff] }
 0x510   : > { %v2588_v5 = vadd.f32 1e-05, %v2530_v52  ;;  %v2534_v51 = vsel %vm2533_vm12, %v10419_v2, %v2532_v12  ;;  %v7913_v61 = vpop.eup %7912  ;;  %vm2701_vm14 = vcmp.gt.f32.partialorder %v2669_v0, 0.0  ;;  %v2733_v33 = vmul.f32 0.01, %v2669_v0 }
 0x511   : > { %vm2700_vm13 = vcmp.gt.f32.partialorder %v2668_v46, 0.0  ;;  %v2732_v50 = vmul.f32 0.01, %v2668_v46  ;;  %v2671_v7 = vmul.f32 %v7913_v61, %v2639_v36  ;;  %v2670_v63 = vmul.f32 %v7913_v61, %v2638_v13  ;;  %v12671_v36 = vld [vmem:[#allocation117_spill] sm:$0xff]  ;;  %v12672_v13 = vld [vmem:[#allocation90_spill] sm:$0xff] }
 0x512   : > { %7920 = vrcp.f32 %v2588_v5  ;;  %v2537_v8 = vsel %vm2535_vm15, %v2536_v21, %v2534_v51  ;;  %v10620_v38 = vsel %vm2701_vm14, %v2669_v0, %v2733_v33  ;;  %v2642_v25 = vsub.f32 %v12670_v56, %v12668_v1  ;;  %v12677_v56 = vld [vmem:[#allocation91_spill] sm:$0xff] }
 0x513   : > { %v10622_v28 = vsel %vm2700_vm13, %v2668_v46, %v2732_v50  ;;  %v2589_v41 = vadd.f32 1e-05, %v2537_v8  ;;  %v10626_v37 = vpop.eup %7914  ;;  %2972 = vmatprep.mubr.f32.mxu0 %v10620_v38  ;;  %vm2703_vm0 = vcmp.gt.f32.partialorder %v2671_v7, 0.0  ;;  %v2735_v2 = vmul.f32 0.01, %v2671_v7  ;;  %v2868_v50 = vld [vmem:[#allocation11 + $0x280] sm:$0xff] }
 0x514   : > { %vm2702_vm12 = vcmp.gt.f32.partialorder %v2670_v63, 0.0  ;;  %v2734_v43 = vmul.f32 0.01, %v2670_v63  ;;  %2973 = vmatmul.mubr.f32.gmra.mrb[84].mxu0 %v10622_v28  ;;  %v2645_v16 = vsub.f32 %v12672_v13, %v12671_v36  ;;  %v2644_v24 = vsub.f32 %v12673_v55, %v12671_v36 }
 0x515   : > { %7922 = vrcp.f32 %v2589_v41  ;;  %v2539_v11 = vmul.f32 %v10473_v17, %v10432_v40  ;;  %v7917_v10 = vpop.eup %7916  ;;  %v10636_v54 = vsel %vm2703_vm0, %v2671_v7, %v2735_v2  ;;  %vm2540_vm15 = vcmp.eq.f32.partialorder %v10432_v40, inf  ;;  %v12675_v17 = vld [vmem:[#allocation92_spill] sm:$0xff]  ;;  %v2871_v7 = vld [vmem:[#allocation11 + $0x298] sm:$0xff] }
 0x516   : > { %v10638_v22 = vsel %vm2702_vm12, %v2670_v63, %v2734_v43  ;;  %v2543_v15 = vand.u32 2147483648, %v10432_v40  ;;  %2978 = vmatprep.mubr.f32.mxu0 %v10636_v54  ;;  %v2673_v18 = vmul.f32 %v7917_v10, %v2641_v29  ;;  %v2672_v34 = vmul.f32 %v7917_v10, %v2640_v62 }
 0x517   : > { %v2541_v44 = vsel %vm2540_vm15, %v10432_v40, %v2539_v11  ;;  %vm2542_vm14 = vcmp.eq.f32.partialorder %v10432_v40, 0.0  ;;  %v2647_v48 = vsub.f32 %v12675_v17, %v12674_v59  ;;  %v2546_v1 = vmul.f32 %v10477_v23, %v12676_v47 }
 0x518   : > { %v7919_v27 = vpop.eup %7918  ;;  %v2544_v9 = vsel %vm2542_vm14, %v2543_v15, %v2541_v44  ;;  %vm2547_vm13 = vcmp.eq.f32.partialorder %v12676_v47, inf  ;;  %2979 = vmatmul.mubr.f32.gmra.mrb[86].mxu0 %v10638_v22  ;;  %vm2705_vm0 = vcmp.gt.f32.partialorder %v2673_v18, 0.0  ;;  %v2737_v19 = vmul.f32 0.01, %v2673_v18  ;;  %v2820_v15 = vld [vmem:[#allocation11 + $0x100] sm:$0xff] }
 0x519   : > { %vm2704_vm12 = vcmp.gt.f32.partialorder %v2672_v34, 0.0  ;;  %v2736_v29 = vmul.f32 0.01, %v2672_v34  ;;  %v2675_v62 = vmul.f32 %v7919_v27, %v2643_v58  ;;  %v2674_v12 = vmul.f32 %v7919_v27, %v2642_v25  ;;  %v12678_v27 = vld [vmem:[#allocation119_spill] sm:$0xff] }
 0x51a   : > { %v2590_v0 = vadd.f32 1e-05, %v2544_v9  ;;  %v2548_v40 = vsel %vm2547_vm13, %v12676_v47, %v2546_v1  ;;  %v10652_v46 = vsel %vm2705_vm0, %v2673_v18, %v2737_v19  ;;  %vm2549_vm15 = vcmp.eq.f32.partialorder %v12676_v47, 0.0  ;;  %v2823_v18 = vld [vmem:[#allocation11 + $0x118] sm:$0xff]  ;;  %v12681_v19 = vld [vmem:[#allocation120_spill] sm:$0xff] }
 0x51b   : > { %v10654_v52 = vsel %vm2704_vm12, %v2672_v34, %v2736_v29  ;;  %v2550_v23 = vand.u32 2147483648, %v12676_v47  ;;  %2984 = vmatprep.mubr.f32.mxu0 %v10652_v46  ;;  %vm2707_vm14 = vcmp.gt.f32.partialorder %v2675_v62, 0.0  ;;  %v2739_v51 = vmul.f32 0.01, %v2675_v62  ;;  %v12682_v29 = vld [vmem:[#allocation96_spill] sm:$0xff] }
 0x51c   : > { %v7921_v5 = vpop.eup %7920  ;;  %vm2706_vm11 = vcmp.gt.f32.partialorder %v2674_v12, 0.0  ;;  %v2738_v21 = vmul.f32 0.01, %v2674_v12  ;;  %2985 = vmatmul.mubr.f32.gmra.mrb[88].mxu0 %v10654_v52  ;;  %7924 = vrcp.f32 %v2590_v0  ;;  %v2646_v25 = vsub.f32 %v12677_v56, %v12674_v59  ;;  %v12679_v59 = vld [vmem:[#allocation94_spill] sm:$0xff]  ;;  %v2874_v0 = vld [vmem:[#allocation11 + $0x2b0] sm:$0xff] }
 0x51d   : > { %v2677_v58 = vmul.f32 %v7921_v5, %v2645_v16  ;;  %v2676_v61 = vmul.f32 %v7921_v5, %v2644_v24  ;;  %v2551_v33 = vsel %vm2549_vm15, %v2550_v23, %v2548_v40  ;;  %v10660_v63 = vsel %vm2707_vm14, %v2675_v62, %v2739_v51  ;;  %v2877_v40 = vld [vmem:[#allocation11 + $0x2c8] sm:$0xff] }
 0x51e   : > { %v10662_v8 = vsel %vm2706_vm11, %v2674_v12, %v2738_v21  ;;  %v2591_v41 = vadd.f32 1e-05, %v2551_v33  ;;  %2990 = vmatprep.mubr.f32.mxu0 %v10660_v63  ;;  %v7280_v55 = vpack.c.bf16 %v2871_v7, %v2868_v50  ;;  %v2553_v10 = vmul.f32 %v10525_v26, %v10459_v42  ;;  %v12683_v5 = vld [vmem:[#allocation95_spill] sm:$0xff] }
 0x51f   : > { %v7923_v2 = vpop.eup %7922  ;;  %vm2709_vm13 = vcmp.gt.f32.partialorder %v2677_v58, 0.0  ;;  %v2741_v43 = vmul.f32 0.01, %v2677_v58  ;;  %vm2708_vm0 = vcmp.gt.f32.partialorder %v2676_v61, 0.0  ;;  %v2740_v36 = vmul.f32 0.01, %v2676_v61 }
 0x520   : > { %v2679_v13 = vmul.f32 %v7923_v2, %v2647_v48  ;;  %v2678_v16 = vmul.f32 %v7923_v2, %v2646_v25  ;;  %7926 = vrcp.f32 %v2591_v41  ;;  %2991 = vmatmul.mubr.f32.gmra.mrb[90].mxu0 %v10662_v8  ;;  %vm2554_vm11 = vcmp.eq.f32.partialorder %v10459_v42, inf  ;;  %7281 = vmatprep.subr.bf16.mxu0 %v7280_v55  ;;  %v12680_v48 = vld [vmem:[#allocation93_spill] sm:$0xff] }
 0x521   : > { %v10668_v24 = vsel %vm2709_vm13, %v2677_v58, %v2741_v43  ;;  %v10670_v11 = vsel %vm2708_vm0, %v2676_v61, %v2740_v36  ;;  %v2649_v17 = vsub.f32 %v12679_v59, %v12678_v27  ;;  %v2648_v9 = vsub.f32 %v12680_v48, %v12678_v27  ;;  %v2880_v59 = vld [vmem:[#allocation11 + $0x2e0] sm:$0xff] }
 0x522   : > { %2996 = vmatprep.mubr.f32.mxu0 %v10668_v24  ;;  %vm2711_vm12 = vcmp.gt.f32.partialorder %v2679_v13, 0.0  ;;  %v2743_v34 = vmul.f32 0.01, %v2679_v13  ;;  %vm2710_vm15 = vcmp.gt.f32.partialorder %v2678_v16, 0.0  ;;  %v2742_v44 = vmul.f32 0.01, %v2678_v16 }
 0x523   : > { %v2555_v47 = vsel %vm2554_vm11, %v10459_v42, %v2553_v10  ;;  %v2557_v26 = vand.u32 2147483648, %v10459_v42  ;;  %v2651_v62 = vsub.f32 %v12682_v29, %v12681_v19  ;;  %vm2556_vm14 = vcmp.eq.f32.partialorder %v10459_v42, 0.0 }
 0x524   : > { %v10682_v1 = vsel %vm2711_vm12, %v2679_v13, %v2743_v34  ;;  %v7282_v12 = vpack.c.bf16 %v2823_v18, %v2820_v15  ;;  %2997 = vmatmul.mubr.f32.gmra.mrb[92].mxu0 %v10670_v11  ;;  %v10688_v23 = vsel %vm2710_vm15, %v2678_v16, %v2742_v44  ;;  %v2650_v51 = vsub.f32 %v12683_v5, %v12681_v19  ;;  %v2826_v15 = vld [vmem:[#allocation11 + $0x130] sm:$0xff]  ;;  %v2829_v18 = vld [vmem:[#allocation11 + $0x148] sm:$0xff]  ;;  %v2835_v19 = vld [vmem:[#allocation11 + $0x178] sm:$0xff] }
 0x525   : > { %v2558_v21 = vsel %vm2556_vm14, %v2557_v26, %v2555_v47  ;;  %v2560_v58 = vmul.f32 %v10572_v35, %v10490_v60  ;;  %3002 = vmatprep.mubr.f32.mxu0 %v10682_v1  ;;  %vm2561_vm13 = vcmp.eq.f32.partialorder %v10490_v60, inf  ;;  %vm2563_vm0 = vcmp.eq.f32.partialorder %v10490_v60, 0.0  ;;  %v2883_v47 = vld [vmem:[#allocation11 + $0x2f8] sm:$0xff]  ;;  %v2832_v26 = vld [vmem:[#allocation11 + $0x160] sm:$0xff] }
 0x526   : > { %v2592_v61 = vadd.f32 1e-05, %v2558_v21  ;;  %7283 = vmatpush3.bf16.msra.mxu0 %v7282_v12  ;;  %v2564_v42 = vand.u32 2147483648, %v10490_v60  ;;  %v7925_v33 = vpop.eup %7924  ;;  %v7284_v7 = vpack.c.bf16 %v2877_v40, %v2874_v0  ;;  %v2567_v56 = vmul.f32 %v10583_v53, %v10506_v57  ;;  %v12684_v12 = vld [vmem:[#allocation121_spill] sm:$0xff]  ;;  %v12685_v0 = vld [vmem:[#allocation98_spill] sm:$0xff] }
 0x527   : > { %v2562_v50 = vsel %vm2561_vm13, %v10490_v60, %v2560_v58  ;;  %vm2568_vm11 = vcmp.eq.f32.partialorder %v10506_v57, inf  ;;  %v2681_v35 = vmul.f32 %v7925_v33, %v2649_v17  ;;  %v2680_v25 = vmul.f32 %v7925_v33, %v2648_v9 }
 0x528   : > { %7928 = vrcp.f32 %v2592_v61  ;;  %v2565_v41 = vsel %vm2563_vm0, %v2564_v42, %v2562_v50  ;;  %3003 = vmatmul.mubr.f32.gmra.mrb[94].mxu0 %v10688_v23  ;;  %7285 = vmatprep.subr.bf16.mxu0 %v7284_v7  ;;  %v2569_v43 = vsel %vm2568_vm11, %v10506_v57, %v2567_v56  ;;  %vm2570_vm12 = vcmp.eq.f32.partialorder %v10506_v57, 0.0 }
 0x529   : > { %v2593_v2 = vadd.f32 1e-05, %v2565_v41  ;;  %v2571_v60 = vand.u32 2147483648, %v10506_v57  ;;  %vm2713_vm15 = vcmp.gt.f32.partialorder %v2681_v35, 0.0  ;;  %v2745_v13 = vmul.f32 0.01, %v2681_v35 }
 0x52a   : > { %v7927_v36 = vpop.eup %7926  ;;  %vm2712_vm14 = vcmp.gt.f32.partialorder %v2680_v25, 0.0  ;;  %v2744_v53 = vmul.f32 0.01, %v2680_v25  ;;  %v7286_v48 = vpack.c.bf16 %v2829_v18, %v2826_v15  ;;  %v2574_v9 = vmul.f32 %v10626_v37, %v10556_v30  ;;  %v12686_v37 = vld [vmem:[#allocation97_spill] sm:$0xff] }
 0x52b   : > { %v2683_v16 = vmul.f32 %v7927_v36, %v2651_v62  ;;  %v2682_v55 = vmul.f32 %v7927_v36, %v2650_v51  ;;  %7930 = vrcp.f32 %v2593_v2  ;;  %v2572_v10 = vsel %vm2570_vm12, %v2571_v60, %v2569_v43  ;;  %v12689_v2 = vld [vmem:[#allocation99_spill] sm:$0xff]  ;;  %v12691_v18 = vld [vmem:[#allocation101_spill] sm:$0xff] }
 0x52c   : > { %v10706_v34 = vsel %vm2713_vm15, %v2681_v35, %v2745_v13  ;;  %v10708_v44 = vsel %vm2712_vm14, %v2680_v25, %v2744_v53  ;;  %v2594_v27 = vadd.f32 1e-05, %v2572_v10  ;;  %vm2575_vm11 = vcmp.eq.f32.partialorder %v10556_v30, inf  ;;  %7287 = vmatpush3.bf16.msra.mxu0 %v7286_v48  ;;  %v12687_v35 = vld [vmem:[#allocation123_spill] sm:$0xff]  ;;  %v12688_v25 = vld [vmem:[#allocation100_spill] sm:$0xff]  ;;  %v12690_v10 = vld [vmem:[#allocation102_spill] sm:$0xff] }
 0x52d   : > { %3008 = vmatprep.mubr.f32.mxu0 %v10706_v34  ;;  %vm2715_vm13 = vcmp.gt.f32.partialorder %v2683_v16, 0.0  ;;  %v2747_v57 = vmul.f32 0.01, %v2683_v16  ;;  %vm2714_vm0 = vcmp.gt.f32.partialorder %v2682_v55, 0.0  ;;  %v2746_v17 = vmul.f32 0.01, %v2682_v55 }
 0x52e   : > { %3009 = vmatmul.mubr.f32.gmra.mrb[96].mxu0 %v10708_v44  ;;  %7932 = vrcp.f32 %v2594_v27  ;;  %v2653_v40 = vsub.f32 %v12685_v0, %v12684_v12  ;;  %v2576_v5 = vsel %vm2575_vm11, %v10556_v30, %v2574_v9  ;;  %v2578_v51 = vand.u32 2147483648, %v10556_v30 }
 0x52f   : > { %v10714_v29 = vsel %vm2715_vm13, %v2683_v16, %v2747_v57  ;;  %v10716_v62 = vsel %vm2714_vm0, %v2682_v55, %v2746_v17  ;;  %v2652_v21 = vsub.f32 %v12686_v37, %v12684_v12  ;;  %vm2577_vm12 = vcmp.eq.f32.partialorder %v10556_v30, 0.0 }
 0x530   : > { %3014 = vmatprep.mubr.f32.mxu0 %v10714_v29  ;;  %v7288_v58 = vpack.c.bf16 %v2883_v47, %v2880_v59  ;;  %v7290_v61 = vpack.c.bf16 %v2835_v19, %v2832_v26  ;;  %v2579_v33 = vsel %vm2577_vm12, %v2578_v51, %v2576_v5  ;;  %v2655_v41 = vsub.f32 %v12688_v25, %v12687_v35  ;;  %v12693_v51 = vld [vmem:[#allocation103_spill] sm:$0xff] }
 0x531   : > { %v2595_v56 = vadd.f32 1e-05, %v2579_v33  ;;  %v2654_v43 = vsub.f32 %v12689_v2, %v12687_v35  ;;  %v2657_v15 = vsub.f32 %v12690_v10, %v10464_v6  ;;  %v2656_v27 = vsub.f32 %v12691_v18, %v10464_v6 }
 0x532   : > { %v7929_v42 = vpop.eup %7928  ;;  %3015 = vmatmul.mubr.f32.gmra.mrb[98].mxu0 %v10716_v62  ;;  %7289 = vmatprep.subr.bf16.mxu0 %v7288_v58  ;;  %v2658_v37 = vsub.f32 %v12693_v51, %v10486_v32 }
 0x533   : > { %v2685_v50 = vmul.f32 %v7929_v42, %v2653_v40  ;;  %v2684_v7 = vmul.f32 %v7929_v42, %v2652_v21  ;;  %7291 = vmatpush3.bf16.msra.mxu0 %v7290_v61  ;;  %7934 = vrcp.f32 %v2595_v56  ;;  %v12692_v40 = vld [vmem:[#allocation104_spill] sm:$0xff] }
 0x534   : > { %v2659_v5 = vsub.f32 %v12692_v40, %v10486_v32 }
 0x535   : > { %v7931_v60 = vpop.eup %7930  ;;  %vm2717_vm15 = vcmp.gt.f32.partialorder %v2685_v50, 0.0  ;;  %v2749_v30 = vmul.f32 0.01, %v2685_v50  ;;  %vm2716_vm14 = vcmp.gt.f32.partialorder %v2684_v7, 0.0  ;;  %v2748_v36 = vmul.f32 0.01, %v2684_v7 }
 0x536   : > { %v2687_v13 = vmul.f32 %v7931_v60, %v2655_v41  ;;  %v2686_v53 = vmul.f32 %v7931_v60, %v2654_v43 }
 0x537   : > { %v2781_v16 = vsel %vm2717_vm15, %v2685_v50, %v2749_v30  ;;  %v2780_v55 = vsel %vm2716_vm14, %v2684_v7, %v2748_v36 }
 0x538   : > { %v7933_v59 = vpop.eup %7932  ;;  %3020 = vmatprep.mubr.f32.mxu0 %v2781_v16  ;;  %vm2719_vm13 = vcmp.gt.f32.partialorder %v2687_v13, 0.0  ;;  %v2751_v57 = vmul.f32 0.01, %v2687_v13  ;;  %vm2718_vm0 = vcmp.gt.f32.partialorder %v2686_v53, 0.0  ;;  %v2750_v17 = vmul.f32 0.01, %v2686_v53 }
 0x539   : > { %3021 = vmatmul.mubr.f32.gmra.mrb[100].mxu0 %v2780_v55  ;;  %v2689_v48 = vmul.f32 %v7933_v59, %v2657_v15  ;;  %v2688_v9 = vmul.f32 %v7933_v59, %v2656_v27 }
 0x53a   : > { %v2783_v47 = vsel %vm2719_vm13, %v2687_v13, %v2751_v57  ;;  %v2782_v26 = vsel %vm2718_vm0, %v2686_v53, %v2750_v17 }
 0x53b   : > { %3026 = vmatprep.mubr.f32.mxu0 %v2783_v47  ;;  %vm2721_vm11 = vcmp.gt.f32.partialorder %v2689_v48, 0.0  ;;  %v2753_v19 = vmul.f32 0.01, %v2689_v48  ;;  %vm2720_vm12 = vcmp.gt.f32.partialorder %v2688_v9, 0.0  ;;  %v2752_v12 = vmul.f32 0.01, %v2688_v9 }
 0x53d   : > { %3027 = vmatmul.mubr.f32.gmra.mrb[102].mxu0 %v2782_v26  ;;  %v2785_v0 = vsel %vm2721_vm11, %v2689_v48, %v2753_v19  ;;  %v2784_v6 = vsel %vm2720_vm12, %v2688_v9, %v2752_v12  ;;  %v7935_v21 = vpop.eup %7934 }
 0x53e   : > { %3032 = vmatprep.mubr.f32.mxu0 %v2785_v0  ;;  %v2691_v58 = vmul.f32 %v7935_v21, %v2659_v5  ;;  %v2690_v61 = vmul.f32 %v7935_v21, %v2658_v37 }
 0x540   : > { %vm2723_vm15 = vcmp.gt.f32.partialorder %v2691_v58, 0.0  ;;  %v2755_v42 = vmul.f32 0.01, %v2691_v58  ;;  %vm2722_vm14 = vcmp.gt.f32.partialorder %v2690_v61, 0.0  ;;  %v2754_v33 = vmul.f32 0.01, %v2690_v61 }
 0x541   : > { %3033 = vmatmul.mubr.f32.gmra.mrb[104].mxu0 %v2784_v6 }
 0x542   : > { %v2787_v50 = vsel %vm2723_vm15, %v2691_v58, %v2755_v42  ;;  %v2786_v7 = vsel %vm2722_vm14, %v2690_v61, %v2754_v33 }
 0x543   : > { %3038 = vmatprep.mubr.f32.mxu0 %v2787_v50 }
 0x545   : > { %3039 = vmatmul.mubr.f32.gmra.mrb[106].mxu0 %v2786_v7 }
 0x546   : > { %3109 = vmatprep.mubr.f32.mxu0 %v10479_v31  ;;  %v12694_v31 = vmov 1.0  }
 0x549   : > { %3110 = vmatmul.mubr.f32.vlgmr.msra.gmra.mrb[108].mxu0 %v10481_v49  ;;  %v12695_v49 = vld [vmem:[#allocation37_spill] sm:$0xff] }
 0x54a   : > { %3114 = vmatprep.mubr.f32.mxu0 %v10517_v3 }
 0x54d   : > { %3115 = vmatmul.mubr.f32.gmra.mrb[110].mxu0 %v10519_v4 }
 0x54e   : > { %3119 = vmatprep.mubr.f32.mxu0 %v10554_v20 }
 0x551   : > { %3120 = vmatmul.mubr.f32.gmra.mrb[112].mxu0 %v10563_v14 }
 0x552   : > { %3124 = vmatprep.mubr.f32.mxu0 %v10596_v39 }
 0x555   : > { %3125 = vmatmul.mubr.f32.gmra.mrb[114].mxu0 %v10598_v45 }
 0x556   : > { %3129 = vmatprep.mubr.f32.mxu0 %v10620_v38 }
 0x559   : > { %3130 = vmatmul.mubr.f32.gmra.mrb[116].mxu0 %v10622_v28 }
 0x55a   : > { %3134 = vmatprep.mubr.f32.mxu0 %v10636_v54 }
 0x55d   : > { %3135 = vmatmul.mubr.f32.gmra.mrb[118].mxu0 %v10638_v22 }
 0x55e   : > { %3139 = vmatprep.mubr.f32.mxu0 %v10652_v46 }
 0x561   : > { %3140 = vmatmul.mubr.f32.gmra.mrb[120].mxu0 %v10654_v52 }
 0x562   : > { %3144 = vmatprep.mubr.f32.mxu0 %v10660_v63 }
 0x565   : > { %3145 = vmatmul.mubr.f32.gmra.mrb[122].mxu0 %v10662_v8 }
 0x566   : > { %3149 = vmatprep.mubr.f32.mxu0 %v10668_v24 }
 0x569   : > { %3150 = vmatmul.mubr.f32.gmra.mrb[124].mxu0 %v10670_v11 }
 0x56a   : > { %3154 = vmatprep.mubr.f32.mxu0 %v10682_v1 }
 0x56d   : > { %3155 = vmatmul.mubr.f32.gmra.mrb[126].mxu0 %v10688_v23 }
 0x56e   : > { %3159 = vmatprep.mubr.f32.mxu0 %v10706_v34 }
 0x571   : > { %3160 = vmatmul.mubr.f32.gmra.mrb[128].mxu0 %v10708_v44 }
 0x572   : > { %3164 = vmatprep.mubr.f32.mxu0 %v10714_v29 }
 0x575   : > { %3165 = vmatmul.mubr.f32.gmra.mrb[130].mxu0 %v10716_v62 }
 0x576   : > { %3169 = vmatprep.mubr.f32.mxu0 %v2781_v16 }
 0x579   : > { %3170 = vmatmul.mubr.f32.gmra.mrb[132].mxu0 %v2780_v55 }
 0x57a   : > { %3174 = vmatprep.mubr.f32.mxu0 %v2783_v47 }
 0x57d   : > { %3175 = vmatmul.mubr.f32.gmra.mrb[134].mxu0 %v2782_v26 }
 0x57e   : > { %3179 = vmatprep.mubr.f32.mxu0 %v2785_v0 }
 0x581   : > { %3180 = vmatmul.mubr.f32.gmra.mrb[136].mxu0 %v2784_v6 }
 0x582   : > { %3184 = vmatprep.mubr.f32.mxu0 %v2787_v50 }
 0x585   : > { %3185 = vmatmul.mubr.f32.gmra.mrb[138].mxu0 %v2786_v7 }
 0x586   : > { %6766 = vmatprep.mubr.msk.f32.mxu0 %vm788_vm1, %v12694_v31 }
 0x5c9   : > { %v2950_v3 = vpop.f32.mrb[76].mxu0 }
 0x5ca   : > { %v2952_v4 = vpop.f32.mrb[77].mxu0 }
 0x5d1   : > { %v2956_v20 = vpop.f32.mrb[78].mxu0 }
 0x5d2   : > { %v10768_v14 = vpack.c.bf16 %v2956_v20, %v2950_v3  ;;  %v2958_v39 = vpop.f32.mrb[79].mxu0 }
 0x5d3   : > { %v7292_v45 = vpack.c.bf16 %v2958_v39, %v2952_v4 }
 0x5d5   : > { %7293 = vmatprep.subr.bf16.mxu0 %v7292_v45 }
 0x5d6   : > { %7295 = vmatpush3.bf16.msra.mxu0 %v7292_v45 }
 0x5da   : > { %v2962_v38 = vpop.f32.mrb[80].mxu0 }
 0x5db   : > { %v2964_v28 = vpop.f32.mrb[81].mxu0 }
 0x5e1   : > { %v2968_v54 = vpop.f32.mrb[82].mxu0 }
 0x5e2   : > { %v10770_v22 = vpack.c.bf16 %v2968_v54, %v2962_v38  ;;  %v2970_v46 = vpop.f32.mrb[83].mxu0 }
 0x5e3   : > { %v7296_v52 = vpack.c.bf16 %v2970_v46, %v2964_v28 }
 0x5e5   : > { %7297 = vmatprep.subr.bf16.mxu0 %v7296_v52 }
 0x5e6   : > { %7299 = vmatpush3.bf16.msra.mxu0 %v7296_v52 }
 0x5e7   : > { %v2974_v63 = vpop.f32.mrb[84].mxu0 }
 0x5e8   : > { %v2976_v8 = vpop.f32.mrb[85].mxu0 }
 0x5eb   : > { %v2980_v24 = vpop.f32.mrb[86].mxu0 }
 0x5ec   : > { %v10772_v11 = vpack.c.bf16 %v2980_v24, %v2974_v63  ;;  %v2982_v1 = vpop.f32.mrb[87].mxu0 }
 0x5ed   : > { %v7300_v23 = vpack.c.bf16 %v2982_v1, %v2976_v8 }
 0x5ef   : > { %v2986_v34 = vpop.f32.mrb[88].mxu0  ;;  %7301 = vmatprep.subr.bf16.mxu0 %v7300_v23 }
 0x5f0   : > { %v2988_v44 = vpop.f32.mrb[89].mxu0  ;;  %7303 = vmatpush3.bf16.msra.mxu0 %v7300_v23 }
 0x5f3   : > { %v2992_v29 = vpop.f32.mrb[90].mxu0 }
 0x5f4   : > { %v10774_v62 = vpack.c.bf16 %v2992_v29, %v2986_v34  ;;  %v2994_v56 = vpop.f32.mrb[91].mxu0 }
 0x5f5   : > { %v7304_v35 = vpack.c.bf16 %v2994_v56, %v2988_v44  ;;  %v12708_v44 = vld [vmem:[#allocation35_spill] sm:$0xff] }
 0x5f6   : > { %vm12709_vm0 = vcmp.eq.s32.totalorder %v12695_v49, %v12708_v44 }
 0x5f7   : > { %v2998_v25 = vpop.f32.mrb[92].mxu0  ;;  %7305 = vmatprep.subr.bf16.mxu0 %v7304_v35 }
 0x5f8   : > { %v3000_v41 = vpop.f32.mrb[93].mxu0  ;;  %7307 = vmatpush3.bf16.msra.mxu0 %v7304_v35 }
 0x5fb   : > { %v3004_v2 = vpop.f32.mrb[94].mxu0 }
 0x5fc   : > { %v10776_v43 = vpack.c.bf16 %v3004_v2, %v2998_v25  ;;  %v3006_v60 = vpop.f32.mrb[95].mxu0  ;;  %v12712_v25 = vld [vmem:[#allocation45_spill] sm:$0xff]  ;;  %v12714_v2 = vld [vmem:[#allocation46_spill] sm:$0xff] }
 0x5fd   : > { %v7308_v30 = vpack.c.bf16 %v3006_v60, %v3000_v41  ;;  %vm12713_vm12 = vcmp.eq.s32.totalorder %v12695_v49, %v12712_v25  ;;  %vm12715_vm15 = vcmp.eq.s32.totalorder %v12695_v49, %v12714_v2 }
 0x5ff   : > { %7309 = vmatprep.subr.bf16.mxu0 %v7308_v30 }
 0x600   : > { %7311 = vmatpush3.bf16.msra.mxu0 %v7308_v30 }
 0x601   : > { %v3010_v36 = vpop.f32.mrb[96].mxu0 }
 0x602   : > { %v3012_v13 = vpop.f32.mrb[97].mxu0 }
 0x605   : > { %v3016_v53 = vpop.f32.mrb[98].mxu0 }
 0x606   : > { %v10778_v16 = vpack.c.bf16 %v3016_v53, %v3010_v36  ;;  %v3018_v55 = vpop.f32.mrb[99].mxu0  ;;  %v12716_v36 = vld [vmem:[#allocation47_spill] sm:$0xff]  ;;  %v12718_v53 = vld [vmem:[#allocation48_spill] sm:$0xff] }
 0x607   : > { %v7312_v10 = vpack.c.bf16 %v3018_v55, %v3012_v13  ;;  %vm12717_vm14 = vcmp.eq.s32.totalorder %v12695_v49, %v12716_v36 }
 0x609   : > { %7313 = vmatprep.subr.bf16.mxu0 %v7312_v10 }
 0x60a   : > { %7315 = vmatpush3.bf16.msra.mxu0 %v7312_v10  ;;  %v12720_v10 = vld [vmem:[#allocation49_spill] sm:$0xff] }
 0x60c   : > { %v3022_v15 = vpop.f32.mrb[100].mxu0 }
 0x60d   : > { %v3024_v18 = vpop.f32.mrb[101].mxu0 }
 0x610   : > { %v3028_v27 = vpop.f32.mrb[102].mxu0 }
 0x611   : > { %v10780_v59 = vpack.c.bf16 %v3028_v27, %v3022_v15  ;;  %v3030_v57 = vpop.f32.mrb[103].mxu0 }
 0x612   : > { %v7316_v17 = vpack.c.bf16 %v3030_v57, %v3024_v18  ;;  %v12722_v18 = vld [vmem:[#allocation50_spill] sm:$0xff] }
 0x614   : > { %v3034_v48 = vpop.f32.mrb[104].mxu0  ;;  %7317 = vmatprep.subr.bf16.mxu0 %v7316_v17 }
 0x615   : > { %v3036_v9 = vpop.f32.mrb[105].mxu0  ;;  %7319 = vmatpush3.bf16.msra.mxu0 %v7316_v17  ;;  %v12724_v17 = vld [vmem:[#allocation51_spill] sm:$0xff] }
 0x618   : > { %v3040_v47 = vpop.f32.mrb[106].mxu0 }
 0x619   : > { %v10782_v26 = vpack.c.bf16 %v3040_v47, %v3034_v48  ;;  %v3042_v19 = vpop.f32.mrb[107].mxu0 }
 0x61a   : > { %v7320_v12 = vpack.c.bf16 %v3042_v19, %v3036_v9  ;;  %v12726_v9 = vld [vmem:[#allocation52_spill] sm:$0xff]  ;;  %v12728_v19 = vld [vmem:[#allocation53_spill] sm:$0xff] }
 0x61c   : > { %v6478_v0 = vpop.f32.mrb[108].mxu0  ;;  %7321 = vmatprep.subr.bf16.mxu0 %v7320_v12 }
 0x61d   : > { %v6479_v6 = vpop.f32.mrb[109].mxu0  ;;  %7323 = vmatpush3.bf16.msra.mxu0 %v7320_v12 }
 0x61e   : > { %v6480_v40 = vadd.f32 %v6479_v6, %v6478_v0  ;;  %7325 = vmatprep.subr.bf16.mxu0 %v10768_v14  ;;  %v12730_v0 = vld [vmem:[#allocation54_spill] sm:$0xff] }
 0x620   : > { %v6481_v5 = vpop.f32.mrb[110].mxu0  ;;  %6767 = vmatmul.mubr.msk.f32.vlgmr.msra.gmra.mrb[140].mxu0 %vm789_vm2, %v12694_v31 }
 0x621   : > { %v6482_v37 = vpop.f32.mrb[111].mxu0  ;;  %6769 = vmatprep.mubr.msk.f32.mxu0 %vm790_vm3, %v12694_v31  ;;  %7327 = vmatpush3.bf16.msra.mxu0 %v10768_v14 }
 0x622   : > { %v6483_v58 = vadd.f32 %v6482_v37, %v6481_v5  ;;  %7329 = vmatprep.subr.bf16.mxu0 %v10770_v22  ;;  %v12732_v37 = vld [vmem:[#allocation55_spill] sm:$0xff] }
 0x624   : > { %v7356_v61 = vpack.c.bf16 %v6483_v58, %v6480_v40  ;;  %v6484_v42 = vpop.f32.mrb[112].mxu0  ;;  %6770 = vmatmul.mubr.msk.f32.gmra.mrb[142].mxu0 %vm791_vm4, %v12694_v31 }
 0x625   : > { %v6485_v50 = vpop.f32.mrb[113].mxu0  ;;  %6772 = vmatprep.mubr.msk.f32.mxu0 %vm792_vm5, %v12694_v31  ;;  %7331 = vmatpush3.bf16.msra.mxu0 %v10770_v22 }
 0x626   : > { %v6486_v3 = vadd.f32 %v6485_v50, %v6484_v42  ;;  %7333 = vmatprep.subr.bf16.mxu0 %v10772_v11 }
 0x628   : > { %v6487_v4 = vpop.f32.mrb[114].mxu0  ;;  %6773 = vmatmul.mubr.msk.f32.gmra.mrb[144].mxu0 %vm793_vm6, %v12694_v31 }
 0x629   : > { %v6488_v14 = vpop.f32.mrb[115].mxu0  ;;  %6775 = vmatprep.mubr.msk.f32.mxu0 %vm794_vm7, %v12694_v31  ;;  %7335 = vmatpush3.bf16.msra.mxu0 %v10772_v11  ;;  %v12706_v11 = vld [vmem:[#allocation34_spill] sm:$0xff] }
 0x62a   : > { %v6489_v45 = vadd.f32 %v6488_v14, %v6487_v4  ;;  %7337 = vmatprep.subr.bf16.mxu0 %v10774_v62  ;;  %vm12707_vm13 = vcmp.eq.s32.totalorder %v12695_v49, %v12706_v11  ;;  %v12738_v14 = vld [vmem:[#allocation58_spill] sm:$0xff] }
 0x62c   : > { %v7360_v38 = vpack.c.bf16 %v6489_v45, %v6486_v3  ;;  %v6490_v28 = vpop.f32.mrb[116].mxu0  ;;  %6776 = vmatmul.mubr.msk.f32.gmra.mrb[146].mxu0 %vm795_vm8, %v12694_v31  ;;  %v12736_v3 = vld [vmem:[#allocation57_spill] sm:$0xff] }
 0x62d   : > { %v6491_v22 = vpop.f32.mrb[117].mxu0  ;;  %6778 = vmatprep.mubr.msk.f32.mxu0 %vm796_vm9, %v12694_v31  ;;  %7339 = vmatpush3.bf16.msra.mxu0 %v10774_v62  ;;  %v12710_v62 = vld [vmem:[#allocation33_spill] sm:$0xff] }
 0x62e   : > { %v6492_v52 = vadd.f32 %v6491_v22, %v6490_v28  ;;  %7341 = vmatprep.subr.bf16.mxu0 %v10776_v43  ;;  %vm12711_vm11 = vcmp.eq.s32.totalorder %v12695_v49, %v12710_v62  ;;  %v12740_v22 = vld [vmem:[#allocation59_spill] sm:$0xff] }
 0x630   : > { %v6493_v63 = vpop.f32.mrb[118].mxu0  ;;  %6779 = vmatmul.mubr.msk.f32.gmra.mrb[148].mxu0 %vm797_vm10, %v12694_v31 }
 0x631   : > { %v6494_v24 = vpop.f32.mrb[119].mxu0  ;;  %6781 = vmatprep.mubr.msk.f32.mxu0 %vm12707_vm13, %v12694_v31  ;;  %7343 = vmatpush3.bf16.msra.mxu0 %v10776_v43  ;;  %vm12719_vm13 = vcmp.eq.s32.totalorder %v12695_v49, %v12718_v53 }
 0x632   : > { %v6495_v1 = vadd.f32 %v6494_v24, %v6493_v63  ;;  %7345 = vmatprep.subr.bf16.mxu0 %v10778_v16  ;;  %v12742_v63 = vld [vmem:[#allocation60_spill] sm:$0xff] }
 0x634   : > { %v7364_v23 = vpack.c.bf16 %v6495_v1, %v6492_v52  ;;  %v6496_v34 = vpop.f32.mrb[120].mxu0  ;;  %6782 = vmatmul.mubr.msk.f32.gmra.mrb[150].mxu0 %vm12709_vm0, %v12694_v31  ;;  %vm12721_vm0 = vcmp.eq.s32.totalorder %v12695_v49, %v12720_v10 }
 0x635   : > { %v6497_v29 = vpop.f32.mrb[121].mxu0  ;;  %6784 = vmatprep.mubr.msk.f32.mxu0 %vm12711_vm11, %v12694_v31  ;;  %7347 = vmatpush3.bf16.msra.mxu0 %v10778_v16  ;;  %vm12723_vm11 = vcmp.eq.s32.totalorder %v12695_v49, %v12722_v18 }
 0x636   : > { %v6498_v56 = vadd.f32 %v6497_v29, %v6496_v34  ;;  %7349 = vmatprep.subr.bf16.mxu0 %v10780_v59  ;;  %v12746_v29 = vld [vmem:[#allocation62_spill] sm:$0xff] }
 0x638   : > { %v6499_v35 = vpop.f32.mrb[122].mxu0  ;;  %6785 = vmatmul.mubr.msk.f32.gmra.mrb[152].mxu0 %vm12713_vm12, %v12694_v31  ;;  %vm12725_vm12 = vcmp.eq.s32.totalorder %v12695_v49, %v12724_v17 }
 0x639   : > { %v6500_v41 = vpop.f32.mrb[123].mxu0  ;;  %6787 = vmatprep.mubr.msk.f32.mxu0 %vm12715_vm15, %v12694_v31  ;;  %7351 = vmatpush3.bf16.msra.mxu0 %v10780_v59  ;;  %vm12727_vm15 = vcmp.eq.s32.totalorder %v12695_v49, %v12726_v9 }
 0x63a   : > { %v6501_v43 = vadd.f32 %v6500_v41, %v6499_v35  ;;  %7353 = vmatprep.subr.bf16.mxu0 %v10782_v26  ;;  %v12748_v41 = vld [vmem:[#allocation63_spill] sm:$0xff] }
 0x63c   : > { %v7368_v60 = vpack.c.bf16 %v6501_v43, %v6498_v56  ;;  %v6502_v30 = vpop.f32.mrb[124].mxu0  ;;  %6788 = vmatmul.mubr.msk.f32.gmra.mrb[154].mxu0 %vm12717_vm14, %v12694_v31  ;;  %vm12729_vm14 = vcmp.eq.s32.totalorder %v12695_v49, %v12728_v19  ;;  %v12750_v43 = vld [vmem:[#allocation64_spill] sm:$0xff] }
 0x63d   : > { %v6503_v13 = vpop.f32.mrb[125].mxu0  ;;  %7355 = vmatpush3.bf16.msra.mxu0 %v10782_v26  ;;  %6822 = vmatprep.mubr.msk.f32.mxu0 %vm12719_vm13, %v12694_v31  ;;  %vm12731_vm13 = vcmp.eq.s32.totalorder %v12695_v49, %v12730_v0 }
 0x63e   : > { %v6504_v16 = vadd.f32 %v6503_v13, %v6502_v30  ;;  %7357 = vmatprep.subr.bf16.mxu0 %v7356_v61  ;;  %v12754_v30 = vld [vmem:[#allocation66_spill] sm:$0xff]  ;;  %v12756_v13 = vld [vmem:[#allocation67_spill] sm:$0xff] }
 0x640   : > { %v6505_v55 = vpop.f32.mrb[126].mxu0  ;;  %6823 = vmatmul.mubr.msk.f32.vlgmr.msra.gmra.mrb[140].mxu0 %vm12721_vm0, %v12694_v31  ;;  %vm12733_vm0 = vcmp.eq.s32.totalorder %v12695_v49, %v12732_v37 }
 0x641   : > { %v6506_v15 = vpop.f32.mrb[127].mxu0  ;;  %6825 = vmatprep.mubr.msk.f32.mxu0 %vm12723_vm11, %v12694_v31  ;;  %7359 = vmatpush3.bf16.msra.mxu0 %v7356_v61  ;;  %v12734_v61 = vld [vmem:[#allocation56_spill] sm:$0xff] }
 0x642   : > { %v6507_v27 = vadd.f32 %v6506_v15, %v6505_v55  ;;  %7361 = vmatprep.subr.bf16.mxu0 %v7360_v38  ;;  %vm12735_vm11 = vcmp.eq.s32.totalorder %v12695_v49, %v12734_v61  ;;  %v12760_v55 = vld [vmem:[#allocation69_spill] sm:$0xff]  ;;  %v12762_v15 = vld [vmem:[#allocation70_spill] sm:$0xff] }
 0x644   : > { %v7372_v59 = vpack.c.bf16 %v6507_v27, %v6504_v16  ;;  %v6508_v57 = vpop.f32.mrb[128].mxu0  ;;  %6826 = vmatmul.mubr.msk.f32.gmra.mrb[142].mxu0 %vm12725_vm12, %v12694_v31  ;;  %vm12737_vm12 = vcmp.eq.s32.totalorder %v12695_v49, %v12736_v3  ;;  %v12758_v16 = vld [vmem:[#allocation68_spill] sm:$0xff]  ;;  %v12764_v27 = vld [vmem:[#allocation71_spill] sm:$0xff] }
 0x645   : > { %v6509_v48 = vpop.f32.mrb[129].mxu0  ;;  %6828 = vmatprep.mubr.msk.f32.mxu0 %vm12727_vm15, %v12694_v31  ;;  %7363 = vmatpush3.bf16.msra.mxu0 %v7360_v38  ;;  %vm12739_vm15 = vcmp.eq.s32.totalorder %v12695_v49, %v12738_v14 }
 0x646   : > { %v6510_v47 = vadd.f32 %v6509_v48, %v6508_v57  ;;  %7365 = vmatprep.subr.bf16.mxu0 %v7364_v23  ;;  %v12768_v57 = vld [vmem:[#allocation73_spill] sm:$0xff]  ;;  %v12770_v48 = vld [vmem:[#allocation74_spill] sm:$0xff] }
 0x648   : > { %v6511_v26 = vpop.f32.mrb[130].mxu0  ;;  %6829 = vmatmul.mubr.msk.f32.gmra.mrb[144].mxu0 %vm12729_vm14, %v12694_v31  ;;  %vm12741_vm14 = vcmp.eq.s32.totalorder %v12695_v49, %v12740_v22 }
 0x649   : > { %v6512_v12 = vpop.f32.mrb[131].mxu0  ;;  %6831 = vmatprep.mubr.msk.f32.mxu0 %vm12731_vm13, %v12694_v31  ;;  %7367 = vmatpush3.bf16.msra.mxu0 %v7364_v23  ;;  %vm12743_vm13 = vcmp.eq.s32.totalorder %v12695_v49, %v12742_v63  ;;  %v12744_v23 = vld [vmem:[#allocation61_spill] sm:$0xff] }
 0x64a   : > { %v6513_v6 = vadd.f32 %v6512_v12, %v6511_v26  ;;  %7369 = vmatprep.subr.bf16.mxu0 %v7368_v60  ;;  %v12774_v26 = vld [vmem:[#allocation76_spill] sm:$0xff]  ;;  %v12776_v12 = vld [vmem:[#allocation77_spill] sm:$0xff] }
 0x64c   : > { %v7376_v40 = vpack.c.bf16 %v6513_v6, %v6510_v47  ;;  %v6514_v5 = vpop.f32.mrb[132].mxu0  ;;  %6832 = vmatmul.mubr.msk.f32.gmra.mrb[146].mxu0 %vm12733_vm0, %v12694_v31  ;;  %vm12745_vm0 = vcmp.eq.s32.totalorder %v12695_v49, %v12744_v23  ;;  %v12772_v47 = vld [vmem:[#allocation75_spill] sm:$0xff]  ;;  %v12778_v6 = vld [vmem:[#allocation78_spill] sm:$0xff] }
 0x64d   : > { %v6515_v58 = vpop.f32.mrb[133].mxu0  ;;  %6834 = vmatprep.mubr.msk.f32.mxu0 %vm12735_vm11, %v12694_v31  ;;  %7371 = vmatpush3.bf16.msra.mxu0 %v7368_v60  ;;  %vm12747_vm11 = vcmp.eq.s32.totalorder %v12695_v49, %v12746_v29  ;;  %v12752_v60 = vld [vmem:[#allocation65_spill] sm:$0xff] }
 0x64e   : > { %v6516_v42 = vadd.f32 %v6515_v58, %v6514_v5  ;;  %7373 = vmatprep.subr.bf16.mxu0 %v7372_v59  ;;  %v4275_v5 = vld [vmem:[#allocation14 + $0x8] sm:$0xff]  ;;  %v4277_v58 = vld [vmem:[#allocation14 + $0x18] sm:$0xff] }
 0x650   : > { %v6517_v50 = vpop.f32.mrb[134].mxu0  ;;  %6835 = vmatmul.mubr.msk.f32.gmra.mrb[148].mxu0 %vm12737_vm12, %v12694_v31  ;;  %vm12749_vm12 = vcmp.eq.s32.totalorder %v12695_v49, %v12748_v41  ;;  %v4282_v41 = vld [vmem:[#allocation14 + $0x40] sm:$0xff] }
 0x651   : > { %v6518_v4 = vpop.f32.mrb[135].mxu0  ;;  %6837 = vmatprep.mubr.msk.f32.mxu0 %vm12739_vm15, %v12694_v31  ;;  %7375 = vmatpush3.bf16.msra.mxu0 %v7372_v59  ;;  %vm12751_vm15 = vcmp.eq.s32.totalorder %v12695_v49, %v12750_v43  ;;  %v12766_v59 = vld [vmem:[#allocation72_spill] sm:$0xff] }
 0x652   : > { %v6519_v45 = vadd.f32 %v6518_v4, %v6517_v50  ;;  %7377 = vmatprep.subr.bf16.mxu0 %v7376_v40  ;;  %v7388_v50 = vpack.c.bf16 %v4277_v58, %v4275_v5  ;;  %v4276_v4 = vld [vmem:[#allocation14 + $0x10] sm:$0xff] }
 0x654   : > { %v7380_v38 = vpack.c.bf16 %v6519_v45, %v6516_v42  ;;  %v6520_v28 = vpop.f32.mrb[136].mxu0  ;;  %6838 = vmatmul.mubr.msk.f32.gmra.mrb[150].mxu0 %vm12741_vm14, %v12694_v31  ;;  %vm12753_vm14 = vcmp.eq.s32.totalorder %v12695_v49, %v12752_v60  ;;  %v4274_v42 = vld [vmem:[#allocation14] sm:$0xff]  ;;  %7389 = vmatprep.subr.bf16.mxu1 %v7388_v50 }
 0x655   : > { %v6521_v52 = vpop.f32.mrb[137].mxu0  ;;  %6840 = vmatprep.mubr.msk.f32.mxu0 %vm12743_vm13, %v12694_v31  ;;  %7379 = vmatpush3.bf16.msra.mxu0 %v7376_v40  ;;  %vm12755_vm13 = vcmp.eq.s32.totalorder %v12695_v49, %v12754_v30  ;;  %v12780_v40 = vld [vmem:[#allocation79_spill] sm:$0xff]  ;;  %v7390_v45 = vpack.c.bf16 %v4276_v4, %v4274_v42 }
 0x656   : > { %v6522_v24 = vadd.f32 %v6521_v52, %v6520_v28  ;;  %7381 = vmatprep.subr.bf16.mxu0 %v7380_v38  ;;  %v4283_v30 = vld [vmem:[#allocation14 + $0x48] sm:$0xff] }
 0x657   : > { %7391 = vmatpush1.bf16.msra.mxu1 %v7390_v45 }
 0x658   : > { %v6523_v1 = vpop.f32.mrb[138].mxu0  ;;  %6841 = vmatmul.mubr.msk.f32.gmra.mrb[152].mxu0 %vm12745_vm0, %v12694_v31  ;;  %vm12757_vm0 = vcmp.eq.s32.totalorder %v12695_v49, %v12756_v13  ;;  %v4280_v13 = vld [vmem:[#allocation14 + $0x30] sm:$0xff] }
 0x659   : > { %v6524_v34 = vpop.f32.mrb[139].mxu0  ;;  %6843 = vmatprep.mubr.msk.f32.mxu0 %vm12747_vm11, %v12694_v31  ;;  %7383 = vmatpush3.bf16.msra.mxu0 %v7380_v38  ;;  %vm12759_vm11 = vcmp.eq.s32.totalorder %v12695_v49, %v12758_v16  ;;  %v10988_v38 = vld [vmem:[#allocation12] ss:$0 sm:$0xff] }
 0x65a   : > { %v6525_v56 = vadd.f32 %v6524_v34, %v6523_v1  ;;  %v12782_v34 = vld [vmem:[#allocation81_spill] sm:$0xff] }
 0x65b   : > { %v4281_v16 = vld [vmem:[#allocation14 + $0x38] sm:$0xff] }
 0x65c   : > { %v7384_v35 = vpack.c.bf16 %v6525_v56, %v6522_v24  ;;  %6844 = vmatmul.mubr.msk.f32.gmra.mrb[154].mxu0 %vm12749_vm12, %v12694_v31  ;;  %vm12761_vm12 = vcmp.eq.s32.totalorder %v12695_v49, %v12760_v55  ;;  %v4279_v55 = vld [vmem:[#allocation14 + $0x28] sm:$0xff] }
 0x65d   : > { %6878 = vmatprep.mubr.msk.f32.mxu0 %vm12751_vm15, %v12694_v31  ;;  %vm12763_vm15 = vcmp.eq.s32.totalorder %v12695_v49, %v12762_v15 }
 0x65e   : > { %7385 = vmatprep.subr.bf16.mxu0 %v7384_v35 }
 0x65f   : > { %7387 = vmatpush3.bf16.msra.mxu0 %v7384_v35 }
 0x662   : > { %6879 = vmatmul.mubr.msk.f32.vlgmr.msra.gmra.mrb[140].mxu0 %vm12753_vm14, %v12694_v31  ;;  %vm12765_vm14 = vcmp.eq.s32.totalorder %v12695_v49, %v12764_v27 }
 0x663   : > { %6881 = vmatprep.mubr.msk.f32.mxu0 %vm12755_vm13, %v12694_v31  ;;  %vm12767_vm13 = vcmp.eq.s32.totalorder %v12695_v49, %v12766_v59 }
 0x666   : > { %6882 = vmatmul.mubr.msk.f32.gmra.mrb[142].mxu0 %vm12757_vm0, %v12694_v31  ;;  %vm12769_vm0 = vcmp.eq.s32.totalorder %v12695_v49, %v12768_v57 }
 0x667   : > { %6884 = vmatprep.mubr.msk.f32.mxu0 %vm12759_vm11, %v12694_v31  ;;  %vm12771_vm11 = vcmp.eq.s32.totalorder %v12695_v49, %v12770_v48 }
 0x66a   : > { %6885 = vmatmul.mubr.msk.f32.gmra.mrb[144].mxu0 %vm12761_vm12, %v12694_v31  ;;  %vm12773_vm12 = vcmp.eq.s32.totalorder %v12695_v49, %v12772_v47 }
 0x66b   : > { %6887 = vmatprep.mubr.msk.f32.mxu0 %vm12763_vm15, %v12694_v31  ;;  %vm12775_vm15 = vcmp.eq.s32.totalorder %v12695_v49, %v12774_v26 }
 0x66e   : > { %6888 = vmatmul.mubr.msk.f32.gmra.mrb[146].mxu0 %vm12765_vm14, %v12694_v31  ;;  %vm12777_vm14 = vcmp.eq.s32.totalorder %v12695_v49, %v12776_v12 }
 0x66f   : > { %6890 = vmatprep.mubr.msk.f32.mxu0 %vm12767_vm13, %v12694_v31  ;;  %vm12779_vm13 = vcmp.eq.s32.totalorder %v12695_v49, %v12778_v6 }
 0x672   : > { %6891 = vmatmul.mubr.msk.f32.gmra.mrb[148].mxu0 %vm12769_vm0, %v12694_v31  ;;  %vm12781_vm0 = vcmp.eq.s32.totalorder %v12695_v49, %v12780_v40 }
 0x673   : > { %6893 = vmatprep.mubr.msk.f32.mxu0 %vm12771_vm11, %v12694_v31 }
 0x676   : > { %6894 = vmatmul.mubr.msk.f32.gmra.mrb[150].mxu0 %vm12773_vm12, %v12694_v31 }
 0x677   : > { %6896 = vmatprep.mubr.msk.f32.mxu0 %vm12775_vm15, %v12694_v31 }
 0x67a   : > { %6897 = vmatmul.mubr.msk.f32.gmra.mrb[152].mxu0 %vm12777_vm14, %v12694_v31 }
 0x67b   : > { %6899 = vmatprep.mubr.msk.f32.mxu0 %vm12779_vm13, %v12694_v31 }
 0x67e   : > { %6900 = vmatmul.mubr.msk.f32.gmra.mrb[154].mxu0 %vm12781_vm0, %v12694_v31 }
 0x735   : > { %v6880_v28 = vpop.f32.mrb[140].mxu0 }
 0x736   : > { %v3649_v52 = vadd.f32 %v6880_v28, %v10988_v38  ;;  %v3546_v24 = vpop.f32.mrb[141].mxu0 }
 0x737   : > { %v3648_v1 = vadd.f32 %v10988_v38, %v3546_v24 }
 0x738   : > { %v10993_v56 = vmul.f32 %v12782_v34, %v3649_v52 }
 0x739   : > { %v10996_v35 = vmul.f32 %v12782_v34, %v3648_v1  ;;  %v6883_v40 = vpop.f32.mrb[142].mxu0 }
 0x73a   : > { %3682 = vadd.xlane.f32.xlu0 %v10993_v56  ;;  %v3556_v5 = vpop.f32.mrb[143].mxu0  ;;  %v3651_v42 = vadd.f32 %v6883_v40, %v10988_v38  ;;  %v3809_v40 = vmul.f32 %v10993_v56, %v10993_v56 }
 0x73b   : > { %v3650_v58 = vadd.f32 %v10988_v38, %v3556_v5  ;;  %3680 = vadd.xlane.f32.xlu1 %v10996_v35  ;;  %v3808_v45 = vmul.f32 %v10996_v35, %v10996_v35 }
 0x73c   : > { %v11009_v52 = vmul.f32 %v12782_v34, %v3651_v42 }
 0x73d   : > { %v11003_v50 = vmul.f32 %v12782_v34, %v3650_v58  ;;  %v6886_v4 = vpop.f32.mrb[144].mxu0 }
 0x73e   : > { %v3566_v28 = vpop.f32.mrb[145].mxu0  ;;  %v3653_v58 = vadd.f32 %v6886_v4, %v10988_v38  ;;  %v3811_v4 = vmul.f32 %v11009_v52, %v11009_v52 }
 0x73f   : > { %3824 = vadd.xlane.f32.xlu1 %v3808_v45  ;;  %3684 = vadd.xlane.f32.xlu0 %v11003_v50  ;;  %v3652_v24 = vadd.f32 %v10988_v38, %v3566_v28  ;;  %v3810_v42 = vmul.f32 %v11003_v50, %v11003_v50 }
 0x740   : > { %v11023_v28 = vmul.f32 %v12782_v34, %v3653_v58 }
 0x741   : > { %v6889_v1 = vpop.f32.mrb[146].mxu0  ;;  %v11017_v6 = vmul.f32 %v12782_v34, %v3652_v24 }
 0x742   : > { %v3576_v5 = vpop.f32.mrb[147].mxu0  ;;  %v3655_v24 = vadd.f32 %v6889_v1, %v10988_v38  ;;  %v3813_v1 = vmul.f32 %v11023_v28, %v11023_v28 }
 0x743   : > { %3826 = vadd.xlane.f32.xlu1 %v3809_v40  ;;  %3686 = vadd.xlane.f32.xlu0 %v11009_v52  ;;  %v3654_v40 = vadd.f32 %v10988_v38, %v3576_v5  ;;  %v3812_v58 = vmul.f32 %v11017_v6, %v11017_v6 }
 0x744   : > { %v11037_v5 = vmul.f32 %v12782_v34, %v3655_v24 }
 0x745   : > { %v6892_v45 = vpop.f32.mrb[148].mxu0  ;;  %v11031_v48 = vmul.f32 %v12782_v34, %v3654_v40 }
 0x746   : > { %v3586_v12 = vpop.f32.mrb[149].mxu0  ;;  %v3657_v40 = vadd.f32 %v6892_v45, %v10988_v38 }
 0x747   : > { %3828 = vadd.xlane.f32.xlu1 %v3810_v42  ;;  %3688 = vadd.xlane.f32.xlu0 %v11017_v6 }
 0x749   : > { %v6895_v26 = vpop.f32.mrb[150].mxu0 }
 0x74a   : > { %v3596_v47 = vpop.f32.mrb[151].mxu0  ;;  %v3659_v45 = vadd.f32 %v6895_v26, %v10988_v38 }
 0x74b   : > { %3830 = vadd.xlane.f32.xlu1 %v3811_v4  ;;  %3690 = vadd.xlane.f32.xlu0 %v11023_v28  ;;  %v3656_v4 = vadd.f32 %v10988_v38, %v3586_v12  ;;  %v11051_v12 = vmul.f32 %v12782_v34, %v3657_v40  ;;  %v3658_v24 = vadd.f32 %v10988_v38, %v3596_v47 }
 0x74c   : > { %v11065_v40 = vmul.f32 %v12782_v34, %v3659_v45 }
 0x74d   : > { %v6898_v42 = vpop.f32.mrb[152].mxu0  ;;  %v11045_v15 = vmul.f32 %v12782_v34, %v3656_v4  ;;  %12784 = vst [vmem:[#allocation106_spill] sm:$0xff] %v11051_v12  ;;  %v11059_v4 = vmul.f32 %v12782_v34, %v3658_v24 }
 0x74e   : > { %v3606_v57 = vpop.f32.mrb[153].mxu0  ;;  %12786 = vst [vmem:[#allocation82_spill] sm:$0xff] %v11065_v40  ;;  %v3661_v26 = vadd.f32 %v6898_v42, %v10988_v38  ;;  %v4278_v42 = vld [vmem:[#allocation14 + $0x20] sm:$0xff] }
 0x74f   : > { %3832 = vadd.xlane.f32.xlu1 %v3812_v58  ;;  %3692 = vadd.xlane.f32.xlu0 %v11031_v48  ;;  %12783 = vst [vmem:[#allocation116_spill] sm:$0xff] %v11045_v15  ;;  %v3814_v58 = vmul.f32 %v11031_v48, %v11031_v48  ;;  %12785 = vst [vmem:[#allocation105_spill] sm:$0xff] %v11059_v4  ;;  %v3660_v47 = vadd.f32 %v10988_v38, %v3606_v57 }
 0x750   : > { %v11079_v45 = vmul.f32 %v12782_v34, %v3661_v26  ;;  %v7394_v60 = vpack.c.bf16 %v4280_v13, %v4278_v42  ;;  %v4284_v26 = vld [vmem:[#allocation14 + $0x50] sm:$0xff]  ;;  %v4286_v13 = vld [vmem:[#allocation14 + $0x60] sm:$0xff] }
 0x751   : > { %v6901_v59 = vpop.f32.mrb[154].mxu0  ;;  %v11073_v24 = vmul.f32 %v12782_v34, %v3660_v47  ;;  %v7392_v47 = vpack.c.bf16 %v4281_v16, %v4279_v55  ;;  %v4287_v16 = vld [vmem:[#allocation14 + $0x68] sm:$0xff]  ;;  %v4289_v55 = vld [vmem:[#allocation14 + $0x78] sm:$0xff]  ;;  %v4288_v42 = vld [vmem:[#allocation14 + $0x70] sm:$0xff] }
 0x752   : > { %v3616_v27 = vpop.f32.mrb[155].mxu0  ;;  %12788 = vst [vmem:[#allocation107_spill] sm:$0xff] %v11079_v45  ;;  %v3663_v29 = vadd.f32 %v6901_v59, %v10988_v38 }
 0x753   : > { %3834 = vadd.xlane.f32.xlu1 %v3813_v1  ;;  %3694 = vadd.xlane.f32.xlu0 %v11037_v5  ;;  %v3815_v1 = vmul.f32 %v11037_v5, %v11037_v5  ;;  %12787 = vst [vmem:[#allocation108_spill] sm:$0xff] %v11073_v24  ;;  %v3662_v57 = vadd.f32 %v10988_v38, %v3616_v27 }
 0x754   : > { %v3820_v23 = vmul.f32 %v11073_v24, %v11073_v24  ;;  %7393 = vmatprep.subr.bf16.mxu1 %v7392_v47  ;;  %v11093_v59 = vmul.f32 %v12782_v34, %v3663_v29  ;;  %v3821_v38 = vmul.f32 %v11079_v45, %v11079_v45  ;;  %v4291_v29 = vld [vmem:[#allocation14 + $0x88] sm:$0xff] }
 0x755   : > { %v11087_v27 = vmul.f32 %v12782_v34, %v3662_v57  ;;  %7395 = vmatpush1.bf16.msra.mxu1 %v7394_v60  ;;  %v7402_v57 = vpack.c.bf16 %v4288_v42, %v4286_v13  ;;  %v4290_v60 = vld [vmem:[#allocation14 + $0x80] sm:$0xff]  ;;  %v4300_v34 = vld [vmem:[#allocation14 + $0xd0] sm:$0xff] }
 0x756   : > { %12790 = vst [vmem:[#allocation109_spill] sm:$0xff] %v11093_v59 }
 0x757   : > { %3836 = vadd.xlane.f32.xlu1 %v3814_v58  ;;  %3696 = vadd.xlane.f32.xlu0 %v11045_v15  ;;  %v3816_v58 = vmul.f32 %v11045_v15, %v11045_v15  ;;  %12789 = vst [vmem:[#allocation110_spill] sm:$0xff] %v11087_v27 }
 0x75b   : > { %3838 = vadd.xlane.f32.xlu1 %v3815_v1  ;;  %3698 = vadd.xlane.f32.xlu0 %v11051_v12  ;;  %v3817_v1 = vmul.f32 %v11051_v12, %v11051_v12 }
 0x75f   : > { %3840 = vadd.xlane.f32.xlu1 %v3816_v58  ;;  %3700 = vadd.xlane.f32.xlu0 %v11059_v4  ;;  %v3818_v58 = vmul.f32 %v11059_v4, %v11059_v4 }
 0x763   : > { %3842 = vadd.xlane.f32.xlu1 %v3817_v1  ;;  %3702 = vadd.xlane.f32.xlu0 %v11065_v40  ;;  %v3819_v1 = vmul.f32 %v11065_v40, %v11065_v40 }
 0x767   : > { %3844 = vadd.xlane.f32.xlu1 %v3818_v58  ;;  %3704 = vadd.xlane.f32.xlu0 %v11073_v24  ;;  %v4285_v58 = vld [vmem:[#allocation14 + $0x58] sm:$0xff] }
 0x768   : > { %v7396_v43 = vpack.c.bf16 %v4285_v58, %v4283_v30  ;;  %v7400_v30 = vpack.c.bf16 %v4289_v55, %v4287_v16  ;;  %v4292_v58 = vld [vmem:[#allocation14 + $0x90] sm:$0xff]  ;;  %v4297_v16 = vld [vmem:[#allocation14 + $0xb8] sm:$0xff]  ;;  %v4294_v55 = vld [vmem:[#allocation14 + $0xa0] sm:$0xff] }
 0x76a   : > { %7397 = vmatprep.subr.bf16.mxu1 %v7396_v43  ;;  %v4293_v43 = vld [vmem:[#allocation14 + $0x98] sm:$0xff] }
 0x76b   : > { %3846 = vadd.xlane.f32.xlu1 %v3819_v1  ;;  %3706 = vadd.xlane.f32.xlu0 %v11079_v45  ;;  %v7398_v1 = vpack.c.bf16 %v4284_v26, %v4282_v41  ;;  %v3822_v41 = vmul.f32 %v11087_v27, %v11087_v27  ;;  %v7404_v47 = vpack.c.bf16 %v4293_v43, %v4291_v29  ;;  %v4303_v29 = vld [vmem:[#allocation14 + $0xe8] sm:$0xff]  ;;  %v4305_v43 = vld [vmem:[#allocation14 + $0xf8] sm:$0xff] }
 0x76c   : > { %v7406_v26 = vpack.c.bf16 %v4292_v58, %v4290_v60  ;;  %v7416_v60 = vpack.c.bf16 %v4305_v43, %v4303_v29  ;;  %v4304_v58 = vld [vmem:[#allocation14 + $0xf0] sm:$0xff] }
 0x76d   : > { %7399 = vmatpush1.bf16.msra.mxu1 %v7398_v1  ;;  %v4295_v1 = vld [vmem:[#allocation14 + $0xa8] sm:$0xff] }
 0x76e   : > { %7401 = vmatprep.subr.bf16.mxu1 %v7400_v30  ;;  %v7408_v13 = vpack.c.bf16 %v4297_v16, %v4295_v1  ;;  %v4296_v30 = vld [vmem:[#allocation14 + $0xb0] sm:$0xff] }
 0x76f   : > { %3848 = vadd.xlane.f32.xlu1 %v3820_v23  ;;  %3708 = vadd.xlane.f32.xlu0 %v11087_v27  ;;  %v3823_v23 = vmul.f32 %v11093_v59, %v11093_v59  ;;  %v7410_v42 = vpack.c.bf16 %v4296_v30, %v4294_v55 }
 0x771   : > { %7403 = vmatpush1.bf16.msra.mxu1 %v7402_v57  ;;  %v4301_v57 = vld [vmem:[#allocation14 + $0xd8] sm:$0xff] }
 0x772   : > { %7405 = vmatprep.subr.bf16.mxu1 %v7404_v47  ;;  %v4302_v47 = vld [vmem:[#allocation14 + $0xe0] sm:$0xff] }
 0x773   : > { %3850 = vadd.xlane.f32.xlu1 %v3821_v38  ;;  %3710 = vadd.xlane.f32.xlu0 %v11093_v59  ;;  %v4299_v38 = vld [vmem:[#allocation14 + $0xc8] sm:$0xff] }
 0x775   : > { %7407 = vmatpush1.bf16.msra.mxu1 %v7406_v26  ;;  %v7418_v26 = vpack.c.bf16 %v4304_v58, %v4302_v47 }
 0x776   : > { %7409 = vmatprep.subr.bf16.mxu1 %v7408_v13 }
 0x777   : > { %3854 = vadd.xlane.f32.xlu0 %v3823_v23  ;;  %3852 = vadd.xlane.f32.xlu1 %v3822_v41  ;;  %v7412_v23 = vpack.c.bf16 %v4301_v57, %v4299_v38  ;;  %v4298_v41 = vld [vmem:[#allocation14 + $0xc0] sm:$0xff] }
 0x778   : > { %v7414_v63 = vpack.c.bf16 %v4300_v34, %v4298_v41 }
 0x779   : > { %7411 = vmatpush1.bf16.msra.mxu1 %v7410_v42 }
 0x77a   : > { %7413 = vmatprep.subr.bf16.mxu1 %v7412_v23 }
 0x77d   : > { %7415 = vmatpush1.bf16.msra.mxu1 %v7414_v63 }
 0x77e   : > { %7417 = vmatprep.subr.bf16.mxu1 %v7416_v60 }
 0x781   : > { %7419 = vmatpush1.bf16.msra.mxu1 %v7418_v26 }
 0x7c7   : > { %v3683_v1 = vpop.xlane.xlu0 %3682 }
 0x7c8   : > { %v3718_v16 = vrot.slane %v3683_v1, 4  ;;  %v3681_v55 = vpop.xlane.xlu1 %3680 }
 0x7c9   : > { %v3712_v13 = vrot.slane %v3681_v55, 4 }
 0x7ca   : > { %v3719_v30 = vadd.f32 %v3718_v16, %v3683_v1 }
 0x7cb   : > { %v3713_v42 = vadd.f32 %v3712_v13, %v3681_v55 }
 0x7cc   : > { %v3720_v38 = vrot.slane %v3719_v30, 2  ;;  %v3825_v57 = vpop.xlane.xlu1 %3824  ;;  %v3685_v22 = vpop.xlane.xlu0 %3684 }
 0x7cd   : > { %v3714_v34 = vrot.slane %v3713_v42, 2  ;;  %v3856_v23 = vrot.slane %v3825_v57, 4  ;;  %v3724_v63 = vrot.slane %v3685_v22, 4 }
 0x7ce   : > { %v3721_v41 = vadd.f32 %v3720_v38, %v3719_v30 }
 0x7cf   : > { %v3715_v14 = vadd.f32 %v3714_v34, %v3713_v42  ;;  %v3857_v29 = vadd.f32 %v3856_v23, %v3825_v57  ;;  %v3725_v43 = vadd.f32 %v3724_v63, %v3685_v22 }
 0x7d0   : > { %v3722_v3 = vrot.slane %v3721_v41, 1  ;;  %v3827_v47 = vpop.xlane.xlu1 %3826  ;;  %v3687_v60 = vpop.xlane.xlu0 %3686 }
 0x7d1   : > { %v3716_v58 = vrot.slane %v3715_v14, 1  ;;  %v3858_v26 = vrot.slane %v3857_v29, 2  ;;  %v3726_v61 = vrot.slane %v3725_v43, 2  ;;  %v3862_v37 = vrot.slane %v3827_v47, 4 }
 0x7d2   : > { %v3723_v0 = vadd.f32 %v3722_v3, %v3721_v41  ;;  %v3730_v1 = vrot.slane %v3687_v60, 4 }
 0x7d3   : > { %v3717_v16 = vadd.f32 %v3716_v58, %v3715_v14  ;;  %v3859_v55 = vadd.f32 %v3858_v26, %v3857_v29  ;;  %v3727_v13 = vadd.f32 %v3726_v61, %v3725_v43  ;;  %v3863_v19 = vadd.f32 %v3862_v37, %v3827_v47 }
 0x7d4   : > { %v11102_v9 = vmul.f32 0.0009765625, %v3723_v0  ;;  %v3731_v17 = vadd.f32 %v3730_v1, %v3687_v60  ;;  %v3829_v30 = vpop.xlane.xlu1 %3828  ;;  %v3689_v42 = vpop.xlane.xlu0 %3688 }
 0x7d5   : > { %v11104_v38 = vmul.f32 0.0009765625, %v3717_v16  ;;  %v3860_v22 = vrot.slane %v3859_v55, 1  ;;  %v3728_v57 = vrot.slane %v3727_v13, 1  ;;  %v3864_v34 = vrot.slane %v3863_v19, 2 }
 0x7d6   : > { %v3732_v23 = vrot.slane %v3731_v17, 2  ;;  %v3868_v63 = vrot.slane %v3829_v30, 4  ;;  %v3736_v18 = vrot.slane %v3689_v42, 4  ;;  %v3970_v58 = vmul.f32 %v11102_v9, %v3723_v0 }
 0x7d7   : > { %v3969_v3 = vmul.f32 %v11104_v38, %v3717_v16  ;;  %v3861_v41 = vadd.f32 %v3860_v22, %v3859_v55  ;;  %v3729_v14 = vadd.f32 %v3728_v57, %v3727_v13  ;;  %v3865_v29 = vadd.f32 %v3864_v34, %v3863_v19 }
 0x7d8   : > { %v3733_v61 = vadd.f32 %v3732_v23, %v3731_v17  ;;  %v3869_v37 = vadd.f32 %v3868_v63, %v3829_v30  ;;  %v3737_v43 = vadd.f32 %v3736_v18, %v3689_v42  ;;  %v3831_v47 = vpop.xlane.xlu1 %3830  ;;  %v3691_v60 = vpop.xlane.xlu0 %3690 }
 0x7d9   : > { %v3985_v26 = vsub.f32 %v3861_v41, %v3969_v3  ;;  %v3874_v1 = vrot.slane %v3831_v47, 4  ;;  %v3742_v10 = vrot.slane %v3691_v60, 4  ;;  %v3866_v53 = vrot.slane %v3865_v29, 1 }
 0x7da   : > { %v3734_v36 = vrot.slane %v3733_v61, 1  ;;  %v3870_v2 = vrot.slane %v3869_v37, 2  ;;  %v3738_v25 = vrot.slane %v3737_v43, 2  ;;  %v11108_v44 = vmul.f32 0.0009765625, %v3729_v14 }
 0x7db   : > { %v4002_v62 = vmul.f32 0.0009775171, %v3985_v26  ;;  %v3875_v16 = vadd.f32 %v3874_v1, %v3831_v47  ;;  %v3743_v55 = vadd.f32 %v3742_v10, %v3691_v60  ;;  %v3867_v19 = vadd.f32 %v3866_v53, %v3865_v29 }
 0x7dc   : > { %v3735_v17 = vadd.f32 %v3734_v36, %v3733_v61  ;;  %v3871_v13 = vadd.f32 %v3870_v2, %v3869_v37  ;;  %v3739_v18 = vadd.f32 %v3738_v25, %v3737_v43  ;;  %v3833_v30 = vpop.xlane.xlu1 %3832  ;;  %v3693_v42 = vpop.xlane.xlu0 %3692  ;;  %v3971_v41 = vmul.f32 %v11108_v44, %v3729_v14 }
 0x7dd   : > { %v3876_v22 = vrot.slane %v3875_v16, 2  ;;  %v3744_v0 = vrot.slane %v3743_v55, 2  ;;  %v3880_v57 = vrot.slane %v3833_v30, 4  ;;  %v3986_v34 = vsub.f32 %v3867_v19, %v3970_v58 }
 0x7de   : > { %v11110_v23 = vmul.f32 0.0009765625, %v3735_v17  ;;  %v3872_v63 = vrot.slane %v3871_v13, 1  ;;  %v3740_v3 = vrot.slane %v3739_v18, 1  ;;  %v11113_v10 = vmax.f32 %v4002_v62, 0.0 }
 0x7df   : > { %v3877_v26 = vadd.f32 %v3876_v22, %v3875_v16  ;;  %v3745_v11 = vadd.f32 %v3744_v0, %v3743_v55  ;;  %v3881_v47 = vadd.f32 %v3880_v57, %v3833_v30  ;;  %v4003_v36 = vmul.f32 0.0009775171, %v3986_v34 }
 0x7e0   : > { %v3873_v2 = vadd.f32 %v3872_v63, %v3871_v13  ;;  %v3741_v25 = vadd.f32 %v3740_v3, %v3739_v18  ;;  %v3835_v53 = vpop.xlane.xlu1 %3834  ;;  %v3695_v29 = vpop.xlane.xlu0 %3694  ;;  %v3748_v60 = vrot.slane %v3693_v42, 4  ;;  %v3972_v58 = vmul.f32 %v11110_v23, %v3735_v17 }
 0x7e1   : > { %v3878_v61 = vrot.slane %v3877_v26, 1  ;;  %v3746_v37 = vrot.slane %v3745_v11, 1  ;;  %v3882_v43 = vrot.slane %v3881_v47, 2  ;;  %v3886_v14 = vrot.slane %v3835_v53, 4 }
 0x7e2   : > { %v3987_v1 = vsub.f32 %v3873_v2, %v3971_v41  ;;  %v11116_v19 = vmul.f32 0.0009765625, %v3741_v25  ;;  %v3749_v62 = vadd.f32 %v3748_v60, %v3693_v42  ;;  %7936 = vrsqrt.f32 %v11113_v10 }
 0x7e3   : > { %v3879_v16 = vadd.f32 %v3878_v61, %v3877_v26  ;;  %v3747_v55 = vadd.f32 %v3746_v37, %v3745_v11  ;;  %v3883_v30 = vadd.f32 %v3882_v43, %v3881_v47  ;;  %v11119_v13 = vmax.f32 %v4003_v36, 0.0 }
 0x7e4   : > { %v3887_v18 = vadd.f32 %v3886_v14, %v3835_v53  ;;  %v3837_v22 = vpop.xlane.xlu1 %3836  ;;  %v3697_v0 = vpop.xlane.xlu0 %3696  ;;  %v4004_v57 = vmul.f32 0.0009775171, %v3987_v1  ;;  %v3750_v3 = vrot.slane %v3749_v62, 2  ;;  %v3754_v2 = vrot.slane %v3695_v29, 4 }
 0x7e5   : > { %v3988_v34 = vsub.f32 %v3879_v16, %v3972_v58  ;;  %v3884_v63 = vrot.slane %v3883_v30, 1  ;;  %v11121_v17 = vmul.f32 0.0009765625, %v3747_v55  ;;  %v3892_v8 = vrot.slane %v3837_v22, 4 }
 0x7e6   : > { %v3888_v41 = vrot.slane %v3887_v18, 2  ;;  %v3973_v11 = vmul.f32 %v11116_v19, %v3741_v25  ;;  %v3751_v47 = vadd.f32 %v3750_v3, %v3749_v62  ;;  %7938 = vrsqrt.f32 %v11119_v13 }
 0x7e7   : > { %v4005_v26 = vmul.f32 0.0009775171, %v3988_v34  ;;  %v3885_v42 = vadd.f32 %v3884_v63, %v3883_v30  ;;  %v3755_v53 = vadd.f32 %v3754_v2, %v3695_v29  ;;  %v3893_v61 = vadd.f32 %v3892_v8, %v3837_v22 }
 0x7e8   : > { %v3889_v36 = vadd.f32 %v3888_v41, %v3887_v18  ;;  %v3839_v37 = vpop.xlane.xlu1 %3838  ;;  %v3699_v43 = vpop.xlane.xlu0 %3698  ;;  %v11125_v60 = vmax.f32 %v4004_v57, 0.0  ;;  %v3752_v1 = vrot.slane %v3751_v47, 1  ;;  %v3760_v14 = vrot.slane %v3697_v0, 4 }
 0x7e9   : > { %v3989_v58 = vsub.f32 %v3885_v42, %v3973_v11  ;;  %v3974_v16 = vmul.f32 %v11121_v17, %v3747_v55  ;;  %v3756_v54 = vrot.slane %v3755_v53, 2  ;;  %v3894_v25 = vrot.slane %v3893_v61, 2 }
 0x7ea   : > { %v3890_v46 = vrot.slane %v3889_v36, 1  ;;  %v11128_v34 = vmax.f32 %v4005_v26, 0.0  ;;  %v3753_v62 = vadd.f32 %v3752_v1, %v3751_v47  ;;  %v3761_v63 = vadd.f32 %v3760_v14, %v3697_v0 }
 0x7eb   : > { %v4006_v30 = vmul.f32 0.0009775171, %v3989_v58  ;;  %v3757_v29 = vadd.f32 %v3756_v54, %v3755_v53  ;;  %v3895_v8 = vadd.f32 %v3894_v25, %v3893_v61  ;;  %v3898_v22 = vrot.slane %v3839_v37, 4 }
 0x7ec   : > { %v3891_v18 = vadd.f32 %v3890_v46, %v3889_v36  ;;  %v3841_v3 = vpop.xlane.xlu1 %3840  ;;  %v3701_v57 = vpop.xlane.xlu0 %3700  ;;  %7940 = vrsqrt.f32 %v11125_v60  ;;  %v11131_v41 = vmul.f32 0.0009765625, %v3753_v62  ;;  %v3762_v2 = vrot.slane %v3761_v63, 2 }
 0x7ed   : > { %v3766_v55 = vrot.slane %v3699_v43, 4  ;;  %v7937_v11 = vpop.eup %7936  ;;  %v3758_v39 = vrot.slane %v3757_v29, 1  ;;  %v3896_v26 = vrot.slane %v3895_v8, 1  ;;  %v3899_v20 = vadd.f32 %v3898_v22, %v3839_v37 }
 0x7ee   : > { %v3990_v42 = vsub.f32 %v3891_v18, %v3974_v16  ;;  %7942 = vrsqrt.f32 %v11128_v34  ;;  %v3763_v54 = vadd.f32 %v3762_v2, %v3761_v63  ;;  %v11136_v47 = vmax.f32 %v4006_v30, 0.0 }
 0x7ef   : > { %v3767_v46 = vadd.f32 %v3766_v55, %v3699_v43  ;;  %v3759_v36 = vadd.f32 %v3758_v39, %v3757_v29  ;;  %v3897_v53 = vadd.f32 %v3896_v26, %v3895_v8  ;;  %v3900_v61 = vrot.slane %v3899_v20, 2 }
 0x7f0   : > { %v3843_v58 = vpop.xlane.xlu1 %3842  ;;  %v3703_v1 = vpop.xlane.xlu0 %3702  ;;  %v3764_v14 = vrot.slane %v3763_v54, 1  ;;  %v3904_v16 = vrot.slane %v3841_v3, 4  ;;  %v3772_v18 = vrot.slane %v3701_v57, 4  ;;  %v3975_v37 = vmul.f32 %v11131_v41, %v3753_v62 }
 0x7f1   : > { %v3768_v25 = vrot.slane %v3767_v46, 2  ;;  %v11138_v7 = vpop.eup %7938  ;;  %v4007_v22 = vmul.f32 0.0009775171, %v3990_v42  ;;  %v11141_v0 = vmul.f32 0.0009765625, %v3759_v36  ;;  %v3901_v63 = vadd.f32 %v3900_v61, %v3899_v20 }
 0x7f2   : > { %v3765_v43 = vadd.f32 %v3764_v14, %v3763_v54  ;;  %v3905_v2 = vadd.f32 %v3904_v16, %v3841_v3  ;;  %v3773_v39 = vadd.f32 %v3772_v18, %v3701_v57  ;;  %v11144_v29 = vmul.f32 %v7937_v11, %v11113_v10 }
 0x7f3   : > { %v3769_v30 = vadd.f32 %v3768_v25, %v3767_v46  ;;  %7944 = vrsqrt.f32 %v11136_v47  ;;  %v3991_v8 = vsub.f32 %v3897_v53, %v3975_v37  ;;  %v3902_v55 = vrot.slane %v3901_v63, 1 }
 0x7f4   : > { %v3845_v26 = vpop.xlane.xlu1 %3844  ;;  %v11147_v33 = vmul.f32 0.0009765625, %v3765_v43  ;;  %v3906_v62 = vrot.slane %v3905_v2, 2  ;;  %v3774_v42 = vrot.slane %v3773_v39, 2  ;;  %v3976_v51 = vmul.f32 %v11141_v0, %v3759_v36  ;;  %v3705_v3 = vpop.xlane.xlu0 %3704 }
 0x7f5   : > { %v3770_v21 = vrot.slane %v3769_v30, 1  ;;  %v3903_v20 = vadd.f32 %v3902_v55, %v3901_v63  ;;  %v3910_v54 = vrot.slane %v3843_v58, 4  ;;  %v3778_v46 = vrot.slane %v3703_v1, 4 }
 0x7f6   : > { %12791 = vst [vmem:[#allocation113_spill] sm:$0xff] %v11147_v33  ;;  %v11150_v57 = vpop.eup %7940  ;;  %v11152_v11 = vmax.f32 %v4007_v22, 0.0  ;;  %v3907_v14 = vadd.f32 %v3906_v62, %v3905_v2  ;;  %v3775_v53 = vadd.f32 %v3774_v42, %v3773_v39  ;;  %v4008_v25 = vmul.f32 0.0009775171, %v3991_v8 }
 0x7f7   : > { %v3771_v61 = vadd.f32 %v3770_v21, %v3769_v30  ;;  %v3992_v16 = vsub.f32 %v3903_v20, %v3976_v51  ;;  %v3911_v18 = vadd.f32 %v3910_v54, %v3843_v58  ;;  %v3779_v37 = vadd.f32 %v3778_v46, %v3703_v1 }
 0x7f8   : > { %v3847_v32 = vpop.xlane.xlu1 %3846  ;;  %v11154_v49 = vpop.eup %7942  ;;  %v3977_v36 = vmul.f32 %v11147_v33, %v3765_v43  ;;  %v3908_v63 = vrot.slane %v3907_v14, 1  ;;  %v3776_v55 = vrot.slane %v3775_v53, 1  ;;  %v3916_v31 = vrot.slane %v3845_v26, 4 }
 0x7f9   : > { %v11157_v59 = vmul.f32 0.0009765625, %v3771_v61  ;;  %v3912_v27 = vrot.slane %v3911_v18, 2  ;;  %v3780_v22 = vrot.slane %v3779_v37, 2  ;;  %v3784_v45 = vrot.slane %v3705_v3, 4  ;;  %v3707_v8 = vpop.xlane.xlu0 %3706 }
 0x7fa   : > { %v4009_v21 = vmul.f32 0.0009775171, %v3992_v16  ;;  %v3909_v30 = vadd.f32 %v3908_v63, %v3907_v14  ;;  %v3777_v2 = vadd.f32 %v3776_v55, %v3775_v53  ;;  %v3917_v39 = vadd.f32 %v3916_v31, %v3845_v26 }
 0x7fb   : > { %7946 = vrsqrt.f32 %v11152_v11  ;;  %v3913_v51 = vadd.f32 %v3912_v27, %v3911_v18  ;;  %v3781_v58 = vadd.f32 %v3780_v22, %v3779_v37  ;;  %v3785_v1 = vadd.f32 %v3784_v45, %v3705_v3 }
 0x7fc   : > { %v11160_v62 = vmax.f32 %v4008_v25, 0.0  ;;  %v3993_v43 = vsub.f32 %v3909_v30, %v3977_v36  ;;  %v3918_v42 = vrot.slane %v3917_v39, 2  ;;  %v3922_v20 = vrot.slane %v3847_v32, 4  ;;  %v3849_v53 = vpop.xlane.xlu1 %3848 }
 0x7fd   : > { %v11162_v54 = vpop.eup %7944  ;;  %v11164_v46 = vmul.f32 0.0009765625, %v3777_v2  ;;  %v3914_v24 = vrot.slane %v3913_v51, 1  ;;  %v3782_v16 = vrot.slane %v3781_v58, 1  ;;  %v3786_v14 = vrot.slane %v3785_v1, 2  ;;  %v3709_v15 = vpop.xlane.xlu0 %3708 }
 0x7fe   : > { %v11166_v31 = vmax.f32 %v4009_v21, 0.0  ;;  %v3978_v27 = vmul.f32 %v11157_v59, %v3771_v61  ;;  %v3919_v26 = vadd.f32 %v3918_v42, %v3917_v39  ;;  %v3923_v45 = vadd.f32 %v3922_v20, %v3847_v32 }
 0x7ff   : > { %v3915_v3 = vadd.f32 %v3914_v24, %v3913_v51  ;;  %v3783_v25 = vadd.f32 %v3782_v16, %v3781_v58  ;;  %v3787_v18 = vadd.f32 %v3786_v14, %v3785_v1  ;;  %v3790_v37 = vrot.slane %v3707_v8, 4 }
 0x800   : > { %v4010_v36 = vmul.f32 0.0009775171, %v3993_v43  ;;  %v3920_v63 = vrot.slane %v3919_v26, 1  ;;  %v3924_v55 = vrot.slane %v3923_v45, 2  ;;  %v3928_v22 = vrot.slane %v3849_v53, 4 }
 0x801   : > { %v3979_v30 = vmul.f32 %v11164_v46, %v3777_v2  ;;  %v3994_v40 = vsub.f32 %v3915_v3, %v3978_v27  ;;  %v3788_v4 = vrot.slane %v3787_v18, 1  ;;  %v3791_v12 = vadd.f32 %v3790_v37, %v3707_v8 }
 0x802   : > { %v11170_v21 = vmul.f32 0.0009765625, %v3783_v25  ;;  %v3921_v33 = vadd.f32 %v3920_v63, %v3919_v26  ;;  %v3925_v61 = vadd.f32 %v3924_v55, %v3923_v45  ;;  %v3929_v39 = vadd.f32 %v3928_v22, %v3849_v53  ;;  %v3711_v63 = vpop.xlane.xlu0 %3710 }
 0x803   : > { %7948 = vrsqrt.f32 %v11160_v62  ;;  %v4011_v32 = vmul.f32 0.0009775171, %v3994_v40  ;;  %v3789_v24 = vadd.f32 %v3788_v4, %v3787_v18  ;;  %v3792_v51 = vrot.slane %v3791_v12, 2  ;;  %v3851_v4 = vpop.xlane.xlu1 %3850 }
 0x804   : > { %v3995_v58 = vsub.f32 %v3921_v33, %v3979_v30  ;;  %v3926_v1 = vrot.slane %v3925_v61, 1  ;;  %v3930_v43 = vrot.slane %v3929_v39, 2  ;;  %v3796_v42 = vrot.slane %v3709_v15, 4 }
 0x805   : > { %v11173_v20 = vpop.eup %7946  ;;  %7950 = vrsqrt.f32 %v11166_v31  ;;  %v11176_v2 = vmax.f32 %v4010_v36, 0.0  ;;  %v11178_v8 = vmul.f32 0.0009765625, %v3789_v24  ;;  %v3793_v16 = vadd.f32 %v3792_v51, %v3791_v12 }
 0x806   : > { %v3980_v14 = vmul.f32 %v11170_v21, %v3783_v25  ;;  %v3927_v53 = vadd.f32 %v3926_v1, %v3925_v61  ;;  %v3931_v27 = vadd.f32 %v3930_v43, %v3929_v39  ;;  %v3797_v40 = vadd.f32 %v3796_v42, %v3709_v15 }
 0x807   : > { %v11181_v26 = vmax.f32 %v4011_v32, 0.0  ;;  %v4012_v33 = vmul.f32 0.0009775171, %v3995_v58  ;;  %v3794_v45 = vrot.slane %v3793_v16, 1  ;;  %vm4036_vm11 = vcmp.eq.f32.partialorder %v11113_v10, inf }
 0x808   : > { %v3996_v3 = vsub.f32 %v3927_v53, %v3980_v14  ;;  %v3932_v18 = vrot.slane %v3931_v27, 1  ;;  %v3798_v37 = vrot.slane %v3797_v40, 2  ;;  %v4037_v36 = vsel %vm4036_vm11, %v11113_v10, %v11144_v29 }
 0x809   : > { %v3981_v12 = vmul.f32 %v11178_v8, %v3789_v24  ;;  %v3795_v25 = vadd.f32 %v3794_v45, %v3793_v16  ;;  %v4039_v55 = vand.u32 2147483648, %v11113_v10  ;;  %v3934_v15 = vrot.slane %v3851_v4, 4 }
 0x80a   : > { %v4013_v22 = vmul.f32 0.0009775171, %v3996_v3  ;;  %v3933_v30 = vadd.f32 %v3932_v18, %v3931_v27  ;;  %v3799_v61 = vadd.f32 %v3798_v37, %v3797_v40  ;;  %vm4038_vm12 = vcmp.eq.f32.partialorder %v11113_v10, 0.0  ;;  %v3855_v40 = vpop.xlane.xlu0 %3854  ;;  %v3853_v18 = vpop.xlane.xlu1 %3852 }
 0x80b   : > { %v11189_v39 = vmax.f32 %v4012_v33, 0.0  ;;  %v4040_v32 = vsel %vm4038_vm12, %v4039_v55, %v4037_v36  ;;  %v3935_v51 = vadd.f32 %v3934_v15, %v3851_v4  ;;  %v3802_v58 = vrot.slane %v3711_v63, 4 }
 0x80c   : > { %v11191_v1 = vmul.f32 0.0009765625, %v3795_v25  ;;  %v3997_v29 = vsub.f32 %v3933_v30, %v3981_v12  ;;  %v3800_v43 = vrot.slane %v3799_v61, 1  ;;  %v4146_v42 = vadd.f32 1e-05, %v4040_v32 }
 0x80d   : > { %v11193_v24 = vpop.eup %7948  ;;  %7952 = vrsqrt.f32 %v11176_v2  ;;  %v3936_v16 = vrot.slane %v3935_v51, 2  ;;  %v3803_v14 = vadd.f32 %v3802_v58, %v3711_v63  ;;  %v4042_v53 = vmul.f32 %v11138_v7, %v11119_v13 }
 0x80e   : > { %7954 = vrsqrt.f32 %v11181_v26  ;;  %v11199_v10 = vmax.f32 %v4013_v22, 0.0  ;;  %v4014_v27 = vmul.f32 0.0009775171, %v3997_v29  ;;  %vm4043_vm15 = vcmp.eq.f32.partialorder %v11119_v13, inf }
 0x80f   : > { %v11202_v4 = vpop.eup %7950  ;;  %7956 = vrcp.f32 %v4146_v42  ;;  %v3937_v33 = vadd.f32 %v3936_v16, %v3935_v51  ;;  %v3804_v45 = vrot.slane %v3803_v14, 2  ;;  %v4044_v3 = vsel %vm4043_vm15, %v11119_v13, %v4042_v53 }
 0x810   : > { %7958 = vrsqrt.f32 %v11189_v39  ;;  %v3982_v7 = vmul.f32 %v11191_v1, %v3795_v25  ;;  %v3801_v37 = vadd.f32 %v3800_v43, %v3799_v61  ;;  %v4046_v36 = vand.u32 2147483648, %v11119_v13 }
 0x811   : > { %v3938_v63 = vrot.slane %v3937_v33, 1  ;;  %v3805_v12 = vadd.f32 %v3804_v45, %v3803_v14  ;;  %vm4045_vm14 = vcmp.eq.f32.partialorder %v11119_v13, 0.0  ;;  %v3946_v55 = vrot.slane %v3855_v40, 4 }
 0x812   : > { %7960 = vrsqrt.f32 %v11199_v10  ;;  %v11210_v15 = vmax.f32 %v4014_v27, 0.0  ;;  %v4047_v22 = vsel %vm4045_vm14, %v4046_v36, %v4044_v3  ;;  %v3940_v30 = vrot.slane %v3853_v18, 4 }
 0x813   : > { %v3939_v32 = vadd.f32 %v3938_v63, %v3937_v33  ;;  %v3806_v51 = vrot.slane %v3805_v12, 1  ;;  %v4147_v58 = vadd.f32 1e-05, %v4047_v22  ;;  %v3947_v29 = vadd.f32 %v3946_v55, %v3855_v40 }
 0x814   : > { %v11212_v42 = vmul.f32 0.0009765625, %v3801_v37  ;;  %v3941_v25 = vadd.f32 %v3940_v30, %v3853_v18  ;;  %v4049_v61 = vmul.f32 %v11150_v57, %v11125_v60  ;;  %vm4050_vm13 = vcmp.eq.f32.partialorder %v11125_v60, inf }
 0x815   : > { %v3998_v13 = vsub.f32 %v3939_v32, %v3982_v7  ;;  %v3807_v43 = vadd.f32 %v3806_v51, %v3805_v12  ;;  %7962 = vrcp.f32 %v4147_v58  ;;  %v3948_v16 = vrot.slane %v3947_v29, 2 }
 0x816   : > { %v4195_v14 = vsub.f32 %v10993_v56, %v11102_v9  ;;  %v3942_v53 = vrot.slane %v3941_v25, 2  ;;  %v4051_v27 = vsel %vm4050_vm13, %v11125_v60, %v4049_v61  ;;  %v4053_v40 = vand.u32 2147483648, %v11125_v60 }
 0x817   : > { %v11221_v33 = vpop.eup %7952  ;;  %v11223_v45 = vmul.f32 0.0009765625, %v3807_v43  ;;  %v3949_v3 = vadd.f32 %v3948_v16, %v3947_v29  ;;  %vm4052_vm0 = vcmp.eq.f32.partialorder %v11125_v60, 0.0  ;;  %v4056_v57 = vmul.f32 %v11154_v49, %v11128_v34 }
 0x818   : > { %v11228_v18 = vpop.eup %7954  ;;  %7964 = vrsqrt.f32 %v11210_v15  ;;  %v4015_v9 = vmul.f32 0.0009775171, %v3998_v13  ;;  %v3943_v56 = vadd.f32 %v3942_v53, %v3941_v25  ;;  %v4054_v7 = vsel %vm4052_vm0, %v4053_v40, %v4051_v27 }
 0x819   : > { %v7957_v36 = vpop.eup %7956  ;;  %v3984_v63 = vmul.f32 %v11223_v45, %v3807_v43  ;;  %v3950_v12 = vrot.slane %v3949_v3, 1  ;;  %v4148_v55 = vadd.f32 1e-05, %v4054_v7  ;;  %vm4057_vm11 = vcmp.eq.f32.partialorder %v11128_v34, inf }
 0x81a   : > { %v11233_v22 = vpop.eup %7958  ;;  %v3983_v60 = vmul.f32 %v11212_v42, %v3801_v37  ;;  %v12792_v49 = vsub.f32 %v10996_v35, %v11104_v38  ;;  %v3944_v32 = vrot.slane %v3943_v56, 1  ;;  %v4058_v51 = vsel %vm4057_vm11, %v11128_v34, %v4056_v57 }
 0x81b   : > { %v3951_v58 = vadd.f32 %v3950_v12, %v3949_v3  ;;  %vm4059_vm12 = vcmp.eq.f32.partialorder %v11128_v34, 0.0  ;;  %v4060_v29 = vand.u32 2147483648, %v11128_v34  ;;  %v4063_v25 = vmul.f32 %v11162_v54, %v11136_v47 }
 0x81c   : > { %v4210_v30 = vmul.f32 %v7957_v36, %v12792_v49  ;;  %v11244_v61 = vpop.eup %7960  ;;  %v3945_v37 = vadd.f32 %v3944_v32, %v3943_v56  ;;  %7966 = vrcp.f32 %v4148_v55  ;;  %v11246_v43 = vmax.f32 %v4015_v9, 0.0 }
 0x81d   : > { %v4000_v35 = vsub.f32 %v3951_v58, %v3984_v63  ;;  %v4061_v38 = vsel %vm4059_vm12, %v4060_v29, %v4058_v51  ;;  %vm4064_vm14 = vcmp.eq.f32.partialorder %v11136_v47, inf  ;;  %vm4066_vm13 = vcmp.eq.f32.partialorder %v11136_v47, 0.0 }
 0x81e   : > { %vm4226_vm15 = vcmp.gt.f32.partialorder %v4210_v30, 0.0  ;;  %v4242_v13 = vmul.f32 0.01, %v4210_v30  ;;  %v3999_v53 = vsub.f32 %v3945_v37, %v3983_v60  ;;  %v4149_v27 = vadd.f32 1e-05, %v4061_v38 }
 0x81f   : > { %v4065_v34 = vsel %vm4064_vm14, %v11136_v47, %v4063_v25  ;;  %v7963_v40 = vpop.eup %7962  ;;  %v4017_v54 = vmul.f32 0.0009775171, %v4000_v35  ;;  %v4067_v3 = vand.u32 2147483648, %v11136_v47  ;;  %v4070_v57 = vmul.f32 %v11173_v20, %v11152_v11 }
 0x820   : > { %v4258_v16 = vsel %vm4226_vm15, %v4210_v30, %v4242_v13  ;;  %v12793_v9 = vmov 0.0   ;;  %v4211_v56 = vmul.f32 %v7963_v40, %v4195_v14  ;;  %v4016_v7 = vmul.f32 0.0009775171, %v3999_v53 }
 0x821   : > { %4371 = vmatmul.mubr.f32.vlgmr.msra.gmra.mrb[52].mxu1 %v4258_v16  ;;  %7968 = vrcp.f32 %v4149_v27  ;;  %vm4071_vm0 = vcmp.eq.f32.partialorder %v11152_v11, inf  ;;  %v11256_v36 = vmax.f32 %v4017_v54, 0.0  ;;  %v4196_v63 = vsub.f32 %v11003_v50, %v11108_v44 }
 0x822   : > { %4376 = vmatprep.mubr.f32.mxu1 %v12793_v9  ;;  %v4068_v12 = vsel %vm4066_vm13, %v4067_v3, %v4065_v34  ;;  %v4072_v55 = vsel %vm4071_vm0, %v11152_v11, %v4070_v57  ;;  %v11261_v60 = vpop.eup %7964  ;;  %vm4227_vm11 = vcmp.gt.f32.partialorder %v4211_v56, 0.0  ;;  %v4243_v47 = vmul.f32 0.01, %v4211_v56 }
 0x823   : > { %v11263_v20 = vmax.f32 %v4016_v7, 0.0  ;;  %v4150_v49 = vadd.f32 1e-05, %v4068_v12  ;;  %7970 = vrsqrt.f32 %v11246_v43  ;;  %v4197_v14 = vsub.f32 %v11009_v52, %v11110_v23 }
 0x824   : > { %v4074_v30 = vand.u32 2147483648, %v11152_v11  ;;  %v4077_v44 = vmul.f32 %v11193_v24, %v11160_v62  ;;  %v4259_v50 = vsel %vm4227_vm11, %v4211_v56, %v4243_v47  ;;  %7972 = vrsqrt.f32 %v11256_v36 }
 0x825   : > { %vm4073_vm12 = vcmp.eq.f32.partialorder %v11152_v11, 0.0  ;;  %vm4078_vm15 = vcmp.eq.f32.partialorder %v11160_v62, inf  ;;  %4377 = vmatmul.mubr.f32.gmra.mrb[54].mxu1 %v4259_v50  ;;  %7974 = vrcp.f32 %v4150_v49  ;;  %v4081_v58 = vand.u32 2147483648, %v11160_v62 }
 0x826   : > { %v4075_v32 = vsel %vm4073_vm12, %v4074_v30, %v4072_v55  ;;  %v4079_v51 = vsel %vm4078_vm15, %v11160_v62, %v4077_v44  ;;  %v7967_v52 = vpop.eup %7966  ;;  %7976 = vrsqrt.f32 %v11263_v20  ;;  %4382 = vmatprep.mubr.f32.mxu1 %v12793_v9  ;;  %vm4080_vm14 = vcmp.eq.f32.partialorder %v11160_v62, 0.0 }
 0x827   : > { %v4151_v23 = vadd.f32 1e-05, %v4075_v32  ;;  %v4084_v11 = vmul.f32 %v11202_v4, %v11166_v31  ;;  %v4212_v24 = vmul.f32 %v7967_v52, %v4196_v63  ;;  %v4082_v29 = vsel %vm4080_vm14, %v4081_v58, %v4079_v51 }
 0x828   : > { %vm4085_vm13 = vcmp.eq.f32.partialorder %v11166_v31, inf  ;;  %v4088_v25 = vand.u32 2147483648, %v11166_v31  ;;  %v4152_v13 = vadd.f32 1e-05, %v4082_v29  ;;  %vm4087_vm0 = vcmp.eq.f32.partialorder %v11166_v31, 0.0 }
 0x829   : > { %7978 = vrcp.f32 %v4151_v23  ;;  %v4086_v37 = vsel %vm4085_vm13, %v11166_v31, %v4084_v11  ;;  %vm4228_vm11 = vcmp.gt.f32.partialorder %v4212_v24, 0.0  ;;  %v4244_v35 = vmul.f32 0.01, %v4212_v24 }
 0x82a   : > { %v4089_v38 = vsel %vm4087_vm0, %v4088_v25, %v4086_v37  ;;  %v4091_v62 = vmul.f32 %v11221_v33, %v11176_v2  ;;  %v4198_v4 = vsub.f32 %v11017_v6, %v11116_v19  ;;  %7980 = vrcp.f32 %v4152_v13  ;;  %v12794_v13 = vld [vmem:[#allocation113_spill] sm:$0xff] }
 0x82b   : > { %v7969_v16 = vpop.eup %7968  ;;  %v4153_v53 = vadd.f32 1e-05, %v4089_v38  ;;  %vm4092_vm12 = vcmp.eq.f32.partialorder %v11176_v2, inf  ;;  %v4260_v27 = vsel %vm4228_vm11, %v4212_v24, %v4244_v35  ;;  %v4095_v31 = vand.u32 2147483648, %v11176_v2 }
 0x82c   : > { %v4213_v34 = vmul.f32 %v7969_v16, %v4197_v14  ;;  %v4093_v40 = vsel %vm4092_vm12, %v11176_v2, %v4091_v62  ;;  %4383 = vmatmul.mubr.f32.gmra.mrb[56].mxu1 %v4260_v27  ;;  %v4199_v54 = vsub.f32 %v11023_v28, %v11121_v17  ;;  %vm4094_vm15 = vcmp.eq.f32.partialorder %v11176_v2, 0.0 }
 0x82d   : > { %7982 = vrcp.f32 %v4153_v53  ;;  %v4098_v6 = vmul.f32 %v11228_v18, %v11181_v26  ;;  %v11297_v19 = vpop.eup %7970  ;;  %4388 = vmatprep.mubr.f32.mxu1 %v12793_v9  ;;  %v4096_v3 = vsel %vm4094_vm15, %v4095_v31, %v4093_v40  ;;  %vm4099_vm13 = vcmp.eq.f32.partialorder %v11181_v26, inf }
 0x82e   : > { %vm4229_vm14 = vcmp.gt.f32.partialorder %v4213_v34, 0.0  ;;  %v4245_v33 = vmul.f32 0.01, %v4213_v34  ;;  %v11301_v57 = vpop.eup %7972  ;;  %v4200_v28 = vsub.f32 %v11031_v48, %v11131_v41  ;;  %v4154_v17 = vadd.f32 1e-05, %v4096_v3 }
 0x82f   : > { %v4100_v2 = vsel %vm4099_vm13, %v11181_v26, %v4098_v6  ;;  %v4102_v56 = vand.u32 2147483648, %v11181_v26  ;;  %v7975_v18 = vpop.eup %7974  ;;  %vm4101_vm0 = vcmp.eq.f32.partialorder %v11181_v26, 0.0  ;;  %v4105_v63 = vmul.f32 %v11233_v22, %v11189_v39 }
 0x830   : > { %v4261_v7 = vsel %vm4229_vm14, %v4213_v34, %v4245_v33  ;;  %vm4106_vm11 = vcmp.eq.f32.partialorder %v11189_v39, inf  ;;  %v7977_v12 = vpop.eup %7976  ;;  %v4214_v55 = vmul.f32 %v7975_v18, %v4198_v4  ;;  %7984 = vrcp.f32 %v4154_v17 }
 0x831   : > { %4389 = vmatmul.mubr.f32.gmra.mrb[58].mxu1 %v4261_v7  ;;  %v4103_v47 = vsel %vm4101_vm0, %v4102_v56, %v4100_v2  ;;  %v4109_v48 = vand.u32 2147483648, %v11189_v39  ;;  %v4107_v49 = vsel %vm4106_vm11, %v11189_v39, %v4105_v63  ;;  %vm4108_vm12 = vcmp.eq.f32.partialorder %v11189_v39, 0.0  ;;  %v12797_v63 = vld [vmem:[#allocation105_spill] sm:$0xff] }
 0x832   : > { %4394 = vmatprep.mubr.f32.mxu1 %v12793_v9  ;;  %v4155_v41 = vadd.f32 1e-05, %v4103_v47  ;;  %v4112_v26 = vmul.f32 %v11244_v61, %v11199_v10  ;;  %vm4230_vm15 = vcmp.gt.f32.partialorder %v4214_v55, 0.0  ;;  %v4246_v14 = vmul.f32 0.01, %v4214_v55 }
 0x833   : > { %v7979_v22 = vpop.eup %7978  ;;  %v4110_v30 = vsel %vm4108_vm12, %v4109_v48, %v4107_v49  ;;  %vm4113_vm14 = vcmp.eq.f32.partialorder %v11199_v10, inf  ;;  %v4201_v52 = vsub.f32 %v11037_v5, %v11141_v0  ;;  %vm4115_vm13 = vcmp.eq.f32.partialorder %v11199_v10, 0.0 }
 0x834   : > { %v4215_v44 = vmul.f32 %v7979_v22, %v4199_v54  ;;  %7986 = vrcp.f32 %v4155_v41  ;;  %v4156_v50 = vadd.f32 1e-05, %v4110_v30  ;;  %v4114_v32 = vsel %vm4113_vm14, %v11199_v10, %v4112_v26  ;;  %v7981_v51 = vpop.eup %7980  ;;  %v12796_v54 = vld [vmem:[#allocation106_spill] sm:$0xff] }
 0x835   : > { %v4262_v58 = vsel %vm4230_vm15, %v4214_v55, %v4246_v14  ;;  %v4116_v39 = vand.u32 2147483648, %v11199_v10  ;;  %v4216_v23 = vmul.f32 %v7981_v51, %v4200_v28  ;;  %v4119_v29 = vmul.f32 %v11261_v60, %v11210_v15  ;;  %v12795_v10 = vld [vmem:[#allocation116_spill] sm:$0xff]  ;;  %v12798_v22 = vld [vmem:[#allocation82_spill] sm:$0xff] }
 0x836   : > { %4395 = vmatmul.mubr.f32.gmra.mrb[60].mxu1 %v4262_v58  ;;  %vm4231_vm0 = vcmp.gt.f32.partialorder %v4215_v44, 0.0  ;;  %v4247_v61 = vmul.f32 0.01, %v4215_v44  ;;  %7988 = vrcp.f32 %v4156_v50  ;;  %vm4120_vm11 = vcmp.eq.f32.partialorder %v11210_v15, inf  ;;  %v12799_v58 = vld [vmem:[#allocation108_spill] sm:$0xff] }
 0x837   : > { %v7983_v11 = vpop.eup %7982  ;;  %4400 = vmatprep.mubr.f32.mxu1 %v12793_v9  ;;  %v4117_v24 = vsel %vm4115_vm13, %v4116_v39, %v4114_v32  ;;  %vm4232_vm12 = vcmp.gt.f32.partialorder %v4216_v23, 0.0  ;;  %v4248_v5 = vmul.f32 0.01, %v4216_v23  ;;  %v4202_v37 = vsub.f32 %v12795_v10, %v12794_v13 }
 0x838   : > { %v4263_v25 = vsel %vm4231_vm0, %v4215_v44, %v4247_v61  ;;  %v4217_v0 = vmul.f32 %v7983_v11, %v4201_v52  ;;  %v4157_v35 = vadd.f32 1e-05, %v4117_v24  ;;  %v4121_v38 = vsel %vm4120_vm11, %v11210_v15, %v4119_v29 }
 0x839   : > { %v4123_v62 = vand.u32 2147483648, %v11210_v15  ;;  %v4264_v16 = vsel %vm4232_vm12, %v4216_v23, %v4248_v5  ;;  %vm4122_vm15 = vcmp.eq.f32.partialorder %v11210_v15, 0.0  ;;  %v4126_v60 = vmul.f32 %v11297_v19, %v11246_v43  ;;  %v12800_v23 = vld [vmem:[#allocation107_spill] sm:$0xff] }
 0x83a   : > { %4401 = vmatmul.mubr.f32.gmra.mrb[62].mxu1 %v4263_v25  ;;  %v4249_v4 = vmul.f32 0.01, %v4217_v0  ;;  %v7985_v53 = vpop.eup %7984  ;;  %vm4233_vm14 = vcmp.gt.f32.partialorder %v4217_v0, 0.0  ;;  %7990 = vrcp.f32 %v4157_v35  ;;  %vm4127_vm13 = vcmp.eq.f32.partialorder %v11246_v43, inf }
 0x83b   : > { %4406 = vmatprep.mubr.f32.mxu1 %v12793_v9  ;;  %v4124_v27 = vsel %vm4122_vm15, %v4123_v62, %v4121_v38  ;;  %v4218_v34 = vmul.f32 %v7985_v53, %v4202_v37  ;;  %v4128_v31 = vsel %vm4127_vm13, %v11246_v43, %v4126_v60  ;;  %v4203_v6 = vsub.f32 %v12796_v54, %v11157_v59  ;;  %v12802_v62 = vld [vmem:[#allocation109_spill] sm:$0xff] }
 0x83c   : > { %v4158_v40 = vadd.f32 1e-05, %v4124_v27  ;;  %vm4129_vm0 = vcmp.eq.f32.partialorder %v11246_v43, 0.0  ;;  %v4130_v15 = vand.u32 2147483648, %v11246_v43  ;;  %v4133_v19 = vmul.f32 %v7977_v12, %v11263_v20 }
 0x83d   : > { %v4265_v3 = vsel %vm4233_vm14, %v4217_v0, %v4249_v4  ;;  %v4250_v28 = vmul.f32 0.01, %v4218_v34  ;;  %vm4134_vm11 = vcmp.eq.f32.partialorder %v11263_v20, inf  ;;  %v4137_v59 = vand.u32 2147483648, %v11263_v20 }
 0x83e   : > { %v7987_v33 = vpop.eup %7986  ;;  %4407 = vmatmul.mubr.f32.gmra.mrb[64].mxu1 %v4264_v16  ;;  %7992 = vrcp.f32 %v4158_v40  ;;  %v4131_v2 = vsel %vm4129_vm0, %v4130_v15, %v4128_v31  ;;  %v4135_v56 = vsel %vm4134_vm11, %v11263_v20, %v4133_v19  ;;  %vm4234_vm12 = vcmp.gt.f32.partialorder %v4218_v34, 0.0 }
 0x83f   : > { %4412 = vmatprep.mubr.f32.mxu1 %v12793_v9  ;;  %v4219_v17 = vmul.f32 %v7987_v33, %v4203_v6  ;;  %v4159_v43 = vadd.f32 1e-05, %v4131_v2  ;;  %vm4136_vm15 = vcmp.eq.f32.partialorder %v11263_v20, 0.0  ;;  %v4140_v7 = vmul.f32 %v11301_v57, %v11256_v36 }
 0x840   : > { %v7989_v18 = vpop.eup %7988  ;;  %v4204_v12 = vsub.f32 %v12797_v63, %v11164_v46  ;;  %v4138_v55 = vsel %vm4136_vm15, %v4137_v59, %v4135_v56  ;;  %vm4141_vm14 = vcmp.eq.f32.partialorder %v11256_v36, inf  ;;  %v4266_v48 = vsel %vm4234_vm12, %v4218_v34, %v4250_v28  ;;  %v12804_v34 = vld [vmem:[#allocation37_spill] sm:$0xff] }
 0x841   : > { %7994 = vrcp.f32 %v4159_v43  ;;  %v4160_v47 = vadd.f32 1e-05, %v4138_v55  ;;  %v4251_v41 = vmul.f32 0.01, %v4219_v17  ;;  %v4142_v26 = vsel %vm4141_vm14, %v11256_v36, %v4140_v7 }
 0x842   : > { %4413 = vmatmul.mubr.f32.gmra.mrb[66].mxu1 %v4265_v3  ;;  %v4220_v49 = vmul.f32 %v7989_v18, %v4204_v12  ;;  %vm4235_vm13 = vcmp.gt.f32.partialorder %v4219_v17, 0.0  ;;  %v4144_v20 = vand.u32 2147483648, %v11256_v36  ;;  %v4205_v46 = vsub.f32 %v12798_v22, %v11170_v21 }
 0x843   : > { %4418 = vmatprep.mubr.f32.mxu1 %v12793_v9  ;;  %vm4143_vm0 = vcmp.eq.f32.partialorder %v11256_v36, 0.0  ;;  %7996 = vrcp.f32 %v4160_v47  ;;  %v4267_v30 = vsel %vm4235_vm13, %v4219_v17, %v4251_v41  ;;  %v4206_v52 = vsub.f32 %v12799_v58, %v11178_v8  ;;  %v12801_v8 = vld [vmem:[#allocation110_spill] sm:$0xff] }
 0x844   : > { %v7991_v57 = vpop.eup %7990  ;;  %v4145_v14 = vsel %vm4143_vm0, %v4144_v20, %v4142_v26  ;;  %v4252_v44 = vmul.f32 0.01, %v4220_v49  ;;  %vm4236_vm11 = vcmp.gt.f32.partialorder %v4220_v49, 0.0  ;;  %v4207_v11 = vsub.f32 %v12800_v23, %v11191_v1 }
 0x845   : > { %v4221_v50 = vmul.f32 %v7991_v57, %v4205_v46  ;;  %v4161_v51 = vadd.f32 1e-05, %v4145_v14  ;;  %v4208_v0 = vsub.f32 %v12801_v8, %v11212_v42  ;;  %v4209_v16 = vsub.f32 %v12802_v62, %v11223_v45 }
 0x846   : > { %4419 = vmatmul.mubr.f32.gmra.mrb[68].mxu1 %v4266_v48  ;;  %v4268_v21 = vsel %vm4236_vm11, %v4220_v49, %v4252_v44  ;;  %v12803_v27 = vmov 1.0  }
 0x847   : > { %4424 = vmatprep.mubr.f32.mxu1 %v12793_v9  ;;  %v4253_v39 = vmul.f32 0.01, %v4221_v50  ;;  %vm4237_vm12 = vcmp.gt.f32.partialorder %v4221_v50, 0.0  ;;  %7998 = vrcp.f32 %v4161_v51 }
 0x848   : > { %v7993_v32 = vpop.eup %7992 }
 0x849   : > { %v4222_v36 = vmul.f32 %v7993_v32, %v4206_v52  ;;  %v4269_v24 = vsel %vm4237_vm12, %v4221_v50, %v4253_v39 }
 0x84a   : > { %4425 = vmatmul.mubr.f32.gmra.mrb[70].mxu1 %v4267_v30 }
 0x84b   : > { %4430 = vmatprep.mubr.f32.mxu1 %v12793_v9  ;;  %v7995_v61 = vpop.eup %7994  ;;  %v4254_v29 = vmul.f32 0.01, %v4222_v36  ;;  %vm4238_vm15 = vcmp.gt.f32.partialorder %v4222_v36, 0.0 }
 0x84c   : > { %v4223_v25 = vmul.f32 %v7995_v61, %v4207_v11 }
 0x84d   : > { %v7997_v5 = vpop.eup %7996  ;;  %v4270_v13 = vsel %vm4238_vm15, %v4222_v36, %v4254_v29 }
 0x84e   : > { %4431 = vmatmul.mubr.f32.gmra.mrb[72].mxu1 %v4268_v21  ;;  %v4255_v10 = vmul.f32 0.01, %v4223_v25  ;;  %v4224_v37 = vmul.f32 %v7997_v5, %v4208_v0  ;;  %vm4239_vm14 = vcmp.gt.f32.partialorder %v4223_v25, 0.0 }
 0x84f   : > { %4436 = vmatprep.mubr.f32.mxu1 %v12793_v9 }
 0x850   : > { %v4271_v1 = vsel %vm4239_vm14, %v4223_v25, %v4255_v10  ;;  %v4256_v38 = vmul.f32 0.01, %v4224_v37  ;;  %vm4240_vm13 = vcmp.gt.f32.partialorder %v4224_v37, 0.0 }
 0x851   : > { %v7999_v35 = vpop.eup %7998 }
 0x852   : > { %4437 = vmatmul.mubr.f32.gmra.mrb[74].mxu1 %v4269_v24  ;;  %v4225_v4 = vmul.f32 %v7999_v35, %v4209_v16  ;;  %v4272_v42 = vsel %vm4240_vm13, %v4224_v37, %v4256_v38 }
 0x853   : > { %4442 = vmatprep.mubr.f32.mxu1 %v12793_v9 }
 0x854   : > { %v4257_v60 = vmul.f32 0.01, %v4225_v4  ;;  %vm4241_vm0 = vcmp.gt.f32.partialorder %v4225_v4, 0.0 }
 0x856   : > { %4443 = vmatmul.mubr.f32.gmra.mrb[76].mxu1 %v4270_v13  ;;  %v4273_v53 = vsel %vm4241_vm0, %v4225_v4, %v4257_v60 }
 0x857   : > { %4448 = vmatprep.mubr.f32.mxu1 %v12793_v9 }
 0x85a   : > { %4449 = vmatmul.mubr.f32.gmra.mrb[78].mxu1 %v4271_v1 }
 0x85b   : > { %4454 = vmatprep.mubr.f32.mxu1 %v12793_v9 }
 0x85e   : > { %4455 = vmatmul.mubr.f32.gmra.mrb[80].mxu1 %v4272_v42 }
 0x85f   : > { %4460 = vmatprep.mubr.f32.mxu1 %v12793_v9 }
 0x862   : > { %4461 = vmatmul.mubr.f32.gmra.mrb[82].mxu1 %v4273_v53 }
 0x863   : > { %6934 = vmatprep.mubr.msk.f32.mxu1 %vm788_vm1, %v12803_v27 }
 0x8f4   : > { %v4372_v31 = vpop.f32.mrb[52].mxu1 }
 0x8f5   : > { %v4374_v45 = vpop.f32.mrb[53].mxu1 }
 0x8f8   : > { %v4378_v54 = vpop.f32.mrb[54].mxu1 }
 0x8f9   : > { %v7830_v6 = vpack.i.bf16 %v4378_v54, %v4372_v31  ;;  %v11377_v15 = vpack.c.bf16 %v4378_v54, %v4372_v31  ;;  %v4380_v19 = vpop.f32.mrb[55].mxu1 }
 0x8fa   : > { %v11379_v33 = vpack.c.bf16 %v4380_v19, %v4374_v45 }
 0x8fb   : > { %7831 = vrot.lane.b32.xlu1 %v7830_v6, %s8490_s27 }
 0x8ff   : > { %v4384_v3 = vpop.f32.mrb[56].mxu1 }
 0x900   : > { %v4386_v28 = vpop.f32.mrb[57].mxu1 }
 0x904   : > { %v4390_v17 = vpop.f32.mrb[58].mxu1 }
 0x905   : > { %v7835_v2 = vpack.i.bf16 %v4390_v17, %v4384_v3  ;;  %v11382_v56 = vpack.c.bf16 %v4390_v17, %v4384_v3  ;;  %v4392_v59 = vpop.f32.mrb[59].mxu1 }
 0x906   : > { %v11384_v18 = vpack.c.bf16 %v4392_v59, %v4386_v28 }
 0x907   : > { %7836 = vrot.lane.b32.xlu0 %v7835_v2, %s8490_s27 }
 0x909   : > { %v4396_v43 = vpop.f32.mrb[60].mxu1 }
 0x90a   : > { %v4398_v7 = vpop.f32.mrb[61].mxu1 }
 0x90d   : > { %v4402_v63 = vpop.f32.mrb[62].mxu1 }
 0x90e   : > { %v7840_v12 = vpack.i.bf16 %v4402_v63, %v4396_v43  ;;  %v11387_v55 = vpack.c.bf16 %v4402_v63, %v4396_v43  ;;  %v4404_v47 = vpop.f32.mrb[63].mxu1 }
 0x90f   : > { %v11389_v48 = vpack.c.bf16 %v4404_v47, %v4398_v7 }
 0x910   : > { %7841 = vrot.lane.b32.xlu1 %v7840_v12, %s8490_s27 }
 0x911   : > { %v4408_v41 = vpop.f32.mrb[64].mxu1 }
 0x912   : > { %v4410_v49 = vpop.f32.mrb[65].mxu1 }
 0x915   : > { %v4414_v26 = vpop.f32.mrb[66].mxu1 }
 0x916   : > { %v7845_v20 = vpack.i.bf16 %v4414_v26, %v4408_v41  ;;  %v11392_v57 = vpack.c.bf16 %v4414_v26, %v4408_v41  ;;  %v4416_v22 = vpop.f32.mrb[67].mxu1 }
 0x917   : > { %v11394_v46 = vpack.c.bf16 %v4416_v22, %v4410_v49 }
 0x918   : > { %7846 = vrot.lane.b32.xlu1 %v7845_v20, %s8490_s27 }
 0x919   : > { %v4420_v14 = vpop.f32.mrb[68].mxu1 }
 0x91a   : > { %v4422_v30 = vpop.f32.mrb[69].mxu1 }
 0x91d   : > { %v4426_v44 = vpop.f32.mrb[70].mxu1 }
 0x91e   : > { %v7850_v50 = vpack.i.bf16 %v4426_v44, %v4420_v14  ;;  %v11397_v32 = vpack.c.bf16 %v4426_v44, %v4420_v14  ;;  %v4428_v51 = vpop.f32.mrb[71].mxu1 }
 0x91f   : > { %v11399_v58 = vpack.c.bf16 %v4428_v51, %v4422_v30 }
 0x920   : > { %7851 = vrot.lane.b32.xlu0 %v7850_v50, %s8490_s27 }
 0x921   : > { %v4432_v52 = vpop.f32.mrb[72].mxu1 }
 0x922   : > { %v4434_v21 = vpop.f32.mrb[73].mxu1 }
 0x925   : > { %v4438_v39 = vpop.f32.mrb[74].mxu1 }
 0x926   : > { %v7855_v36 = vpack.i.bf16 %v4438_v39, %v4432_v52  ;;  %v11402_v61 = vpack.c.bf16 %v4438_v39, %v4432_v52  ;;  %v4440_v23 = vpop.f32.mrb[75].mxu1 }
 0x927   : > { %v11404_v11 = vpack.c.bf16 %v4440_v23, %v4434_v21 }
 0x928   : > { %7856 = vrot.lane.b32.xlu1 %v7855_v36, %s8490_s27 }
 0x929   : > { %v4444_v24 = vpop.f32.mrb[76].mxu1 }
 0x92a   : > { %v4446_v29 = vpop.f32.mrb[77].mxu1 }
 0x92d   : > { %v4450_v25 = vpop.f32.mrb[78].mxu1 }
 0x92e   : > { %v7860_v5 = vpack.i.bf16 %v4450_v25, %v4444_v24  ;;  %v11407_v8 = vpack.c.bf16 %v4450_v25, %v4444_v24  ;;  %v4452_v0 = vpop.f32.mrb[79].mxu1 }
 0x92f   : > { %v11409_v13 = vpack.c.bf16 %v4452_v0, %v4446_v29  ;;  %v12817_v0 = vld [vmem:[#allocation35_spill] sm:$0xff] }
 0x930   : > { %7861 = vrot.lane.b32.xlu0 %v7860_v5, %s8490_s27 }
 0x931   : > { %v4456_v10 = vpop.f32.mrb[80].mxu1 }
 0x932   : > { %v4458_v37 = vpop.f32.mrb[81].mxu1 }
 0x935   : > { %v4462_v35 = vpop.f32.mrb[82].mxu1 }
 0x936   : > { %v7865_v1 = vpack.i.bf16 %v4462_v35, %v4456_v10  ;;  %v11412_v38 = vpack.c.bf16 %v4462_v35, %v4456_v10  ;;  %v4464_v62 = vpop.f32.mrb[83].mxu1  ;;  %v12821_v10 = vld [vmem:[#allocation45_spill] sm:$0xff] }
 0x937   : > { %v11414_v16 = vpack.c.bf16 %v4464_v62, %v4458_v37  ;;  %v12825_v37 = vld [vmem:[#allocation47_spill] sm:$0xff]  ;;  %v12829_v35 = vld [vmem:[#allocation49_spill] sm:$0xff] }
 0x938   : > { %7866 = vrot.lane.b32.xlu1 %v7865_v1, %s8490_s27  ;;  %v12833_v1 = vld [vmem:[#allocation51_spill] sm:$0xff]  ;;  %v12837_v62 = vld [vmem:[#allocation53_spill] sm:$0xff] }
 0x939   : > { %vm12838_vm12 = vcmp.eq.s32.totalorder %v12804_v34, %v12837_v62 }
 0x96d   : > { %v7832_v4 = vpop.permute.xlu1 %7831 }
 0x96e   : > { %v7834_v42 = vunpack.i.h.bf16 %v7832_v4  ;;  %v7833_v60 = vunpack.i.l.bf16 %v7832_v4  ;;  %v12841_v4 = vld [vmem:[#allocation55_spill] sm:$0xff] }
 0x96f   : > { %vm12842_vm14 = vcmp.eq.s32.totalorder %v12804_v34, %v12841_v4 }
 0x970   : > { %v7420_v53 = vpack.c.bf16 %v7834_v42, %v7833_v60  ;;  %v12845_v42 = vld [vmem:[#allocation57_spill] sm:$0xff]  ;;  %v12849_v60 = vld [vmem:[#allocation59_spill] sm:$0xff] }
 0x971   : > { %vm12846_vm0 = vcmp.eq.s32.totalorder %v12804_v34, %v12845_v42 }
 0x972   : > { %7421 = vmatprep.subr.bf16.mxu1 %v7420_v53 }
 0x973   : > { %7423 = vmatpush3.bf16.msra.mxu1 %v7420_v53  ;;  %v12853_v53 = vld [vmem:[#allocation61_spill] sm:$0xff] }
 0x979   : > { %v7837_v40 = vpop.permute.xlu0 %7836 }
 0x97a   : > { %v7839_v31 = vunpack.i.h.bf16 %v7837_v40  ;;  %v7838_v45 = vunpack.i.l.bf16 %v7837_v40  ;;  %v12857_v40 = vld [vmem:[#allocation63_spill] sm:$0xff] }
 0x97c   : > { %v7424_v54 = vpack.c.bf16 %v7839_v31, %v7838_v45  ;;  %v12861_v31 = vld [vmem:[#allocation65_spill] sm:$0xff]  ;;  %v12865_v45 = vld [vmem:[#allocation67_spill] sm:$0xff] }
 0x97e   : > { %7425 = vmatprep.subr.bf16.mxu1 %v7424_v54 }
 0x97f   : > { %7427 = vmatpush3.bf16.msra.mxu1 %v7424_v54  ;;  %v12869_v54 = vld [vmem:[#allocation69_spill] sm:$0xff] }
 0x982   : > { %v7842_v6 = vpop.permute.xlu1 %7841 }
 0x983   : > { %v7844_v19 = vunpack.i.h.bf16 %v7842_v6  ;;  %v7843_v3 = vunpack.i.l.bf16 %v7842_v6  ;;  %v12871_v6 = vld [vmem:[#allocation70_spill] sm:$0xff] }
 0x985   : > { %v7428_v28 = vpack.c.bf16 %v7844_v19, %v7843_v3  ;;  %v12873_v19 = vld [vmem:[#allocation71_spill] sm:$0xff]  ;;  %v12875_v3 = vld [vmem:[#allocation72_spill] sm:$0xff] }
 0x987   : > { %7429 = vmatprep.subr.bf16.mxu1 %v7428_v28 }
 0x988   : > { %7431 = vmatpush3.bf16.msra.mxu1 %v7428_v28  ;;  %v12877_v28 = vld [vmem:[#allocation73_spill] sm:$0xff] }
 0x98a   : > { %v7847_v17 = vpop.permute.xlu1 %7846 }
 0x98b   : > { %v7849_v2 = vunpack.i.h.bf16 %v7847_v17  ;;  %v7848_v59 = vunpack.i.l.bf16 %v7847_v17  ;;  %v12879_v17 = vld [vmem:[#allocation74_spill] sm:$0xff] }
 0x98d   : > { %v7432_v43 = vpack.c.bf16 %v7849_v2, %v7848_v59  ;;  %v12881_v2 = vld [vmem:[#allocation75_spill] sm:$0xff]  ;;  %v12883_v59 = vld [vmem:[#allocation76_spill] sm:$0xff] }
 0x98f   : > { %7433 = vmatprep.subr.bf16.mxu1 %v7432_v43 }
 0x990   : > { %7435 = vmatpush3.bf16.msra.mxu1 %v7432_v43  ;;  %v12885_v43 = vld [vmem:[#allocation77_spill] sm:$0xff] }
 0x992   : > { %v7852_v7 = vpop.permute.xlu0 %7851 }
 0x993   : > { %v7854_v63 = vunpack.i.h.bf16 %v7852_v7  ;;  %v7853_v12 = vunpack.i.l.bf16 %v7852_v7  ;;  %v12887_v7 = vld [vmem:[#allocation78_spill] sm:$0xff] }
 0x995   : > { %v7436_v47 = vpack.c.bf16 %v7854_v63, %v7853_v12  ;;  %v12889_v63 = vld [vmem:[#allocation79_spill] sm:$0xff]  ;;  %v11637_v12 = vld [vmem:[#allocation15] ss:$0 sm:$0xff] }
 0x997   : > { %7437 = vmatprep.subr.bf16.mxu1 %v7436_v47 }
 0x998   : > { %7439 = vmatpush3.bf16.msra.mxu1 %v7436_v47 }
 0x99a   : > { %v7857_v41 = vpop.permute.xlu1 %7856 }
 0x99b   : > { %v7859_v49 = vunpack.i.h.bf16 %v7857_v41  ;;  %v7858_v26 = vunpack.i.l.bf16 %v7857_v41 }
 0x99d   : > { %v7440_v20 = vpack.c.bf16 %v7859_v49, %v7858_v26 }
 0x99f   : > { %7441 = vmatprep.subr.bf16.mxu1 %v7440_v20 }
 0x9a0   : > { %7443 = vmatpush3.bf16.msra.mxu1 %v7440_v20  ;;  %v12891_v20 = vld [vmem:[#allocation81_spill] sm:$0xff] }
 0x9a2   : > { %v7862_v22 = vpop.permute.xlu0 %7861 }
 0x9a3   : > { %v7864_v14 = vunpack.i.h.bf16 %v7862_v22  ;;  %v7863_v30 = vunpack.i.l.bf16 %v7862_v22 }
 0x9a5   : > { %v7444_v44 = vpack.c.bf16 %v7864_v14, %v7863_v30 }
 0x9a7   : > { %7445 = vmatprep.subr.bf16.mxu1 %v7444_v44 }
 0x9a8   : > { %7447 = vmatpush3.bf16.msra.mxu1 %v7444_v44 }
 0x9aa   : > { %v7867_v50 = vpop.permute.xlu1 %7866 }
 0x9ab   : > { %v7869_v51 = vunpack.i.h.bf16 %v7867_v50  ;;  %v7868_v52 = vunpack.i.l.bf16 %v7867_v50 }
 0x9ad   : > { %v7448_v21 = vpack.c.bf16 %v7869_v51, %v7868_v52 }
 0x9af   : > { %7449 = vmatprep.subr.bf16.mxu1 %v7448_v21 }
 0x9b0   : > { %7451 = vmatpush3.bf16.msra.mxu1 %v7448_v21 }
 0x9b1   : > { %7453 = vmatprep.subr.bf16.mxu1 %v11377_v15 }
 0x9b3   : > { %6935 = vmatmul.mubr.msk.f32.vlgmr.msra.gmra.mrb[84].mxu1 %vm789_vm2, %v12803_v27  ;;  %vm12818_vm2 = vcmp.eq.s32.totalorder %v12804_v34, %v12817_v0 }
 0x9b4   : > { %6937 = vmatprep.mubr.msk.f32.mxu1 %vm790_vm3, %v12803_v27  ;;  %7455 = vmatpush3.bf16.msra.mxu1 %v11377_v15 }
 0x9b5   : > { %7457 = vmatprep.subr.bf16.mxu1 %v11382_v56 }
 0x9b7   : > { %6938 = vmatmul.mubr.msk.f32.gmra.mrb[86].mxu1 %vm791_vm4, %v12803_v27  ;;  %vm12822_vm4 = vcmp.eq.s32.totalorder %v12804_v34, %v12821_v10 }
 0x9b8   : > { %6940 = vmatprep.mubr.msk.f32.mxu1 %vm792_vm5, %v12803_v27  ;;  %7459 = vmatpush3.bf16.msra.mxu1 %v11382_v56 }
 0x9b9   : > { %7461 = vmatprep.subr.bf16.mxu1 %v11387_v55 }
 0x9bb   : > { %6941 = vmatmul.mubr.msk.f32.gmra.mrb[88].mxu1 %vm793_vm6, %v12803_v27  ;;  %vm12826_vm6 = vcmp.eq.s32.totalorder %v12804_v34, %v12825_v37 }
 0x9bc   : > { %6943 = vmatprep.mubr.msk.f32.mxu1 %vm794_vm7, %v12803_v27  ;;  %7463 = vmatpush3.bf16.msra.mxu1 %v11387_v55  ;;  %v12815_v55 = vld [vmem:[#allocation34_spill] sm:$0xff] }
 0x9bd   : > { %7465 = vmatprep.subr.bf16.mxu1 %v11392_v57  ;;  %vm12816_vm1 = vcmp.eq.s32.totalorder %v12804_v34, %v12815_v55 }
 0x9bf   : > { %6944 = vmatmul.mubr.msk.f32.gmra.mrb[90].mxu1 %vm795_vm8, %v12803_v27  ;;  %vm12830_vm8 = vcmp.eq.s32.totalorder %v12804_v34, %v12829_v35 }
 0x9c0   : > { %6946 = vmatprep.mubr.msk.f32.mxu1 %vm796_vm9, %v12803_v27  ;;  %7467 = vmatpush3.bf16.msra.mxu1 %v11392_v57  ;;  %v12819_v57 = vld [vmem:[#allocation33_spill] sm:$0xff] }
 0x9c1   : > { %7469 = vmatprep.subr.bf16.mxu1 %v11397_v32  ;;  %vm12820_vm3 = vcmp.eq.s32.totalorder %v12804_v34, %v12819_v57 }
 0x9c3   : > { %6947 = vmatmul.mubr.msk.f32.gmra.mrb[92].mxu1 %vm797_vm10, %v12803_v27  ;;  %vm12834_vm10 = vcmp.eq.s32.totalorder %v12804_v34, %v12833_v1 }
 0x9c4   : > { %6949 = vmatprep.mubr.msk.f32.mxu1 %vm12816_vm1, %v12803_v27  ;;  %7471 = vmatpush3.bf16.msra.mxu1 %v11397_v32  ;;  %v12823_v32 = vld [vmem:[#allocation46_spill] sm:$0xff] }
 0x9c5   : > { %7473 = vmatprep.subr.bf16.mxu1 %v11402_v61  ;;  %vm12824_vm5 = vcmp.eq.s32.totalorder %v12804_v34, %v12823_v32 }
 0x9c7   : > { %6950 = vmatmul.mubr.msk.f32.gmra.mrb[94].mxu1 %vm12818_vm2, %v12803_v27  ;;  %vm12850_vm2 = vcmp.eq.s32.totalorder %v12804_v34, %v12849_v60 }
 0x9c8   : > { %6952 = vmatprep.mubr.msk.f32.mxu1 %vm12820_vm3, %v12803_v27  ;;  %7475 = vmatpush3.bf16.msra.mxu1 %v11402_v61  ;;  %v12827_v61 = vld [vmem:[#allocation48_spill] sm:$0xff] }
 0x9c9   : > { %7477 = vmatprep.subr.bf16.mxu1 %v11407_v8  ;;  %vm12828_vm7 = vcmp.eq.s32.totalorder %v12804_v34, %v12827_v61 }
 0x9cb   : > { %6953 = vmatmul.mubr.msk.f32.gmra.mrb[96].mxu1 %vm12822_vm4, %v12803_v27  ;;  %vm12854_vm4 = vcmp.eq.s32.totalorder %v12804_v34, %v12853_v53 }
 0x9cc   : > { %6955 = vmatprep.mubr.msk.f32.mxu1 %vm12824_vm5, %v12803_v27  ;;  %7479 = vmatpush3.bf16.msra.mxu1 %v11407_v8  ;;  %v12831_v8 = vld [vmem:[#allocation50_spill] sm:$0xff] }
 0x9cd   : > { %7481 = vmatprep.subr.bf16.mxu1 %v11412_v38  ;;  %vm12832_vm9 = vcmp.eq.s32.totalorder %v12804_v34, %v12831_v8 }
 0x9cf   : > { %6956 = vmatmul.mubr.msk.f32.gmra.mrb[98].mxu1 %vm12826_vm6, %v12803_v27  ;;  %vm12858_vm6 = vcmp.eq.s32.totalorder %v12804_v34, %v12857_v40 }
 0x9d0   : > { %7483 = vmatpush3.bf16.msra.mxu1 %v11412_v38  ;;  %6990 = vmatprep.mubr.msk.f32.mxu1 %vm12828_vm7, %v12803_v27  ;;  %v12835_v38 = vld [vmem:[#allocation52_spill] sm:$0xff] }
 0x9d1   : > { %7485 = vmatprep.subr.bf16.mxu1 %v11379_v33  ;;  %vm12836_vm11 = vcmp.eq.s32.totalorder %v12804_v34, %v12835_v38 }
 0x9d3   : > { %6991 = vmatmul.mubr.msk.f32.vlgmr.msra.gmra.mrb[84].mxu1 %vm12830_vm8, %v12803_v27  ;;  %vm12862_vm8 = vcmp.eq.s32.totalorder %v12804_v34, %v12861_v31 }
 0x9d4   : > { %6993 = vmatprep.mubr.msk.f32.mxu1 %vm12832_vm9, %v12803_v27  ;;  %7487 = vmatpush3.bf16.msra.mxu1 %v11379_v33  ;;  %v12839_v33 = vld [vmem:[#allocation54_spill] sm:$0xff] }
 0x9d5   : > { %7489 = vmatprep.subr.bf16.mxu1 %v11384_v18  ;;  %vm12840_vm15 = vcmp.eq.s32.totalorder %v12804_v34, %v12839_v33 }
 0x9d7   : > { %6994 = vmatmul.mubr.msk.f32.gmra.mrb[86].mxu1 %vm12834_vm10, %v12803_v27  ;;  %vm12866_vm10 = vcmp.eq.s32.totalorder %v12804_v34, %v12865_v45 }
 0x9d8   : > { %6996 = vmatprep.mubr.msk.f32.mxu1 %vm12836_vm11, %v12803_v27  ;;  %7491 = vmatpush3.bf16.msra.mxu1 %v11384_v18  ;;  %v12843_v18 = vld [vmem:[#allocation56_spill] sm:$0xff] }
 0x9d9   : > { %7493 = vmatprep.subr.bf16.mxu1 %v11389_v48  ;;  %vm12844_vm13 = vcmp.eq.s32.totalorder %v12804_v34, %v12843_v18 }
 0x9db   : > { %6997 = vmatmul.mubr.msk.f32.gmra.mrb[88].mxu1 %vm12838_vm12, %v12803_v27  ;;  %vm12870_vm12 = vcmp.eq.s32.totalorder %v12804_v34, %v12869_v54 }
 0x9dc   : > { %6999 = vmatprep.mubr.msk.f32.mxu1 %vm12840_vm15, %v12803_v27  ;;  %7495 = vmatpush3.bf16.msra.mxu1 %v11389_v48  ;;  %v12847_v48 = vld [vmem:[#allocation58_spill] sm:$0xff]  ;;  %vm12872_vm15 = vcmp.eq.s32.totalorder %v12804_v34, %v12871_v6 }
 0x9dd   : > { %7497 = vmatprep.subr.bf16.mxu1 %v11394_v46  ;;  %vm12848_vm1 = vcmp.eq.s32.totalorder %v12804_v34, %v12847_v48 }
 0x9df   : > { %7000 = vmatmul.mubr.msk.f32.gmra.mrb[90].mxu1 %vm12842_vm14, %v12803_v27  ;;  %vm12874_vm14 = vcmp.eq.s32.totalorder %v12804_v34, %v12873_v19 }
 0x9e0   : > { %7002 = vmatprep.mubr.msk.f32.mxu1 %vm12844_vm13, %v12803_v27  ;;  %7499 = vmatpush3.bf16.msra.mxu1 %v11394_v46  ;;  %v12851_v46 = vld [vmem:[#allocation60_spill] sm:$0xff]  ;;  %vm12876_vm13 = vcmp.eq.s32.totalorder %v12804_v34, %v12875_v3 }
 0x9e1   : > { %7501 = vmatprep.subr.bf16.mxu1 %v11399_v58  ;;  %vm12852_vm3 = vcmp.eq.s32.totalorder %v12804_v34, %v12851_v46 }
 0x9e3   : > { %7003 = vmatmul.mubr.msk.f32.gmra.mrb[92].mxu1 %vm12846_vm0, %v12803_v27  ;;  %vm12878_vm0 = vcmp.eq.s32.totalorder %v12804_v34, %v12877_v28 }
 0x9e4   : > { %7005 = vmatprep.mubr.msk.f32.mxu1 %vm12848_vm1, %v12803_v27  ;;  %7503 = vmatpush3.bf16.msra.mxu1 %v11399_v58  ;;  %v12855_v58 = vld [vmem:[#allocation62_spill] sm:$0xff]  ;;  %vm12880_vm1 = vcmp.eq.s32.totalorder %v12804_v34, %v12879_v17 }
 0x9e5   : > { %7505 = vmatprep.subr.bf16.mxu1 %v11404_v11  ;;  %vm12856_vm5 = vcmp.eq.s32.totalorder %v12804_v34, %v12855_v58 }
 0x9e7   : > { %7006 = vmatmul.mubr.msk.f32.gmra.mrb[94].mxu1 %vm12850_vm2, %v12803_v27  ;;  %vm12882_vm2 = vcmp.eq.s32.totalorder %v12804_v34, %v12881_v2 }
 0x9e8   : > { %7008 = vmatprep.mubr.msk.f32.mxu1 %vm12852_vm3, %v12803_v27  ;;  %7507 = vmatpush3.bf16.msra.mxu1 %v11404_v11  ;;  %v12859_v11 = vld [vmem:[#allocation64_spill] sm:$0xff]  ;;  %vm12884_vm3 = vcmp.eq.s32.totalorder %v12804_v34, %v12883_v59 }
 0x9e9   : > { %7509 = vmatprep.subr.bf16.mxu1 %v11409_v13  ;;  %vm12860_vm7 = vcmp.eq.s32.totalorder %v12804_v34, %v12859_v11 }
 0x9eb   : > { %7009 = vmatmul.mubr.msk.f32.gmra.mrb[96].mxu1 %vm12854_vm4, %v12803_v27  ;;  %vm12886_vm4 = vcmp.eq.s32.totalorder %v12804_v34, %v12885_v43 }
 0x9ec   : > { %7011 = vmatprep.mubr.msk.f32.mxu1 %vm12856_vm5, %v12803_v27  ;;  %7511 = vmatpush3.bf16.msra.mxu1 %v11409_v13  ;;  %v12863_v13 = vld [vmem:[#allocation66_spill] sm:$0xff]  ;;  %vm12888_vm5 = vcmp.eq.s32.totalorder %v12804_v34, %v12887_v7 }
 0x9ed   : > { %7513 = vmatprep.subr.bf16.mxu1 %v11414_v16  ;;  %vm12864_vm9 = vcmp.eq.s32.totalorder %v12804_v34, %v12863_v13 }
 0x9ef   : > { %7012 = vmatmul.mubr.msk.f32.gmra.mrb[98].mxu1 %vm12858_vm6, %v12803_v27  ;;  %vm12890_vm6 = vcmp.eq.s32.totalorder %v12804_v34, %v12889_v63 }
 0x9f0   : > { %7515 = vmatpush3.bf16.msra.mxu1 %v11414_v16  ;;  %7046 = vmatprep.mubr.msk.f32.mxu1 %vm12860_vm7, %v12803_v27  ;;  %v12867_v16 = vld [vmem:[#allocation68_spill] sm:$0xff]  ;;  %vm5021_vm7 = vcmask 523264  }
 0x9f1   : > { %vm12868_vm11 = vcmp.eq.s32.totalorder %v12804_v34, %v12867_v16 }
 0x9f3   : > { %7047 = vmatmul.mubr.msk.f32.vlgmr.msra.gmra.mrb[84].mxu1 %vm12862_vm8, %v12803_v27 }
 0x9f4   : > { %7049 = vmatprep.mubr.msk.f32.mxu1 %vm12864_vm9, %v12803_v27 }
 0x9f7   : > { %7050 = vmatmul.mubr.msk.f32.gmra.mrb[86].mxu1 %vm12866_vm10, %v12803_v27 }
 0x9f8   : > { %7052 = vmatprep.mubr.msk.f32.mxu1 %vm12868_vm11, %v12803_v27 }
 0x9fb   : > { %7053 = vmatmul.mubr.msk.f32.gmra.mrb[88].mxu1 %vm12870_vm12, %v12803_v27 }
 0x9fc   : > { %7055 = vmatprep.mubr.msk.f32.mxu1 %vm12872_vm15, %v12803_v27 }
 0x9ff   : > { %7056 = vmatmul.mubr.msk.f32.gmra.mrb[90].mxu1 %vm12874_vm14, %v12803_v27 }
 0xa00   : > { %7058 = vmatprep.mubr.msk.f32.mxu1 %vm12876_vm13, %v12803_v27 }
 0xa03   : > { %7059 = vmatmul.mubr.msk.f32.gmra.mrb[92].mxu1 %vm12878_vm0, %v12803_v27 }
 0xa04   : > { %7061 = vmatprep.mubr.msk.f32.mxu1 %vm12880_vm1, %v12803_v27 }
 0xa07   : > { %7062 = vmatmul.mubr.msk.f32.gmra.mrb[94].mxu1 %vm12882_vm2, %v12803_v27 }
 0xa08   : > { %7064 = vmatprep.mubr.msk.f32.mxu1 %vm12884_vm3, %v12803_v27 }
 0xa0b   : > { %7065 = vmatmul.mubr.msk.f32.gmra.mrb[96].mxu1 %vm12886_vm4, %v12803_v27 }
 0xa0c   : > { %7067 = vmatprep.mubr.msk.f32.mxu1 %vm12888_vm5, %v12803_v27 }
 0xa0f   : > { %7068 = vmatmul.mubr.msk.f32.gmra.mrb[98].mxu1 %vm12890_vm6, %v12803_v27 }
 0xac6   : > { %v7048_v47 = vpop.f32.mrb[84].mxu1 }
 0xac7   : > { %v4990_v41 = vadd.f32 %v7048_v47, %v11637_v12  ;;  %v4887_v49 = vpop.f32.mrb[85].mxu1 }
 0xac8   : > { %v4989_v26 = vadd.f32 %v11637_v12, %v4887_v49 }
 0xac9   : > { %v11642_v22 = vmul.f32 %v12891_v20, %v4990_v41 }
 0xaca   : > { %v11645_v14 = vmul.f32 %v12891_v20, %v4989_v26  ;;  %v7051_v30 = vpop.f32.mrb[86].mxu1 }
 0xacb   : > { %v4992_v44 = vadd.f32 %v7051_v30, %v11637_v12  ;;  %v4897_v50 = vpop.f32.mrb[87].mxu1  ;;  %v5025_v27 = vsel %vm5021_vm7, %v11642_v22, 0.0  ;;  %v5167_v51 = vmul.f32 %v11642_v22, %v11642_v22 }
 0xacc   : > { %5026 = vadd.xlane.f32.xlu1 %v5025_v27  ;;  %v5022_v52 = vsel %vm5021_vm7, %v11645_v14, 0.0  ;;  %v5166_v21 = vmul.f32 %v11645_v14, %v11645_v14  ;;  %v4991_v15 = vadd.f32 %v11637_v12, %v4897_v50 }
 0xacd   : > { %v11657_v39 = vmul.f32 %v12891_v20, %v4992_v44  ;;  %5023 = vadd.xlane.f32.xlu0 %v5022_v52  ;;  %v5185_v24 = vsel %vm5021_vm7, %v5167_v51, 0.0 }
 0xace   : > { %v7054_v36 = vpop.f32.mrb[88].mxu1  ;;  %v5182_v25 = vsel %vm5021_vm7, %v5166_v21, 0.0  ;;  %v11667_v57 = vmul.f32 %v12891_v20, %v4991_v15 }
 0xacf   : > { %v4907_v23 = vpop.f32.mrb[89].mxu1  ;;  %v5169_v29 = vmul.f32 %v11657_v39, %v11657_v39  ;;  %v5031_v10 = vsel %vm5021_vm7, %v11657_v39, 0.0  ;;  %v4994_v1 = vadd.f32 %v7054_v36, %v11637_v12 }
 0xad0   : > { %5186 = vadd.xlane.f32.xlu1 %v5185_v24  ;;  %v5028_v62 = vsel %vm5021_vm7, %v11667_v57, 0.0  ;;  %v5168_v33 = vmul.f32 %v11667_v57, %v11667_v57  ;;  %v4993_v58 = vadd.f32 %v11637_v12, %v4907_v23 }
 0xad1   : > { %5183 = vadd.xlane.f32.xlu0 %v5182_v25  ;;  %v5191_v0 = vsel %vm5021_vm7, %v5169_v29, 0.0  ;;  %v11693_v53 = vmul.f32 %v12891_v20, %v4994_v1 }
 0xad2   : > { %v7057_v56 = vpop.f32.mrb[90].mxu1  ;;  %v5188_v40 = vsel %vm5021_vm7, %v5168_v33, 0.0  ;;  %v11705_v6 = vmul.f32 %v12891_v20, %v4993_v58 }
 0xad3   : > { %v4996_v5 = vadd.f32 %v7057_v56, %v11637_v12  ;;  %v4917_v55 = vpop.f32.mrb[91].mxu1  ;;  %v5037_v19 = vsel %vm5021_vm7, %v11693_v53, 0.0  ;;  %v5171_v43 = vmul.f32 %v11693_v53, %v11693_v53 }
 0xad4   : > { %5192 = vadd.xlane.f32.xlu1 %v5191_v0  ;;  %v5034_v59 = vsel %vm5021_vm7, %v11705_v6, 0.0  ;;  %v4995_v41 = vadd.f32 %v11637_v12, %v4917_v55  ;;  %v5170_v26 = vmul.f32 %v11705_v6, %v11705_v6 }
 0xad5   : > { %v11672_v32 = vmul.f32 %v12891_v20, %v4996_v5  ;;  %5032 = vadd.xlane.f32.xlu0 %v5031_v10  ;;  %v5197_v49 = vsel %vm5021_vm7, %v5171_v43, 0.0 }
 0xad6   : > { %v7060_v37 = vpop.f32.mrb[92].mxu1  ;;  %v11733_v27 = vmul.f32 %v12891_v20, %v4995_v41  ;;  %v5194_v51 = vsel %vm5021_vm7, %v5170_v26, 0.0 }
 0xad7   : > { %12892 = vst [vmem:[#allocation84_spill] sm:$0xff] %v11672_v32  ;;  %v4998_v61 = vadd.f32 %v7060_v37, %v11637_v12  ;;  %v4927_v35 = vpop.f32.mrb[93].mxu1  ;;  %v5043_v8 = vsel %vm5021_vm7, %v11672_v32, 0.0 }
 0xad8   : > { %v4997_v38 = vadd.f32 %v11637_v12, %v4927_v35  ;;  %5044 = vadd.xlane.f32.xlu1 %v5043_v8  ;;  %v5040_v36 = vsel %vm5021_vm7, %v11733_v27, 0.0  ;;  %v5172_v23 = vmul.f32 %v11733_v27, %v11733_v27 }
 0xad9   : > { %v11684_v4 = vmul.f32 %v12891_v20, %v4998_v61  ;;  %5029 = vadd.xlane.f32.xlu0 %v5028_v62 }
 0xada   : > { %v11687_v18 = vmul.f32 %v12891_v20, %v4997_v38  ;;  %v7063_v42 = vpop.f32.mrb[94].mxu1  ;;  %v5200_v15 = vsel %vm5021_vm7, %v5172_v23, 0.0 }
 0xadb   : > { %12893 = vst [vmem:[#allocation112_spill] sm:$0xff] %v11684_v4  ;;  %v5000_v48 = vadd.f32 %v7063_v42, %v11637_v12  ;;  %v4937_v60 = vpop.f32.mrb[95].mxu1  ;;  %v5049_v46 = vsel %vm5021_vm7, %v11684_v4, 0.0  ;;  %v5175_v10 = vmul.f32 %v11684_v4, %v11684_v4  ;;  %v5173_v42 = vmul.f32 %v11672_v32, %v11672_v32 }
 0xadc   : > { %5050 = vadd.xlane.f32.xlu1 %v5049_v46  ;;  %v5174_v11 = vmul.f32 %v11687_v18, %v11687_v18  ;;  %v4999_v16 = vadd.f32 %v11637_v12, %v4937_v60  ;;  %v5046_v0 = vsel %vm5021_vm7, %v11687_v18, 0.0 }
 0xadd   : > { %5189 = vadd.xlane.f32.xlu0 %v5188_v40  ;;  %v11701_v45 = vmul.f32 %v12891_v20, %v5000_v48  ;;  %v5209_v35 = vsel %vm5021_vm7, %v5175_v10, 0.0  ;;  %v5203_v48 = vsel %vm5021_vm7, %v5173_v42, 0.0 }
 0xade   : > { %v7066_v31 = vpop.f32.mrb[96].mxu1  ;;  %v5206_v13 = vsel %vm5021_vm7, %v5174_v11, 0.0  ;;  %v11710_v28 = vmul.f32 %v12891_v20, %v4999_v16 }
 0xadf   : > { %12894 = vst [vmem:[#allocation111_spill] sm:$0xff] %v11701_v45  ;;  %v4947_v54 = vpop.f32.mrb[97].mxu1  ;;  %v5055_v2 = vsel %vm5021_vm7, %v11701_v45, 0.0  ;;  %v5002_v7 = vadd.f32 %v7066_v31, %v11637_v12  ;;  %v5177_v47 = vmul.f32 %v11701_v45, %v11701_v45 }
 0xae0   : > { %5207 = vadd.xlane.f32.xlu1 %v5206_v13  ;;  %12895 = vst [vmem:[#allocation83_spill] sm:$0xff] %v11710_v28  ;;  %v5052_v63 = vsel %vm5021_vm7, %v11710_v28, 0.0  ;;  %v5001_v44 = vadd.f32 %v11637_v12, %v4947_v54  ;;  %v5176_v8 = vmul.f32 %v11710_v28, %v11710_v28 }
 0xae1   : > { %5038 = vadd.xlane.f32.xlu0 %v5037_v19  ;;  %v11728_v30 = vmul.f32 %v12891_v20, %v5002_v7  ;;  %v5215_v50 = vsel %vm5021_vm7, %v5177_v47, 0.0 }
 0xae2   : > { %v7069_v3 = vpop.f32.mrb[98].mxu1  ;;  %v11737_v52 = vmul.f32 %v12891_v20, %v5001_v44  ;;  %v5212_v62 = vsel %vm5021_vm7, %v5176_v8, 0.0 }
 0xae3   : > { %v4957_v17 = vpop.f32.mrb[99].mxu1  ;;  %v5061_v21 = vsel %vm5021_vm7, %v11728_v30, 0.0  ;;  %v5179_v29 = vmul.f32 %v11728_v30, %v11728_v30  ;;  %v5004_v25 = vadd.f32 %v7069_v3, %v11637_v12 }
 0xae4   : > { %5056 = vadd.xlane.f32.xlu1 %v5055_v2  ;;  %v5058_v24 = vsel %vm5021_vm7, %v11737_v52, 0.0  ;;  %v5003_v56 = vadd.f32 %v11637_v12, %v4957_v17  ;;  %v5178_v55 = vmul.f32 %v11737_v52, %v11737_v52 }
 0xae5   : > { %5035 = vadd.xlane.f32.xlu0 %v5034_v59  ;;  %v5221_v5 = vsel %vm5021_vm7, %v5179_v29, 0.0  ;;  %v11760_v37 = vmul.f32 %v12891_v20, %v5004_v25 }
 0xae6   : > { %v11763_v61 = vmul.f32 %v12891_v20, %v5003_v56  ;;  %v5218_v12 = vsel %vm5021_vm7, %v5178_v55, 0.0 }
 0xae7   : > { %v5067_v1 = vsel %vm5021_vm7, %v11760_v37, 0.0  ;;  %v5181_v60 = vmul.f32 %v11760_v37, %v11760_v37 }
 0xae8   : > { %5053 = vadd.xlane.f32.xlu1 %v5052_v63  ;;  %v5180_v38 = vmul.f32 %v11763_v61, %v11763_v61  ;;  %v5064_v33 = vsel %vm5021_vm7, %v11763_v61, 0.0 }
 0xae9   : > { %5198 = vadd.xlane.f32.xlu0 %v5197_v49  ;;  %v5227_v46 = vsel %vm5021_vm7, %v5181_v60, 0.0 }
 0xaea   : > { %v5224_v20 = vsel %vm5021_vm7, %v5180_v38, 0.0 }
 0xaec   : > { %5216 = vadd.xlane.f32.xlu1 %v5215_v50 }
 0xaed   : > { %5195 = vadd.xlane.f32.xlu0 %v5194_v51 }
 0xaf0   : > { %5062 = vadd.xlane.f32.xlu1 %v5061_v21 }
 0xaf1   : > { %5041 = vadd.xlane.f32.xlu0 %v5040_v36 }
 0xaf4   : > { %5059 = vadd.xlane.f32.xlu1 %v5058_v24 }
 0xaf5   : > { %5201 = vadd.xlane.f32.xlu0 %v5200_v15 }
 0xaf8   : > { %5222 = vadd.xlane.f32.xlu1 %v5221_v5 }
 0xaf9   : > { %5047 = vadd.xlane.f32.xlu0 %v5046_v0 }
 0xafc   : > { %5219 = vadd.xlane.f32.xlu1 %v5218_v12 }
 0xafd   : > { %5210 = vadd.xlane.f32.xlu0 %v5209_v35 }
 0xb00   : > { %5068 = vadd.xlane.f32.xlu1 %v5067_v1 }
 0xb01   : > { %5213 = vadd.xlane.f32.xlu0 %v5212_v62 }
 0xb04   : > { %5225 = vadd.xlane.f32.xlu1 %v5224_v20 }
 0xb05   : > { %5065 = vadd.xlane.f32.xlu0 %v5064_v33 }
 0xb09   : > { %5204 = vadd.xlane.f32.xlu0 %v5203_v48 }
 0xb0d   : > { %5228 = vadd.xlane.f32.xlu0 %v5227_v46 }
 0xb59   : > { %v5027_v58 = vpop.xlane.xlu1 %5026 }
 0xb5a   : > { %v5076_v40 = vrot.slane %v5027_v58, 4  ;;  %v5024_v11 = vpop.xlane.xlu0 %5023 }
 0xb5b   : > { %v5070_v31 = vrot.slane %v5024_v11, 4 }
 0xb5c   : > { %v5077_v13 = vadd.f32 %v5076_v40, %v5027_v58 }
 0xb5d   : > { %v5071_v16 = vadd.f32 %v5070_v31, %v5024_v11  ;;  %v5187_v54 = vpop.xlane.xlu1 %5186 }
 0xb5e   : > { %v5078_v19 = vrot.slane %v5077_v13, 2  ;;  %v5236_v3 = vrot.slane %v5187_v54, 4  ;;  %v5184_v17 = vpop.xlane.xlu0 %5183 }
 0xb5f   : > { %v5072_v2 = vrot.slane %v5071_v16, 2  ;;  %v5230_v59 = vrot.slane %v5184_v17, 4 }
 0xb60   : > { %v5079_v43 = vadd.f32 %v5078_v19, %v5077_v13  ;;  %v5237_v7 = vadd.f32 %v5236_v3, %v5187_v54 }
 0xb61   : > { %v5073_v63 = vadd.f32 %v5072_v2, %v5071_v16  ;;  %v5231_v47 = vadd.f32 %v5230_v59, %v5184_v17  ;;  %v5193_v41 = vpop.xlane.xlu1 %5192 }
 0xb62   : > { %v5080_v49 = vrot.slane %v5079_v43, 1  ;;  %v5238_v26 = vrot.slane %v5237_v7, 2  ;;  %v5248_v44 = vrot.slane %v5193_v41, 4  ;;  %v5033_v50 = vpop.xlane.xlu0 %5032 }
 0xb63   : > { %v5074_v51 = vrot.slane %v5073_v63, 1  ;;  %v5232_v21 = vrot.slane %v5231_v47, 2  ;;  %v5088_v36 = vrot.slane %v5033_v50, 4 }
 0xb64   : > { %v5081_v23 = vadd.f32 %v5080_v49, %v5079_v43  ;;  %v5239_v24 = vadd.f32 %v5238_v26, %v5237_v7  ;;  %v5249_v29 = vadd.f32 %v5248_v44, %v5193_v41 }
 0xb65   : > { %v5075_v15 = vadd.f32 %v5074_v51, %v5073_v63  ;;  %v5233_v25 = vadd.f32 %v5232_v21, %v5231_v47  ;;  %v5089_v56 = vadd.f32 %v5088_v36, %v5033_v50  ;;  %v5045_v5 = vpop.xlane.xlu1 %5044 }
 0xb66   : > { %v11783_v55 = vmul.f32 0.001953125, %v5081_v23  ;;  %v5240_v0 = vrot.slane %v5239_v24, 1  ;;  %v5250_v10 = vrot.slane %v5249_v29, 2  ;;  %v5112_v12 = vrot.slane %v5045_v5, 4  ;;  %v5030_v35 = vpop.xlane.xlu0 %5029 }
 0xb67   : > { %v11785_v8 = vmul.f32 0.001953125, %v5075_v15  ;;  %v5234_v1 = vrot.slane %v5233_v25, 1  ;;  %v5090_v38 = vrot.slane %v5089_v56, 2  ;;  %v5082_v62 = vrot.slane %v5030_v35, 4 }
 0xb68   : > { %v5344_v20 = vmul.f32 %v11783_v55, %v5081_v23  ;;  %v5241_v33 = vadd.f32 %v5240_v0, %v5239_v24  ;;  %v5251_v40 = vadd.f32 %v5250_v10, %v5249_v29  ;;  %v5113_v11 = vadd.f32 %v5112_v12, %v5045_v5 }
 0xb69   : > { %v5343_v42 = vmul.f32 %v11785_v8, %v5075_v15  ;;  %v5235_v48 = vadd.f32 %v5234_v1, %v5233_v25  ;;  %v5091_v60 = vadd.f32 %v5090_v38, %v5089_v56  ;;  %v5051_v46 = vpop.xlane.xlu1 %5050  ;;  %v5083_v31 = vadd.f32 %v5082_v62, %v5030_v35 }
 0xb6a   : > { %v5360_v58 = vsub.f32 %v5241_v33, %v5344_v20  ;;  %v5190_v13 = vpop.xlane.xlu0 %5189  ;;  %v5124_v19 = vrot.slane %v5051_v46, 4  ;;  %v5114_v2 = vrot.slane %v5113_v11, 2  ;;  %v5252_v49 = vrot.slane %v5251_v40, 1 }
 0xb6b   : > { %v5359_v16 = vsub.f32 %v5235_v48, %v5343_v42  ;;  %v5092_v54 = vrot.slane %v5091_v60, 1  ;;  %v5242_v3 = vrot.slane %v5190_v13, 4  ;;  %v5084_v59 = vrot.slane %v5083_v31, 2 }
 0xb6c   : > { %v5377_v17 = vmul.f32 0.0019569471, %v5360_v58  ;;  %v5125_v21 = vadd.f32 %v5124_v19, %v5051_v46  ;;  %v5115_v23 = vadd.f32 %v5114_v2, %v5113_v11  ;;  %v5253_v29 = vadd.f32 %v5252_v49, %v5251_v40 }
 0xb6d   : > { %v5376_v43 = vmul.f32 0.0019569471, %v5359_v16  ;;  %v5093_v7 = vadd.f32 %v5092_v54, %v5091_v60  ;;  %v5243_v63 = vadd.f32 %v5242_v3, %v5190_v13  ;;  %v5208_v47 = vpop.xlane.xlu1 %5207  ;;  %v5085_v26 = vadd.f32 %v5084_v59, %v5083_v31 }
 0xb6e   : > { %v11789_v41 = vmax.f32 %v5377_v17, 0.0  ;;  %v5039_v44 = vpop.xlane.xlu0 %5038  ;;  %v5126_v56 = vrot.slane %v5125_v21, 2  ;;  %v5278_v0 = vrot.slane %v5208_v47, 4  ;;  %v5116_v35 = vrot.slane %v5115_v23, 1 }
 0xb6f   : > { %v11791_v50 = vmax.f32 %v5376_v43, 0.0  ;;  %v11793_v51 = vmul.f32 0.001953125, %v5093_v7  ;;  %v5244_v36 = vrot.slane %v5243_v63, 2  ;;  %v5086_v25 = vrot.slane %v5085_v26, 1 }
 0xb70   : > { %8000 = vrsqrt.f32 %v11789_v41  ;;  %v5100_v10 = vrot.slane %v5039_v44, 4  ;;  %v5127_v46 = vadd.f32 %v5126_v56, %v5125_v21  ;;  %v5279_v40 = vadd.f32 %v5278_v0, %v5208_v47 }
 0xb71   : > { %8002 = vrsqrt.f32 %v11791_v50  ;;  %v5057_v24 = vpop.xlane.xlu1 %5056  ;;  %v5346_v15 = vmul.f32 %v11793_v51, %v5093_v7  ;;  %v5245_v5 = vadd.f32 %v5244_v36, %v5243_v63  ;;  %v5087_v1 = vadd.f32 %v5086_v25, %v5085_v26 }
 0xb72   : > { %v5136_v38 = vrot.slane %v5057_v24, 4  ;;  %v5036_v62 = vpop.xlane.xlu0 %5035  ;;  %v5101_v33 = vadd.f32 %v5100_v10, %v5039_v44  ;;  %v5117_v13 = vadd.f32 %v5116_v35, %v5115_v23  ;;  %vm5417_vm8 = vcmp.eq.f32.partialorder %v11789_v41, inf }
 0xb73   : > { %v5362_v12 = vsub.f32 %v5253_v29, %v5346_v15  ;;  %v5246_v20 = vrot.slane %v5245_v5, 1  ;;  %v11798_v60 = vmul.f32 0.001953125, %v5087_v1  ;;  %vm5419_vm9 = vcmp.eq.f32.partialorder %v11789_v41, 0.0 }
 0xb74   : > { %v5102_v11 = vrot.slane %v5101_v33, 2  ;;  %v5137_v54 = vadd.f32 %v5136_v38, %v5057_v24  ;;  %v5420_v2 = vand.u32 2147483648, %v11789_v41  ;;  %vm5410_vm10 = vcmp.eq.f32.partialorder %v11791_v50, inf }
 0xb75   : > { %v5054_v42 = vpop.xlane.xlu1 %5053  ;;  %v5379_v48 = vmul.f32 0.0019569471, %v5362_v12  ;;  %v5247_v58 = vadd.f32 %v5246_v20, %v5245_v5  ;;  %v5345_v16 = vmul.f32 %v11798_v60, %v5087_v1  ;;  %v5128_v47 = vrot.slane %v5127_v46, 1 }
 0xb76   : > { %v5103_v59 = vadd.f32 %v5102_v11, %v5101_v33  ;;  %v5199_v43 = vpop.xlane.xlu0 %5198  ;;  %v11814_v21 = vmul.f32 0.001953125, %v5117_v13  ;;  %v5280_v36 = vrot.slane %v5279_v40, 2  ;;  %v5138_v23 = vrot.slane %v5137_v54, 2 }
 0xb77   : > { %v11800_v31 = vmax.f32 %v5379_v48, 0.0  ;;  %v5361_v49 = vsub.f32 %v5247_v58, %v5345_v16  ;;  %vm5412_vm11 = vcmp.eq.f32.partialorder %v11791_v50, 0.0  ;;  %v5094_v29 = vrot.slane %v5036_v62, 4 }
 0xb78   : > { %12896 = vst [vmem:[#allocation114_spill] sm:$0xff] %v11814_v21  ;;  %v5130_v15 = vrot.slane %v5054_v42, 4  ;;  %v5413_v56 = vand.u32 2147483648, %v11791_v50  ;;  %v5104_v5 = vrot.slane %v5103_v59, 1  ;;  %v5139_v0 = vadd.f32 %v5138_v23, %v5137_v54 }
 0xb79   : > { %8004 = vrsqrt.f32 %v11800_v31  ;;  %v5217_v26 = vpop.xlane.xlu1 %5216  ;;  %v5378_v24 = vmul.f32 0.0019569471, %v5361_v49  ;;  %v5095_v1 = vadd.f32 %v5094_v29, %v5036_v62  ;;  %v11829_v38 = vmul.f32 %v11814_v21, %v5117_v13 }
 0xb7a   : > { %v8001_v17 = vpop.eup %8000  ;;  %v11831_v20 = vadd.f32 %v5128_v47, %v5127_v46  ;;  %v11833_v33 = vadd.f32 %v5280_v36, %v5279_v40  ;;  %v5140_v48 = vrot.slane %v5139_v0, 1  ;;  %v5196_v58 = vpop.xlane.xlu0 %5195  ;;  %vm5431_vm12 = vcmp.eq.f32.partialorder %v11800_v31, inf }
 0xb7b   : > { %v8003_v7 = vpop.eup %8002  ;;  %v5416_v63 = vmul.f32 %v8001_v17, %v11789_v41  ;;  %v11826_v35 = vmax.f32 %v5378_v24, 0.0  ;;  %v5131_v54 = vadd.f32 %v5130_v15, %v5054_v42  ;;  %vm5433_vm15 = vcmp.eq.f32.partialorder %v11800_v31, 0.0 }
 0xb7c   : > { %v5409_v44 = vmul.f32 %v8003_v7, %v11791_v50  ;;  %v5434_v46 = vand.u32 2147483648, %v11800_v31  ;;  %v5105_v40 = vadd.f32 %v5104_v5, %v5103_v59  ;;  %v5141_v13 = vadd.f32 %v5140_v48, %v5139_v0 }
 0xb7d   : > { %v5418_v25 = vsel %vm5417_vm8, %v11789_v41, %v5416_v63  ;;  %v5063_v17 = vpop.xlane.xlu1 %5062  ;;  %8006 = vrsqrt.f32 %v11826_v35  ;;  %v5096_v41 = vrot.slane %v5095_v1, 2  ;;  %v5296_v47 = vrot.slane %v5217_v26, 4 }
 0xb7e   : > { %v5411_v10 = vsel %vm5410_vm10, %v11791_v50, %v5409_v44  ;;  %v5421_v11 = vsel %vm5419_vm9, %v5420_v2, %v5418_v25  ;;  %v5260_v2 = vrot.slane %v5199_v43, 4  ;;  %v5254_v49 = vrot.slane %v5196_v58, 4  ;;  %v5042_v25 = vpop.xlane.xlu0 %5041 }
 0xb7f   : > { %v5414_v62 = vsel %vm5412_vm11, %v5413_v56, %v5411_v10  ;;  %v11845_v63 = vadd.f32 1e-05, %v5421_v11  ;;  %v5148_v42 = vrot.slane %v5063_v17, 4  ;;  %v5097_v50 = vadd.f32 %v5096_v41, %v5095_v1 }
 0xb80   : > { %v5132_v36 = vrot.slane %v5131_v54, 2  ;;  %v5261_v23 = vadd.f32 %v5260_v2, %v5199_v43  ;;  %v5520_v24 = vadd.f32 1e-05, %v5414_v62  ;;  %v11848_v29 = vmul.f32 0.001953125, %v5105_v40 }
 0xb81   : > { %v5297_v59 = vadd.f32 %v5296_v47, %v5217_v26  ;;  %v5255_v15 = vadd.f32 %v5254_v49, %v5196_v58  ;;  %vm5424_vm14 = vcmp.eq.f32.partialorder %v11826_v35, inf  ;;  %v11854_v5 = vmul.f32 0.001953125, %v5141_v13 }
 0xb82   : > { %v5098_v0 = vrot.slane %v5097_v50, 1  ;;  %v5262_v10 = vrot.slane %v5261_v23, 2  ;;  %vm5426_vm13 = vcmp.eq.f32.partialorder %v11826_v35, 0.0  ;;  %v5149_v26 = vadd.f32 %v5148_v42, %v5063_v17  ;;  %v5060_v17 = vpop.xlane.xlu1 %5059  ;;  %v5202_v42 = vpop.xlane.xlu0 %5201 }
 0xb83   : > { %v8005_v7 = vpop.eup %8004  ;;  %12897 = vst [vmem:[#allocation86_spill] sm:$0xff] %v11854_v5  ;;  %v5298_v43 = vrot.slane %v5297_v59, 2  ;;  %v5256_v48 = vrot.slane %v5255_v15, 2  ;;  %v5133_v62 = vadd.f32 %v5132_v36, %v5131_v54  ;;  %v5106_v49 = vrot.slane %v5042_v25, 4 }
 0xb84   : > { %v5430_v44 = vmul.f32 %v8005_v7, %v11800_v31  ;;  %v5099_v11 = vadd.f32 %v5098_v0, %v5097_v50  ;;  %v5263_v41 = vadd.f32 %v5262_v10, %v5261_v23  ;;  %v5150_v47 = vrot.slane %v5149_v26, 2 }
 0xb85   : > { %v5299_v2 = vadd.f32 %v5298_v43, %v5297_v59  ;;  %v5257_v7 = vadd.f32 %v5256_v48, %v5255_v15  ;;  %v5348_v16 = vmul.f32 %v11848_v29, %v5105_v40  ;;  %v5107_v12 = vadd.f32 %v5106_v49, %v5042_v25 }
 0xb86   : > { %v5432_v56 = vsel %vm5431_vm12, %v11800_v31, %v5430_v44  ;;  %v5427_v44 = vand.u32 2147483648, %v11826_v35  ;;  %v11861_v19 = vmul.f32 0.001953125, %v5099_v11  ;;  %v5264_v31 = vrot.slane %v5263_v41, 1 }
 0xb87   : > { %v5435_v1 = vsel %vm5433_vm15, %v5434_v46, %v5432_v56  ;;  %v5300_v46 = vrot.slane %v5299_v2, 1  ;;  %v5258_v56 = vrot.slane %v5257_v7, 1  ;;  %v5151_v3 = vadd.f32 %v5150_v47, %v5149_v26  ;;  %v8007_v50 = vpop.eup %8006 }
 0xb88   : > { %v5523_v58 = vadd.f32 1e-05, %v5435_v1  ;;  %v5354_v54 = vmul.f32 %v11854_v5, %v5141_v13  ;;  %v5347_v36 = vmul.f32 %v11861_v19, %v5099_v11  ;;  %v5134_v23 = vrot.slane %v5133_v62, 1 }
 0xb89   : > { %v5423_v59 = vmul.f32 %v8007_v50, %v11826_v35  ;;  %v5265_v15 = vadd.f32 %v5264_v31, %v5263_v41  ;;  %v5301_v40 = vadd.f32 %v5300_v46, %v5299_v2  ;;  %v5259_v0 = vadd.f32 %v5258_v56, %v5257_v7  ;;  %v5223_v56 = vpop.xlane.xlu1 %5222 }
 0xb8a   : > { %8008 = vrcp.f32 %v5523_v58  ;;  %v5152_v10 = vrot.slane %v5151_v3, 1  ;;  %v5108_v1 = vrot.slane %v5107_v12, 2  ;;  %v5142_v43 = vrot.slane %v5060_v17, 4 }
 0xb8b   : > { %v5266_v48 = vrot.slane %v5202_v42, 4  ;;  %v5425_v25 = vsel %vm5424_vm14, %v11826_v35, %v5423_v59  ;;  %v5364_v26 = vsub.f32 %v5265_v15, %v5348_v16  ;;  %v5370_v58 = vsub.f32 %v5301_v40, %v5354_v54  ;;  %v5048_v35 = vpop.xlane.xlu0 %5047 }
 0xb8c   : > { %v5363_v47 = vsub.f32 %v5259_v0, %v5347_v36  ;;  %v11870_v13 = vmul.f32 0.001953125, %v11831_v20  ;;  %v5428_v11 = vsel %vm5426_vm13, %v5427_v44, %v5425_v25  ;;  %v5135_v41 = vadd.f32 %v5134_v23, %v5133_v62 }
 0xb8d   : > { %v5109_v2 = vadd.f32 %v5108_v1, %v5107_v12  ;;  %v5381_v7 = vmul.f32 0.0019569471, %v5364_v26  ;;  %v5387_v49 = vmul.f32 0.0019569471, %v5370_v58  ;;  %v5143_v31 = vadd.f32 %v5142_v43, %v5060_v17 }
 0xb8e   : > { %12898 = vst [vmem:[#allocation85_spill] sm:$0xff] %v11870_v13  ;;  %v5267_v46 = vadd.f32 %v5266_v48, %v5202_v42  ;;  %8010 = vrcp.f32 %v11845_v63  ;;  %v5380_v50 = vmul.f32 0.0019569471, %v5363_v47  ;;  %v5153_v59 = vadd.f32 %v5152_v10, %v5151_v3 }
 0xb8f   : > { %v5110_v16 = vrot.slane %v5109_v2, 1  ;;  %8012 = vrcp.f32 %v5520_v24  ;;  %v5282_v54 = vrot.slane %v11833_v33, 1  ;;  %v11876_v36 = vmax.f32 %v5381_v7, 0.0 }
 0xb90   : > { %v11878_v15 = vmax.f32 %v5387_v49, 0.0  ;;  %v5522_v62 = vadd.f32 1e-05, %v5428_v11  ;;  %v11880_v12 = vmul.f32 0.001953125, %v5135_v41  ;;  %v11882_v44 = vmax.f32 %v5380_v50, 0.0 }
 0xb91   : > { %v5111_v17 = vadd.f32 %v5110_v16, %v5109_v2  ;;  %8014 = vrsqrt.f32 %v11876_v36  ;;  %v5144_v3 = vrot.slane %v5143_v31, 2  ;;  %v5268_v24 = vrot.slane %v5267_v46, 2  ;;  %v5211_v2 = vpop.xlane.xlu0 %5210 }
 0xb92   : > { %12899 = vst [vmem:[#allocation115_spill] sm:$0xff] %v11880_v12  ;;  %v11889_v23 = vmul.f32 %v11870_v13, %v11831_v20  ;;  %8016 = vrsqrt.f32 %v11878_v15  ;;  %v11894_v0 = vmul.f32 0.001953125, %v5153_v59  ;;  %v11897_v10 = vadd.f32 %v5282_v54, %v11833_v33  ;;  %v5220_v20 = vpop.xlane.xlu1 %5219 }
 0xb93   : > { %8018 = vrsqrt.f32 %v11882_v44  ;;  %v11907_v25 = vmul.f32 %v11880_v12, %v5135_v41  ;;  %v11909_v26 = vmul.f32 0.001953125, %v5111_v17  ;;  %v5145_v33 = vadd.f32 %v5144_v3, %v5143_v31 }
 0xb94   : > { %v8009_v42 = vpop.eup %8008  ;;  %8020 = vrcp.f32 %v5522_v62  ;;  %v5269_v58 = vadd.f32 %v5268_v24, %v5267_v46  ;;  %v5308_v47 = vrot.slane %v5223_v56, 4  ;;  %v5118_v11 = vrot.slane %v5048_v35, 4 }
 0xb95   : > { %v12900_v7 = vsub.f32 %v11657_v39, %v11793_v51  ;;  %v11915_v50 = vmul.f32 %v11894_v0, %v5153_v59  ;;  %v5349_v16 = vmul.f32 %v11909_v26, %v5111_v17  ;;  %v5302_v54 = vrot.slane %v5220_v20, 4 }
 0xb96   : > { %v5146_v62 = vrot.slane %v5145_v33, 1  ;;  %v5270_v41 = vrot.slane %v5269_v58, 1  ;;  %v5309_v40 = vadd.f32 %v5308_v47, %v5223_v56  ;;  %v5119_v43 = vadd.f32 %v5118_v11, %v5048_v35  ;;  %v5069_v17 = vpop.xlane.xlu1 %5068 }
 0xb97   : > { %v5587_v49 = vmul.f32 %v8009_v42, %v12900_v7  ;;  %vm5445_vm0 = vcmp.eq.f32.partialorder %v11876_v36, inf  ;;  %vm5447_vm1 = vcmp.eq.f32.partialorder %v11876_v36, 0.0  ;;  %v5303_v31 = vadd.f32 %v5302_v54, %v5220_v20 }
 0xb98   : > { %v11918_v1 = vpop.eup %8010  ;;  %v5284_v46 = vrot.slane %v5211_v2, 4  ;;  %v5147_v51 = vadd.f32 %v5146_v62, %v5145_v33  ;;  %v5271_v59 = vadd.f32 %v5270_v41, %v5269_v58  ;;  %v5310_v3 = vrot.slane %v5309_v40, 2 }
 0xb99   : > { %v11922_v39 = vpop.eup %8012  ;;  %v5120_v24 = vrot.slane %v5119_v43, 2  ;;  %v5621_v42 = vsel %vm5021_vm7, %v5587_v49, -inf  ;;  %v5448_v56 = vand.u32 2147483648, %v11876_v36  ;;  %vm5487_vm2 = vcmp.eq.f32.partialorder %v11878_v15, inf }
 0xb9a   : > { %v5304_v35 = vrot.slane %v5303_v31, 2  ;;  %v5490_v11 = vand.u32 2147483648, %v11878_v15  ;;  %v5365_v7 = vsub.f32 %v5271_v59, %v5349_v16  ;;  %v5311_v20 = vadd.f32 %v5310_v3, %v5309_v40 }
 0xb9b   : > { %v8015_v47 = vpop.eup %8014  ;;  %v5121_v54 = vadd.f32 %v5120_v24, %v5119_v43  ;;  %v5285_v62 = vadd.f32 %v5284_v46, %v5211_v2  ;;  %v5160_v41 = vrot.slane %v5069_v17, 4  ;;  %v5622_v9 = vrot.slane %v5621_v42, 4 }
 0xb9c   : > { %v8017_v48 = vpop.eup %8016  ;;  %v5444_v33 = vmul.f32 %v8015_v47, %v11876_v36  ;;  %v5305_v58 = vadd.f32 %v5304_v35, %v5303_v31  ;;  %v11930_v34 = vmul.f32 0.001953125, %v5147_v51  ;;  %v5382_v21 = vmul.f32 0.0019569471, %v5365_v7  ;;  %v5214_v31 = vpop.xlane.xlu0 %5213 }
 0xb9d   : > { %v8019_v63 = vpop.eup %8018  ;;  %v5486_v49 = vmul.f32 %v8017_v48, %v11878_v15  ;;  %v5312_v16 = vrot.slane %v5311_v20, 1  ;;  %v5122_v59 = vrot.slane %v5121_v54, 1  ;;  %vm5489_vm3 = vcmp.eq.f32.partialorder %v11878_v15, 0.0 }
 0xb9e   : > { %v11932_v32 = vpop.eup %8020  ;;  %v5446_v40 = vsel %vm5445_vm0, %v11876_v36, %v5444_v33  ;;  %v5437_v43 = vmul.f32 %v8019_v63, %v11882_v44  ;;  %v11943_v46 = vmax.f32 %v5382_v21, 0.0  ;;  %v5306_v3 = vrot.slane %v5305_v58, 1  ;;  %v5226_v33 = vpop.xlane.xlu1 %5225 }
 0xb9f   : > { %v5449_v2 = vsel %vm5447_vm1, %v5448_v56, %v5446_v40  ;;  %v5488_v48 = vsel %vm5487_vm2, %v11878_v15, %v5486_v49  ;;  %v5313_v24 = vadd.f32 %v5312_v16, %v5311_v20  ;;  %v5286_v35 = vrot.slane %v5285_v62, 2 }
 0xba0   : > { %v5161_v47 = vadd.f32 %v5160_v41, %v5069_v17  ;;  %v5491_v7 = vsel %vm5489_vm3, %v5490_v11, %v5488_v48  ;;  %vm5438_vm4 = vcmp.eq.f32.partialorder %v11882_v44, inf  ;;  %vm5440_vm5 = vcmp.eq.f32.partialorder %v11882_v44, 0.0  ;;  %v5066_v48 = vpop.xlane.xlu0 %5065 }
 0xba1   : > { %8022 = vrsqrt.f32 %v11943_v46  ;;  %v5623_v36 = vmax.f32 %v5621_v42, %v5622_v9  ;;  %v5525_v63 = vadd.f32 1e-05, %v5449_v2  ;;  %v5441_v56 = vand.u32 2147483648, %v11882_v44 }
 0xba2   : > { %v5355_v21 = vmul.f32 %v11930_v34, %v5147_v51  ;;  %v5439_v49 = vsel %vm5438_vm4, %v11882_v44, %v5437_v43  ;;  %v5372_v15 = vsub.f32 %v5313_v24, %v11915_v50  ;;  %v5123_v20 = vadd.f32 %v5122_v59, %v5121_v54 }
 0xba3   : > { %v5307_v17 = vadd.f32 %v5306_v3, %v5305_v58  ;;  %v5531_v11 = vadd.f32 1e-05, %v5491_v7  ;;  %v5287_v41 = vadd.f32 %v5286_v35, %v5285_v62  ;;  %v5162_v40 = vrot.slane %v5161_v47, 2 }
 0xba4   : > { %v5290_v16 = vrot.slane %v5214_v31, 4  ;;  %v5389_v13 = vmul.f32 0.0019569471, %v5372_v15  ;;  %v11953_v4 = vmul.f32 0.001953125, %v5123_v20  ;;  %v5314_v42 = vrot.slane %v5226_v33, 4 }
 0xba5   : > { %v5371_v9 = vsub.f32 %v5307_v17, %v5355_v21  ;;  %v5442_v51 = vsel %vm5440_vm5, %v5441_v56, %v5439_v49  ;;  %v5288_v2 = vrot.slane %v5287_v41, 1  ;;  %v5163_v5 = vadd.f32 %v5162_v40, %v5161_v47  ;;  %v5205_v56 = vpop.xlane.xlu0 %5204 }
 0xba6   : > { %v5291_v43 = vadd.f32 %v5290_v16, %v5214_v31  ;;  %v11957_v45 = vmax.f32 %v5389_v13, 0.0  ;;  %v5351_v50 = vmul.f32 %v11953_v4, %v5123_v20  ;;  %v5154_v58 = vrot.slane %v5066_v48, 4 }
 0xba7   : > { %v5388_v54 = vmul.f32 0.0019569471, %v5371_v9  ;;  %v5624_v62 = vrot.slane %v5623_v36, 2  ;;  %v5289_v59 = vadd.f32 %v5288_v2, %v5287_v41  ;;  %v5164_v3 = vrot.slane %v5163_v5, 1  ;;  %v5712_v9 = vld [vmem:[#allocation17] sm:$0xff]  ;;  %v5713_v2 = vld [vmem:[#allocation17 + $0x8] sm:$0xff] }
 0xba8   : > { %v5292_v24 = vrot.slane %v5291_v43, 2  ;;  %v5524_v7 = vadd.f32 1e-05, %v5442_v51  ;;  %8024 = vrsqrt.f32 %v11957_v45  ;;  %v5315_v44 = vadd.f32 %v5314_v42, %v5226_v33 }
 0xba9   : > { %8026 = vrcp.f32 %v5525_v63  ;;  %v5367_v31 = vsub.f32 %v11897_v10, %v5351_v50  ;;  %v11964_v13 = vmax.f32 %v5388_v54, 0.0  ;;  %v5368_v47 = vsub.f32 %v5289_v59, %v11889_v23  ;;  %v5229_v51 = vpop.xlane.xlu0 %5228  ;;  %v5715_v50 = vld [vmem:[#allocation17 + $0x18] sm:$0xff] }
 0xbaa   : > { %8028 = vrcp.f32 %v5531_v11  ;;  %v5165_v49 = vadd.f32 %v5164_v3, %v5163_v5  ;;  %v5293_v15 = vadd.f32 %v5292_v24, %v5291_v43  ;;  %v5155_v20 = vadd.f32 %v5154_v58, %v5066_v48  ;;  %v5714_v43 = vld [vmem:[#allocation17 + $0x10] sm:$0xff] }
 0xbab   : > { %v8023_v21 = vpop.eup %8022  ;;  %v11967_v17 = vmax.f32 %v5623_v36, %v5624_v62  ;;  %vm5452_vm6 = vcmp.eq.f32.partialorder %v11943_v46, inf  ;;  %v5384_v41 = vmul.f32 0.0019569471, %v5367_v31  ;;  %8030 = vrsqrt.f32 %v11964_v13 }
 0xbac   : > { %8032 = vrcp.f32 %v5524_v7  ;;  %vm5454_vm8 = vcmp.eq.f32.partialorder %v11943_v46, 0.0  ;;  %v5455_v10 = vand.u32 2147483648, %v11943_v46  ;;  %v5385_v63 = vmul.f32 0.0019569471, %v5368_v47 }
 0xbad   : > { %v5316_v23 = vrot.slane %v5315_v44, 2  ;;  %v5451_v33 = vmul.f32 %v8023_v21, %v11943_v46  ;;  %v11974_v11 = vmax.f32 %v5384_v41, 0.0  ;;  %v5294_v5 = vrot.slane %v5293_v15, 1 }
 0xbae   : > { %v5272_v40 = vrot.slane %v5205_v56, 4  ;;  %vm5501_vm9 = vcmp.eq.f32.partialorder %v11957_v45, inf  ;;  %v11977_v36 = vmax.f32 %v5385_v63, 0.0  ;;  %v11979_v16 = vmul.f32 0.001953125, %v5165_v49 }
 0xbaf   : > { %v5156_v48 = vrot.slane %v5155_v20, 2  ;;  %vm5503_vm10 = vcmp.eq.f32.partialorder %v11957_v45, 0.0  ;;  %v5504_v42 = vand.u32 2147483648, %v11957_v45  ;;  %8034 = vrsqrt.f32 %v11974_v11 }
 0xbb0   : > { %vm5494_vm11 = vcmp.eq.f32.partialorder %v11964_v13, inf  ;;  %vm5496_vm12 = vcmp.eq.f32.partialorder %v11964_v13, 0.0  ;;  %v5497_v54 = vand.u32 2147483648, %v11964_v13  ;;  %8036 = vrsqrt.f32 %v11977_v36 }
 0xbb1   : > { %v5317_v58 = vadd.f32 %v5316_v23, %v5315_v44  ;;  %v5453_v62 = vsel %vm5452_vm6, %v11943_v46, %v5451_v33  ;;  %v5295_v59 = vadd.f32 %v5294_v5, %v5293_v15  ;;  %v5157_v3 = vadd.f32 %v5156_v48, %v5155_v20  ;;  %v5716_v33 = vld [vmem:[#allocation17 + $0x20] sm:$0xff]  ;;  %v5717_v15 = vld [vmem:[#allocation17 + $0x28] sm:$0xff] }
 0xbb2   : > { %v5273_v24 = vadd.f32 %v5272_v40, %v5205_v56  ;;  %v8025_v7 = vpop.eup %8024  ;;  %v11992_v31 = vmul.f32 %v11979_v16, %v5165_v49  ;;  %v5320_v47 = vrot.slane %v5229_v51, 4  ;;  %v7516_v21 = vpack.c.bf16 %v5713_v2, %v5712_v9 }
 0xbb3   : > { %v7520_v41 = vpack.c.bf16 %v5715_v50, %v5714_v43  ;;  %v11994_v63 = vpop.eup %8026  ;;  %v5500_v35 = vmul.f32 %v8025_v7, %v11957_v45  ;;  %vm5466_vm15 = vcmp.eq.f32.partialorder %v11974_v11, inf  ;;  %v5369_v44 = vsub.f32 %v5295_v59, %v11907_v25 }
 0xbb4   : > { %v5158_v23 = vrot.slane %v5157_v3, 1  ;;  %v11999_v20 = vpop.eup %8028  ;;  %vm5468_vm14 = vcmp.eq.f32.partialorder %v11974_v11, 0.0  ;;  %v5318_v56 = vrot.slane %v5317_v58, 1  ;;  %v5274_v49 = vrot.slane %v5273_v24, 2  ;;  %7517 = vmatprep.subr.bf16.mxu0 %v7516_v21 }
 0xbb5   : > { %v5321_v5 = vadd.f32 %v5320_v47, %v5229_v51  ;;  %v8031_v40 = vpop.eup %8030  ;;  %v5502_v48 = vsel %vm5501_vm9, %v11957_v45, %v5500_v35  ;;  %v5386_v9 = vmul.f32 0.0019569471, %v5369_v44  ;;  %7519 = vmatpush3.bf16.msra.mxu0 %v7516_v21  ;;  %v5456_v25 = vsel %vm5454_vm8, %v5455_v10, %v5453_v62  ;;  %v5719_v21 = vld [vmem:[#allocation17 + $0x38] sm:$0xff] }
 0xbb6   : > { %v5159_v2 = vadd.f32 %v5158_v23, %v5157_v3  ;;  %v8033_v43 = vpop.eup %8032  ;;  %v5493_v50 = vmul.f32 %v8031_v40, %v11964_v13  ;;  %v5275_v59 = vadd.f32 %v5274_v49, %v5273_v24  ;;  %7521 = vmatprep.subr.bf16.mxu0 %v7520_v41  ;;  %v7524_v12 = vpack.c.bf16 %v5717_v15, %v5716_v33  ;;  %v5718_v3 = vld [vmem:[#allocation17 + $0x30] sm:$0xff] }
 0xbb7   : > { %v5322_v7 = vrot.slane %v5321_v5, 2  ;;  %v5505_v51 = vsel %vm5503_vm10, %v5504_v42, %v5502_v48  ;;  %v5469_v47 = vand.u32 2147483648, %v11974_v11  ;;  %v12011_v28 = vmax.f32 %v5386_v9, 0.0 }
 0xbb8   : > { %v12013_v35 = vmul.f32 0.001953125, %v5159_v2  ;;  %v5495_v46 = vsel %vm5494_vm11, %v11964_v13, %v5493_v50  ;;  %v5276_v10 = vrot.slane %v5275_v59, 1  ;;  %v5526_v24 = vadd.f32 1e-05, %v5456_v25 }
 0xbb9   : > { %v5323_v62 = vadd.f32 %v5322_v7, %v5321_v5  ;;  %v8035_v44 = vpop.eup %8034  ;;  %v5498_v45 = vsel %vm5496_vm12, %v5497_v54, %v5495_v46  ;;  %vm5473_vm13 = vcmp.eq.f32.partialorder %v11977_v36, inf  ;;  %v5476_v42 = vand.u32 2147483648, %v11977_v36  ;;  %7523 = vmatpush3.bf16.msra.mxu0 %v7520_v41 }
 0xbba   : > { %v5319_v23 = vadd.f32 %v5318_v56, %v5317_v58  ;;  %v8037_v33 = vpop.eup %8036  ;;  %v5533_v15 = vadd.f32 1e-05, %v5505_v51  ;;  %v5465_v49 = vmul.f32 %v8035_v44, %v11974_v11  ;;  %8038 = vrsqrt.f32 %v12011_v28  ;;  %7525 = vmatprep.subr.bf16.mxu0 %v7524_v12 }
 0xbbb   : > { %v7528_v40 = vpack.c.bf16 %v5719_v21, %v5718_v3  ;;  %v5532_v5 = vadd.f32 1e-05, %v5498_v45  ;;  %v5472_v48 = vmul.f32 %v8037_v33, %v11977_v36  ;;  %v5357_v13 = vmul.f32 %v12013_v35, %v5159_v2 }
 0xbbc   : > { %v5277_v54 = vadd.f32 %v5276_v10, %v5275_v59  ;;  %v5467_v9 = vsel %vm5466_vm15, %v11974_v11, %v5465_v49  ;;  %v5324_v58 = vrot.slane %v5323_v62, 1  ;;  %8040 = vrcp.f32 %v5526_v24  ;;  %v12907_v49 = vld [vmem:[#allocation86_spill] sm:$0xff] }
 0xbbd   : > { %v12901_v41 = vsub.f32 %v11645_v14, %v11785_v8  ;;  %v5470_v25 = vsel %vm5468_vm14, %v5469_v47, %v5467_v9  ;;  %v5474_v50 = vsel %vm5473_vm13, %v11977_v36, %v5472_v48  ;;  %v5373_v2 = vsub.f32 %v5319_v23, %v5357_v13  ;;  %7527 = vmatpush3.bf16.msra.mxu0 %v7524_v12 }
 0xbbe   : > { %v5366_v59 = vsub.f32 %v5277_v54, %v11829_v38  ;;  %8042 = vrcp.f32 %v5533_v15  ;;  %v5528_v7 = vadd.f32 1e-05, %v5470_v25  ;;  %vm5475_vm0 = vcmp.eq.f32.partialorder %v11977_v36, 0.0  ;;  %7529 = vmatprep.subr.bf16.mxu0 %v7528_v40  ;;  %v12906_v15 = vld [vmem:[#allocation111_spill] sm:$0xff] }
 0xbbf   : > { %v5584_v56 = vmul.f32 %v11922_v39, %v12901_v41  ;;  %v5325_v51 = vadd.f32 %v5324_v58, %v5323_v62  ;;  %8044 = vrcp.f32 %v5532_v5  ;;  %v5477_v14 = vsel %vm5475_vm0, %v5476_v42, %v5474_v50 }
 0xbc0   : > { %v5390_v8 = vmul.f32 0.0019569471, %v5373_v2  ;;  %v5383_v39 = vmul.f32 0.0019569471, %v5366_v59  ;;  %v5581_v11 = vsub.f32 %v11728_v30, %v11894_v0  ;;  %v5574_v47 = vsub.f32 %v11733_v27, %v11909_v26 }
 0xbc1   : > { %8046 = vrcp.f32 %v5528_v7  ;;  %v5374_v38 = vsub.f32 %v5325_v51, %v11992_v31  ;;  %v12902_v36 = vsub.f32 %v11642_v22, %v11783_v55  ;;  %v5600_v46 = vsel %vm5021_vm7, %v5584_v56, -inf  ;;  %7531 = vmatpush3.bf16.msra.mxu0 %v7528_v40 }
 0xbc2   : > { %v12045_v12 = vmax.f32 %v5390_v8, 0.0  ;;  %v12047_v3 = vmax.f32 %v5383_v39, 0.0  ;;  %v5529_v10 = vadd.f32 1e-05, %v5477_v14  ;;  %v12903_v27 = vsub.f32 %v11667_v57, %v11798_v60 }
 0xbc3   : > { %v5585_v21 = vmul.f32 %v11918_v1, %v12902_v36  ;;  %v5391_v30 = vmul.f32 0.0019569471, %v5374_v38  ;;  %v12904_v26 = vsub.f32 %v11705_v6, %v11861_v19  ;;  %v5626_v62 = vrot.slane %v11967_v17, 1 }
 0xbc4   : > { %v5586_v0 = vmul.f32 %v11932_v32, %v12903_v27  ;;  %v5580_v22 = vsub.f32 %v11737_v52, %v11930_v34  ;;  %8048 = vrsqrt.f32 %v12045_v12  ;;  %v5601_v55 = vrot.slane %v5600_v46, 4  ;;  %v8039_v1 = vpop.eup %8038 }
 0xbc5   : > { %v5588_v31 = vmul.f32 %v8033_v43, %v12904_v26  ;;  %v5576_v24 = vsub.f32 %v11687_v18, %v11953_v4  ;;  %v5583_v57 = vsub.f32 %v11760_v37, %v11979_v16  ;;  %vm5480_vm1 = vcmp.eq.f32.partialorder %v12011_v28, inf }
 0xbc6   : > { %8050 = vrsqrt.f32 %v12047_v3  ;;  %v5479_v32 = vmul.f32 %v8039_v1, %v12011_v28  ;;  %vm5482_vm2 = vcmp.eq.f32.partialorder %v12011_v28, 0.0  ;;  %v12073_v6 = vmax.f32 %v5391_v30, 0.0  ;;  %v8041_v52 = vpop.eup %8040 }
 0xbc7   : > { %v5607_v34 = vsel %vm5021_vm7, %v5585_v21, -inf  ;;  %8052 = vrcp.f32 %v5529_v10  ;;  %v5483_v60 = vand.u32 2147483648, %v12011_v28  ;;  %v5614_v4 = vsel %vm5021_vm7, %v5586_v0, -inf }
 0xbc8   : > { %v5628_v18 = vsel %vm5021_vm7, %v5588_v31, -inf  ;;  %v5481_v19 = vsel %vm5480_vm1, %v12011_v28, %v5479_v32  ;;  %v5582_v43 = vsub.f32 %v11763_v61, %v12013_v35  ;;  %8054 = vrsqrt.f32 %v12073_v6  ;;  %v8043_v45 = vpop.eup %8042 }
 0xbc9   : > { %v5602_v44 = vmax.f32 %v5600_v46, %v5601_v55  ;;  %v5484_v42 = vsel %vm5482_vm2, %v5483_v60, %v5481_v19  ;;  %v12905_v23 = vsub.f32 %v11693_v53, %v11848_v29  ;;  %v12908_v40 = vsub.f32 %v12906_v15, %v12907_v49  ;;  %v8045_v28 = vpop.eup %8044  ;;  %v12910_v19 = vld [vmem:[#allocation85_spill] sm:$0xff] }
 0xbca   : > { %v5608_v48 = vrot.slane %v5607_v34, 4  ;;  %v5530_v13 = vadd.f32 1e-05, %v5484_v42  ;;  %v5590_v54 = vmul.f32 %v8041_v52, %v5574_v47  ;;  %v5615_v9 = vrot.slane %v5614_v4, 4 }
 0xbcb   : > { %v5589_v33 = vmul.f32 %v11994_v63, %v12905_v23  ;;  %v5595_v5 = vmul.f32 %v11999_v20, %v12908_v40  ;;  %v5629_v58 = vrot.slane %v5628_v18, 4  ;;  %v8047_v41 = vpop.eup %8046  ;;  %vm5508_vm3 = vcmp.eq.f32.partialorder %v12045_v12, inf }
 0xbcc   : > { %vm5510_vm4 = vcmp.eq.f32.partialorder %v12045_v12, 0.0  ;;  %v5511_v53 = vand.u32 2147483648, %v12045_v12  ;;  %vm5459_vm5 = vcmp.eq.f32.partialorder %v12047_v3, inf  ;;  %v5592_v29 = vmul.f32 %v8047_v41, %v5576_v24 }
 0xbcd   : > { %8056 = vrcp.f32 %v5530_v13  ;;  %vm5461_vm6 = vcmp.eq.f32.partialorder %v12047_v3, 0.0  ;;  %v5603_v63 = vrot.slane %v5602_v44, 2  ;;  %v5462_v20 = vand.u32 2147483648, %v12047_v3  ;;  %v12913_v13 = vld [vmem:[#allocation115_spill] sm:$0xff] }
 0xbce   : > { %v12097_v56 = vmul.f32 %v8043_v45, %v5581_v11  ;;  %v5609_v25 = vmax.f32 %v5607_v34, %v5608_v48  ;;  %v5616_v50 = vmax.f32 %v5614_v4, %v5615_v9  ;;  %v8049_v2 = vpop.eup %8048  ;;  %v5656_v59 = vsel %vm5021_vm7, %v5592_v29, -inf }
 0xbcf   : > { %vm5515_vm8 = vcmp.eq.f32.partialorder %v12073_v6, inf  ;;  %vm5517_vm9 = vcmp.eq.f32.partialorder %v12073_v6, 0.0  ;;  %v5630_v7 = vmax.f32 %v5628_v18, %v5629_v58  ;;  %v5657_v14 = vrot.slane %v5656_v59, 4  ;;  %v12909_v18 = vld [vmem:[#allocation112_spill] sm:$0xff] }
 0xbd0   : > { %v8051_v51 = vpop.eup %8050  ;;  %v5507_v8 = vmul.f32 %v8049_v2, %v12045_v12  ;;  %v5518_v39 = vand.u32 2147483648, %v12073_v6  ;;  %v5635_v47 = vsel %vm5021_vm7, %v5589_v33, -inf  ;;  %v5596_v38 = vmul.f32 %v8045_v28, %v5580_v22  ;;  %v12912_v28 = vld [vmem:[#allocation83_spill] sm:$0xff] }
 0xbd1   : > { %v5458_v11 = vmul.f32 %v8051_v51, %v12047_v3  ;;  %v5604_v36 = vmax.f32 %v5602_v44, %v5603_v63  ;;  %v5642_v21 = vsel %vm5021_vm7, %v5590_v54, -inf  ;;  %v8053_v46 = vpop.eup %8052  ;;  %v5658_v10 = vmax.f32 %v5656_v59, %v5657_v14 }
 0xbd2   : > { %v5509_v30 = vsel %vm5508_vm3, %v12045_v12, %v5507_v8  ;;  %v5610_v27 = vrot.slane %v5609_v25, 2  ;;  %v5617_v0 = vrot.slane %v5616_v50, 2  ;;  %v8055_v26 = vpop.eup %8054  ;;  %v5631_v22 = vrot.slane %v5630_v7, 2 }
 0xbd3   : > { %v5512_v31 = vsel %vm5510_vm4, %v5511_v53, %v5509_v30  ;;  %v5460_v55 = vsel %vm5459_vm5, %v12047_v3, %v5458_v11  ;;  %v5636_v1 = vrot.slane %v5635_v47, 4  ;;  %v5514_v32 = vmul.f32 %v8055_v26, %v12073_v6 }
 0xbd4   : > { %v5534_v24 = vadd.f32 1e-05, %v5512_v31  ;;  %v5463_v34 = vsel %vm5461_vm6, %v5462_v20, %v5460_v55  ;;  %v5643_v52 = vrot.slane %v5642_v21, 4  ;;  %v5659_v60 = vrot.slane %v5658_v10, 2 }
 0xbd5   : > { %v5527_v4 = vadd.f32 1e-05, %v5463_v34  ;;  %v12911_v44 = vsub.f32 %v12909_v18, %v12910_v19  ;;  %v5677_v45 = vsel %vm5021_vm7, %v5595_v5, -inf  ;;  %v5516_v42 = vsel %vm5515_vm8, %v12073_v6, %v5514_v32  ;;  %v12916_v18 = vld [vmem:[#allocation114_spill] sm:$0xff] }
 0xbd6   : > { %8058 = vrcp.f32 %v5534_v24  ;;  %v5611_v23 = vmax.f32 %v5609_v25, %v5610_v27  ;;  %v5618_v33 = vmax.f32 %v5616_v50, %v5617_v0  ;;  %v5519_v3 = vsel %vm5517_vm9, %v5518_v39, %v5516_v42 }
 0xbd7   : > { %v5593_v12 = vmul.f32 %v8053_v46, %v12911_v44  ;;  %v8057_v15 = vpop.eup %8056  ;;  %8060 = vrcp.f32 %v5527_v4  ;;  %v5605_v49 = vrot.slane %v5604_v36, 1  ;;  %v5632_v40 = vmax.f32 %v5630_v7, %v5631_v22 }
 0xbd8   : > { %v5535_v48 = vadd.f32 1e-05, %v5519_v3  ;;  %v12914_v54 = vsub.f32 %v12912_v28, %v12913_v13  ;;  %v5637_v5 = vmax.f32 %v5635_v47, %v5636_v1  ;;  %v5644_v58 = vmax.f32 %v5642_v21, %v5643_v52 }
 0xbd9   : > { %vm5743_vm10 = vcmask 1041409   ;;  %v5660_v41 = vmax.f32 %v5658_v10, %v5659_v60  ;;  %v5663_v53 = vsel %vm5021_vm7, %v5593_v12, -inf  ;;  %v5678_v29 = vrot.slane %v5677_v45, 4 }
 0xbda   : > { %v5594_v9 = vmul.f32 %v8057_v15, %v12914_v54  ;;  %v5684_v63 = vsel %vm5021_vm7, %v5596_v38, -inf  ;;  %8062 = vrcp.f32 %v5535_v48  ;;  %v5612_v6 = vrot.slane %v5611_v23, 1 }
 0xbdb   : > { %v5619_v20 = vrot.slane %v5618_v33, 1  ;;  %v5664_v25 = vrot.slane %v5663_v53, 4  ;;  %v5633_v50 = vrot.slane %v5632_v40, 1  ;;  %v5679_v59 = vmax.f32 %v5677_v45, %v5678_v29 }
 0xbdc   : > { %v5670_v2 = vsel %vm5021_vm7, %v5594_v9, -inf  ;;  %v5685_v7 = vrot.slane %v5684_v63, 4  ;;  %v5638_v51 = vrot.slane %v5637_v5, 2  ;;  %v5691_v39 = vsel %vm5021_vm7, %v12097_v56, -inf }
 0xbdd   : > { %v5665_v14 = vmax.f32 %v5663_v53, %v5664_v25  ;;  %v5671_v8 = vrot.slane %v5670_v2, 4  ;;  %v5661_v47 = vrot.slane %v5660_v41, 1  ;;  %v5645_v11 = vrot.slane %v5644_v58, 2 }
 0xbde   : > { %v5686_v21 = vmax.f32 %v5684_v63, %v5685_v7  ;;  %v5692_v46 = vrot.slane %v5691_v39, 4  ;;  %v5627_v38 = vmax.f32 %v11967_v17, %v5626_v62  ;;  %v5680_v27 = vrot.slane %v5679_v59, 2  ;;  %v12915_v62 = vld [vmem:[#allocation84_spill] sm:$0xff] }
 0xbdf   : > { %v5666_v10 = vrot.slane %v5665_v14, 2  ;;  %v5672_v30 = vmax.f32 %v5670_v2, %v5671_v8  ;;  %v5606_v0 = vmax.f32 %v5604_v36, %v5605_v49  ;;  %v5613_v26 = vmax.f32 %v5611_v23, %v5612_v6 }
 0xbe0   : > { %v5620_v31 = vmax.f32 %v5618_v33, %v5619_v20  ;;  %v5693_v55 = vmax.f32 %v5691_v39, %v5692_v46  ;;  %v8059_v22 = vpop.eup %8058  ;;  %v5634_v1 = vmax.f32 %v5632_v40, %v5633_v50  ;;  %v5639_v24 = vmax.f32 %v5637_v5, %v5638_v51 }
 0xbe1   : > { %v5667_v32 = vmax.f32 %v5665_v14, %v5666_v10  ;;  %v5673_v56 = vrot.slane %v5672_v30, 2  ;;  %v8061_v34 = vpop.eup %8060  ;;  %v5662_v52 = vmax.f32 %v5660_v41, %v5661_v47  ;;  %v5598_v60 = vmul.f32 %v8059_v22, %v5582_v43 }
 0xbe2   : > { %v5646_v4 = vmax.f32 %v5644_v58, %v5645_v11  ;;  %v5687_v17 = vrot.slane %v5686_v21, 2  ;;  %v12917_v19 = vsub.f32 %v12915_v62, %v12916_v18  ;;  %v5681_v45 = vmax.f32 %v5679_v59, %v5680_v27  ;;  %v5852_v62 = vld [vmem:[#allocation20 + $0x18] sm:$0xff] }
 0xbe3   : > { %v5668_v44 = vrot.slane %v5667_v32, 1  ;;  %v5674_v12 = vmax.f32 %v5672_v30, %v5673_v56  ;;  %v5698_v42 = vsel %vm5021_vm7, %v5598_v60, -inf  ;;  %v5694_v23 = vrot.slane %v5693_v55, 2  ;;  %v5850_v60 = vld [vmem:[#allocation20 + $0x8] sm:$0xff] }
 0xbe4   : > { %v5591_v36 = vmul.f32 %v8061_v34, %v12917_v19  ;;  %v5744_v33 = vsel %vm5743_vm10, %v5613_v26, %v5606_v0  ;;  %vm5745_vm11 = vcmask 1042434   ;;  %v8063_v15 = vpop.eup %8062  ;;  %v5699_v3 = vrot.slane %v5698_v42, 4  ;;  %v6433_v19 = vld [vmem:[#allocation18] ss:$0 sm:$0xff] }
 0xbe5   : > { %v5675_v35 = vrot.slane %v5674_v12, 1  ;;  %vm5747_vm12 = vcmask 1043459   ;;  %v5599_v43 = vmul.f32 %v8063_v15, %v5583_v57  ;;  %v5669_v40 = vmax.f32 %v5667_v32, %v5668_v44 }
 0xbe6   : > { %v5649_v61 = vsel %vm5021_vm7, %v5591_v36, -inf  ;;  %v5688_v48 = vmax.f32 %v5686_v21, %v5687_v17  ;;  %v5700_v28 = vmax.f32 %v5698_v42, %v5699_v3  ;;  %v5682_v54 = vrot.slane %v5681_v45, 1  ;;  %v6436_v3 = vld [vmem:[#allocation2] ss:$0 sm:$0xff] }
 0xbe7   : > { %v5650_v49 = vrot.slane %v5649_v61, 4  ;;  %v5676_v13 = vmax.f32 %v5674_v12, %v5675_v35  ;;  %v5746_v9 = vsel %vm5745_vm11, %v5620_v31, %v5744_v33  ;;  %v5647_v5 = vrot.slane %v5646_v4, 1 }
 0xbe8   : > { %v5695_v41 = vmax.f32 %v5693_v55, %v5694_v23  ;;  %v5705_v53 = vsel %vm5021_vm7, %v5599_v43, -inf  ;;  %v5701_v29 = vrot.slane %v5700_v28, 2  ;;  %v5640_v63 = vrot.slane %v5639_v24, 1 }
 0xbe9   : > { %v5651_v58 = vmax.f32 %v5649_v61, %v5650_v49  ;;  %v5706_v6 = vrot.slane %v5705_v53, 4  ;;  %vm5749_vm15 = vcmask 1044484   ;;  %v5689_v37 = vrot.slane %v5688_v48, 1 }
 0xbea   : > { %v5748_v16 = vsel %vm5747_vm12, %v5627_v38, %v5746_v9  ;;  %v5757_v57 = vsel %vm5743_vm10, %v5669_v40, %v5662_v52  ;;  %v5683_v25 = vmax.f32 %v5681_v45, %v5682_v54  ;;  %v5702_v50 = vmax.f32 %v5700_v28, %v5701_v29  ;;  %v5849_v52 = vld [vmem:[#allocation20] sm:$0xff]  ;;  %v12918_v40 = vld [vmem:[#allocation80_spill] sm:$0xff]  ;;  %v12919_v28 = vld [vmem:[#allocation37_spill] sm:$0xff] }
 0xbeb   : > { %v5652_v20 = vrot.slane %v5651_v58, 2  ;;  %v5707_v2 = vmax.f32 %v5705_v53, %v5706_v6  ;;  %v5758_v59 = vsel %vm5745_vm11, %v5676_v13, %v5757_v57  ;;  %v5648_v7 = vmax.f32 %v5646_v4, %v5647_v5  ;;  %v5851_v4 = vld [vmem:[#allocation20 + $0x10] sm:$0xff] }
 0xbec   : > { %v5696_v14 = vrot.slane %v5695_v41, 1  ;;  %v5750_v8 = vsel %vm5749_vm15, %v5634_v1, %v5748_v16  ;;  %v5703_v39 = vrot.slane %v5702_v50, 1  ;;  %vm5751_vm14 = vcmask 1045509  }
 0xbed   : > { %v5653_v51 = vmax.f32 %v5651_v58, %v5652_v20  ;;  %v5708_v47 = vrot.slane %v5707_v2, 2  ;;  %v5759_v11 = vsel %vm5747_vm12, %v5683_v25, %v5758_v59  ;;  %v5641_v21 = vmax.f32 %v5639_v24, %v5640_v63 }
 0xbee   : > { %v5690_v38 = vmax.f32 %v5688_v48, %v5689_v37  ;;  %vm5753_vm13 = vcmask 1046534   ;;  %vm5755_vm0 = vcmask 1047559   ;;  %v5704_v27 = vmax.f32 %v5702_v50, %v5703_v39 }
 0xbef   : > { %v5654_v46 = vrot.slane %v5653_v51, 1  ;;  %v5709_v10 = vmax.f32 %v5707_v2, %v5708_v47  ;;  %v5752_v0 = vsel %vm5751_vm14, %v5641_v21, %v5750_v8  ;;  %v5697_v31 = vmax.f32 %v5695_v41, %v5696_v14 }
 0xbf0   : > { %v5760_v26 = vsel %vm5749_vm15, %v5690_v38, %v5759_v11  ;;  %v5754_v22 = vsel %vm5753_vm13, %v5648_v7, %v5752_v0  ;;  %v7532_v17 = vpack.c.bf16 %v5850_v60, %v5849_v52  ;;  %v7536_v18 = vpack.c.bf16 %v5852_v62, %v5851_v4 }
 0xbf1   : > { %v5655_v30 = vmax.f32 %v5653_v51, %v5654_v46  ;;  %v5710_v55 = vrot.slane %v5709_v10, 1  ;;  %v5761_v56 = vsel %vm5751_vm14, %v5697_v31, %v5760_v26  ;;  %v5942_v48 = vadd.s32 8, %v12918_v40 }
 0xbf2   : > { %v5762_v24 = vsel %vm5753_vm13, %v5704_v27, %v5761_v56  ;;  %7533 = vmatprep.subr.bf16.mxu0 %v7532_v17  ;;  %vm5943_vm4 = vcmp.eq.s32.totalorder %v12918_v40, %v12919_v28  ;;  %v12920_v13 = vmov 0.0   ;;  %vm5961_vm5 = vcmask 130048  }
 0xbf3   : > { %v5756_v1 = vsel %vm5755_vm0, %v5655_v30, %v5754_v22  ;;  %v5711_v32 = vmax.f32 %v5709_v10, %v5710_v55  ;;  %vm5944_vm3 = vcmp.eq.s32.totalorder %v5942_v48, %v12919_v28  ;;  %v6439_v9 = vsel %vm5943_vm4, 1.0, %v12920_v13 }
 0xbf4   : > { %7086 = vmatprep.mubr.msk.f32.mxu0 %vm5021_vm7, %v5756_v1  ;;  %v6440_v54 = vsel %vm5944_vm3, 1.0, %v12920_v13  ;;  %vm5971_vm6 = vcmask 122880  }
 0xbf5   : > { %v5763_v34 = vsel %vm5755_vm0, %v5711_v32, %v5762_v24 }
 0xbf6   : > { %7087 = vmatmul.mubr.msk.f32.vlgmr.msra.gmra.mrb[156].mxu0 %vm5021_vm7, %v5763_v34  ;;  %vm5860_vm7 = vcmask 261120  }
 0xbf7   : > { %7535 = vmatpush3.bf16.msra.mxu0 %v7532_v17 }
 0xbf8   : > { %7537 = vmatprep.subr.bf16.mxu0 %v7536_v18 }
 0xbfb   : > { %7539 = vmatpush3.bf16.msra.mxu0 %v7536_v18 }
 0xcc9   : > { %v7088_v36 = vpop.f32.mrb[156].mxu0 }
 0xcca   : > { %v5840_v44 = vadd.f32 %v7088_v36, %v6433_v19  ;;  %v5834_v12 = vpop.f32.mrb[157].mxu0 }
 0xccb   : > { %v5835_v45 = vadd.f32 %v6433_v19, %v5834_v12 }
 0xccc   : > { %v5846_v42 = vmul.f32 0.01, %v5840_v44  ;;  %vm5844_vm1 = vcmp.gt.f32.partialorder %v5840_v44, 0.0 }
 0xccd   : > { %vm5843_vm2 = vcmp.gt.f32.partialorder %v5835_v45, 0.0  ;;  %v5845_v23 = vmul.f32 0.01, %v5835_v45 }
 0xcce   : > { %v5848_v15 = vsel %vm5844_vm1, %v5840_v44, %v5846_v42 }
 0xccf   : > { %v5847_v33 = vsel %vm5843_vm2, %v5835_v45, %v5845_v23 }
 0xcd0   : > { %7097 = vmatprep.mubr.msk.f32.mxu0 %vm5860_vm7, %v5847_v33 }
 0xcd1   : > { %7098 = vmatmul.mubr.msk.f32.vlgmr.msra.gmra.mrb[158].mxu0 %vm5860_vm7, %v5848_v15 }
 0xda4   : > { %v7099_v61 = vpop.f32.mrb[158].mxu0 }
 0xda5   : > { %v5939_v35 = vadd.f32 %v7099_v61, %v6436_v3  ;;  %v5933_v43 = vpop.f32.mrb[159].mxu0 }
 0xda6   : > { %v5934_v49 = vadd.f32 %v6436_v3, %v5933_v43 }
 0xda7   : > { %5956 = vperm.xlu0 %7871, %v5939_v35  }
 0xda8   : > { %5951 = vperm.xlu1 %7870, %v5934_v49  }
 0xe26   : > { %v5957_v5 = vpop.permute.xlu0 %5956 }
 0xe27   : > { %v5960_v58 = vmul.f32 %v6440_v54, %v5957_v5  ;;  %v5952_v41 = vpop.permute.xlu1 %5951 }
 0xe28   : > { %v5959_v53 = vmul.f32 %v6439_v9, %v5952_v41 }
 0xe29   : > { %v5963_v29 = vsel %vm5961_vm5, %v5960_v58, 0.0 }
 0xe2a   : > { %v5962_v63 = vsel %vm5961_vm5, %v5959_v53, 0.0 }
 0xe2b   : > { %v5964_v6 = vadd.f32 %v5963_v29, %v5962_v63 }
 0xe2d   : > { %v5965_v20 = vrot.slane %v5964_v6, 4 }
 0xe2f   : > { %v5966_v37 = vadd.f32 %v5965_v20, %v5964_v6 }
 0xe31   : > { %v5967_v16 = vrot.slane %v5966_v37, 2 }
 0xe33   : > { %v5968_v57 = vadd.f32 %v5967_v16, %v5966_v37 }
 0xe35   : > { %v5969_v25 = vrot.slane %v5968_v57, 1 }
 0xe37   : > { %v5970_v50 = vadd.f32 %v5969_v25, %v5968_v57 }
 0xe39   : > { %5972 = vst.msk [vmem:[%s592_s15] sm:$0x1] %vm5971_vm6, %v5970_v50 }
 0xe3a   : > { %8389 = shalt.err (!%p8386_p13)
}
 0xe3b   : > { %s8390_s2 = scalar_lea.hbm %s12173_s22, 16  ;;  %s8394_s18 = scalar_lea.hbm %s12921_s6, 32 }
 0xe3c   : > { %p8391_p1 = scmp.ne.s32.totalorder %s12173_s22, %s8390_s2  ;;  %p8395_p2 = scmp.lt.u32.totalorder %s12173_s22, %s12921_s6 }
 0xe3d   : > { %p8396_p6 = scmp.lt.u32.totalorder %s8394_s18, %s8390_s2  ;;  %p8398_p5 = scmp.lt.u32.totalorder %s8390_s2, %s12173_s22 }
 0xe3e   : > { %p8392_p3 = pnand %p8391_p1, %p12922_p9 }
 0xe3f   : > { %p8397_p4 = por %p8396_p6, %p8395_p2 }
 0xe40   : > { %p8393_p7 = pneg %p8392_p3 }
 0xe41   : > { %p8399_p10 = por %p8398_p5, %p8397_p4 }
 0xe43   : > { %p8400_p8 = pnand %p8399_p10, %p8393_p7 }
 0xe45   : > { %8403 = shalt.err (!%p8400_p8)
}
 0xe46   : > { %7710 = dma.vmem_to_hbm [thread:$0]  (%p12922_p9), %s12175_s16, 16, %s12173_s22, %s5974_s29  }
 0xe47 PF: > { %s5998_s3 = sand.u32 1, %s8454_s23   ;;  %p12923_p11 = scmp.ne.s32.totalorder %s12490_s21, 0 }
 0xe48   : > { %p12924_p0 = scmp.ge.s32.totalorder %s8466_s26, 2  ;;  %s5999_s27 = scalar_lea.sflag [#allocation5], %s5998_s3 }
 0xe4a   : > { %p7748_p12 = pnand %p12924_p0, %p12923_p11 }
 0xe4c   : > { %8449 = dma.done.wait (!%p7748_p12), %s5999_s27, 16  }
 0xe4d   : > { %8451 = vsyncadd (!%p7748_p12), %s5999_s27, 4294967280  ;;  %p34_p13 = scmp.ge.s32.totalorder %s8800_s30, 4   ;;  %s12925_s23 = smov %s8458_s24 }
 0xe4e   : > { %s12926_s24 = smov %s8462_s25  ;;  %s12927_s25 = smov %s8812_s13 }
 0xe4f   : > { %s12928_s26 = smov %s8800_s30  ;;  %36 = sbr.rel (!%p34_p13) target bundleno = 21 (0x15), region = 162 }
 0xe56   :  { %6003 = vsyncpa [#allocation4], 1 }
 0xe57   :  { %6005 = vsyncpa [#allocation4 + $0x1], 1 }
 0xe58   :  { %6006 = vsyncpa [#allocation7], 1 }
 0xe59   :  { %6008 = vsyncpa [#allocation7 + $0x1], 1 }
 0xe5a   :  { %6009 = vsyncpa [#allocation10], 1 }
 0xe5b   :  { %6010 = vsyncpa [#allocation13], 1 }
 0xe5c   :  { %6011 = vsyncpa [#allocation16], 1 }
 0xe5d   :  { %6012 = vsyncpa [#allocation19], 1 }
 0xe5e   :  { %6013 = vsyncpa [#allocation5], 1 }
 0xe5f   :  { %6015 = vsyncpa [#allocation5 + $0x1], 1 }

</bundles_post_ra>
